<compile_context>
chip_gen: v7x
topology: tpu7x:2x2x1
jax: 0.10.0
libtpu: 0.0.40
codegen_flags: <defaults>
</compile_context>

<pallas_src>
import functools

import numpy as np
import jax
import jax.numpy as jnp
from jax import lax
from jax.experimental import pallas as pl
from jax.experimental.pallas import tpu as pltpu

C1, C2, C3 = 32, 64, 128            # conv1/conv2/conv3 output channels (conv4 -> 1)
DOT_PREC = jax.lax.Precision.HIGHEST   # host-side folding + pure-JAX reference only


def _visil_kernel(x_ref, w1_ref, w2_ref, w34_ref, o_ref,
                  rowbuf, p1, c2s, p2, *, H, W, Bt):
    """Processes Bt (query, support) similarity maps per grid step.

    x_ref   : (Bt, W+2, H+2)  zero-padded, transposed maps (x on sublanes)
    w1_ref  : (9, C1)         conv1 taps (Cin == 1)
    w2_ref  : (9, C1, C2)     conv2 taps, bf16
    w34_ref : (9, C2)         conv3 taps with conv4 (1x1) folded in
    o_ref   : (Bt, 1, M3)     conv3/4 output, flat rows on lanes (junk cols kept)
    rowbuf  : (W, C1)         conv1 row-pair max scratch (pool1 strided reads)
    p1      : (Bt*P1len, C1)  pool1 output, flat, zero-bordered, all Bt maps
    c2s     : (MB2, C2)       conv2 flat output, all Bt maps
    p2      : (Bt*P2len, C2)  pool2 output, flat, zero-bordered, all Bt maps
    """
    H2, W2 = H // 2, W // 2
    H4, W4 = H // 4, W // 4
    L2w, L4w = W2 + 2, W4 + 2
    P1len = (H2 + 2) * L2w            # flat rows per padded pool1 map
    P2len = (H4 + 2) * L4w            # flat rows per padded pool2 map
    M2 = (H2 - 1) * L2w + W2          # conv2 flat output rows needed per map
    M3 = (H4 - 1) * L4w + W4          # conv3 flat output rows needed per map
    MB2 = (Bt - 1) * P1len + M2       # conv2 rows for all Bt maps at once
    MB3 = (Bt - 1) * P2len + M3       # conv3 rows for all Bt maps at once

    zrow1 = jnp.zeros((L2w, C1), jnp.float32)
    zrow2 = jnp.zeros((L4w, C2), jnp.float32)

    # ---- stage 1: conv1 (1->32, 3x3, pad 1) fused with 2x2 maxpool + ReLU ----
    # Every flat row of p1 (borders included) is written here, so conv2's
    # zero padding needs no separate clear.
    def stage1_map(b, carry):
        base1 = b * P1len
        p1[pl.ds(base1, L2w), :] = zrow1                          # top border
        p1[pl.ds(base1 + (H2 + 1) * L2w, L2w), :] = zrow1         # bottom border
        for i in range(H2):                                       # pooled rows
            r0 = 2 * i
            xcols = x_ref[b, :, r0:r0 + 4]                        # (W+2, 4): padded rows 2i..2i+3
            acc0 = jnp.zeros((W, C1), jnp.float32)                # conv1 row 2i
            acc1 = jnp.zeros((W, C1), jnp.float32)                # conv1 row 2i+1
            for k in range(9):
                dy, dx = divmod(k, 3)
                wk = w1_ref[k]                                    # (C1,)
                acc0 = acc0 + xcols[dx:dx + W, dy:dy + 1] * wk    # (W,1)*(C1,)->(W,C1)
                acc1 = acc1 + xcols[dx:dx + W, dy + 1:dy + 2] * wk
            # row-pair max + ReLU, then strided column-pair max (true 2x2 pool)
            rowbuf[...] = jnp.maximum(jnp.maximum(acc0, acc1), 0.0)
            pooled = jnp.maximum(rowbuf[pl.ds(0, W2, stride=2), :],
                                 rowbuf[pl.ds(1, W2, stride=2), :])     # (W2, C1)
            row = jnp.concatenate(
                [jnp.zeros((1, C1), jnp.float32), pooled,
                 jnp.zeros((1, C1), jnp.float32)], axis=0)              # (L2w, C1)
            p1[pl.ds(base1 + (i + 1) * L2w, L2w), :] = row
        return carry

    lax.fori_loop(0, Bt, stage1_map, 0)

    # ---- stage 2: conv2 (32->64, 3x3, pad 1), all Bt maps batched in M -------
    # Single-pass bf16 MXU matmuls, f32 accumulation (per perf review).
    acc2 = jnp.zeros((MB2, C2), jnp.float32)
    for k in range(9):
        dy, dx = divmod(k, 3)
        off = dy * L2w + dx
        acc2 = acc2 + jnp.dot(
            p1[pl.ds(off, MB2), :].astype(jnp.bfloat16), w2_ref[k],
            preferred_element_type=jnp.float32)
    c2s[...] = acc2

    # ---- stage 3: 2x2 maxpool + ReLU -> p2, via strided flat-row reads -------
    def pool2_map(b, carry):
        cbase = b * P1len                 # conv2 flat rows of map b start here
        pbase = b * P2len
        p2[pl.ds(pbase, L4w), :] = zrow2
        p2[pl.ds(pbase + (H4 + 1) * L4w, L4w), :] = zrow2
        for i in range(H4):
            r0 = cbase + (2 * i) * L2w
            m00 = c2s[pl.ds(r0, W4, stride=2), :]                 # row 2i,   even cols
            m01 = c2s[pl.ds(r0 + 1, W4, stride=2), :]             # row 2i,   odd cols
            m10 = c2s[pl.ds(r0 + L2w, W4, stride=2), :]           # row 2i+1, even cols
            m11 = c2s[pl.ds(r0 + L2w + 1, W4, stride=2), :]       # row 2i+1, odd cols
            pooled = jnp.maximum(jnp.maximum(m00, m01), jnp.maximum(m10, m11))
            pooled = jnp.maximum(pooled, 0.0)                     # (W4, C2)
            row = jnp.concatenate(
                [jnp.zeros((1, C2), jnp.float32), pooled,
                 jnp.zeros((1, C2), jnp.float32)], axis=0)        # (L4w, C2)
            p2[pl.ds(pbase + (i + 1) * L4w, L4w), :] = row
        return carry

    lax.fori_loop(0, Bt, pool2_map, 0)

    # ---- stage 4: conv3 (3x3, pad 1) with conv4 (1x1) folded in + hardtanh ----
    acc3 = jnp.zeros((MB3, C2), jnp.float32)
    for k in range(9):
        dy, dx = divmod(k, 3)
        off = dy * L4w + dx
        acc3 = acc3 + p2[pl.ds(off, MB3), :] * w34_ref[k]         # (MB3,C2)*(C2,)
    col = jnp.clip(jnp.sum(acc3, axis=-1), -1.0, 1.0)             # (MB3,)
    for b in range(Bt):
        o_ref[b, 0, :] = col[b * P2len: b * P2len + M3]           # lane-dense store


def visil_fcn_forward(similarity, w1, w2, w3, w4, *, maps_per_step=None):
    """similarity: (Q, S, Lq, Ls) f32; conv weights in HWIO layout."""
    Q, S, H, W = similarity.shape
    assert H % 4 == 0 and W % 4 == 0, "clip counts must be divisible by 4"
    B = Q * S
    H2, W2, H4, W4 = H // 2, W // 2, H // 4, W // 4
    L2w, L4w = W2 + 2, W4 + 2
    P1len = (H2 + 2) * L2w
    P2len = (H4 + 2) * L4w
    M2 = (H2 - 1) * L2w + W2
    M3 = (H4 - 1) * L4w + W4

    if maps_per_step is None:
        if B >= 2:     # keep >= 2 grid steps: megacore sharding + DMA pipelining
            maps_per_step = max(d for d in range(1, min(B, 8) + 1)
                                if B % d == 0 and B // d >= 2)
        else:
            maps_per_step = 1
    Bt = maps_per_step
    assert B % Bt == 0
    MB2 = (Bt - 1) * P1len + M2

    # glue: 'q s lq ls -> (q s) lq ls', zero pad (padding=1), transpose so the
    # image x-axis lands on sublanes inside the kernel (broadcast-friendly).
    x = similarity.reshape(B, H, W).astype(jnp.float32)
    xpad = jnp.pad(x, ((0, 0), (1, 1), (1, 1)))                   # (B, H+2, W+2)
    xT = jnp.transpose(xpad, (0, 2, 1))                           # (B, W+2, H+2)

    # glue: HWIO weights -> per-tap matrices; fold conv4 (1x1) into conv3
    w1k = w1.reshape(9, C1).astype(jnp.float32)
    w2k = w2.reshape(9, C1, C2).astype(jnp.bfloat16)              # bf16 MXU inputs
    w34k = jnp.einsum('kco,o->kc', w3.reshape(9, C2, C3), w4.reshape(C3),
                      precision=DOT_PREC).astype(jnp.float32)     # (9, C2)

    kernel = functools.partial(_visil_kernel, H=H, W=W, Bt=Bt)

    grid_spec = pltpu.PrefetchScalarGridSpec(
        num_scalar_prefetch=0,
        grid=(B // Bt,),
        in_specs=[
            pl.BlockSpec((Bt, W + 2, H + 2), lambda g: (g, 0, 0)),
            pl.BlockSpec((9, C1), lambda g: (0, 0)),
            pl.BlockSpec((9, C1, C2), lambda g: (0, 0, 0)),
            pl.BlockSpec((9, C2), lambda g: (0, 0)),
        ],
        out_specs=pl.BlockSpec((Bt, 1, M3), lambda g: (g, 0, 0)),
        scratch_shapes=[
            pltpu.VMEM((W, C1), jnp.float32),                     # rowbuf
            pltpu.VMEM((Bt * P1len, C1), jnp.float32),            # p1 (flat, padded)
            pltpu.VMEM((MB2, C2), jnp.float32),                   # conv2 flat output
            pltpu.VMEM((Bt * P2len, C2), jnp.float32),            # p2 (flat, padded)
        ],
    )

    out_flat = pl.pallas_call(
        kernel,
        out_shape=jax.ShapeDtypeStruct((B, 1, M3), jnp.float32),
        grid_spec=grid_spec,
        compiler_params=pltpu.CompilerParams(
            dimension_semantics=("parallel",)),                   # maps are independent
    )(xT, w1k, w2k, w34k)

    # glue: drop the junk columns of the flat conv3/4 rows, restore 'q s lq//4 ls//4'
    idx = jnp.arange(H4)[:, None] * L4w + jnp.arange(W4)[None, :]
    out = out_flat[:, 0, :][:, idx]                               # (B, H4, W4)
    return out.reshape(Q, S, H4, W4)


def ref_forward(similarity, w1, w2, w3, w4):
    """Pure-JAX reference of the PyTorch forward (NHWC / HWIO), f32 HIGHEST."""
    Q, S, H, W = similarity.shape
    x = similarity.reshape(Q * S, H, W, 1)
    dn = ('NHWC', 'HWIO', 'NHWC')
    conv = lambda a, w: jax.lax.conv_general_dilated(
        a, w, (1, 1), 'SAME', dimension_numbers=dn, precision=DOT_PREC)
    pool = lambda a: jax.lax.reduce_window(
        a, -jnp.inf, jax.lax.max, (1, 2, 2, 1), (1, 2, 2, 1), 'VALID')
    x = jnp.maximum(pool(conv(x, w1)), 0.0)     # conv1 -> pool1 -> relu
    x = jnp.maximum(pool(conv(x, w2)), 0.0)     # conv2 -> pool2 -> relu
    x = conv(x, w3)                             # conv3 (no relu in forward)
    x = conv(x, w4)                             # conv4 (1x1)
    x = jnp.clip(x, -1.0, 1.0)                  # hardtanh
    return x.reshape(Q, S, H // 4, W // 4)


if __name__ == "__main__":
    key = jax.random.PRNGKey(0)
    k1, k2, k3, k4, kx = jax.random.split(key, 5)

    Q, S, Lq, Ls = 2, 2, 16, 16   # small shapes: 2 queries, 2 supports, 16x16 clip counts

    # deterministic He-like init, same parameter shapes as the PyTorch module (bias=False)
    w1 = jax.random.normal(k1, (3, 3, 1, C1), jnp.float32) * (2.0 / (3 * 3 * 1)) ** 0.5
    w2 = jax.random.normal(k2, (3, 3, C1, C2), jnp.float32) * (2.0 / (3 * 3 * C1)) ** 0.5
    w3 = jax.random.normal(k3, (3, 3, C2, C3), jnp.float32) * (2.0 / (3 * 3 * C2)) ** 0.5
    w4 = jax.random.normal(k4, (1, 1, C3, 1), jnp.float32) * (2.0 / C3) ** 0.5
    similarity = jax.random.normal(kx, (Q, S, Lq, Ls), jnp.float32)

    out = jax.block_until_ready(visil_fcn_forward(similarity, w1, w2, w3, w4))
    assert out.shape == (Q, S, Lq // 4, Ls // 4), out.shape

    ref = jax.block_until_ready(ref_forward(similarity, w1, w2, w3, w4))
    # conv2 runs as single-pass bf16 on the MXU (per perf review); conv1/pools/
    # conv3/conv4 are exact f32, so agreement with the f32 HIGHEST reference is
    # at the ~1e-2 level rather than 1e-3.
    np.testing.assert_allclose(np.asarray(out), np.asarray(ref),
                               rtol=1e-2, atol=5e-2)

    print("KERNEL_OK")
</pallas_src>

<mosaic_0001>
module attributes {stable_mosaic.version = 11 : i64} {
  func.func @_visil_kernel(%arg0: i32, %arg1: memref<2x18x18xf32, #tpu.memory_space<vmem>>, %arg2: memref<9x32xf32, #tpu.memory_space<vmem>>, %arg3: memref<9x32x64xbf16, #tpu.memory_space<vmem>>, %arg4: memref<9x64xf32, #tpu.memory_space<vmem>>, %arg5: memref<2x1x22xf32, #tpu.memory_space<vmem>>, %arg6: memref<16x32xf32, #tpu.memory_space<vmem>>, %arg7: memref<200x32xf32, #tpu.memory_space<vmem>>, %arg8: memref<178x64xf32, #tpu.memory_space<vmem>>, %arg9: memref<72x64xf32, #tpu.memory_space<vmem>>) attributes {dimension_semantics = [#tpu.dimension_semantics<parallel>], iteration_bounds = array<i64: 2>, scalar_prefetch = 0 : i64, scratch_operands = 4 : i64, tpu.core_type = #tpu.core_type<tc>, window_params = [{transform_indices = @transform_0, window_bounds = array<i64: 2, 18, 18>}, {pipeline_mode = #tpu.pipeline_mode<synchronous>, transform_indices = @transform_1, window_bounds = array<i64: 9, 32>}, {pipeline_mode = #tpu.pipeline_mode<synchronous>, transform_indices = @transform_2, window_bounds = array<i64: 9, 32, 64>}, {pipeline_mode = #tpu.pipeline_mode<synchronous>, transform_indices = @transform_3, window_bounds = array<i64: 9, 64>}, {transform_indices = @transform_4, window_bounds = array<i64: 2, 1, 22>}]} {
    %cst = arith.constant 0.000000e+00 : f32
    %0 = vector.broadcast %cst : f32 to vector<10x32xf32>
    %cst_0 = arith.constant 0.000000e+00 : f32
    %1 = vector.broadcast %cst_0 : f32 to vector<6x64xf32>
    %c0_i32 = arith.constant 0 : i32
    %c2_i32 = arith.constant 2 : i32
    %2 = arith.addi %c0_i32, %c2_i32 : i32
    %c1_i32 = arith.constant 1 : i32
    scf.for %arg10 = %c0_i32 to %2 step %c1_i32  : i32 {
      %c100_i32 = arith.constant 100 : i32
      %137 = arith.muli %arg10, %c100_i32 : i32
      %138 = arith.index_cast %137 : i32 to index
      %c0_92 = arith.constant 0 : index
      %139 = vector.load %arg7[%138, %c0_92] : memref<200x32xf32, #tpu.memory_space<vmem>>, vector<10x32xf32>
      tpu.vector_store %arg7[%138, %c0_92], %0 {strides = array<i32>} : memref<200x32xf32, #tpu.memory_space<vmem>>, vector<10x32xf32>,
      %c90_i32 = arith.constant 90 : i32
      %140 = arith.addi %137, %c90_i32 : i32
      %141 = arith.index_cast %140 : i32 to index
      %c0_93 = arith.constant 0 : index
      %142 = vector.load %arg7[%141, %c0_93] : memref<200x32xf32, #tpu.memory_space<vmem>>, vector<10x32xf32>
      tpu.vector_store %arg7[%141, %c0_93], %0 {strides = array<i32>} : memref<200x32xf32, #tpu.memory_space<vmem>>, vector<10x32xf32>,
      %143 = arith.index_cast %arg10 : i32 to index
      %c0_94 = arith.constant 0 : index
      %c0_95 = arith.constant 0 : index
      %144 = vector.load %arg1[%143, %c0_94, %c0_95] : memref<2x18x18xf32, #tpu.memory_space<vmem>>, vector<1x18x4xf32>
      %145 = vector.shape_cast %144 : vector<1x18x4xf32> to vector<18x4xf32>
      %cst_96 = arith.constant 0.000000e+00 : f32
      %146 = vector.broadcast %cst_96 : f32 to vector<16x32xf32>
      %cst_97 = arith.constant 0.000000e+00 : f32
      %147 = vector.broadcast %cst_97 : f32 to vector<16x32xf32>
      %c0_98 = arith.constant 0 : index
      %c0_99 = arith.constant 0 : index
      %148 = vector.load %arg2[%c0_98, %c0_99] : memref<9x32xf32, #tpu.memory_space<vmem>>, vector<1x32xf32>
      %149 = vector.shape_cast %148 : vector<1x32xf32> to vector<32xf32>
      %150 = vector.extract_strided_slice %145 {offsets = [0, 0], sizes = [16, 1], strides = [1, 1]} : vector<18x4xf32> to vector<16x1xf32>
      %151 = vector.shape_cast %149 : vector<32xf32> to vector<1x32xf32>
      %152 = vector.broadcast %150 : vector<16x1xf32> to vector<16x32xf32>
      %153 = vector.broadcast %151 : vector<1x32xf32> to vector<16x32xf32>
      %154 = arith.mulf %152, %153 : vector<16x32xf32>
      %155 = arith.addf %146, %154 : vector<16x32xf32>
      %156 = vector.extract_strided_slice %145 {offsets = [0, 1], sizes = [16, 1], strides = [1, 1]} : vector<18x4xf32> to vector<16x1xf32>
      %157 = vector.shape_cast %149 : vector<32xf32> to vector<1x32xf32>
      %158 = vector.broadcast %156 : vector<16x1xf32> to vector<16x32xf32>
      %159 = vector.broadcast %157 : vector<1x32xf32> to vector<16x32xf32>
      %160 = arith.mulf %158, %159 : vector<16x32xf32>
      %161 = arith.addf %147, %160 : vector<16x32xf32>
      %c1_100 = arith.constant 1 : index
      %c0_101 = arith.constant 0 : index
      %162 = vector.load %arg2[%c1_100, %c0_101] : memref<9x32xf32, #tpu.memory_space<vmem>>, vector<1x32xf32>
      %163 = vector.shape_cast %162 : vector<1x32xf32> to vector<32xf32>
      %164 = vector.extract_strided_slice %145 {offsets = [1, 0], sizes = [16, 1], strides = [1, 1]} : vector<18x4xf32> to vector<16x1xf32>
      %165 = vector.shape_cast %163 : vector<32xf32> to vector<1x32xf32>
      %166 = vector.broadcast %164 : vector<16x1xf32> to vector<16x32xf32>
      %167 = vector.broadcast %165 : vector<1x32xf32> to vector<16x32xf32>
      %168 = arith.mulf %166, %167 : vector<16x32xf32>
      %169 = arith.addf %155, %168 : vector<16x32xf32>
      %170 = vector.extract_strided_slice %145 {offsets = [1, 1], sizes = [16, 1], strides = [1, 1]} : vector<18x4xf32> to vector<16x1xf32>
      %171 = vector.shape_cast %163 : vector<32xf32> to vector<1x32xf32>
      %172 = vector.broadcast %170 : vector<16x1xf32> to vector<16x32xf32>
      %173 = vector.broadcast %171 : vector<1x32xf32> to vector<16x32xf32>
      %174 = arith.mulf %172, %173 : vector<16x32xf32>
      %175 = arith.addf %161, %174 : vector<16x32xf32>
      %c2_102 = arith.constant 2 : index
      %c0_103 = arith.constant 0 : index
      %176 = vector.load %arg2[%c2_102, %c0_103] : memref<9x32xf32, #tpu.memory_space<vmem>>, vector<1x32xf32>
      %177 = vector.shape_cast %176 : vector<1x32xf32> to vector<32xf32>
      %178 = vector.extract_strided_slice %145 {offsets = [2, 0], sizes = [16, 1], strides = [1, 1]} : vector<18x4xf32> to vector<16x1xf32>
      %179 = vector.shape_cast %177 : vector<32xf32> to vector<1x32xf32>
      %180 = vector.broadcast %178 : vector<16x1xf32> to vector<16x32xf32>
      %181 = vector.broadcast %179 : vector<1x32xf32> to vector<16x32xf32>
      %182 = arith.mulf %180, %181 : vector<16x32xf32>
      %183 = arith.addf %169, %182 : vector<16x32xf32>
      %184 = vector.extract_strided_slice %145 {offsets = [2, 1], sizes = [16, 1], strides = [1, 1]} : vector<18x4xf32> to vector<16x1xf32>
      %185 = vector.shape_cast %177 : vector<32xf32> to vector<1x32xf32>
      %186 = vector.broadcast %184 : vector<16x1xf32> to vector<16x32xf32>
      %187 = vector.broadcast %185 : vector<1x32xf32> to vector<16x32xf32>
      %188 = arith.mulf %186, %187 : vector<16x32xf32>
      %189 = arith.addf %175, %188 : vector<16x32xf32>
      %c3_104 = arith.constant 3 : index
      %c0_105 = arith.constant 0 : index
      %190 = vector.load %arg2[%c3_104, %c0_105] : memref<9x32xf32, #tpu.memory_space<vmem>>, vector<1x32xf32>
      %191 = vector.shape_cast %190 : vector<1x32xf32> to vector<32xf32>
      %192 = vector.extract_strided_slice %145 {offsets = [0, 1], sizes = [16, 1], strides = [1, 1]} : vector<18x4xf32> to vector<16x1xf32>
      %193 = vector.shape_cast %191 : vector<32xf32> to vector<1x32xf32>
      %194 = vector.broadcast %192 : vector<16x1xf32> to vector<16x32xf32>
      %195 = vector.broadcast %193 : vector<1x32xf32> to vector<16x32xf32>
      %196 = arith.mulf %194, %195 : vector<16x32xf32>
      %197 = arith.addf %183, %196 : vector<16x32xf32>
      %198 = vector.extract_strided_slice %145 {offsets = [0, 2], sizes = [16, 1], strides = [1, 1]} : vector<18x4xf32> to vector<16x1xf32>
      %199 = vector.shape_cast %191 : vector<32xf32> to vector<1x32xf32>
      %200 = vector.broadcast %198 : vector<16x1xf32> to vector<16x32xf32>
      %201 = vector.broadcast %199 : vector<1x32xf32> to vector<16x32xf32>
      %202 = arith.mulf %200, %201 : vector<16x32xf32>
      %203 = arith.addf %189, %202 : vector<16x32xf32>
      %c4_106 = arith.constant 4 : index
      %c0_107 = arith.constant 0 : index
      %204 = vector.load %arg2[%c4_106, %c0_107] : memref<9x32xf32, #tpu.memory_space<vmem>>, vector<1x32xf32>
      %205 = vector.shape_cast %204 : vector<1x32xf32> to vector<32xf32>
      %206 = vector.extract_strided_slice %145 {offsets = [1, 1], sizes = [16, 1], strides = [1, 1]} : vector<18x4xf32> to vector<16x1xf32>
      %207 = vector.shape_cast %205 : vector<32xf32> to vector<1x32xf32>
      %208 = vector.broadcast %206 : vector<16x1xf32> to vector<16x32xf32>
      %209 = vector.broadcast %207 : vector<1x32xf32> to vector<16x32xf32>
      %210 = arith.mulf %208, %209 : vector<16x32xf32>
      %211 = arith.addf %197, %210 : vector<16x32xf32>
      %212 = vector.extract_strided_slice %145 {offsets = [1, 2], sizes = [16, 1], strides = [1, 1]} : vector<18x4xf32> to vector<16x1xf32>
      %213 = vector.shape_cast %205 : vector<32xf32> to vector<1x32xf32>
      %214 = vector.broadcast %212 : vector<16x1xf32> to vector<16x32xf32>
      %215 = vector.broadcast %213 : vector<1x32xf32> to vector<16x32xf32>
      %216 = arith.mulf %214, %215 : vector<16x32xf32>
      %217 = arith.addf %203, %216 : vector<16x32xf32>
      %c5_108 = arith.constant 5 : index
      %c0_109 = arith.constant 0 : index
      %218 = vector.load %arg2[%c5_108, %c0_109] : memref<9x32xf32, #tpu.memory_space<vmem>>, vector<1x32xf32>
      %219 = vector.shape_cast %218 : vector<1x32xf32> to vector<32xf32>
      %220 = vector.extract_strided_slice %145 {offsets = [2, 1], sizes = [16, 1], strides = [1, 1]} : vector<18x4xf32> to vector<16x1xf32>
      %221 = vector.shape_cast %219 : vector<32xf32> to vector<1x32xf32>
      %222 = vector.broadcast %220 : vector<16x1xf32> to vector<16x32xf32>
      %223 = vector.broadcast %221 : vector<1x32xf32> to vector<16x32xf32>
      %224 = arith.mulf %222, %223 : vector<16x32xf32>
      %225 = arith.addf %211, %224 : vector<16x32xf32>
      %226 = vector.extract_strided_slice %145 {offsets = [2, 2], sizes = [16, 1], strides = [1, 1]} : vector<18x4xf32> to vector<16x1xf32>
      %227 = vector.shape_cast %219 : vector<32xf32> to vector<1x32xf32>
      %228 = vector.broadcast %226 : vector<16x1xf32> to vector<16x32xf32>
      %229 = vector.broadcast %227 : vector<1x32xf32> to vector<16x32xf32>
      %230 = arith.mulf %228, %229 : vector<16x32xf32>
      %231 = arith.addf %217, %230 : vector<16x32xf32>
      %c6_110 = arith.constant 6 : index
      %c0_111 = arith.constant 0 : index
      %232 = vector.load %arg2[%c6_110, %c0_111] : memref<9x32xf32, #tpu.memory_space<vmem>>, vector<1x32xf32>
      %233 = vector.shape_cast %232 : vector<1x32xf32> to vector<32xf32>
      %234 = vector.extract_strided_slice %145 {offsets = [0, 2], sizes = [16, 1], strides = [1, 1]} : vector<18x4xf32> to vector<16x1xf32>
      %235 = vector.shape_cast %233 : vector<32xf32> to vector<1x32xf32>
      %236 = vector.broadcast %234 : vector<16x1xf32> to vector<16x32xf32>
      %237 = vector.broadcast %235 : vector<1x32xf32> to vector<16x32xf32>
      %238 = arith.mulf %236, %237 : vector<16x32xf32>
      %239 = arith.addf %225, %238 : vector<16x32xf32>
      %240 = vector.extract_strided_slice %145 {offsets = [0, 3], sizes = [16, 1], strides = [1, 1]} : vector<18x4xf32> to vector<16x1xf32>
      %241 = vector.shape_cast %233 : vector<32xf32> to vector<1x32xf32>
      %242 = vector.broadcast %240 : vector<16x1xf32> to vector<16x32xf32>
      %243 = vector.broadcast %241 : vector<1x32xf32> to vector<16x32xf32>
      %244 = arith.mulf %242, %243 : vector<16x32xf32>
      %245 = arith.addf %231, %244 : vector<16x32xf32>
      %c7_112 = arith.constant 7 : index
      %c0_113 = arith.constant 0 : index
      %246 = vector.load %arg2[%c7_112, %c0_113] : memref<9x32xf32, #tpu.memory_space<vmem>>, vector<1x32xf32>
      %247 = vector.shape_cast %246 : vector<1x32xf32> to vector<32xf32>
      %248 = vector.extract_strided_slice %145 {offsets = [1, 2], sizes = [16, 1], strides = [1, 1]} : vector<18x4xf32> to vector<16x1xf32>
      %249 = vector.shape_cast %247 : vector<32xf32> to vector<1x32xf32>
      %250 = vector.broadcast %248 : vector<16x1xf32> to vector<16x32xf32>
      %251 = vector.broadcast %249 : vector<1x32xf32> to vector<16x32xf32>
      %252 = arith.mulf %250, %251 : vector<16x32xf32>
      %253 = arith.addf %239, %252 : vector<16x32xf32>
      %254 = vector.extract_strided_slice %145 {offsets = [1, 3], sizes = [16, 1], strides = [1, 1]} : vector<18x4xf32> to vector<16x1xf32>
      %255 = vector.shape_cast %247 : vector<32xf32> to vector<1x32xf32>
      %256 = vector.broadcast %254 : vector<16x1xf32> to vector<16x32xf32>
      %257 = vector.broadcast %255 : vector<1x32xf32> to vector<16x32xf32>
      %258 = arith.mulf %256, %257 : vector<16x32xf32>
      %259 = arith.addf %245, %258 : vector<16x32xf32>
      %c8_114 = arith.constant 8 : index
      %c0_115 = arith.constant 0 : index
      %260 = vector.load %arg2[%c8_114, %c0_115] : memref<9x32xf32, #tpu.memory_space<vmem>>, vector<1x32xf32>
      %261 = vector.shape_cast %260 : vector<1x32xf32> to vector<32xf32>
      %262 = vector.extract_strided_slice %145 {offsets = [2, 2], sizes = [16, 1], strides = [1, 1]} : vector<18x4xf32> to vector<16x1xf32>
      %263 = vector.shape_cast %261 : vector<32xf32> to vector<1x32xf32>
      %264 = vector.broadcast %262 : vector<16x1xf32> to vector<16x32xf32>
      %265 = vector.broadcast %263 : vector<1x32xf32> to vector<16x32xf32>
      %266 = arith.mulf %264, %265 : vector<16x32xf32>
      %267 = arith.addf %253, %266 : vector<16x32xf32>
      %268 = vector.extract_strided_slice %145 {offsets = [2, 3], sizes = [16, 1], strides = [1, 1]} : vector<18x4xf32> to vector<16x1xf32>
      %269 = vector.shape_cast %261 : vector<32xf32> to vector<1x32xf32>
      %270 = vector.broadcast %268 : vector<16x1xf32> to vector<16x32xf32>
      %271 = vector.broadcast %269 : vector<1x32xf32> to vector<16x32xf32>
      %272 = arith.mulf %270, %271 : vector<16x32xf32>
      %273 = arith.addf %259, %272 : vector<16x32xf32>
      %274 = arith.maximumf %267, %273 : vector<16x32xf32>
      %cst_116 = arith.constant 0.000000e+00 : f32
      %275 = vector.broadcast %cst_116 : f32 to vector<16x32xf32>
      %276 = arith.maximumf %274, %275 : vector<16x32xf32>
      %c0_117 = arith.constant 0 : index
      %c0_118 = arith.constant 0 : index
      %277 = vector.load %arg6[%c0_117, %c0_118] : memref<16x32xf32, #tpu.memory_space<vmem>>, vector<16x32xf32>
      tpu.vector_store %arg6[%c0_117, %c0_118], %276 {strides = array<i32>} : memref<16x32xf32, #tpu.memory_space<vmem>>, vector<16x32xf32>,
      %c0_119 = arith.constant 0 : index
      %c0_120 = arith.constant 0 : index
      %278 = tpu.strided_load %arg6[%c0_119, %c0_120] {strides = array<i32: 2, 1>} : memref<16x32xf32, #tpu.memory_space<vmem>>, vector<8x32xf32>
      %c1_121 = arith.constant 1 : index
      %c0_122 = arith.constant 0 : index
      %279 = tpu.strided_load %arg6[%c1_121, %c0_122] {strides = array<i32: 2, 1>} : memref<16x32xf32, #tpu.memory_space<vmem>>, vector<8x32xf32>
      %280 = arith.maximumf %278, %279 : vector<8x32xf32>
      %cst_123 = arith.constant 0.000000e+00 : f32
      %281 = vector.broadcast %cst_123 : f32 to vector<1x32xf32>
      %cst_124 = arith.constant 0.000000e+00 : f32
      %282 = vector.broadcast %cst_124 : f32 to vector<1x32xf32>
      %283 = tpu.concatenate %281, %280, %282 in 0 : vector<1x32xf32>, vector<8x32xf32>, vector<1x32xf32> -> vector<10x32xf32>
      %c10_i32 = arith.constant 10 : i32
      %284 = arith.addi %137, %c10_i32 : i32
      %285 = arith.index_cast %284 : i32 to index
      %c0_125 = arith.constant 0 : index
      %286 = vector.load %arg7[%285, %c0_125] : memref<200x32xf32, #tpu.memory_space<vmem>>, vector<10x32xf32>
      tpu.vector_store %arg7[%285, %c0_125], %283 {strides = array<i32>} : memref<200x32xf32, #tpu.memory_space<vmem>>, vector<10x32xf32>,
      %287 = arith.index_cast %arg10 : i32 to index
      %c0_126 = arith.constant 0 : index
      %c2_127 = arith.constant 2 : index
      %288 = vector.load %arg1[%287, %c0_126, %c2_127] : memref<2x18x18xf32, #tpu.memory_space<vmem>>, vector<1x18x4xf32>
      %289 = vector.shape_cast %288 : vector<1x18x4xf32> to vector<18x4xf32>
      %cst_128 = arith.constant 0.000000e+00 : f32
      %290 = vector.broadcast %cst_128 : f32 to vector<16x32xf32>
      %cst_129 = arith.constant 0.000000e+00 : f32
      %291 = vector.broadcast %cst_129 : f32 to vector<16x32xf32>
      %c0_130 = arith.constant 0 : index
      %c0_131 = arith.constant 0 : index
      %292 = vector.load %arg2[%c0_130, %c0_131] : memref<9x32xf32, #tpu.memory_space<vmem>>, vector<1x32xf32>
      %293 = vector.shape_cast %292 : vector<1x32xf32> to vector<32xf32>
      %294 = vector.extract_strided_slice %289 {offsets = [0, 0], sizes = [16, 1], strides = [1, 1]} : vector<18x4xf32> to vector<16x1xf32>
      %295 = vector.shape_cast %293 : vector<32xf32> to vector<1x32xf32>
      %296 = vector.broadcast %294 : vector<16x1xf32> to vector<16x32xf32>
      %297 = vector.broadcast %295 : vector<1x32xf32> to vector<16x32xf32>
      %298 = arith.mulf %296, %297 : vector<16x32xf32>
      %299 = arith.addf %290, %298 : vector<16x32xf32>
      %300 = vector.extract_strided_slice %289 {offsets = [0, 1], sizes = [16, 1], strides = [1, 1]} : vector<18x4xf32> to vector<16x1xf32>
      %301 = vector.shape_cast %293 : vector<32xf32> to vector<1x32xf32>
      %302 = vector.broadcast %300 : vector<16x1xf32> to vector<16x32xf32>
      %303 = vector.broadcast %301 : vector<1x32xf32> to vector<16x32xf32>
      %304 = arith.mulf %302, %303 : vector<16x32xf32>
      %305 = arith.addf %291, %304 : vector<16x32xf32>
      %c1_132 = arith.constant 1 : index
      %c0_133 = arith.constant 0 : index
      %306 = vector.load %arg2[%c1_132, %c0_133] : memref<9x32xf32, #tpu.memory_space<vmem>>, vector<1x32xf32>
      %307 = vector.shape_cast %306 : vector<1x32xf32> to vector<32xf32>
      %308 = vector.extract_strided_slice %289 {offsets = [1, 0], sizes = [16, 1], strides = [1, 1]} : vector<18x4xf32> to vector<16x1xf32>
      %309 = vector.shape_cast %307 : vector<32xf32> to vector<1x32xf32>
      %310 = vector.broadcast %308 : vector<16x1xf32> to vector<16x32xf32>
      %311 = vector.broadcast %309 : vector<1x32xf32> to vector<16x32xf32>
      %312 = arith.mulf %310, %311 : vector<16x32xf32>
      %313 = arith.addf %299, %312 : vector<16x32xf32>
      %314 = vector.extract_strided_slice %289 {offsets = [1, 1], sizes = [16, 1], strides = [1, 1]} : vector<18x4xf32> to vector<16x1xf32>
      %315 = vector.shape_cast %307 : vector<32xf32> to vector<1x32xf32>
      %316 = vector.broadcast %314 : vector<16x1xf32> to vector<16x32xf32>
      %317 = vector.broadcast %315 : vector<1x32xf32> to vector<16x32xf32>
      %318 = arith.mulf %316, %317 : vector<16x32xf32>
      %319 = arith.addf %305, %318 : vector<16x32xf32>
      %c2_134 = arith.constant 2 : index
      %c0_135 = arith.constant 0 : index
      %320 = vector.load %arg2[%c2_134, %c0_135] : memref<9x32xf32, #tpu.memory_space<vmem>>, vector<1x32xf32>
      %321 = vector.shape_cast %320 : vector<1x32xf32> to vector<32xf32>
      %322 = vector.extract_strided_slice %289 {offsets = [2, 0], sizes = [16, 1], strides = [1, 1]} : vector<18x4xf32> to vector<16x1xf32>
      %323 = vector.shape_cast %321 : vector<32xf32> to vector<1x32xf32>
      %324 = vector.broadcast %322 : vector<16x1xf32> to vector<16x32xf32>
      %325 = vector.broadcast %323 : vector<1x32xf32> to vector<16x32xf32>
      %326 = arith.mulf %324, %325 : vector<16x32xf32>
      %327 = arith.addf %313, %326 : vector<16x32xf32>
      %328 = vector.extract_strided_slice %289 {offsets = [2, 1], sizes = [16, 1], strides = [1, 1]} : vector<18x4xf32> to vector<16x1xf32>
      %329 = vector.shape_cast %321 : vector<32xf32> to vector<1x32xf32>
      %330 = vector.broadcast %328 : vector<16x1xf32> to vector<16x32xf32>
      %331 = vector.broadcast %329 : vector<1x32xf32> to vector<16x32xf32>
      %332 = arith.mulf %330, %331 : vector<16x32xf32>
      %333 = arith.addf %319, %332 : vector<16x32xf32>
      %c3_136 = arith.constant 3 : index
      %c0_137 = arith.constant 0 : index
      %334 = vector.load %arg2[%c3_136, %c0_137] : memref<9x32xf32, #tpu.memory_space<vmem>>, vector<1x32xf32>
      %335 = vector.shape_cast %334 : vector<1x32xf32> to vector<32xf32>
      %336 = vector.extract_strided_slice %289 {offsets = [0, 1], sizes = [16, 1], strides = [1, 1]} : vector<18x4xf32> to vector<16x1xf32>
      %337 = vector.shape_cast %335 : vector<32xf32> to vector<1x32xf32>
      %338 = vector.broadcast %336 : vector<16x1xf32> to vector<16x32xf32>
      %339 = vector.broadcast %337 : vector<1x32xf32> to vector<16x32xf32>
      %340 = arith.mulf %338, %339 : vector<16x32xf32>
      %341 = arith.addf %327, %340 : vector<16x32xf32>
      %342 = vector.extract_strided_slice %289 {offsets = [0, 2], sizes = [16, 1], strides = [1, 1]} : vector<18x4xf32> to vector<16x1xf32>
      %343 = vector.shape_cast %335 : vector<32xf32> to vector<1x32xf32>
      %344 = vector.broadcast %342 : vector<16x1xf32> to vector<16x32xf32>
      %345 = vector.broadcast %343 : vector<1x32xf32> to vector<16x32xf32>
      %346 = arith.mulf %344, %345 : vector<16x32xf32>
      %347 = arith.addf %333, %346 : vector<16x32xf32>
      %c4_138 = arith.constant 4 : index
      %c0_139 = arith.constant 0 : index
      %348 = vector.load %arg2[%c4_138, %c0_139] : memref<9x32xf32, #tpu.memory_space<vmem>>, vector<1x32xf32>
      %349 = vector.shape_cast %348 : vector<1x32xf32> to vector<32xf32>
      %350 = vector.extract_strided_slice %289 {offsets = [1, 1], sizes = [16, 1], strides = [1, 1]} : vector<18x4xf32> to vector<16x1xf32>
      %351 = vector.shape_cast %349 : vector<32xf32> to vector<1x32xf32>
      %352 = vector.broadcast %350 : vector<16x1xf32> to vector<16x32xf32>
      %353 = vector.broadcast %351 : vector<1x32xf32> to vector<16x32xf32>
      %354 = arith.mulf %352, %353 : vector<16x32xf32>
      %355 = arith.addf %341, %354 : vector<16x32xf32>
      %356 = vector.extract_strided_slice %289 {offsets = [1, 2], sizes = [16, 1], strides = [1, 1]} : vector<18x4xf32> to vector<16x1xf32>
      %357 = vector.shape_cast %349 : vector<32xf32> to vector<1x32xf32>
      %358 = vector.broadcast %356 : vector<16x1xf32> to vector<16x32xf32>
      %359 = vector.broadcast %357 : vector<1x32xf32> to vector<16x32xf32>
      %360 = arith.mulf %358, %359 : vector<16x32xf32>
      %361 = arith.addf %347, %360 : vector<16x32xf32>
      %c5_140 = arith.constant 5 : index
      %c0_141 = arith.constant 0 : index
      %362 = vector.load %arg2[%c5_140, %c0_141] : memref<9x32xf32, #tpu.memory_space<vmem>>, vector<1x32xf32>
      %363 = vector.shape_cast %362 : vector<1x32xf32> to vector<32xf32>
      %364 = vector.extract_strided_slice %289 {offsets = [2, 1], sizes = [16, 1], strides = [1, 1]} : vector<18x4xf32> to vector<16x1xf32>
      %365 = vector.shape_cast %363 : vector<32xf32> to vector<1x32xf32>
      %366 = vector.broadcast %364 : vector<16x1xf32> to vector<16x32xf32>
      %367 = vector.broadcast %365 : vector<1x32xf32> to vector<16x32xf32>
      %368 = arith.mulf %366, %367 : vector<16x32xf32>
      %369 = arith.addf %355, %368 : vector<16x32xf32>
      %370 = vector.extract_strided_slice %289 {offsets = [2, 2], sizes = [16, 1], strides = [1, 1]} : vector<18x4xf32> to vector<16x1xf32>
      %371 = vector.shape_cast %363 : vector<32xf32> to vector<1x32xf32>
      %372 = vector.broadcast %370 : vector<16x1xf32> to vector<16x32xf32>
      %373 = vector.broadcast %371 : vector<1x32xf32> to vector<16x32xf32>
      %374 = arith.mulf %372, %373 : vector<16x32xf32>
      %375 = arith.addf %361, %374 : vector<16x32xf32>
      %c6_142 = arith.constant 6 : index
      %c0_143 = arith.constant 0 : index
      %376 = vector.load %arg2[%c6_142, %c0_143] : memref<9x32xf32, #tpu.memory_space<vmem>>, vector<1x32xf32>
      %377 = vector.shape_cast %376 : vector<1x32xf32> to vector<32xf32>
      %378 = vector.extract_strided_slice %289 {offsets = [0, 2], sizes = [16, 1], strides = [1, 1]} : vector<18x4xf32> to vector<16x1xf32>
      %379 = vector.shape_cast %377 : vector<32xf32> to vector<1x32xf32>
      %380 = vector.broadcast %378 : vector<16x1xf32> to vector<16x32xf32>
      %381 = vector.broadcast %379 : vector<1x32xf32> to vector<16x32xf32>
      %382 = arith.mulf %380, %381 : vector<16x32xf32>
      %383 = arith.addf %369, %382 : vector<16x32xf32>
      %384 = vector.extract_strided_slice %289 {offsets = [0, 3], sizes = [16, 1], strides = [1, 1]} : vector<18x4xf32> to vector<16x1xf32>
      %385 = vector.shape_cast %377 : vector<32xf32> to vector<1x32xf32>
      %386 = vector.broadcast %384 : vector<16x1xf32> to vector<16x32xf32>
      %387 = vector.broadcast %385 : vector<1x32xf32> to vector<16x32xf32>
      %388 = arith.mulf %386, %387 : vector<16x32xf32>
      %389 = arith.addf %375, %388 : vector<16x32xf32>
      %c7_144 = arith.constant 7 : index
      %c0_145 = arith.constant 0 : index
      %390 = vector.load %arg2[%c7_144, %c0_145] : memref<9x32xf32, #tpu.memory_space<vmem>>, vector<1x32xf32>
      %391 = vector.shape_cast %390 : vector<1x32xf32> to vector<32xf32>
      %392 = vector.extract_strided_slice %289 {offsets = [1, 2], sizes = [16, 1], strides = [1, 1]} : vector<18x4xf32> to vector<16x1xf32>
      %393 = vector.shape_cast %391 : vector<32xf32> to vector<1x32xf32>
      %394 = vector.broadcast %392 : vector<16x1xf32> to vector<16x32xf32>
      %395 = vector.broadcast %393 : vector<1x32xf32> to vector<16x32xf32>
      %396 = arith.mulf %394, %395 : vector<16x32xf32>
      %397 = arith.addf %383, %396 : vector<16x32xf32>
      %398 = vector.extract_strided_slice %289 {offsets = [1, 3], sizes = [16, 1], strides = [1, 1]} : vector<18x4xf32> to vector<16x1xf32>
      %399 = vector.shape_cast %391 : vector<32xf32> to vector<1x32xf32>
      %400 = vector.broadcast %398 : vector<16x1xf32> to vector<16x32xf32>
      %401 = vector.broadcast %399 : vector<1x32xf32> to vector<16x32xf32>
      %402 = arith.mulf %400, %401 : vector<16x32xf32>
      %403 = arith.addf %389, %402 : vector<16x32xf32>
      %c8_146 = arith.constant 8 : index
      %c0_147 = arith.constant 0 : index
      %404 = vector.load %arg2[%c8_146, %c0_147] : memref<9x32xf32, #tpu.memory_space<vmem>>, vector<1x32xf32>
      %405 = vector.shape_cast %404 : vector<1x32xf32> to vector<32xf32>
      %406 = vector.extract_strided_slice %289 {offsets = [2, 2], sizes = [16, 1], strides = [1, 1]} : vector<18x4xf32> to vector<16x1xf32>
      %407 = vector.shape_cast %405 : vector<32xf32> to vector<1x32xf32>
      %408 = vector.broadcast %406 : vector<16x1xf32> to vector<16x32xf32>
      %409 = vector.broadcast %407 : vector<1x32xf32> to vector<16x32xf32>
      %410 = arith.mulf %408, %409 : vector<16x32xf32>
      %411 = arith.addf %397, %410 : vector<16x32xf32>
      %412 = vector.extract_strided_slice %289 {offsets = [2, 3], sizes = [16, 1], strides = [1, 1]} : vector<18x4xf32> to vector<16x1xf32>
      %413 = vector.shape_cast %405 : vector<32xf32> to vector<1x32xf32>
      %414 = vector.broadcast %412 : vector<16x1xf32> to vector<16x32xf32>
      %415 = vector.broadcast %413 : vector<1x32xf32> to vector<16x32xf32>
      %416 = arith.mulf %414, %415 : vector<16x32xf32>
      %417 = arith.addf %403, %416 : vector<16x32xf32>
      %418 = arith.maximumf %411, %417 : vector<16x32xf32>
      %cst_148 = arith.constant 0.000000e+00 : f32
      %419 = vector.broadcast %cst_148 : f32 to vector<16x32xf32>
      %420 = arith.maximumf %418, %419 : vector<16x32xf32>
      %c0_149 = arith.constant 0 : index
      %c0_150 = arith.constant 0 : index
      %421 = vector.load %arg6[%c0_149, %c0_150] : memref<16x32xf32, #tpu.memory_space<vmem>>, vector<16x32xf32>
      tpu.vector_store %arg6[%c0_149, %c0_150], %420 {strides = array<i32>} : memref<16x32xf32, #tpu.memory_space<vmem>>, vector<16x32xf32>,
      %c0_151 = arith.constant 0 : index
      %c0_152 = arith.constant 0 : index
      %422 = tpu.strided_load %arg6[%c0_151, %c0_152] {strides = array<i32: 2, 1>} : memref<16x32xf32, #tpu.memory_space<vmem>>, vector<8x32xf32>
      %c1_153 = arith.constant 1 : index
      %c0_154 = arith.constant 0 : index
      %423 = tpu.strided_load %arg6[%c1_153, %c0_154] {strides = array<i32: 2, 1>} : memref<16x32xf32, #tpu.memory_space<vmem>>, vector<8x32xf32>
      %424 = arith.maximumf %422, %423 : vector<8x32xf32>
      %cst_155 = arith.constant 0.000000e+00 : f32
      %425 = vector.broadcast %cst_155 : f32 to vector<1x32xf32>
      %cst_156 = arith.constant 0.000000e+00 : f32
      %426 = vector.broadcast %cst_156 : f32 to vector<1x32xf32>
      %427 = tpu.concatenate %425, %424, %426 in 0 : vector<1x32xf32>, vector<8x32xf32>, vector<1x32xf32> -> vector<10x32xf32>
      %c20_i32 = arith.constant 20 : i32
      %428 = arith.addi %137, %c20_i32 : i32
      %429 = arith.index_cast %428 : i32 to index
      %c0_157 = arith.constant 0 : index
      %430 = vector.load %arg7[%429, %c0_157] : memref<200x32xf32, #tpu.memory_space<vmem>>, vector<10x32xf32>
      tpu.vector_store %arg7[%429, %c0_157], %427 {strides = array<i32>} : memref<200x32xf32, #tpu.memory_space<vmem>>, vector<10x32xf32>,
      %431 = arith.index_cast %arg10 : i32 to index
      %c0_158 = arith.constant 0 : index
      %c4_159 = arith.constant 4 : index
      %432 = vector.load %arg1[%431, %c0_158, %c4_159] : memref<2x18x18xf32, #tpu.memory_space<vmem>>, vector<1x18x4xf32>
      %433 = vector.shape_cast %432 : vector<1x18x4xf32> to vector<18x4xf32>
      %cst_160 = arith.constant 0.000000e+00 : f32
      %434 = vector.broadcast %cst_160 : f32 to vector<16x32xf32>
      %cst_161 = arith.constant 0.000000e+00 : f32
      %435 = vector.broadcast %cst_161 : f32 to vector<16x32xf32>
      %c0_162 = arith.constant 0 : index
      %c0_163 = arith.constant 0 : index
      %436 = vector.load %arg2[%c0_162, %c0_163] : memref<9x32xf32, #tpu.memory_space<vmem>>, vector<1x32xf32>
      %437 = vector.shape_cast %436 : vector<1x32xf32> to vector<32xf32>
      %438 = vector.extract_strided_slice %433 {offsets = [0, 0], sizes = [16, 1], strides = [1, 1]} : vector<18x4xf32> to vector<16x1xf32>
      %439 = vector.shape_cast %437 : vector<32xf32> to vector<1x32xf32>
      %440 = vector.broadcast %438 : vector<16x1xf32> to vector<16x32xf32>
      %441 = vector.broadcast %439 : vector<1x32xf32> to vector<16x32xf32>
      %442 = arith.mulf %440, %441 : vector<16x32xf32>
      %443 = arith.addf %434, %442 : vector<16x32xf32>
      %444 = vector.extract_strided_slice %433 {offsets = [0, 1], sizes = [16, 1], strides = [1, 1]} : vector<18x4xf32> to vector<16x1xf32>
      %445 = vector.shape_cast %437 : vector<32xf32> to vector<1x32xf32>
      %446 = vector.broadcast %444 : vector<16x1xf32> to vector<16x32xf32>
      %447 = vector.broadcast %445 : vector<1x32xf32> to vector<16x32xf32>
      %448 = arith.mulf %446, %447 : vector<16x32xf32>
      %449 = arith.addf %435, %448 : vector<16x32xf32>
      %c1_164 = arith.constant 1 : index
      %c0_165 = arith.constant 0 : index
      %450 = vector.load %arg2[%c1_164, %c0_165] : memref<9x32xf32, #tpu.memory_space<vmem>>, vector<1x32xf32>
      %451 = vector.shape_cast %450 : vector<1x32xf32> to vector<32xf32>
      %452 = vector.extract_strided_slice %433 {offsets = [1, 0], sizes = [16, 1], strides = [1, 1]} : vector<18x4xf32> to vector<16x1xf32>
      %453 = vector.shape_cast %451 : vector<32xf32> to vector<1x32xf32>
      %454 = vector.broadcast %452 : vector<16x1xf32> to vector<16x32xf32>
      %455 = vector.broadcast %453 : vector<1x32xf32> to vector<16x32xf32>
      %456 = arith.mulf %454, %455 : vector<16x32xf32>
      %457 = arith.addf %443, %456 : vector<16x32xf32>
      %458 = vector.extract_strided_slice %433 {offsets = [1, 1], sizes = [16, 1], strides = [1, 1]} : vector<18x4xf32> to vector<16x1xf32>
      %459 = vector.shape_cast %451 : vector<32xf32> to vector<1x32xf32>
      %460 = vector.broadcast %458 : vector<16x1xf32> to vector<16x32xf32>
      %461 = vector.broadcast %459 : vector<1x32xf32> to vector<16x32xf32>
      %462 = arith.mulf %460, %461 : vector<16x32xf32>
      %463 = arith.addf %449, %462 : vector<16x32xf32>
      %c2_166 = arith.constant 2 : index
      %c0_167 = arith.constant 0 : index
      %464 = vector.load %arg2[%c2_166, %c0_167] : memref<9x32xf32, #tpu.memory_space<vmem>>, vector<1x32xf32>
      %465 = vector.shape_cast %464 : vector<1x32xf32> to vector<32xf32>
      %466 = vector.extract_strided_slice %433 {offsets = [2, 0], sizes = [16, 1], strides = [1, 1]} : vector<18x4xf32> to vector<16x1xf32>
      %467 = vector.shape_cast %465 : vector<32xf32> to vector<1x32xf32>
      %468 = vector.broadcast %466 : vector<16x1xf32> to vector<16x32xf32>
      %469 = vector.broadcast %467 : vector<1x32xf32> to vector<16x32xf32>
      %470 = arith.mulf %468, %469 : vector<16x32xf32>
      %471 = arith.addf %457, %470 : vector<16x32xf32>
      %472 = vector.extract_strided_slice %433 {offsets = [2, 1], sizes = [16, 1], strides = [1, 1]} : vector<18x4xf32> to vector<16x1xf32>
      %473 = vector.shape_cast %465 : vector<32xf32> to vector<1x32xf32>
      %474 = vector.broadcast %472 : vector<16x1xf32> to vector<16x32xf32>
      %475 = vector.broadcast %473 : vector<1x32xf32> to vector<16x32xf32>
      %476 = arith.mulf %474, %475 : vector<16x32xf32>
      %477 = arith.addf %463, %476 : vector<16x32xf32>
      %c3_168 = arith.constant 3 : index
      %c0_169 = arith.constant 0 : index
      %478 = vector.load %arg2[%c3_168, %c0_169] : memref<9x32xf32, #tpu.memory_space<vmem>>, vector<1x32xf32>
      %479 = vector.shape_cast %478 : vector<1x32xf32> to vector<32xf32>
      %480 = vector.extract_strided_slice %433 {offsets = [0, 1], sizes = [16, 1], strides = [1, 1]} : vector<18x4xf32> to vector<16x1xf32>
      %481 = vector.shape_cast %479 : vector<32xf32> to vector<1x32xf32>
      %482 = vector.broadcast %480 : vector<16x1xf32> to vector<16x32xf32>
      %483 = vector.broadcast %481 : vector<1x32xf32> to vector<16x32xf32>
      %484 = arith.mulf %482, %483 : vector<16x32xf32>
      %485 = arith.addf %471, %484 : vector<16x32xf32>
      %486 = vector.extract_strided_slice %433 {offsets = [0, 2], sizes = [16, 1], strides = [1, 1]} : vector<18x4xf32> to vector<16x1xf32>
      %487 = vector.shape_cast %479 : vector<32xf32> to vector<1x32xf32>
      %488 = vector.broadcast %486 : vector<16x1xf32> to vector<16x32xf32>
      %489 = vector.broadcast %487 : vector<1x32xf32> to vector<16x32xf32>
      %490 = arith.mulf %488, %489 : vector<16x32xf32>
      %491 = arith.addf %477, %490 : vector<16x32xf32>
      %c4_170 = arith.constant 4 : index
      %c0_171 = arith.constant 0 : index
      %492 = vector.load %arg2[%c4_170, %c0_171] : memref<9x32xf32, #tpu.memory_space<vmem>>, vector<1x32xf32>
      %493 = vector.shape_cast %492 : vector<1x32xf32> to vector<32xf32>
      %494 = vector.extract_strided_slice %433 {offsets = [1, 1], sizes = [16, 1], strides = [1, 1]} : vector<18x4xf32> to vector<16x1xf32>
      %495 = vector.shape_cast %493 : vector<32xf32> to vector<1x32xf32>
      %496 = vector.broadcast %494 : vector<16x1xf32> to vector<16x32xf32>
      %497 = vector.broadcast %495 : vector<1x32xf32> to vector<16x32xf32>
      %498 = arith.mulf %496, %497 : vector<16x32xf32>
      %499 = arith.addf %485, %498 : vector<16x32xf32>
      %500 = vector.extract_strided_slice %433 {offsets = [1, 2], sizes = [16, 1], strides = [1, 1]} : vector<18x4xf32> to vector<16x1xf32>
      %501 = vector.shape_cast %493 : vector<32xf32> to vector<1x32xf32>
      %502 = vector.broadcast %500 : vector<16x1xf32> to vector<16x32xf32>
      %503 = vector.broadcast %501 : vector<1x32xf32> to vector<16x32xf32>
      %504 = arith.mulf %502, %503 : vector<16x32xf32>
      %505 = arith.addf %491, %504 : vector<16x32xf32>
      %c5_172 = arith.constant 5 : index
      %c0_173 = arith.constant 0 : index
      %506 = vector.load %arg2[%c5_172, %c0_173] : memref<9x32xf32, #tpu.memory_space<vmem>>, vector<1x32xf32>
      %507 = vector.shape_cast %506 : vector<1x32xf32> to vector<32xf32>
      %508 = vector.extract_strided_slice %433 {offsets = [2, 1], sizes = [16, 1], strides = [1, 1]} : vector<18x4xf32> to vector<16x1xf32>
      %509 = vector.shape_cast %507 : vector<32xf32> to vector<1x32xf32>
      %510 = vector.broadcast %508 : vector<16x1xf32> to vector<16x32xf32>
      %511 = vector.broadcast %509 : vector<1x32xf32> to vector<16x32xf32>
      %512 = arith.mulf %510, %511 : vector<16x32xf32>
      %513 = arith.addf %499, %512 : vector<16x32xf32>
      %514 = vector.extract_strided_slice %433 {offsets = [2, 2], sizes = [16, 1], strides = [1, 1]} : vector<18x4xf32> to vector<16x1xf32>
      %515 = vector.shape_cast %507 : vector<32xf32> to vector<1x32xf32>
      %516 = vector.broadcast %514 : vector<16x1xf32> to vector<16x32xf32>
      %517 = vector.broadcast %515 : vector<1x32xf32> to vector<16x32xf32>
      %518 = arith.mulf %516, %517 : vector<16x32xf32>
      %519 = arith.addf %505, %518 : vector<16x32xf32>
      %c6_174 = arith.constant 6 : index
      %c0_175 = arith.constant 0 : index
      %520 = vector.load %arg2[%c6_174, %c0_175] : memref<9x32xf32, #tpu.memory_space<vmem>>, vector<1x32xf32>
      %521 = vector.shape_cast %520 : vector<1x32xf32> to vector<32xf32>
      %522 = vector.extract_strided_slice %433 {offsets = [0, 2], sizes = [16, 1], strides = [1, 1]} : vector<18x4xf32> to vector<16x1xf32>
      %523 = vector.shape_cast %521 : vector<32xf32> to vector<1x32xf32>
      %524 = vector.broadcast %522 : vector<16x1xf32> to vector<16x32xf32>
      %525 = vector.broadcast %523 : vector<1x32xf32> to vector<16x32xf32>
      %526 = arith.mulf %524, %525 : vector<16x32xf32>
      %527 = arith.addf %513, %526 : vector<16x32xf32>
      %528 = vector.extract_strided_slice %433 {offsets = [0, 3], sizes = [16, 1], strides = [1, 1]} : vector<18x4xf32> to vector<16x1xf32>
      %529 = vector.shape_cast %521 : vector<32xf32> to vector<1x32xf32>
      %530 = vector.broadcast %528 : vector<16x1xf32> to vector<16x32xf32>
      %531 = vector.broadcast %529 : vector<1x32xf32> to vector<16x32xf32>
      %532 = arith.mulf %530, %531 : vector<16x32xf32>
      %533 = arith.addf %519, %532 : vector<16x32xf32>
      %c7_176 = arith.constant 7 : index
      %c0_177 = arith.constant 0 : index
      %534 = vector.load %arg2[%c7_176, %c0_177] : memref<9x32xf32, #tpu.memory_space<vmem>>, vector<1x32xf32>
      %535 = vector.shape_cast %534 : vector<1x32xf32> to vector<32xf32>
      %536 = vector.extract_strided_slice %433 {offsets = [1, 2], sizes = [16, 1], strides = [1, 1]} : vector<18x4xf32> to vector<16x1xf32>
      %537 = vector.shape_cast %535 : vector<32xf32> to vector<1x32xf32>
      %538 = vector.broadcast %536 : vector<16x1xf32> to vector<16x32xf32>
      %539 = vector.broadcast %537 : vector<1x32xf32> to vector<16x32xf32>
      %540 = arith.mulf %538, %539 : vector<16x32xf32>
      %541 = arith.addf %527, %540 : vector<16x32xf32>
      %542 = vector.extract_strided_slice %433 {offsets = [1, 3], sizes = [16, 1], strides = [1, 1]} : vector<18x4xf32> to vector<16x1xf32>
      %543 = vector.shape_cast %535 : vector<32xf32> to vector<1x32xf32>
      %544 = vector.broadcast %542 : vector<16x1xf32> to vector<16x32xf32>
      %545 = vector.broadcast %543 : vector<1x32xf32> to vector<16x32xf32>
      %546 = arith.mulf %544, %545 : vector<16x32xf32>
      %547 = arith.addf %533, %546 : vector<16x32xf32>
      %c8_178 = arith.constant 8 : index
      %c0_179 = arith.constant 0 : index
      %548 = vector.load %arg2[%c8_178, %c0_179] : memref<9x32xf32, #tpu.memory_space<vmem>>, vector<1x32xf32>
      %549 = vector.shape_cast %548 : vector<1x32xf32> to vector<32xf32>
      %550 = vector.extract_strided_slice %433 {offsets = [2, 2], sizes = [16, 1], strides = [1, 1]} : vector<18x4xf32> to vector<16x1xf32>
      %551 = vector.shape_cast %549 : vector<32xf32> to vector<1x32xf32>
      %552 = vector.broadcast %550 : vector<16x1xf32> to vector<16x32xf32>
      %553 = vector.broadcast %551 : vector<1x32xf32> to vector<16x32xf32>
      %554 = arith.mulf %552, %553 : vector<16x32xf32>
      %555 = arith.addf %541, %554 : vector<16x32xf32>
      %556 = vector.extract_strided_slice %433 {offsets = [2, 3], sizes = [16, 1], strides = [1, 1]} : vector<18x4xf32> to vector<16x1xf32>
      %557 = vector.shape_cast %549 : vector<32xf32> to vector<1x32xf32>
      %558 = vector.broadcast %556 : vector<16x1xf32> to vector<16x32xf32>
      %559 = vector.broadcast %557 : vector<1x32xf32> to vector<16x32xf32>
      %560 = arith.mulf %558, %559 : vector<16x32xf32>
      %561 = arith.addf %547, %560 : vector<16x32xf32>
      %562 = arith.maximumf %555, %561 : vector<16x32xf32>
      %cst_180 = arith.constant 0.000000e+00 : f32
      %563 = vector.broadcast %cst_180 : f32 to vector<16x32xf32>
      %564 = arith.maximumf %562, %563 : vector<16x32xf32>
      %c0_181 = arith.constant 0 : index
      %c0_182 = arith.constant 0 : index
      %565 = vector.load %arg6[%c0_181, %c0_182] : memref<16x32xf32, #tpu.memory_space<vmem>>, vector<16x32xf32>
      tpu.vector_store %arg6[%c0_181, %c0_182], %564 {strides = array<i32>} : memref<16x32xf32, #tpu.memory_space<vmem>>, vector<16x32xf32>,
      %c0_183 = arith.constant 0 : index
      %c0_184 = arith.constant 0 : index
      %566 = tpu.strided_load %arg6[%c0_183, %c0_184] {strides = array<i32: 2, 1>} : memref<16x32xf32, #tpu.memory_space<vmem>>, vector<8x32xf32>
      %c1_185 = arith.constant 1 : index
      %c0_186 = arith.constant 0 : index
      %567 = tpu.strided_load %arg6[%c1_185, %c0_186] {strides = array<i32: 2, 1>} : memref<16x32xf32, #tpu.memory_space<vmem>>, vector<8x32xf32>
      %568 = arith.maximumf %566, %567 : vector<8x32xf32>
      %cst_187 = arith.constant 0.000000e+00 : f32
      %569 = vector.broadcast %cst_187 : f32 to vector<1x32xf32>
      %cst_188 = arith.constant 0.000000e+00 : f32
      %570 = vector.broadcast %cst_188 : f32 to vector<1x32xf32>
      %571 = tpu.concatenate %569, %568, %570 in 0 : vector<1x32xf32>, vector<8x32xf32>, vector<1x32xf32> -> vector<10x32xf32>
      %c30_i32 = arith.constant 30 : i32
      %572 = arith.addi %137, %c30_i32 : i32
      %573 = arith.index_cast %572 : i32 to index
      %c0_189 = arith.constant 0 : index
      %574 = vector.load %arg7[%573, %c0_189] : memref<200x32xf32, #tpu.memory_space<vmem>>, vector<10x32xf32>
      tpu.vector_store %arg7[%573, %c0_189], %571 {strides = array<i32>} : memref<200x32xf32, #tpu.memory_space<vmem>>, vector<10x32xf32>,
      %575 = arith.index_cast %arg10 : i32 to index
      %c0_190 = arith.constant 0 : index
      %c6_191 = arith.constant 6 : index
      %576 = vector.load %arg1[%575, %c0_190, %c6_191] : memref<2x18x18xf32, #tpu.memory_space<vmem>>, vector<1x18x4xf32>
      %577 = vector.shape_cast %576 : vector<1x18x4xf32> to vector<18x4xf32>
      %cst_192 = arith.constant 0.000000e+00 : f32
      %578 = vector.broadcast %cst_192 : f32 to vector<16x32xf32>
      %cst_193 = arith.constant 0.000000e+00 : f32
      %579 = vector.broadcast %cst_193 : f32 to vector<16x32xf32>
      %c0_194 = arith.constant 0 : index
      %c0_195 = arith.constant 0 : index
      %580 = vector.load %arg2[%c0_194, %c0_195] : memref<9x32xf32, #tpu.memory_space<vmem>>, vector<1x32xf32>
      %581 = vector.shape_cast %580 : vector<1x32xf32> to vector<32xf32>
      %582 = vector.extract_strided_slice %577 {offsets = [0, 0], sizes = [16, 1], strides = [1, 1]} : vector<18x4xf32> to vector<16x1xf32>
      %583 = vector.shape_cast %581 : vector<32xf32> to vector<1x32xf32>
      %584 = vector.broadcast %582 : vector<16x1xf32> to vector<16x32xf32>
      %585 = vector.broadcast %583 : vector<1x32xf32> to vector<16x32xf32>
      %586 = arith.mulf %584, %585 : vector<16x32xf32>
      %587 = arith.addf %578, %586 : vector<16x32xf32>
      %588 = vector.extract_strided_slice %577 {offsets = [0, 1], sizes = [16, 1], strides = [1, 1]} : vector<18x4xf32> to vector<16x1xf32>
      %589 = vector.shape_cast %581 : vector<32xf32> to vector<1x32xf32>
      %590 = vector.broadcast %588 : vector<16x1xf32> to vector<16x32xf32>
      %591 = vector.broadcast %589 : vector<1x32xf32> to vector<16x32xf32>
      %592 = arith.mulf %590, %591 : vector<16x32xf32>
      %593 = arith.addf %579, %592 : vector<16x32xf32>
      %c1_196 = arith.constant 1 : index
      %c0_197 = arith.constant 0 : index
      %594 = vector.load %arg2[%c1_196, %c0_197] : memref<9x32xf32, #tpu.memory_space<vmem>>, vector<1x32xf32>
      %595 = vector.shape_cast %594 : vector<1x32xf32> to vector<32xf32>
      %596 = vector.extract_strided_slice %577 {offsets = [1, 0], sizes = [16, 1], strides = [1, 1]} : vector<18x4xf32> to vector<16x1xf32>
      %597 = vector.shape_cast %595 : vector<32xf32> to vector<1x32xf32>
      %598 = vector.broadcast %596 : vector<16x1xf32> to vector<16x32xf32>
      %599 = vector.broadcast %597 : vector<1x32xf32> to vector<16x32xf32>
      %600 = arith.mulf %598, %599 : vector<16x32xf32>
      %601 = arith.addf %587, %600 : vector<16x32xf32>
      %602 = vector.extract_strided_slice %577 {offsets = [1, 1], sizes = [16, 1], strides = [1, 1]} : vector<18x4xf32> to vector<16x1xf32>
      %603 = vector.shape_cast %595 : vector<32xf32> to vector<1x32xf32>
      %604 = vector.broadcast %602 : vector<16x1xf32> to vector<16x32xf32>
      %605 = vector.broadcast %603 : vector<1x32xf32> to vector<16x32xf32>
      %606 = arith.mulf %604, %605 : vector<16x32xf32>
      %607 = arith.addf %593, %606 : vector<16x32xf32>
      %c2_198 = arith.constant 2 : index
      %c0_199 = arith.constant 0 : index
      %608 = vector.load %arg2[%c2_198, %c0_199] : memref<9x32xf32, #tpu.memory_space<vmem>>, vector<1x32xf32>
      %609 = vector.shape_cast %608 : vector<1x32xf32> to vector<32xf32>
      %610 = vector.extract_strided_slice %577 {offsets = [2, 0], sizes = [16, 1], strides = [1, 1]} : vector<18x4xf32> to vector<16x1xf32>
      %611 = vector.shape_cast %609 : vector<32xf32> to vector<1x32xf32>
      %612 = vector.broadcast %610 : vector<16x1xf32> to vector<16x32xf32>
      %613 = vector.broadcast %611 : vector<1x32xf32> to vector<16x32xf32>
      %614 = arith.mulf %612, %613 : vector<16x32xf32>
      %615 = arith.addf %601, %614 : vector<16x32xf32>
      %616 = vector.extract_strided_slice %577 {offsets = [2, 1], sizes = [16, 1], strides = [1, 1]} : vector<18x4xf32> to vector<16x1xf32>
      %617 = vector.shape_cast %609 : vector<32xf32> to vector<1x32xf32>
      %618 = vector.broadcast %616 : vector<16x1xf32> to vector<16x32xf32>
      %619 = vector.broadcast %617 : vector<1x32xf32> to vector<16x32xf32>
      %620 = arith.mulf %618, %619 : vector<16x32xf32>
      %621 = arith.addf %607, %620 : vector<16x32xf32>
      %c3_200 = arith.constant 3 : index
      %c0_201 = arith.constant 0 : index
      %622 = vector.load %arg2[%c3_200, %c0_201] : memref<9x32xf32, #tpu.memory_space<vmem>>, vector<1x32xf32>
      %623 = vector.shape_cast %622 : vector<1x32xf32> to vector<32xf32>
      %624 = vector.extract_strided_slice %577 {offsets = [0, 1], sizes = [16, 1], strides = [1, 1]} : vector<18x4xf32> to vector<16x1xf32>
      %625 = vector.shape_cast %623 : vector<32xf32> to vector<1x32xf32>
      %626 = vector.broadcast %624 : vector<16x1xf32> to vector<16x32xf32>
      %627 = vector.broadcast %625 : vector<1x32xf32> to vector<16x32xf32>
      %628 = arith.mulf %626, %627 : vector<16x32xf32>
      %629 = arith.addf %615, %628 : vector<16x32xf32>
      %630 = vector.extract_strided_slice %577 {offsets = [0, 2], sizes = [16, 1], strides = [1, 1]} : vector<18x4xf32> to vector<16x1xf32>
      %631 = vector.shape_cast %623 : vector<32xf32> to vector<1x32xf32>
      %632 = vector.broadcast %630 : vector<16x1xf32> to vector<16x32xf32>
      %633 = vector.broadcast %631 : vector<1x32xf32> to vector<16x32xf32>
      %634 = arith.mulf %632, %633 : vector<16x32xf32>
      %635 = arith.addf %621, %634 : vector<16x32xf32>
      %c4_202 = arith.constant 4 : index
      %c0_203 = arith.constant 0 : index
      %636 = vector.load %arg2[%c4_202, %c0_203] : memref<9x32xf32, #tpu.memory_space<vmem>>, vector<1x32xf32>
      %637 = vector.shape_cast %636 : vector<1x32xf32> to vector<32xf32>
      %638 = vector.extract_strided_slice %577 {offsets = [1, 1], sizes = [16, 1], strides = [1, 1]} : vector<18x4xf32> to vector<16x1xf32>
      %639 = vector.shape_cast %637 : vector<32xf32> to vector<1x32xf32>
      %640 = vector.broadcast %638 : vector<16x1xf32> to vector<16x32xf32>
      %641 = vector.broadcast %639 : vector<1x32xf32> to vector<16x32xf32>
      %642 = arith.mulf %640, %641 : vector<16x32xf32>
      %643 = arith.addf %629, %642 : vector<16x32xf32>
      %644 = vector.extract_strided_slice %577 {offsets = [1, 2], sizes = [16, 1], strides = [1, 1]} : vector<18x4xf32> to vector<16x1xf32>
      %645 = vector.shape_cast %637 : vector<32xf32> to vector<1x32xf32>
      %646 = vector.broadcast %644 : vector<16x1xf32> to vector<16x32xf32>
      %647 = vector.broadcast %645 : vector<1x32xf32> to vector<16x32xf32>
      %648 = arith.mulf %646, %647 : vector<16x32xf32>
      %649 = arith.addf %635, %648 : vector<16x32xf32>
      %c5_204 = arith.constant 5 : index
      %c0_205 = arith.constant 0 : index
      %650 = vector.load %arg2[%c5_204, %c0_205] : memref<9x32xf32, #tpu.memory_space<vmem>>, vector<1x32xf32>
      %651 = vector.shape_cast %650 : vector<1x32xf32> to vector<32xf32>
      %652 = vector.extract_strided_slice %577 {offsets = [2, 1], sizes = [16, 1], strides = [1, 1]} : vector<18x4xf32> to vector<16x1xf32>
      %653 = vector.shape_cast %651 : vector<32xf32> to vector<1x32xf32>
      %654 = vector.broadcast %652 : vector<16x1xf32> to vector<16x32xf32>
      %655 = vector.broadcast %653 : vector<1x32xf32> to vector<16x32xf32>
      %656 = arith.mulf %654, %655 : vector<16x32xf32>
      %657 = arith.addf %643, %656 : vector<16x32xf32>
      %658 = vector.extract_strided_slice %577 {offsets = [2, 2], sizes = [16, 1], strides = [1, 1]} : vector<18x4xf32> to vector<16x1xf32>
      %659 = vector.shape_cast %651 : vector<32xf32> to vector<1x32xf32>
      %660 = vector.broadcast %658 : vector<16x1xf32> to vector<16x32xf32>
      %661 = vector.broadcast %659 : vector<1x32xf32> to vector<16x32xf32>
      %662 = arith.mulf %660, %661 : vector<16x32xf32>
      %663 = arith.addf %649, %662 : vector<16x32xf32>
      %c6_206 = arith.constant 6 : index
      %c0_207 = arith.constant 0 : index
      %664 = vector.load %arg2[%c6_206, %c0_207] : memref<9x32xf32, #tpu.memory_space<vmem>>, vector<1x32xf32>
      %665 = vector.shape_cast %664 : vector<1x32xf32> to vector<32xf32>
      %666 = vector.extract_strided_slice %577 {offsets = [0, 2], sizes = [16, 1], strides = [1, 1]} : vector<18x4xf32> to vector<16x1xf32>
      %667 = vector.shape_cast %665 : vector<32xf32> to vector<1x32xf32>
      %668 = vector.broadcast %666 : vector<16x1xf32> to vector<16x32xf32>
      %669 = vector.broadcast %667 : vector<1x32xf32> to vector<16x32xf32>
      %670 = arith.mulf %668, %669 : vector<16x32xf32>
      %671 = arith.addf %657, %670 : vector<16x32xf32>
      %672 = vector.extract_strided_slice %577 {offsets = [0, 3], sizes = [16, 1], strides = [1, 1]} : vector<18x4xf32> to vector<16x1xf32>
      %673 = vector.shape_cast %665 : vector<32xf32> to vector<1x32xf32>
      %674 = vector.broadcast %672 : vector<16x1xf32> to vector<16x32xf32>
      %675 = vector.broadcast %673 : vector<1x32xf32> to vector<16x32xf32>
      %676 = arith.mulf %674, %675 : vector<16x32xf32>
      %677 = arith.addf %663, %676 : vector<16x32xf32>
      %c7_208 = arith.constant 7 : index
      %c0_209 = arith.constant 0 : index
      %678 = vector.load %arg2[%c7_208, %c0_209] : memref<9x32xf32, #tpu.memory_space<vmem>>, vector<1x32xf32>
      %679 = vector.shape_cast %678 : vector<1x32xf32> to vector<32xf32>
      %680 = vector.extract_strided_slice %577 {offsets = [1, 2], sizes = [16, 1], strides = [1, 1]} : vector<18x4xf32> to vector<16x1xf32>
      %681 = vector.shape_cast %679 : vector<32xf32> to vector<1x32xf32>
      %682 = vector.broadcast %680 : vector<16x1xf32> to vector<16x32xf32>
      %683 = vector.broadcast %681 : vector<1x32xf32> to vector<16x32xf32>
      %684 = arith.mulf %682, %683 : vector<16x32xf32>
      %685 = arith.addf %671, %684 : vector<16x32xf32>
      %686 = vector.extract_strided_slice %577 {offsets = [1, 3], sizes = [16, 1], strides = [1, 1]} : vector<18x4xf32> to vector<16x1xf32>
      %687 = vector.shape_cast %679 : vector<32xf32> to vector<1x32xf32>
      %688 = vector.broadcast %686 : vector<16x1xf32> to vector<16x32xf32>
      %689 = vector.broadcast %687 : vector<1x32xf32> to vector<16x32xf32>
      %690 = arith.mulf %688, %689 : vector<16x32xf32>
      %691 = arith.addf %677, %690 : vector<16x32xf32>
      %c8_210 = arith.constant 8 : index
      %c0_211 = arith.constant 0 : index
      %692 = vector.load %arg2[%c8_210, %c0_211] : memref<9x32xf32, #tpu.memory_space<vmem>>, vector<1x32xf32>
      %693 = vector.shape_cast %692 : vector<1x32xf32> to vector<32xf32>
      %694 = vector.extract_strided_slice %577 {offsets = [2, 2], sizes = [16, 1], strides = [1, 1]} : vector<18x4xf32> to vector<16x1xf32>
      %695 = vector.shape_cast %693 : vector<32xf32> to vector<1x32xf32>
      %696 = vector.broadcast %694 : vector<16x1xf32> to vector<16x32xf32>
      %697 = vector.broadcast %695 : vector<1x32xf32> to vector<16x32xf32>
      %698 = arith.mulf %696, %697 : vector<16x32xf32>
      %699 = arith.addf %685, %698 : vector<16x32xf32>
      %700 = vector.extract_strided_slice %577 {offsets = [2, 3], sizes = [16, 1], strides = [1, 1]} : vector<18x4xf32> to vector<16x1xf32>
      %701 = vector.shape_cast %693 : vector<32xf32> to vector<1x32xf32>
      %702 = vector.broadcast %700 : vector<16x1xf32> to vector<16x32xf32>
      %703 = vector.broadcast %701 : vector<1x32xf32> to vector<16x32xf32>
      %704 = arith.mulf %702, %703 : vector<16x32xf32>
      %705 = arith.addf %691, %704 : vector<16x32xf32>
      %706 = arith.maximumf %699, %705 : vector<16x32xf32>
      %cst_212 = arith.constant 0.000000e+00 : f32
      %707 = vector.broadcast %cst_212 : f32 to vector<16x32xf32>
      %708 = arith.maximumf %706, %707 : vector<16x32xf32>
      %c0_213 = arith.constant 0 : index
      %c0_214 = arith.constant 0 : index
      %709 = vector.load %arg6[%c0_213, %c0_214] : memref<16x32xf32, #tpu.memory_space<vmem>>, vector<16x32xf32>
      tpu.vector_store %arg6[%c0_213, %c0_214], %708 {strides = array<i32>} : memref<16x32xf32, #tpu.memory_space<vmem>>, vector<16x32xf32>,
      %c0_215 = arith.constant 0 : index
      %c0_216 = arith.constant 0 : index
      %710 = tpu.strided_load %arg6[%c0_215, %c0_216] {strides = array<i32: 2, 1>} : memref<16x32xf32, #tpu.memory_space<vmem>>, vector<8x32xf32>
      %c1_217 = arith.constant 1 : index
      %c0_218 = arith.constant 0 : index
      %711 = tpu.strided_load %arg6[%c1_217, %c0_218] {strides = array<i32: 2, 1>} : memref<16x32xf32, #tpu.memory_space<vmem>>, vector<8x32xf32>
      %712 = arith.maximumf %710, %711 : vector<8x32xf32>
      %cst_219 = arith.constant 0.000000e+00 : f32
      %713 = vector.broadcast %cst_219 : f32 to vector<1x32xf32>
      %cst_220 = arith.constant 0.000000e+00 : f32
      %714 = vector.broadcast %cst_220 : f32 to vector<1x32xf32>
      %715 = tpu.concatenate %713, %712, %714 in 0 : vector<1x32xf32>, vector<8x32xf32>, vector<1x32xf32> -> vector<10x32xf32>
      %c40_i32 = arith.constant 40 : i32
      %716 = arith.addi %137, %c40_i32 : i32
      %717 = arith.index_cast %716 : i32 to index
      %c0_221 = arith.constant 0 : index
      %718 = vector.load %arg7[%717, %c0_221] : memref<200x32xf32, #tpu.memory_space<vmem>>, vector<10x32xf32>
      tpu.vector_store %arg7[%717, %c0_221], %715 {strides = array<i32>} : memref<200x32xf32, #tpu.memory_space<vmem>>, vector<10x32xf32>,
      %719 = arith.index_cast %arg10 : i32 to index
      %c0_222 = arith.constant 0 : index
      %c8_223 = arith.constant 8 : index
      %720 = vector.load %arg1[%719, %c0_222, %c8_223] : memref<2x18x18xf32, #tpu.memory_space<vmem>>, vector<1x18x4xf32>
      %721 = vector.shape_cast %720 : vector<1x18x4xf32> to vector<18x4xf32>
      %cst_224 = arith.constant 0.000000e+00 : f32
      %722 = vector.broadcast %cst_224 : f32 to vector<16x32xf32>
      %cst_225 = arith.constant 0.000000e+00 : f32
      %723 = vector.broadcast %cst_225 : f32 to vector<16x32xf32>
      %c0_226 = arith.constant 0 : index
      %c0_227 = arith.constant 0 : index
      %724 = vector.load %arg2[%c0_226, %c0_227] : memref<9x32xf32, #tpu.memory_space<vmem>>, vector<1x32xf32>
      %725 = vector.shape_cast %724 : vector<1x32xf32> to vector<32xf32>
      %726 = vector.extract_strided_slice %721 {offsets = [0, 0], sizes = [16, 1], strides = [1, 1]} : vector<18x4xf32> to vector<16x1xf32>
      %727 = vector.shape_cast %725 : vector<32xf32> to vector<1x32xf32>
      %728 = vector.broadcast %726 : vector<16x1xf32> to vector<16x32xf32>
      %729 = vector.broadcast %727 : vector<1x32xf32> to vector<16x32xf32>
      %730 = arith.mulf %728, %729 : vector<16x32xf32>
      %731 = arith.addf %722, %730 : vector<16x32xf32>
      %732 = vector.extract_strided_slice %721 {offsets = [0, 1], sizes = [16, 1], strides = [1, 1]} : vector<18x4xf32> to vector<16x1xf32>
      %733 = vector.shape_cast %725 : vector<32xf32> to vector<1x32xf32>
      %734 = vector.broadcast %732 : vector<16x1xf32> to vector<16x32xf32>
      %735 = vector.broadcast %733 : vector<1x32xf32> to vector<16x32xf32>
      %736 = arith.mulf %734, %735 : vector<16x32xf32>
      %737 = arith.addf %723, %736 : vector<16x32xf32>
      %c1_228 = arith.constant 1 : index
      %c0_229 = arith.constant 0 : index
      %738 = vector.load %arg2[%c1_228, %c0_229] : memref<9x32xf32, #tpu.memory_space<vmem>>, vector<1x32xf32>
      %739 = vector.shape_cast %738 : vector<1x32xf32> to vector<32xf32>
      %740 = vector.extract_strided_slice %721 {offsets = [1, 0], sizes = [16, 1], strides = [1, 1]} : vector<18x4xf32> to vector<16x1xf32>
      %741 = vector.shape_cast %739 : vector<32xf32> to vector<1x32xf32>
      %742 = vector.broadcast %740 : vector<16x1xf32> to vector<16x32xf32>
      %743 = vector.broadcast %741 : vector<1x32xf32> to vector<16x32xf32>
      %744 = arith.mulf %742, %743 : vector<16x32xf32>
      %745 = arith.addf %731, %744 : vector<16x32xf32>
      %746 = vector.extract_strided_slice %721 {offsets = [1, 1], sizes = [16, 1], strides = [1, 1]} : vector<18x4xf32> to vector<16x1xf32>
      %747 = vector.shape_cast %739 : vector<32xf32> to vector<1x32xf32>
      %748 = vector.broadcast %746 : vector<16x1xf32> to vector<16x32xf32>
      %749 = vector.broadcast %747 : vector<1x32xf32> to vector<16x32xf32>
      %750 = arith.mulf %748, %749 : vector<16x32xf32>
      %751 = arith.addf %737, %750 : vector<16x32xf32>
      %c2_230 = arith.constant 2 : index
      %c0_231 = arith.constant 0 : index
      %752 = vector.load %arg2[%c2_230, %c0_231] : memref<9x32xf32, #tpu.memory_space<vmem>>, vector<1x32xf32>
      %753 = vector.shape_cast %752 : vector<1x32xf32> to vector<32xf32>
      %754 = vector.extract_strided_slice %721 {offsets = [2, 0], sizes = [16, 1], strides = [1, 1]} : vector<18x4xf32> to vector<16x1xf32>
      %755 = vector.shape_cast %753 : vector<32xf32> to vector<1x32xf32>
      %756 = vector.broadcast %754 : vector<16x1xf32> to vector<16x32xf32>
      %757 = vector.broadcast %755 : vector<1x32xf32> to vector<16x32xf32>
      %758 = arith.mulf %756, %757 : vector<16x32xf32>
      %759 = arith.addf %745, %758 : vector<16x32xf32>
      %760 = vector.extract_strided_slice %721 {offsets = [2, 1], sizes = [16, 1], strides = [1, 1]} : vector<18x4xf32> to vector<16x1xf32>
      %761 = vector.shape_cast %753 : vector<32xf32> to vector<1x32xf32>
      %762 = vector.broadcast %760 : vector<16x1xf32> to vector<16x32xf32>
      %763 = vector.broadcast %761 : vector<1x32xf32> to vector<16x32xf32>
      %764 = arith.mulf %762, %763 : vector<16x32xf32>
      %765 = arith.addf %751, %764 : vector<16x32xf32>
      %c3_232 = arith.constant 3 : index
      %c0_233 = arith.constant 0 : index
      %766 = vector.load %arg2[%c3_232, %c0_233] : memref<9x32xf32, #tpu.memory_space<vmem>>, vector<1x32xf32>
      %767 = vector.shape_cast %766 : vector<1x32xf32> to vector<32xf32>
      %768 = vector.extract_strided_slice %721 {offsets = [0, 1], sizes = [16, 1], strides = [1, 1]} : vector<18x4xf32> to vector<16x1xf32>
      %769 = vector.shape_cast %767 : vector<32xf32> to vector<1x32xf32>
      %770 = vector.broadcast %768 : vector<16x1xf32> to vector<16x32xf32>
      %771 = vector.broadcast %769 : vector<1x32xf32> to vector<16x32xf32>
      %772 = arith.mulf %770, %771 : vector<16x32xf32>
      %773 = arith.addf %759, %772 : vector<16x32xf32>
      %774 = vector.extract_strided_slice %721 {offsets = [0, 2], sizes = [16, 1], strides = [1, 1]} : vector<18x4xf32> to vector<16x1xf32>
      %775 = vector.shape_cast %767 : vector<32xf32> to vector<1x32xf32>
      %776 = vector.broadcast %774 : vector<16x1xf32> to vector<16x32xf32>
      %777 = vector.broadcast %775 : vector<1x32xf32> to vector<16x32xf32>
      %778 = arith.mulf %776, %777 : vector<16x32xf32>
      %779 = arith.addf %765, %778 : vector<16x32xf32>
      %c4_234 = arith.constant 4 : index
      %c0_235 = arith.constant 0 : index
      %780 = vector.load %arg2[%c4_234, %c0_235] : memref<9x32xf32, #tpu.memory_space<vmem>>, vector<1x32xf32>
      %781 = vector.shape_cast %780 : vector<1x32xf32> to vector<32xf32>
      %782 = vector.extract_strided_slice %721 {offsets = [1, 1], sizes = [16, 1], strides = [1, 1]} : vector<18x4xf32> to vector<16x1xf32>
      %783 = vector.shape_cast %781 : vector<32xf32> to vector<1x32xf32>
      %784 = vector.broadcast %782 : vector<16x1xf32> to vector<16x32xf32>
      %785 = vector.broadcast %783 : vector<1x32xf32> to vector<16x32xf32>
      %786 = arith.mulf %784, %785 : vector<16x32xf32>
      %787 = arith.addf %773, %786 : vector<16x32xf32>
      %788 = vector.extract_strided_slice %721 {offsets = [1, 2], sizes = [16, 1], strides = [1, 1]} : vector<18x4xf32> to vector<16x1xf32>
      %789 = vector.shape_cast %781 : vector<32xf32> to vector<1x32xf32>
      %790 = vector.broadcast %788 : vector<16x1xf32> to vector<16x32xf32>
      %791 = vector.broadcast %789 : vector<1x32xf32> to vector<16x32xf32>
      %792 = arith.mulf %790, %791 : vector<16x32xf32>
      %793 = arith.addf %779, %792 : vector<16x32xf32>
      %c5_236 = arith.constant 5 : index
      %c0_237 = arith.constant 0 : index
      %794 = vector.load %arg2[%c5_236, %c0_237] : memref<9x32xf32, #tpu.memory_space<vmem>>, vector<1x32xf32>
      %795 = vector.shape_cast %794 : vector<1x32xf32> to vector<32xf32>
      %796 = vector.extract_strided_slice %721 {offsets = [2, 1], sizes = [16, 1], strides = [1, 1]} : vector<18x4xf32> to vector<16x1xf32>
      %797 = vector.shape_cast %795 : vector<32xf32> to vector<1x32xf32>
      %798 = vector.broadcast %796 : vector<16x1xf32> to vector<16x32xf32>
      %799 = vector.broadcast %797 : vector<1x32xf32> to vector<16x32xf32>
      %800 = arith.mulf %798, %799 : vector<16x32xf32>
      %801 = arith.addf %787, %800 : vector<16x32xf32>
      %802 = vector.extract_strided_slice %721 {offsets = [2, 2], sizes = [16, 1], strides = [1, 1]} : vector<18x4xf32> to vector<16x1xf32>
      %803 = vector.shape_cast %795 : vector<32xf32> to vector<1x32xf32>
      %804 = vector.broadcast %802 : vector<16x1xf32> to vector<16x32xf32>
      %805 = vector.broadcast %803 : vector<1x32xf32> to vector<16x32xf32>
      %806 = arith.mulf %804, %805 : vector<16x32xf32>
      %807 = arith.addf %793, %806 : vector<16x32xf32>
      %c6_238 = arith.constant 6 : index
      %c0_239 = arith.constant 0 : index
      %808 = vector.load %arg2[%c6_238, %c0_239] : memref<9x32xf32, #tpu.memory_space<vmem>>, vector<1x32xf32>
      %809 = vector.shape_cast %808 : vector<1x32xf32> to vector<32xf32>
      %810 = vector.extract_strided_slice %721 {offsets = [0, 2], sizes = [16, 1], strides = [1, 1]} : vector<18x4xf32> to vector<16x1xf32>
      %811 = vector.shape_cast %809 : vector<32xf32> to vector<1x32xf32>
      %812 = vector.broadcast %810 : vector<16x1xf32> to vector<16x32xf32>
      %813 = vector.broadcast %811 : vector<1x32xf32> to vector<16x32xf32>
      %814 = arith.mulf %812, %813 : vector<16x32xf32>
      %815 = arith.addf %801, %814 : vector<16x32xf32>
      %816 = vector.extract_strided_slice %721 {offsets = [0, 3], sizes = [16, 1], strides = [1, 1]} : vector<18x4xf32> to vector<16x1xf32>
      %817 = vector.shape_cast %809 : vector<32xf32> to vector<1x32xf32>
      %818 = vector.broadcast %816 : vector<16x1xf32> to vector<16x32xf32>
      %819 = vector.broadcast %817 : vector<1x32xf32> to vector<16x32xf32>
      %820 = arith.mulf %818, %819 : vector<16x32xf32>
      %821 = arith.addf %807, %820 : vector<16x32xf32>
      %c7_240 = arith.constant 7 : index
      %c0_241 = arith.constant 0 : index
      %822 = vector.load %arg2[%c7_240, %c0_241] : memref<9x32xf32, #tpu.memory_space<vmem>>, vector<1x32xf32>
      %823 = vector.shape_cast %822 : vector<1x32xf32> to vector<32xf32>
      %824 = vector.extract_strided_slice %721 {offsets = [1, 2], sizes = [16, 1], strides = [1, 1]} : vector<18x4xf32> to vector<16x1xf32>
      %825 = vector.shape_cast %823 : vector<32xf32> to vector<1x32xf32>
      %826 = vector.broadcast %824 : vector<16x1xf32> to vector<16x32xf32>
      %827 = vector.broadcast %825 : vector<1x32xf32> to vector<16x32xf32>
      %828 = arith.mulf %826, %827 : vector<16x32xf32>
      %829 = arith.addf %815, %828 : vector<16x32xf32>
      %830 = vector.extract_strided_slice %721 {offsets = [1, 3], sizes = [16, 1], strides = [1, 1]} : vector<18x4xf32> to vector<16x1xf32>
      %831 = vector.shape_cast %823 : vector<32xf32> to vector<1x32xf32>
      %832 = vector.broadcast %830 : vector<16x1xf32> to vector<16x32xf32>
      %833 = vector.broadcast %831 : vector<1x32xf32> to vector<16x32xf32>
      %834 = arith.mulf %832, %833 : vector<16x32xf32>
      %835 = arith.addf %821, %834 : vector<16x32xf32>
      %c8_242 = arith.constant 8 : index
      %c0_243 = arith.constant 0 : index
      %836 = vector.load %arg2[%c8_242, %c0_243] : memref<9x32xf32, #tpu.memory_space<vmem>>, vector<1x32xf32>
      %837 = vector.shape_cast %836 : vector<1x32xf32> to vector<32xf32>
      %838 = vector.extract_strided_slice %721 {offsets = [2, 2], sizes = [16, 1], strides = [1, 1]} : vector<18x4xf32> to vector<16x1xf32>
      %839 = vector.shape_cast %837 : vector<32xf32> to vector<1x32xf32>
      %840 = vector.broadcast %838 : vector<16x1xf32> to vector<16x32xf32>
      %841 = vector.broadcast %839 : vector<1x32xf32> to vector<16x32xf32>
      %842 = arith.mulf %840, %841 : vector<16x32xf32>
      %843 = arith.addf %829, %842 : vector<16x32xf32>
      %844 = vector.extract_strided_slice %721 {offsets = [2, 3], sizes = [16, 1], strides = [1, 1]} : vector<18x4xf32> to vector<16x1xf32>
      %845 = vector.shape_cast %837 : vector<32xf32> to vector<1x32xf32>
      %846 = vector.broadcast %844 : vector<16x1xf32> to vector<16x32xf32>
      %847 = vector.broadcast %845 : vector<1x32xf32> to vector<16x32xf32>
      %848 = arith.mulf %846, %847 : vector<16x32xf32>
      %849 = arith.addf %835, %848 : vector<16x32xf32>
      %850 = arith.maximumf %843, %849 : vector<16x32xf32>
      %cst_244 = arith.constant 0.000000e+00 : f32
      %851 = vector.broadcast %cst_244 : f32 to vector<16x32xf32>
      %852 = arith.maximumf %850, %851 : vector<16x32xf32>
      %c0_245 = arith.constant 0 : index
      %c0_246 = arith.constant 0 : index
      %853 = vector.load %arg6[%c0_245, %c0_246] : memref<16x32xf32, #tpu.memory_space<vmem>>, vector<16x32xf32>
      tpu.vector_store %arg6[%c0_245, %c0_246], %852 {strides = array<i32>} : memref<16x32xf32, #tpu.memory_space<vmem>>, vector<16x32xf32>,
      %c0_247 = arith.constant 0 : index
      %c0_248 = arith.constant 0 : index
      %854 = tpu.strided_load %arg6[%c0_247, %c0_248] {strides = array<i32: 2, 1>} : memref<16x32xf32, #tpu.memory_space<vmem>>, vector<8x32xf32>
      %c1_249 = arith.constant 1 : index
      %c0_250 = arith.constant 0 : index
      %855 = tpu.strided_load %arg6[%c1_249, %c0_250] {strides = array<i32: 2, 1>} : memref<16x32xf32, #tpu.memory_space<vmem>>, vector<8x32xf32>
      %856 = arith.maximumf %854, %855 : vector<8x32xf32>
      %cst_251 = arith.constant 0.000000e+00 : f32
      %857 = vector.broadcast %cst_251 : f32 to vector<1x32xf32>
      %cst_252 = arith.constant 0.000000e+00 : f32
      %858 = vector.broadcast %cst_252 : f32 to vector<1x32xf32>
      %859 = tpu.concatenate %857, %856, %858 in 0 : vector<1x32xf32>, vector<8x32xf32>, vector<1x32xf32> -> vector<10x32xf32>
      %c50_i32 = arith.constant 50 : i32
      %860 = arith.addi %137, %c50_i32 : i32
      %861 = arith.index_cast %860 : i32 to index
      %c0_253 = arith.constant 0 : index
      %862 = vector.load %arg7[%861, %c0_253] : memref<200x32xf32, #tpu.memory_space<vmem>>, vector<10x32xf32>
      tpu.vector_store %arg7[%861, %c0_253], %859 {strides = array<i32>} : memref<200x32xf32, #tpu.memory_space<vmem>>, vector<10x32xf32>,
      %863 = arith.index_cast %arg10 : i32 to index
      %c0_254 = arith.constant 0 : index
      %c10_255 = arith.constant 10 : index
      %864 = vector.load %arg1[%863, %c0_254, %c10_255] : memref<2x18x18xf32, #tpu.memory_space<vmem>>, vector<1x18x4xf32>
      %865 = vector.shape_cast %864 : vector<1x18x4xf32> to vector<18x4xf32>
      %cst_256 = arith.constant 0.000000e+00 : f32
      %866 = vector.broadcast %cst_256 : f32 to vector<16x32xf32>
      %cst_257 = arith.constant 0.000000e+00 : f32
      %867 = vector.broadcast %cst_257 : f32 to vector<16x32xf32>
      %c0_258 = arith.constant 0 : index
      %c0_259 = arith.constant 0 : index
      %868 = vector.load %arg2[%c0_258, %c0_259] : memref<9x32xf32, #tpu.memory_space<vmem>>, vector<1x32xf32>
      %869 = vector.shape_cast %868 : vector<1x32xf32> to vector<32xf32>
      %870 = vector.extract_strided_slice %865 {offsets = [0, 0], sizes = [16, 1], strides = [1, 1]} : vector<18x4xf32> to vector<16x1xf32>
      %871 = vector.shape_cast %869 : vector<32xf32> to vector<1x32xf32>
      %872 = vector.broadcast %870 : vector<16x1xf32> to vector<16x32xf32>
      %873 = vector.broadcast %871 : vector<1x32xf32> to vector<16x32xf32>
      %874 = arith.mulf %872, %873 : vector<16x32xf32>
      %875 = arith.addf %866, %874 : vector<16x32xf32>
      %876 = vector.extract_strided_slice %865 {offsets = [0, 1], sizes = [16, 1], strides = [1, 1]} : vector<18x4xf32> to vector<16x1xf32>
      %877 = vector.shape_cast %869 : vector<32xf32> to vector<1x32xf32>
      %878 = vector.broadcast %876 : vector<16x1xf32> to vector<16x32xf32>
      %879 = vector.broadcast %877 : vector<1x32xf32> to vector<16x32xf32>
      %880 = arith.mulf %878, %879 : vector<16x32xf32>
      %881 = arith.addf %867, %880 : vector<16x32xf32>
      %c1_260 = arith.constant 1 : index
      %c0_261 = arith.constant 0 : index
      %882 = vector.load %arg2[%c1_260, %c0_261] : memref<9x32xf32, #tpu.memory_space<vmem>>, vector<1x32xf32>
      %883 = vector.shape_cast %882 : vector<1x32xf32> to vector<32xf32>
      %884 = vector.extract_strided_slice %865 {offsets = [1, 0], sizes = [16, 1], strides = [1, 1]} : vector<18x4xf32> to vector<16x1xf32>
      %885 = vector.shape_cast %883 : vector<32xf32> to vector<1x32xf32>
      %886 = vector.broadcast %884 : vector<16x1xf32> to vector<16x32xf32>
      %887 = vector.broadcast %885 : vector<1x32xf32> to vector<16x32xf32>
      %888 = arith.mulf %886, %887 : vector<16x32xf32>
      %889 = arith.addf %875, %888 : vector<16x32xf32>
      %890 = vector.extract_strided_slice %865 {offsets = [1, 1], sizes = [16, 1], strides = [1, 1]} : vector<18x4xf32> to vector<16x1xf32>
      %891 = vector.shape_cast %883 : vector<32xf32> to vector<1x32xf32>
      %892 = vector.broadcast %890 : vector<16x1xf32> to vector<16x32xf32>
      %893 = vector.broadcast %891 : vector<1x32xf32> to vector<16x32xf32>
      %894 = arith.mulf %892, %893 : vector<16x32xf32>
      %895 = arith.addf %881, %894 : vector<16x32xf32>
      %c2_262 = arith.constant 2 : index
      %c0_263 = arith.constant 0 : index
      %896 = vector.load %arg2[%c2_262, %c0_263] : memref<9x32xf32, #tpu.memory_space<vmem>>, vector<1x32xf32>
      %897 = vector.shape_cast %896 : vector<1x32xf32> to vector<32xf32>
      %898 = vector.extract_strided_slice %865 {offsets = [2, 0], sizes = [16, 1], strides = [1, 1]} : vector<18x4xf32> to vector<16x1xf32>
      %899 = vector.shape_cast %897 : vector<32xf32> to vector<1x32xf32>
      %900 = vector.broadcast %898 : vector<16x1xf32> to vector<16x32xf32>
      %901 = vector.broadcast %899 : vector<1x32xf32> to vector<16x32xf32>
      %902 = arith.mulf %900, %901 : vector<16x32xf32>
      %903 = arith.addf %889, %902 : vector<16x32xf32>
      %904 = vector.extract_strided_slice %865 {offsets = [2, 1], sizes = [16, 1], strides = [1, 1]} : vector<18x4xf32> to vector<16x1xf32>
      %905 = vector.shape_cast %897 : vector<32xf32> to vector<1x32xf32>
      %906 = vector.broadcast %904 : vector<16x1xf32> to vector<16x32xf32>
      %907 = vector.broadcast %905 : vector<1x32xf32> to vector<16x32xf32>
      %908 = arith.mulf %906, %907 : vector<16x32xf32>
      %909 = arith.addf %895, %908 : vector<16x32xf32>
      %c3_264 = arith.constant 3 : index
      %c0_265 = arith.constant 0 : index
      %910 = vector.load %arg2[%c3_264, %c0_265] : memref<9x32xf32, #tpu.memory_space<vmem>>, vector<1x32xf32>
      %911 = vector.shape_cast %910 : vector<1x32xf32> to vector<32xf32>
      %912 = vector.extract_strided_slice %865 {offsets = [0, 1], sizes = [16, 1], strides = [1, 1]} : vector<18x4xf32> to vector<16x1xf32>
      %913 = vector.shape_cast %911 : vector<32xf32> to vector<1x32xf32>
      %914 = vector.broadcast %912 : vector<16x1xf32> to vector<16x32xf32>
      %915 = vector.broadcast %913 : vector<1x32xf32> to vector<16x32xf32>
      %916 = arith.mulf %914, %915 : vector<16x32xf32>
      %917 = arith.addf %903, %916 : vector<16x32xf32>
      %918 = vector.extract_strided_slice %865 {offsets = [0, 2], sizes = [16, 1], strides = [1, 1]} : vector<18x4xf32> to vector<16x1xf32>
      %919 = vector.shape_cast %911 : vector<32xf32> to vector<1x32xf32>
      %920 = vector.broadcast %918 : vector<16x1xf32> to vector<16x32xf32>
      %921 = vector.broadcast %919 : vector<1x32xf32> to vector<16x32xf32>
      %922 = arith.mulf %920, %921 : vector<16x32xf32>
      %923 = arith.addf %909, %922 : vector<16x32xf32>
      %c4_266 = arith.constant 4 : index
      %c0_267 = arith.constant 0 : index
      %924 = vector.load %arg2[%c4_266, %c0_267] : memref<9x32xf32, #tpu.memory_space<vmem>>, vector<1x32xf32>
      %925 = vector.shape_cast %924 : vector<1x32xf32> to vector<32xf32>
      %926 = vector.extract_strided_slice %865 {offsets = [1, 1], sizes = [16, 1], strides = [1, 1]} : vector<18x4xf32> to vector<16x1xf32>
      %927 = vector.shape_cast %925 : vector<32xf32> to vector<1x32xf32>
      %928 = vector.broadcast %926 : vector<16x1xf32> to vector<16x32xf32>
      %929 = vector.broadcast %927 : vector<1x32xf32> to vector<16x32xf32>
      %930 = arith.mulf %928, %929 : vector<16x32xf32>
      %931 = arith.addf %917, %930 : vector<16x32xf32>
      %932 = vector.extract_strided_slice %865 {offsets = [1, 2], sizes = [16, 1], strides = [1, 1]} : vector<18x4xf32> to vector<16x1xf32>
      %933 = vector.shape_cast %925 : vector<32xf32> to vector<1x32xf32>
      %934 = vector.broadcast %932 : vector<16x1xf32> to vector<16x32xf32>
      %935 = vector.broadcast %933 : vector<1x32xf32> to vector<16x32xf32>
      %936 = arith.mulf %934, %935 : vector<16x32xf32>
      %937 = arith.addf %923, %936 : vector<16x32xf32>
      %c5_268 = arith.constant 5 : index
      %c0_269 = arith.constant 0 : index
      %938 = vector.load %arg2[%c5_268, %c0_269] : memref<9x32xf32, #tpu.memory_space<vmem>>, vector<1x32xf32>
      %939 = vector.shape_cast %938 : vector<1x32xf32> to vector<32xf32>
      %940 = vector.extract_strided_slice %865 {offsets = [2, 1], sizes = [16, 1], strides = [1, 1]} : vector<18x4xf32> to vector<16x1xf32>
      %941 = vector.shape_cast %939 : vector<32xf32> to vector<1x32xf32>
      %942 = vector.broadcast %940 : vector<16x1xf32> to vector<16x32xf32>
      %943 = vector.broadcast %941 : vector<1x32xf32> to vector<16x32xf32>
      %944 = arith.mulf %942, %943 : vector<16x32xf32>
      %945 = arith.addf %931, %944 : vector<16x32xf32>
      %946 = vector.extract_strided_slice %865 {offsets = [2, 2], sizes = [16, 1], strides = [1, 1]} : vector<18x4xf32> to vector<16x1xf32>
      %947 = vector.shape_cast %939 : vector<32xf32> to vector<1x32xf32>
      %948 = vector.broadcast %946 : vector<16x1xf32> to vector<16x32xf32>
      %949 = vector.broadcast %947 : vector<1x32xf32> to vector<16x32xf32>
      %950 = arith.mulf %948, %949 : vector<16x32xf32>
      %951 = arith.addf %937, %950 : vector<16x32xf32>
      %c6_270 = arith.constant 6 : index
      %c0_271 = arith.constant 0 : index
      %952 = vector.load %arg2[%c6_270, %c0_271] : memref<9x32xf32, #tpu.memory_space<vmem>>, vector<1x32xf32>
      %953 = vector.shape_cast %952 : vector<1x32xf32> to vector<32xf32>
      %954 = vector.extract_strided_slice %865 {offsets = [0, 2], sizes = [16, 1], strides = [1, 1]} : vector<18x4xf32> to vector<16x1xf32>
      %955 = vector.shape_cast %953 : vector<32xf32> to vector<1x32xf32>
      %956 = vector.broadcast %954 : vector<16x1xf32> to vector<16x32xf32>
      %957 = vector.broadcast %955 : vector<1x32xf32> to vector<16x32xf32>
      %958 = arith.mulf %956, %957 : vector<16x32xf32>
      %959 = arith.addf %945, %958 : vector<16x32xf32>
      %960 = vector.extract_strided_slice %865 {offsets = [0, 3], sizes = [16, 1], strides = [1, 1]} : vector<18x4xf32> to vector<16x1xf32>
      %961 = vector.shape_cast %953 : vector<32xf32> to vector<1x32xf32>
      %962 = vector.broadcast %960 : vector<16x1xf32> to vector<16x32xf32>
      %963 = vector.broadcast %961 : vector<1x32xf32> to vector<16x32xf32>
      %964 = arith.mulf %962, %963 : vector<16x32xf32>
      %965 = arith.addf %951, %964 : vector<16x32xf32>
      %c7_272 = arith.constant 7 : index
      %c0_273 = arith.constant 0 : index
      %966 = vector.load %arg2[%c7_272, %c0_273] : memref<9x32xf32, #tpu.memory_space<vmem>>, vector<1x32xf32>
      %967 = vector.shape_cast %966 : vector<1x32xf32> to vector<32xf32>
      %968 = vector.extract_strided_slice %865 {offsets = [1, 2], sizes = [16, 1], strides = [1, 1]} : vector<18x4xf32> to vector<16x1xf32>
      %969 = vector.shape_cast %967 : vector<32xf32> to vector<1x32xf32>
      %970 = vector.broadcast %968 : vector<16x1xf32> to vector<16x32xf32>
      %971 = vector.broadcast %969 : vector<1x32xf32> to vector<16x32xf32>
      %972 = arith.mulf %970, %971 : vector<16x32xf32>
      %973 = arith.addf %959, %972 : vector<16x32xf32>
      %974 = vector.extract_strided_slice %865 {offsets = [1, 3], sizes = [16, 1], strides = [1, 1]} : vector<18x4xf32> to vector<16x1xf32>
      %975 = vector.shape_cast %967 : vector<32xf32> to vector<1x32xf32>
      %976 = vector.broadcast %974 : vector<16x1xf32> to vector<16x32xf32>
      %977 = vector.broadcast %975 : vector<1x32xf32> to vector<16x32xf32>
      %978 = arith.mulf %976, %977 : vector<16x32xf32>
      %979 = arith.addf %965, %978 : vector<16x32xf32>
      %c8_274 = arith.constant 8 : index
      %c0_275 = arith.constant 0 : index
      %980 = vector.load %arg2[%c8_274, %c0_275] : memref<9x32xf32, #tpu.memory_space<vmem>>, vector<1x32xf32>
      %981 = vector.shape_cast %980 : vector<1x32xf32> to vector<32xf32>
      %982 = vector.extract_strided_slice %865 {offsets = [2, 2], sizes = [16, 1], strides = [1, 1]} : vector<18x4xf32> to vector<16x1xf32>
      %983 = vector.shape_cast %981 : vector<32xf32> to vector<1x32xf32>
      %984 = vector.broadcast %982 : vector<16x1xf32> to vector<16x32xf32>
      %985 = vector.broadcast %983 : vector<1x32xf32> to vector<16x32xf32>
      %986 = arith.mulf %984, %985 : vector<16x32xf32>
      %987 = arith.addf %973, %986 : vector<16x32xf32>
      %988 = vector.extract_strided_slice %865 {offsets = [2, 3], sizes = [16, 1], strides = [1, 1]} : vector<18x4xf32> to vector<16x1xf32>
      %989 = vector.shape_cast %981 : vector<32xf32> to vector<1x32xf32>
      %990 = vector.broadcast %988 : vector<16x1xf32> to vector<16x32xf32>
      %991 = vector.broadcast %989 : vector<1x32xf32> to vector<16x32xf32>
      %992 = arith.mulf %990, %991 : vector<16x32xf32>
      %993 = arith.addf %979, %992 : vector<16x32xf32>
      %994 = arith.maximumf %987, %993 : vector<16x32xf32>
      %cst_276 = arith.constant 0.000000e+00 : f32
      %995 = vector.broadcast %cst_276 : f32 to vector<16x32xf32>
      %996 = arith.maximumf %994, %995 : vector<16x32xf32>
      %c0_277 = arith.constant 0 : index
      %c0_278 = arith.constant 0 : index
      %997 = vector.load %arg6[%c0_277, %c0_278] : memref<16x32xf32, #tpu.memory_space<vmem>>, vector<16x32xf32>
      tpu.vector_store %arg6[%c0_277, %c0_278], %996 {strides = array<i32>} : memref<16x32xf32, #tpu.memory_space<vmem>>, vector<16x32xf32>,
      %c0_279 = arith.constant 0 : index
      %c0_280 = arith.constant 0 : index
      %998 = tpu.strided_load %arg6[%c0_279, %c0_280] {strides = array<i32: 2, 1>} : memref<16x32xf32, #tpu.memory_space<vmem>>, vector<8x32xf32>
      %c1_281 = arith.constant 1 : index
      %c0_282 = arith.constant 0 : index
      %999 = tpu.strided_load %arg6[%c1_281, %c0_282] {strides = array<i32: 2, 1>} : memref<16x32xf32, #tpu.memory_space<vmem>>, vector<8x32xf32>
      %1000 = arith.maximumf %998, %999 : vector<8x32xf32>
      %cst_283 = arith.constant 0.000000e+00 : f32
      %1001 = vector.broadcast %cst_283 : f32 to vector<1x32xf32>
      %cst_284 = arith.constant 0.000000e+00 : f32
      %1002 = vector.broadcast %cst_284 : f32 to vector<1x32xf32>
      %1003 = tpu.concatenate %1001, %1000, %1002 in 0 : vector<1x32xf32>, vector<8x32xf32>, vector<1x32xf32> -> vector<10x32xf32>
      %c60_i32 = arith.constant 60 : i32
      %1004 = arith.addi %137, %c60_i32 : i32
      %1005 = arith.index_cast %1004 : i32 to index
      %c0_285 = arith.constant 0 : index
      %1006 = vector.load %arg7[%1005, %c0_285] : memref<200x32xf32, #tpu.memory_space<vmem>>, vector<10x32xf32>
      tpu.vector_store %arg7[%1005, %c0_285], %1003 {strides = array<i32>} : memref<200x32xf32, #tpu.memory_space<vmem>>, vector<10x32xf32>,
      %1007 = arith.index_cast %arg10 : i32 to index
      %c0_286 = arith.constant 0 : index
      %c12_287 = arith.constant 12 : index
      %1008 = vector.load %arg1[%1007, %c0_286, %c12_287] : memref<2x18x18xf32, #tpu.memory_space<vmem>>, vector<1x18x4xf32>
      %1009 = vector.shape_cast %1008 : vector<1x18x4xf32> to vector<18x4xf32>
      %cst_288 = arith.constant 0.000000e+00 : f32
      %1010 = vector.broadcast %cst_288 : f32 to vector<16x32xf32>
      %cst_289 = arith.constant 0.000000e+00 : f32
      %1011 = vector.broadcast %cst_289 : f32 to vector<16x32xf32>
      %c0_290 = arith.constant 0 : index
      %c0_291 = arith.constant 0 : index
      %1012 = vector.load %arg2[%c0_290, %c0_291] : memref<9x32xf32, #tpu.memory_space<vmem>>, vector<1x32xf32>
      %1013 = vector.shape_cast %1012 : vector<1x32xf32> to vector<32xf32>
      %1014 = vector.extract_strided_slice %1009 {offsets = [0, 0], sizes = [16, 1], strides = [1, 1]} : vector<18x4xf32> to vector<16x1xf32>
      %1015 = vector.shape_cast %1013 : vector<32xf32> to vector<1x32xf32>
      %1016 = vector.broadcast %1014 : vector<16x1xf32> to vector<16x32xf32>
      %1017 = vector.broadcast %1015 : vector<1x32xf32> to vector<16x32xf32>
      %1018 = arith.mulf %1016, %1017 : vector<16x32xf32>
      %1019 = arith.addf %1010, %1018 : vector<16x32xf32>
      %1020 = vector.extract_strided_slice %1009 {offsets = [0, 1], sizes = [16, 1], strides = [1, 1]} : vector<18x4xf32> to vector<16x1xf32>
      %1021 = vector.shape_cast %1013 : vector<32xf32> to vector<1x32xf32>
      %1022 = vector.broadcast %1020 : vector<16x1xf32> to vector<16x32xf32>
      %1023 = vector.broadcast %1021 : vector<1x32xf32> to vector<16x32xf32>
      %1024 = arith.mulf %1022, %1023 : vector<16x32xf32>
      %1025 = arith.addf %1011, %1024 : vector<16x32xf32>
      %c1_292 = arith.constant 1 : index
      %c0_293 = arith.constant 0 : index
      %1026 = vector.load %arg2[%c1_292, %c0_293] : memref<9x32xf32, #tpu.memory_space<vmem>>, vector<1x32xf32>
      %1027 = vector.shape_cast %1026 : vector<1x32xf32> to vector<32xf32>
      %1028 = vector.extract_strided_slice %1009 {offsets = [1, 0], sizes = [16, 1], strides = [1, 1]} : vector<18x4xf32> to vector<16x1xf32>
      %1029 = vector.shape_cast %1027 : vector<32xf32> to vector<1x32xf32>
      %1030 = vector.broadcast %1028 : vector<16x1xf32> to vector<16x32xf32>
      %1031 = vector.broadcast %1029 : vector<1x32xf32> to vector<16x32xf32>
      %1032 = arith.mulf %1030, %1031 : vector<16x32xf32>
      %1033 = arith.addf %1019, %1032 : vector<16x32xf32>
      %1034 = vector.extract_strided_slice %1009 {offsets = [1, 1], sizes = [16, 1], strides = [1, 1]} : vector<18x4xf32> to vector<16x1xf32>
      %1035 = vector.shape_cast %1027 : vector<32xf32> to vector<1x32xf32>
      %1036 = vector.broadcast %1034 : vector<16x1xf32> to vector<16x32xf32>
      %1037 = vector.broadcast %1035 : vector<1x32xf32> to vector<16x32xf32>
      %1038 = arith.mulf %1036, %1037 : vector<16x32xf32>
      %1039 = arith.addf %1025, %1038 : vector<16x32xf32>
      %c2_294 = arith.constant 2 : index
      %c0_295 = arith.constant 0 : index
      %1040 = vector.load %arg2[%c2_294, %c0_295] : memref<9x32xf32, #tpu.memory_space<vmem>>, vector<1x32xf32>
      %1041 = vector.shape_cast %1040 : vector<1x32xf32> to vector<32xf32>
      %1042 = vector.extract_strided_slice %1009 {offsets = [2, 0], sizes = [16, 1], strides = [1, 1]} : vector<18x4xf32> to vector<16x1xf32>
      %1043 = vector.shape_cast %1041 : vector<32xf32> to vector<1x32xf32>
      %1044 = vector.broadcast %1042 : vector<16x1xf32> to vector<16x32xf32>
      %1045 = vector.broadcast %1043 : vector<1x32xf32> to vector<16x32xf32>
      %1046 = arith.mulf %1044, %1045 : vector<16x32xf32>
      %1047 = arith.addf %1033, %1046 : vector<16x32xf32>
      %1048 = vector.extract_strided_slice %1009 {offsets = [2, 1], sizes = [16, 1], strides = [1, 1]} : vector<18x4xf32> to vector<16x1xf32>
      %1049 = vector.shape_cast %1041 : vector<32xf32> to vector<1x32xf32>
      %1050 = vector.broadcast %1048 : vector<16x1xf32> to vector<16x32xf32>
      %1051 = vector.broadcast %1049 : vector<1x32xf32> to vector<16x32xf32>
      %1052 = arith.mulf %1050, %1051 : vector<16x32xf32>
      %1053 = arith.addf %1039, %1052 : vector<16x32xf32>
      %c3_296 = arith.constant 3 : index
      %c0_297 = arith.constant 0 : index
      %1054 = vector.load %arg2[%c3_296, %c0_297] : memref<9x32xf32, #tpu.memory_space<vmem>>, vector<1x32xf32>
      %1055 = vector.shape_cast %1054 : vector<1x32xf32> to vector<32xf32>
      %1056 = vector.extract_strided_slice %1009 {offsets = [0, 1], sizes = [16, 1], strides = [1, 1]} : vector<18x4xf32> to vector<16x1xf32>
      %1057 = vector.shape_cast %1055 : vector<32xf32> to vector<1x32xf32>
      %1058 = vector.broadcast %1056 : vector<16x1xf32> to vector<16x32xf32>
      %1059 = vector.broadcast %1057 : vector<1x32xf32> to vector<16x32xf32>
      %1060 = arith.mulf %1058, %1059 : vector<16x32xf32>
      %1061 = arith.addf %1047, %1060 : vector<16x32xf32>
      %1062 = vector.extract_strided_slice %1009 {offsets = [0, 2], sizes = [16, 1], strides = [1, 1]} : vector<18x4xf32> to vector<16x1xf32>
      %1063 = vector.shape_cast %1055 : vector<32xf32> to vector<1x32xf32>
      %1064 = vector.broadcast %1062 : vector<16x1xf32> to vector<16x32xf32>
      %1065 = vector.broadcast %1063 : vector<1x32xf32> to vector<16x32xf32>
      %1066 = arith.mulf %1064, %1065 : vector<16x32xf32>
      %1067 = arith.addf %1053, %1066 : vector<16x32xf32>
      %c4_298 = arith.constant 4 : index
      %c0_299 = arith.constant 0 : index
      %1068 = vector.load %arg2[%c4_298, %c0_299] : memref<9x32xf32, #tpu.memory_space<vmem>>, vector<1x32xf32>
      %1069 = vector.shape_cast %1068 : vector<1x32xf32> to vector<32xf32>
      %1070 = vector.extract_strided_slice %1009 {offsets = [1, 1], sizes = [16, 1], strides = [1, 1]} : vector<18x4xf32> to vector<16x1xf32>
      %1071 = vector.shape_cast %1069 : vector<32xf32> to vector<1x32xf32>
      %1072 = vector.broadcast %1070 : vector<16x1xf32> to vector<16x32xf32>
      %1073 = vector.broadcast %1071 : vector<1x32xf32> to vector<16x32xf32>
      %1074 = arith.mulf %1072, %1073 : vector<16x32xf32>
      %1075 = arith.addf %1061, %1074 : vector<16x32xf32>
      %1076 = vector.extract_strided_slice %1009 {offsets = [1, 2], sizes = [16, 1], strides = [1, 1]} : vector<18x4xf32> to vector<16x1xf32>
      %1077 = vector.shape_cast %1069 : vector<32xf32> to vector<1x32xf32>
      %1078 = vector.broadcast %1076 : vector<16x1xf32> to vector<16x32xf32>
      %1079 = vector.broadcast %1077 : vector<1x32xf32> to vector<16x32xf32>
      %1080 = arith.mulf %1078, %1079 : vector<16x32xf32>
      %1081 = arith.addf %1067, %1080 : vector<16x32xf32>
      %c5_300 = arith.constant 5 : index
      %c0_301 = arith.constant 0 : index
      %1082 = vector.load %arg2[%c5_300, %c0_301] : memref<9x32xf32, #tpu.memory_space<vmem>>, vector<1x32xf32>
      %1083 = vector.shape_cast %1082 : vector<1x32xf32> to vector<32xf32>
      %1084 = vector.extract_strided_slice %1009 {offsets = [2, 1], sizes = [16, 1], strides = [1, 1]} : vector<18x4xf32> to vector<16x1xf32>
      %1085 = vector.shape_cast %1083 : vector<32xf32> to vector<1x32xf32>
      %1086 = vector.broadcast %1084 : vector<16x1xf32> to vector<16x32xf32>
      %1087 = vector.broadcast %1085 : vector<1x32xf32> to vector<16x32xf32>
      %1088 = arith.mulf %1086, %1087 : vector<16x32xf32>
      %1089 = arith.addf %1075, %1088 : vector<16x32xf32>
      %1090 = vector.extract_strided_slice %1009 {offsets = [2, 2], sizes = [16, 1], strides = [1, 1]} : vector<18x4xf32> to vector<16x1xf32>
      %1091 = vector.shape_cast %1083 : vector<32xf32> to vector<1x32xf32>
      %1092 = vector.broadcast %1090 : vector<16x1xf32> to vector<16x32xf32>
      %1093 = vector.broadcast %1091 : vector<1x32xf32> to vector<16x32xf32>
      %1094 = arith.mulf %1092, %1093 : vector<16x32xf32>
      %1095 = arith.addf %1081, %1094 : vector<16x32xf32>
      %c6_302 = arith.constant 6 : index
      %c0_303 = arith.constant 0 : index
      %1096 = vector.load %arg2[%c6_302, %c0_303] : memref<9x32xf32, #tpu.memory_space<vmem>>, vector<1x32xf32>
      %1097 = vector.shape_cast %1096 : vector<1x32xf32> to vector<32xf32>
      %1098 = vector.extract_strided_slice %1009 {offsets = [0, 2], sizes = [16, 1], strides = [1, 1]} : vector<18x4xf32> to vector<16x1xf32>
      %1099 = vector.shape_cast %1097 : vector<32xf32> to vector<1x32xf32>
      %1100 = vector.broadcast %1098 : vector<16x1xf32> to vector<16x32xf32>
      %1101 = vector.broadcast %1099 : vector<1x32xf32> to vector<16x32xf32>
      %1102 = arith.mulf %1100, %1101 : vector<16x32xf32>
      %1103 = arith.addf %1089, %1102 : vector<16x32xf32>
      %1104 = vector.extract_strided_slice %1009 {offsets = [0, 3], sizes = [16, 1], strides = [1, 1]} : vector<18x4xf32> to vector<16x1xf32>
      %1105 = vector.shape_cast %1097 : vector<32xf32> to vector<1x32xf32>
      %1106 = vector.broadcast %1104 : vector<16x1xf32> to vector<16x32xf32>
      %1107 = vector.broadcast %1105 : vector<1x32xf32> to vector<16x32xf32>
      %1108 = arith.mulf %1106, %1107 : vector<16x32xf32>
      %1109 = arith.addf %1095, %1108 : vector<16x32xf32>
      %c7_304 = arith.constant 7 : index
      %c0_305 = arith.constant 0 : index
      %1110 = vector.load %arg2[%c7_304, %c0_305] : memref<9x32xf32, #tpu.memory_space<vmem>>, vector<1x32xf32>
      %1111 = vector.shape_cast %1110 : vector<1x32xf32> to vector<32xf32>
      %1112 = vector.extract_strided_slice %1009 {offsets = [1, 2], sizes = [16, 1], strides = [1, 1]} : vector<18x4xf32> to vector<16x1xf32>
      %1113 = vector.shape_cast %1111 : vector<32xf32> to vector<1x32xf32>
      %1114 = vector.broadcast %1112 : vector<16x1xf32> to vector<16x32xf32>
      %1115 = vector.broadcast %1113 : vector<1x32xf32> to vector<16x32xf32>
      %1116 = arith.mulf %1114, %1115 : vector<16x32xf32>
      %1117 = arith.addf %1103, %1116 : vector<16x32xf32>
      %1118 = vector.extract_strided_slice %1009 {offsets = [1, 3], sizes = [16, 1], strides = [1, 1]} : vector<18x4xf32> to vector<16x1xf32>
      %1119 = vector.shape_cast %1111 : vector<32xf32> to vector<1x32xf32>
      %1120 = vector.broadcast %1118 : vector<16x1xf32> to vector<16x32xf32>
      %1121 = vector.broadcast %1119 : vector<1x32xf32> to vector<16x32xf32>
      %1122 = arith.mulf %1120, %1121 : vector<16x32xf32>
      %1123 = arith.addf %1109, %1122 : vector<16x32xf32>
      %c8_306 = arith.constant 8 : index
      %c0_307 = arith.constant 0 : index
      %1124 = vector.load %arg2[%c8_306, %c0_307] : memref<9x32xf32, #tpu.memory_space<vmem>>, vector<1x32xf32>
      %1125 = vector.shape_cast %1124 : vector<1x32xf32> to vector<32xf32>
      %1126 = vector.extract_strided_slice %1009 {offsets = [2, 2], sizes = [16, 1], strides = [1, 1]} : vector<18x4xf32> to vector<16x1xf32>
      %1127 = vector.shape_cast %1125 : vector<32xf32> to vector<1x32xf32>
      %1128 = vector.broadcast %1126 : vector<16x1xf32> to vector<16x32xf32>
      %1129 = vector.broadcast %1127 : vector<1x32xf32> to vector<16x32xf32>
      %1130 = arith.mulf %1128, %1129 : vector<16x32xf32>
      %1131 = arith.addf %1117, %1130 : vector<16x32xf32>
      %1132 = vector.extract_strided_slice %1009 {offsets = [2, 3], sizes = [16, 1], strides = [1, 1]} : vector<18x4xf32> to vector<16x1xf32>
      %1133 = vector.shape_cast %1125 : vector<32xf32> to vector<1x32xf32>
      %1134 = vector.broadcast %1132 : vector<16x1xf32> to vector<16x32xf32>
      %1135 = vector.broadcast %1133 : vector<1x32xf32> to vector<16x32xf32>
      %1136 = arith.mulf %1134, %1135 : vector<16x32xf32>
      %1137 = arith.addf %1123, %1136 : vector<16x32xf32>
      %1138 = arith.maximumf %1131, %1137 : vector<16x32xf32>
      %cst_308 = arith.constant 0.000000e+00 : f32
      %1139 = vector.broadcast %cst_308 : f32 to vector<16x32xf32>
      %1140 = arith.maximumf %1138, %1139 : vector<16x32xf32>
      %c0_309 = arith.constant 0 : index
      %c0_310 = arith.constant 0 : index
      %1141 = vector.load %arg6[%c0_309, %c0_310] : memref<16x32xf32, #tpu.memory_space<vmem>>, vector<16x32xf32>
      tpu.vector_store %arg6[%c0_309, %c0_310], %1140 {strides = array<i32>} : memref<16x32xf32, #tpu.memory_space<vmem>>, vector<16x32xf32>,
      %c0_311 = arith.constant 0 : index
      %c0_312 = arith.constant 0 : index
      %1142 = tpu.strided_load %arg6[%c0_311, %c0_312] {strides = array<i32: 2, 1>} : memref<16x32xf32, #tpu.memory_space<vmem>>, vector<8x32xf32>
      %c1_313 = arith.constant 1 : index
      %c0_314 = arith.constant 0 : index
      %1143 = tpu.strided_load %arg6[%c1_313, %c0_314] {strides = array<i32: 2, 1>} : memref<16x32xf32, #tpu.memory_space<vmem>>, vector<8x32xf32>
      %1144 = arith.maximumf %1142, %1143 : vector<8x32xf32>
      %cst_315 = arith.constant 0.000000e+00 : f32
      %1145 = vector.broadcast %cst_315 : f32 to vector<1x32xf32>
      %cst_316 = arith.constant 0.000000e+00 : f32
      %1146 = vector.broadcast %cst_316 : f32 to vector<1x32xf32>
      %1147 = tpu.concatenate %1145, %1144, %1146 in 0 : vector<1x32xf32>, vector<8x32xf32>, vector<1x32xf32> -> vector<10x32xf32>
      %c70_i32 = arith.constant 70 : i32
      %1148 = arith.addi %137, %c70_i32 : i32
      %1149 = arith.index_cast %1148 : i32 to index
      %c0_317 = arith.constant 0 : index
      %1150 = vector.load %arg7[%1149, %c0_317] : memref<200x32xf32, #tpu.memory_space<vmem>>, vector<10x32xf32>
      tpu.vector_store %arg7[%1149, %c0_317], %1147 {strides = array<i32>} : memref<200x32xf32, #tpu.memory_space<vmem>>, vector<10x32xf32>,
      %1151 = arith.index_cast %arg10 : i32 to index
      %c0_318 = arith.constant 0 : index
      %c14_319 = arith.constant 14 : index
      %1152 = vector.load %arg1[%1151, %c0_318, %c14_319] : memref<2x18x18xf32, #tpu.memory_space<vmem>>, vector<1x18x4xf32>
      %1153 = vector.shape_cast %1152 : vector<1x18x4xf32> to vector<18x4xf32>
      %cst_320 = arith.constant 0.000000e+00 : f32
      %1154 = vector.broadcast %cst_320 : f32 to vector<16x32xf32>
      %cst_321 = arith.constant 0.000000e+00 : f32
      %1155 = vector.broadcast %cst_321 : f32 to vector<16x32xf32>
      %c0_322 = arith.constant 0 : index
      %c0_323 = arith.constant 0 : index
      %1156 = vector.load %arg2[%c0_322, %c0_323] : memref<9x32xf32, #tpu.memory_space<vmem>>, vector<1x32xf32>
      %1157 = vector.shape_cast %1156 : vector<1x32xf32> to vector<32xf32>
      %1158 = vector.extract_strided_slice %1153 {offsets = [0, 0], sizes = [16, 1], strides = [1, 1]} : vector<18x4xf32> to vector<16x1xf32>
      %1159 = vector.shape_cast %1157 : vector<32xf32> to vector<1x32xf32>
      %1160 = vector.broadcast %1158 : vector<16x1xf32> to vector<16x32xf32>
      %1161 = vector.broadcast %1159 : vector<1x32xf32> to vector<16x32xf32>
      %1162 = arith.mulf %1160, %1161 : vector<16x32xf32>
      %1163 = arith.addf %1154, %1162 : vector<16x32xf32>
      %1164 = vector.extract_strided_slice %1153 {offsets = [0, 1], sizes = [16, 1], strides = [1, 1]} : vector<18x4xf32> to vector<16x1xf32>
      %1165 = vector.shape_cast %1157 : vector<32xf32> to vector<1x32xf32>
      %1166 = vector.broadcast %1164 : vector<16x1xf32> to vector<16x32xf32>
      %1167 = vector.broadcast %1165 : vector<1x32xf32> to vector<16x32xf32>
      %1168 = arith.mulf %1166, %1167 : vector<16x32xf32>
      %1169 = arith.addf %1155, %1168 : vector<16x32xf32>
      %c1_324 = arith.constant 1 : index
      %c0_325 = arith.constant 0 : index
      %1170 = vector.load %arg2[%c1_324, %c0_325] : memref<9x32xf32, #tpu.memory_space<vmem>>, vector<1x32xf32>
      %1171 = vector.shape_cast %1170 : vector<1x32xf32> to vector<32xf32>
      %1172 = vector.extract_strided_slice %1153 {offsets = [1, 0], sizes = [16, 1], strides = [1, 1]} : vector<18x4xf32> to vector<16x1xf32>
      %1173 = vector.shape_cast %1171 : vector<32xf32> to vector<1x32xf32>
      %1174 = vector.broadcast %1172 : vector<16x1xf32> to vector<16x32xf32>
      %1175 = vector.broadcast %1173 : vector<1x32xf32> to vector<16x32xf32>
      %1176 = arith.mulf %1174, %1175 : vector<16x32xf32>
      %1177 = arith.addf %1163, %1176 : vector<16x32xf32>
      %1178 = vector.extract_strided_slice %1153 {offsets = [1, 1], sizes = [16, 1], strides = [1, 1]} : vector<18x4xf32> to vector<16x1xf32>
      %1179 = vector.shape_cast %1171 : vector<32xf32> to vector<1x32xf32>
      %1180 = vector.broadcast %1178 : vector<16x1xf32> to vector<16x32xf32>
      %1181 = vector.broadcast %1179 : vector<1x32xf32> to vector<16x32xf32>
      %1182 = arith.mulf %1180, %1181 : vector<16x32xf32>
      %1183 = arith.addf %1169, %1182 : vector<16x32xf32>
      %c2_326 = arith.constant 2 : index
      %c0_327 = arith.constant 0 : index
      %1184 = vector.load %arg2[%c2_326, %c0_327] : memref<9x32xf32, #tpu.memory_space<vmem>>, vector<1x32xf32>
      %1185 = vector.shape_cast %1184 : vector<1x32xf32> to vector<32xf32>
      %1186 = vector.extract_strided_slice %1153 {offsets = [2, 0], sizes = [16, 1], strides = [1, 1]} : vector<18x4xf32> to vector<16x1xf32>
      %1187 = vector.shape_cast %1185 : vector<32xf32> to vector<1x32xf32>
      %1188 = vector.broadcast %1186 : vector<16x1xf32> to vector<16x32xf32>
      %1189 = vector.broadcast %1187 : vector<1x32xf32> to vector<16x32xf32>
      %1190 = arith.mulf %1188, %1189 : vector<16x32xf32>
      %1191 = arith.addf %1177, %1190 : vector<16x32xf32>
      %1192 = vector.extract_strided_slice %1153 {offsets = [2, 1], sizes = [16, 1], strides = [1, 1]} : vector<18x4xf32> to vector<16x1xf32>
      %1193 = vector.shape_cast %1185 : vector<32xf32> to vector<1x32xf32>
      %1194 = vector.broadcast %1192 : vector<16x1xf32> to vector<16x32xf32>
      %1195 = vector.broadcast %1193 : vector<1x32xf32> to vector<16x32xf32>
      %1196 = arith.mulf %1194, %1195 : vector<16x32xf32>
      %1197 = arith.addf %1183, %1196 : vector<16x32xf32>
      %c3_328 = arith.constant 3 : index
      %c0_329 = arith.constant 0 : index
      %1198 = vector.load %arg2[%c3_328, %c0_329] : memref<9x32xf32, #tpu.memory_space<vmem>>, vector<1x32xf32>
      %1199 = vector.shape_cast %1198 : vector<1x32xf32> to vector<32xf32>
      %1200 = vector.extract_strided_slice %1153 {offsets = [0, 1], sizes = [16, 1], strides = [1, 1]} : vector<18x4xf32> to vector<16x1xf32>
      %1201 = vector.shape_cast %1199 : vector<32xf32> to vector<1x32xf32>
      %1202 = vector.broadcast %1200 : vector<16x1xf32> to vector<16x32xf32>
      %1203 = vector.broadcast %1201 : vector<1x32xf32> to vector<16x32xf32>
      %1204 = arith.mulf %1202, %1203 : vector<16x32xf32>
      %1205 = arith.addf %1191, %1204 : vector<16x32xf32>
      %1206 = vector.extract_strided_slice %1153 {offsets = [0, 2], sizes = [16, 1], strides = [1, 1]} : vector<18x4xf32> to vector<16x1xf32>
      %1207 = vector.shape_cast %1199 : vector<32xf32> to vector<1x32xf32>
      %1208 = vector.broadcast %1206 : vector<16x1xf32> to vector<16x32xf32>
      %1209 = vector.broadcast %1207 : vector<1x32xf32> to vector<16x32xf32>
      %1210 = arith.mulf %1208, %1209 : vector<16x32xf32>
      %1211 = arith.addf %1197, %1210 : vector<16x32xf32>
      %c4_330 = arith.constant 4 : index
      %c0_331 = arith.constant 0 : index
      %1212 = vector.load %arg2[%c4_330, %c0_331] : memref<9x32xf32, #tpu.memory_space<vmem>>, vector<1x32xf32>
      %1213 = vector.shape_cast %1212 : vector<1x32xf32> to vector<32xf32>
      %1214 = vector.extract_strided_slice %1153 {offsets = [1, 1], sizes = [16, 1], strides = [1, 1]} : vector<18x4xf32> to vector<16x1xf32>
      %1215 = vector.shape_cast %1213 : vector<32xf32> to vector<1x32xf32>
      %1216 = vector.broadcast %1214 : vector<16x1xf32> to vector<16x32xf32>
      %1217 = vector.broadcast %1215 : vector<1x32xf32> to vector<16x32xf32>
      %1218 = arith.mulf %1216, %1217 : vector<16x32xf32>
      %1219 = arith.addf %1205, %1218 : vector<16x32xf32>
      %1220 = vector.extract_strided_slice %1153 {offsets = [1, 2], sizes = [16, 1], strides = [1, 1]} : vector<18x4xf32> to vector<16x1xf32>
      %1221 = vector.shape_cast %1213 : vector<32xf32> to vector<1x32xf32>
      %1222 = vector.broadcast %1220 : vector<16x1xf32> to vector<16x32xf32>
      %1223 = vector.broadcast %1221 : vector<1x32xf32> to vector<16x32xf32>
      %1224 = arith.mulf %1222, %1223 : vector<16x32xf32>
      %1225 = arith.addf %1211, %1224 : vector<16x32xf32>
      %c5_332 = arith.constant 5 : index
      %c0_333 = arith.constant 0 : index
      %1226 = vector.load %arg2[%c5_332, %c0_333] : memref<9x32xf32, #tpu.memory_space<vmem>>, vector<1x32xf32>
      %1227 = vector.shape_cast %1226 : vector<1x32xf32> to vector<32xf32>
      %1228 = vector.extract_strided_slice %1153 {offsets = [2, 1], sizes = [16, 1], strides = [1, 1]} : vector<18x4xf32> to vector<16x1xf32>
      %1229 = vector.shape_cast %1227 : vector<32xf32> to vector<1x32xf32>
      %1230 = vector.broadcast %1228 : vector<16x1xf32> to vector<16x32xf32>
      %1231 = vector.broadcast %1229 : vector<1x32xf32> to vector<16x32xf32>
      %1232 = arith.mulf %1230, %1231 : vector<16x32xf32>
      %1233 = arith.addf %1219, %1232 : vector<16x32xf32>
      %1234 = vector.extract_strided_slice %1153 {offsets = [2, 2], sizes = [16, 1], strides = [1, 1]} : vector<18x4xf32> to vector<16x1xf32>
      %1235 = vector.shape_cast %1227 : vector<32xf32> to vector<1x32xf32>
      %1236 = vector.broadcast %1234 : vector<16x1xf32> to vector<16x32xf32>
      %1237 = vector.broadcast %1235 : vector<1x32xf32> to vector<16x32xf32>
      %1238 = arith.mulf %1236, %1237 : vector<16x32xf32>
      %1239 = arith.addf %1225, %1238 : vector<16x32xf32>
      %c6_334 = arith.constant 6 : index
      %c0_335 = arith.constant 0 : index
      %1240 = vector.load %arg2[%c6_334, %c0_335] : memref<9x32xf32, #tpu.memory_space<vmem>>, vector<1x32xf32>
      %1241 = vector.shape_cast %1240 : vector<1x32xf32> to vector<32xf32>
      %1242 = vector.extract_strided_slice %1153 {offsets = [0, 2], sizes = [16, 1], strides = [1, 1]} : vector<18x4xf32> to vector<16x1xf32>
      %1243 = vector.shape_cast %1241 : vector<32xf32> to vector<1x32xf32>
      %1244 = vector.broadcast %1242 : vector<16x1xf32> to vector<16x32xf32>
      %1245 = vector.broadcast %1243 : vector<1x32xf32> to vector<16x32xf32>
      %1246 = arith.mulf %1244, %1245 : vector<16x32xf32>
      %1247 = arith.addf %1233, %1246 : vector<16x32xf32>
      %1248 = vector.extract_strided_slice %1153 {offsets = [0, 3], sizes = [16, 1], strides = [1, 1]} : vector<18x4xf32> to vector<16x1xf32>
      %1249 = vector.shape_cast %1241 : vector<32xf32> to vector<1x32xf32>
      %1250 = vector.broadcast %1248 : vector<16x1xf32> to vector<16x32xf32>
      %1251 = vector.broadcast %1249 : vector<1x32xf32> to vector<16x32xf32>
      %1252 = arith.mulf %1250, %1251 : vector<16x32xf32>
      %1253 = arith.addf %1239, %1252 : vector<16x32xf32>
      %c7_336 = arith.constant 7 : index
      %c0_337 = arith.constant 0 : index
      %1254 = vector.load %arg2[%c7_336, %c0_337] : memref<9x32xf32, #tpu.memory_space<vmem>>, vector<1x32xf32>
      %1255 = vector.shape_cast %1254 : vector<1x32xf32> to vector<32xf32>
      %1256 = vector.extract_strided_slice %1153 {offsets = [1, 2], sizes = [16, 1], strides = [1, 1]} : vector<18x4xf32> to vector<16x1xf32>
      %1257 = vector.shape_cast %1255 : vector<32xf32> to vector<1x32xf32>
      %1258 = vector.broadcast %1256 : vector<16x1xf32> to vector<16x32xf32>
      %1259 = vector.broadcast %1257 : vector<1x32xf32> to vector<16x32xf32>
      %1260 = arith.mulf %1258, %1259 : vector<16x32xf32>
      %1261 = arith.addf %1247, %1260 : vector<16x32xf32>
      %1262 = vector.extract_strided_slice %1153 {offsets = [1, 3], sizes = [16, 1], strides = [1, 1]} : vector<18x4xf32> to vector<16x1xf32>
      %1263 = vector.shape_cast %1255 : vector<32xf32> to vector<1x32xf32>
      %1264 = vector.broadcast %1262 : vector<16x1xf32> to vector<16x32xf32>
      %1265 = vector.broadcast %1263 : vector<1x32xf32> to vector<16x32xf32>
      %1266 = arith.mulf %1264, %1265 : vector<16x32xf32>
      %1267 = arith.addf %1253, %1266 : vector<16x32xf32>
      %c8_338 = arith.constant 8 : index
      %c0_339 = arith.constant 0 : index
      %1268 = vector.load %arg2[%c8_338, %c0_339] : memref<9x32xf32, #tpu.memory_space<vmem>>, vector<1x32xf32>
      %1269 = vector.shape_cast %1268 : vector<1x32xf32> to vector<32xf32>
      %1270 = vector.extract_strided_slice %1153 {offsets = [2, 2], sizes = [16, 1], strides = [1, 1]} : vector<18x4xf32> to vector<16x1xf32>
      %1271 = vector.shape_cast %1269 : vector<32xf32> to vector<1x32xf32>
      %1272 = vector.broadcast %1270 : vector<16x1xf32> to vector<16x32xf32>
      %1273 = vector.broadcast %1271 : vector<1x32xf32> to vector<16x32xf32>
      %1274 = arith.mulf %1272, %1273 : vector<16x32xf32>
      %1275 = arith.addf %1261, %1274 : vector<16x32xf32>
      %1276 = vector.extract_strided_slice %1153 {offsets = [2, 3], sizes = [16, 1], strides = [1, 1]} : vector<18x4xf32> to vector<16x1xf32>
      %1277 = vector.shape_cast %1269 : vector<32xf32> to vector<1x32xf32>
      %1278 = vector.broadcast %1276 : vector<16x1xf32> to vector<16x32xf32>
      %1279 = vector.broadcast %1277 : vector<1x32xf32> to vector<16x32xf32>
      %1280 = arith.mulf %1278, %1279 : vector<16x32xf32>
      %1281 = arith.addf %1267, %1280 : vector<16x32xf32>
      %1282 = arith.maximumf %1275, %1281 : vector<16x32xf32>
      %cst_340 = arith.constant 0.000000e+00 : f32
      %1283 = vector.broadcast %cst_340 : f32 to vector<16x32xf32>
      %1284 = arith.maximumf %1282, %1283 : vector<16x32xf32>
      %c0_341 = arith.constant 0 : index
      %c0_342 = arith.constant 0 : index
      %1285 = vector.load %arg6[%c0_341, %c0_342] : memref<16x32xf32, #tpu.memory_space<vmem>>, vector<16x32xf32>
      tpu.vector_store %arg6[%c0_341, %c0_342], %1284 {strides = array<i32>} : memref<16x32xf32, #tpu.memory_space<vmem>>, vector<16x32xf32>,
      %c0_343 = arith.constant 0 : index
      %c0_344 = arith.constant 0 : index
      %1286 = tpu.strided_load %arg6[%c0_343, %c0_344] {strides = array<i32: 2, 1>} : memref<16x32xf32, #tpu.memory_space<vmem>>, vector<8x32xf32>
      %c1_345 = arith.constant 1 : index
      %c0_346 = arith.constant 0 : index
      %1287 = tpu.strided_load %arg6[%c1_345, %c0_346] {strides = array<i32: 2, 1>} : memref<16x32xf32, #tpu.memory_space<vmem>>, vector<8x32xf32>
      %1288 = arith.maximumf %1286, %1287 : vector<8x32xf32>
      %cst_347 = arith.constant 0.000000e+00 : f32
      %1289 = vector.broadcast %cst_347 : f32 to vector<1x32xf32>
      %cst_348 = arith.constant 0.000000e+00 : f32
      %1290 = vector.broadcast %cst_348 : f32 to vector<1x32xf32>
      %1291 = tpu.concatenate %1289, %1288, %1290 in 0 : vector<1x32xf32>, vector<8x32xf32>, vector<1x32xf32> -> vector<10x32xf32>
      %c80_i32 = arith.constant 80 : i32
      %1292 = arith.addi %137, %c80_i32 : i32
      %1293 = arith.index_cast %1292 : i32 to index
      %c0_349 = arith.constant 0 : index
      %1294 = vector.load %arg7[%1293, %c0_349] : memref<200x32xf32, #tpu.memory_space<vmem>>, vector<10x32xf32>
      tpu.vector_store %arg7[%1293, %c0_349], %1291 {strides = array<i32>} : memref<200x32xf32, #tpu.memory_space<vmem>>, vector<10x32xf32>,
    }
    %c2_i32_1 = arith.constant 2 : i32
    %cst_2 = arith.constant 0.000000e+00 : f32
    %3 = vector.broadcast %cst_2 : f32 to vector<178x64xf32>
    %c0 = arith.constant 0 : index
    %c0_3 = arith.constant 0 : index
    %4 = vector.load %arg7[%c0, %c0_3] : memref<200x32xf32, #tpu.memory_space<vmem>>, vector<178x32xf32>
    %5 = arith.truncf %4 : vector<178x32xf32> to vector<178x32xbf16>
    %c0_4 = arith.constant 0 : index
    %c0_5 = arith.constant 0 : index
    %c0_6 = arith.constant 0 : index
    %6 = vector.load %arg3[%c0_4, %c0_5, %c0_6] : memref<9x32x64xbf16, #tpu.memory_space<vmem>>, vector<1x32x64xbf16>
    %7 = vector.shape_cast %6 : vector<1x32x64xbf16> to vector<32x64xbf16>
    %cst_7 = arith.constant dense<0.000000e+00> : vector<178x64xf32>
    %8 = tpu.matmul %5, %7, %cst_7 {dimension_numbers = #tpu.dot_dimension_numbers<[1], [0], [0], [1], [0, 0, 1, 1], [], []>} : vector<178x32xbf16>, vector<32x64xbf16>, vector<178x64xf32> -> vector<178x64xf32>
    %9 = arith.addf %3, %8 : vector<178x64xf32>
    %c1 = arith.constant 1 : index
    %c0_8 = arith.constant 0 : index
    %10 = vector.load %arg7[%c1, %c0_8] : memref<200x32xf32, #tpu.memory_space<vmem>>, vector<178x32xf32>
    %11 = arith.truncf %10 : vector<178x32xf32> to vector<178x32xbf16>
    %c1_9 = arith.constant 1 : index
    %c0_10 = arith.constant 0 : index
    %c0_11 = arith.constant 0 : index
    %12 = vector.load %arg3[%c1_9, %c0_10, %c0_11] : memref<9x32x64xbf16, #tpu.memory_space<vmem>>, vector<1x32x64xbf16>
    %13 = vector.shape_cast %12 : vector<1x32x64xbf16> to vector<32x64xbf16>
    %cst_12 = arith.constant dense<0.000000e+00> : vector<178x64xf32>
    %14 = tpu.matmul %11, %13, %cst_12 {dimension_numbers = #tpu.dot_dimension_numbers<[1], [0], [0], [1], [0, 0, 1, 1], [], []>} : vector<178x32xbf16>, vector<32x64xbf16>, vector<178x64xf32> -> vector<178x64xf32>
    %15 = arith.addf %9, %14 : vector<178x64xf32>
    %c2 = arith.constant 2 : index
    %c0_13 = arith.constant 0 : index
    %16 = vector.load %arg7[%c2, %c0_13] : memref<200x32xf32, #tpu.memory_space<vmem>>, vector<178x32xf32>
    %17 = arith.truncf %16 : vector<178x32xf32> to vector<178x32xbf16>
    %c2_14 = arith.constant 2 : index
    %c0_15 = arith.constant 0 : index
    %c0_16 = arith.constant 0 : index
    %18 = vector.load %arg3[%c2_14, %c0_15, %c0_16] : memref<9x32x64xbf16, #tpu.memory_space<vmem>>, vector<1x32x64xbf16>
    %19 = vector.shape_cast %18 : vector<1x32x64xbf16> to vector<32x64xbf16>
    %cst_17 = arith.constant dense<0.000000e+00> : vector<178x64xf32>
    %20 = tpu.matmul %17, %19, %cst_17 {dimension_numbers = #tpu.dot_dimension_numbers<[1], [0], [0], [1], [0, 0, 1, 1], [], []>} : vector<178x32xbf16>, vector<32x64xbf16>, vector<178x64xf32> -> vector<178x64xf32>
    %21 = arith.addf %15, %20 : vector<178x64xf32>
    %c10 = arith.constant 10 : index
    %c0_18 = arith.constant 0 : index
    %22 = vector.load %arg7[%c10, %c0_18] : memref<200x32xf32, #tpu.memory_space<vmem>>, vector<178x32xf32>
    %23 = arith.truncf %22 : vector<178x32xf32> to vector<178x32xbf16>
    %c3 = arith.constant 3 : index
    %c0_19 = arith.constant 0 : index
    %c0_20 = arith.constant 0 : index
    %24 = vector.load %arg3[%c3, %c0_19, %c0_20] : memref<9x32x64xbf16, #tpu.memory_space<vmem>>, vector<1x32x64xbf16>
    %25 = vector.shape_cast %24 : vector<1x32x64xbf16> to vector<32x64xbf16>
    %cst_21 = arith.constant dense<0.000000e+00> : vector<178x64xf32>
    %26 = tpu.matmul %23, %25, %cst_21 {dimension_numbers = #tpu.dot_dimension_numbers<[1], [0], [0], [1], [0, 0, 1, 1], [], []>} : vector<178x32xbf16>, vector<32x64xbf16>, vector<178x64xf32> -> vector<178x64xf32>
    %27 = arith.addf %21, %26 : vector<178x64xf32>
    %c11 = arith.constant 11 : index
    %c0_22 = arith.constant 0 : index
    %28 = vector.load %arg7[%c11, %c0_22] : memref<200x32xf32, #tpu.memory_space<vmem>>, vector<178x32xf32>
    %29 = arith.truncf %28 : vector<178x32xf32> to vector<178x32xbf16>
    %c4 = arith.constant 4 : index
    %c0_23 = arith.constant 0 : index
    %c0_24 = arith.constant 0 : index
    %30 = vector.load %arg3[%c4, %c0_23, %c0_24] : memref<9x32x64xbf16, #tpu.memory_space<vmem>>, vector<1x32x64xbf16>
    %31 = vector.shape_cast %30 : vector<1x32x64xbf16> to vector<32x64xbf16>
    %cst_25 = arith.constant dense<0.000000e+00> : vector<178x64xf32>
    %32 = tpu.matmul %29, %31, %cst_25 {dimension_numbers = #tpu.dot_dimension_numbers<[1], [0], [0], [1], [0, 0, 1, 1], [], []>} : vector<178x32xbf16>, vector<32x64xbf16>, vector<178x64xf32> -> vector<178x64xf32>
    %33 = arith.addf %27, %32 : vector<178x64xf32>
    %c12 = arith.constant 12 : index
    %c0_26 = arith.constant 0 : index
    %34 = vector.load %arg7[%c12, %c0_26] : memref<200x32xf32, #tpu.memory_space<vmem>>, vector<178x32xf32>
    %35 = arith.truncf %34 : vector<178x32xf32> to vector<178x32xbf16>
    %c5 = arith.constant 5 : index
    %c0_27 = arith.constant 0 : index
    %c0_28 = arith.constant 0 : index
    %36 = vector.load %arg3[%c5, %c0_27, %c0_28] : memref<9x32x64xbf16, #tpu.memory_space<vmem>>, vector<1x32x64xbf16>
    %37 = vector.shape_cast %36 : vector<1x32x64xbf16> to vector<32x64xbf16>
    %cst_29 = arith.constant dense<0.000000e+00> : vector<178x64xf32>
    %38 = tpu.matmul %35, %37, %cst_29 {dimension_numbers = #tpu.dot_dimension_numbers<[1], [0], [0], [1], [0, 0, 1, 1], [], []>} : vector<178x32xbf16>, vector<32x64xbf16>, vector<178x64xf32> -> vector<178x64xf32>
    %39 = arith.addf %33, %38 : vector<178x64xf32>
    %c20 = arith.constant 20 : index
    %c0_30 = arith.constant 0 : index
    %40 = vector.load %arg7[%c20, %c0_30] : memref<200x32xf32, #tpu.memory_space<vmem>>, vector<178x32xf32>
    %41 = arith.truncf %40 : vector<178x32xf32> to vector<178x32xbf16>
    %c6 = arith.constant 6 : index
    %c0_31 = arith.constant 0 : index
    %c0_32 = arith.constant 0 : index
    %42 = vector.load %arg3[%c6, %c0_31, %c0_32] : memref<9x32x64xbf16, #tpu.memory_space<vmem>>, vector<1x32x64xbf16>
    %43 = vector.shape_cast %42 : vector<1x32x64xbf16> to vector<32x64xbf16>
    %cst_33 = arith.constant dense<0.000000e+00> : vector<178x64xf32>
    %44 = tpu.matmul %41, %43, %cst_33 {dimension_numbers = #tpu.dot_dimension_numbers<[1], [0], [0], [1], [0, 0, 1, 1], [], []>} : vector<178x32xbf16>, vector<32x64xbf16>, vector<178x64xf32> -> vector<178x64xf32>
    %45 = arith.addf %39, %44 : vector<178x64xf32>
    %c21 = arith.constant 21 : index
    %c0_34 = arith.constant 0 : index
    %46 = vector.load %arg7[%c21, %c0_34] : memref<200x32xf32, #tpu.memory_space<vmem>>, vector<178x32xf32>
    %47 = arith.truncf %46 : vector<178x32xf32> to vector<178x32xbf16>
    %c7 = arith.constant 7 : index
    %c0_35 = arith.constant 0 : index
    %c0_36 = arith.constant 0 : index
    %48 = vector.load %arg3[%c7, %c0_35, %c0_36] : memref<9x32x64xbf16, #tpu.memory_space<vmem>>, vector<1x32x64xbf16>
    %49 = vector.shape_cast %48 : vector<1x32x64xbf16> to vector<32x64xbf16>
    %cst_37 = arith.constant dense<0.000000e+00> : vector<178x64xf32>
    %50 = tpu.matmul %47, %49, %cst_37 {dimension_numbers = #tpu.dot_dimension_numbers<[1], [0], [0], [1], [0, 0, 1, 1], [], []>} : vector<178x32xbf16>, vector<32x64xbf16>, vector<178x64xf32> -> vector<178x64xf32>
    %51 = arith.addf %45, %50 : vector<178x64xf32>
    %c22 = arith.constant 22 : index
    %c0_38 = arith.constant 0 : index
    %52 = vector.load %arg7[%c22, %c0_38] : memref<200x32xf32, #tpu.memory_space<vmem>>, vector<178x32xf32>
    %53 = arith.truncf %52 : vector<178x32xf32> to vector<178x32xbf16>
    %c8 = arith.constant 8 : index
    %c0_39 = arith.constant 0 : index
    %c0_40 = arith.constant 0 : index
    %54 = vector.load %arg3[%c8, %c0_39, %c0_40] : memref<9x32x64xbf16, #tpu.memory_space<vmem>>, vector<1x32x64xbf16>
    %55 = vector.shape_cast %54 : vector<1x32x64xbf16> to vector<32x64xbf16>
    %cst_41 = arith.constant dense<0.000000e+00> : vector<178x64xf32>
    %56 = tpu.matmul %53, %55, %cst_41 {dimension_numbers = #tpu.dot_dimension_numbers<[1], [0], [0], [1], [0, 0, 1, 1], [], []>} : vector<178x32xbf16>, vector<32x64xbf16>, vector<178x64xf32> -> vector<178x64xf32>
    %57 = arith.addf %51, %56 : vector<178x64xf32>
    %c0_42 = arith.constant 0 : index
    %c0_43 = arith.constant 0 : index
    %58 = vector.load %arg8[%c0_42, %c0_43] : memref<178x64xf32, #tpu.memory_space<vmem>>, vector<178x64xf32>
    tpu.vector_store %arg8[%c0_42, %c0_43], %57 {strides = array<i32>} : memref<178x64xf32, #tpu.memory_space<vmem>>, vector<178x64xf32>,
    %c0_i32_44 = arith.constant 0 : i32
    %c2_i32_45 = arith.constant 2 : i32
    %59 = arith.addi %c0_i32_44, %c2_i32_45 : i32
    %c1_i32_46 = arith.constant 1 : i32
    scf.for %arg10 = %c0_i32_44 to %59 step %c1_i32_46  : i32 {
      %c100_i32 = arith.constant 100 : i32
      %137 = arith.muli %arg10, %c100_i32 : i32
      %c36_i32 = arith.constant 36 : i32
      %138 = arith.muli %arg10, %c36_i32 : i32
      %139 = arith.index_cast %138 : i32 to index
      %c0_92 = arith.constant 0 : index
      %140 = vector.load %arg9[%139, %c0_92] : memref<72x64xf32, #tpu.memory_space<vmem>>, vector<6x64xf32>
      tpu.vector_store %arg9[%139, %c0_92], %1 {strides = array<i32>} : memref<72x64xf32, #tpu.memory_space<vmem>>, vector<6x64xf32>,
      %c30_i32 = arith.constant 30 : i32
      %141 = arith.addi %138, %c30_i32 : i32
      %142 = arith.index_cast %141 : i32 to index
      %c0_93 = arith.constant 0 : index
      %143 = vector.load %arg9[%142, %c0_93] : memref<72x64xf32, #tpu.memory_space<vmem>>, vector<6x64xf32>
      tpu.vector_store %arg9[%142, %c0_93], %1 {strides = array<i32>} : memref<72x64xf32, #tpu.memory_space<vmem>>, vector<6x64xf32>,
      %c0_i32_94 = arith.constant 0 : i32
      %144 = arith.addi %137, %c0_i32_94 : i32
      %145 = arith.index_cast %144 : i32 to index
      %c0_95 = arith.constant 0 : index
      %146 = tpu.strided_load %arg8[%145, %c0_95] {strides = array<i32: 2, 1>} : memref<178x64xf32, #tpu.memory_space<vmem>>, vector<4x64xf32>
      %c1_i32_96 = arith.constant 1 : i32
      %147 = arith.addi %144, %c1_i32_96 : i32
      %148 = arith.index_cast %147 : i32 to index
      %c0_97 = arith.constant 0 : index
      %149 = tpu.strided_load %arg8[%148, %c0_97] {strides = array<i32: 2, 1>} : memref<178x64xf32, #tpu.memory_space<vmem>>, vector<4x64xf32>
      %c10_i32 = arith.constant 10 : i32
      %150 = arith.addi %144, %c10_i32 : i32
      %151 = arith.index_cast %150 : i32 to index
      %c0_98 = arith.constant 0 : index
      %152 = tpu.strided_load %arg8[%151, %c0_98] {strides = array<i32: 2, 1>} : memref<178x64xf32, #tpu.memory_space<vmem>>, vector<4x64xf32>
      %c10_i32_99 = arith.constant 10 : i32
      %153 = arith.addi %144, %c10_i32_99 : i32
      %c1_i32_100 = arith.constant 1 : i32
      %154 = arith.addi %153, %c1_i32_100 : i32
      %155 = arith.index_cast %154 : i32 to index
      %c0_101 = arith.constant 0 : index
      %156 = tpu.strided_load %arg8[%155, %c0_101] {strides = array<i32: 2, 1>} : memref<178x64xf32, #tpu.memory_space<vmem>>, vector<4x64xf32>
      %157 = arith.maximumf %146, %149 : vector<4x64xf32>
      %158 = arith.maximumf %152, %156 : vector<4x64xf32>
      %159 = arith.maximumf %157, %158 : vector<4x64xf32>
      %cst_102 = arith.constant 0.000000e+00 : f32
      %160 = vector.broadcast %cst_102 : f32 to vector<4x64xf32>
      %161 = arith.maximumf %159, %160 : vector<4x64xf32>
      %cst_103 = arith.constant 0.000000e+00 : f32
      %162 = vector.broadcast %cst_103 : f32 to vector<1x64xf32>
      %cst_104 = arith.constant 0.000000e+00 : f32
      %163 = vector.broadcast %cst_104 : f32 to vector<1x64xf32>
      %164 = tpu.concatenate %162, %161, %163 in 0 : vector<1x64xf32>, vector<4x64xf32>, vector<1x64xf32> -> vector<6x64xf32>
      %c6_i32 = arith.constant 6 : i32
      %165 = arith.addi %138, %c6_i32 : i32
      %166 = arith.index_cast %165 : i32 to index
      %c0_105 = arith.constant 0 : index
      %167 = vector.load %arg9[%166, %c0_105] : memref<72x64xf32, #tpu.memory_space<vmem>>, vector<6x64xf32>
      tpu.vector_store %arg9[%166, %c0_105], %164 {strides = array<i32>} : memref<72x64xf32, #tpu.memory_space<vmem>>, vector<6x64xf32>,
      %c20_i32 = arith.constant 20 : i32
      %168 = arith.addi %137, %c20_i32 : i32
      %169 = arith.index_cast %168 : i32 to index
      %c0_106 = arith.constant 0 : index
      %170 = tpu.strided_load %arg8[%169, %c0_106] {strides = array<i32: 2, 1>} : memref<178x64xf32, #tpu.memory_space<vmem>>, vector<4x64xf32>
      %c1_i32_107 = arith.constant 1 : i32
      %171 = arith.addi %168, %c1_i32_107 : i32
      %172 = arith.index_cast %171 : i32 to index
      %c0_108 = arith.constant 0 : index
      %173 = tpu.strided_load %arg8[%172, %c0_108] {strides = array<i32: 2, 1>} : memref<178x64xf32, #tpu.memory_space<vmem>>, vector<4x64xf32>
      %c10_i32_109 = arith.constant 10 : i32
      %174 = arith.addi %168, %c10_i32_109 : i32
      %175 = arith.index_cast %174 : i32 to index
      %c0_110 = arith.constant 0 : index
      %176 = tpu.strided_load %arg8[%175, %c0_110] {strides = array<i32: 2, 1>} : memref<178x64xf32, #tpu.memory_space<vmem>>, vector<4x64xf32>
      %c10_i32_111 = arith.constant 10 : i32
      %177 = arith.addi %168, %c10_i32_111 : i32
      %c1_i32_112 = arith.constant 1 : i32
      %178 = arith.addi %177, %c1_i32_112 : i32
      %179 = arith.index_cast %178 : i32 to index
      %c0_113 = arith.constant 0 : index
      %180 = tpu.strided_load %arg8[%179, %c0_113] {strides = array<i32: 2, 1>} : memref<178x64xf32, #tpu.memory_space<vmem>>, vector<4x64xf32>
      %181 = arith.maximumf %170, %173 : vector<4x64xf32>
      %182 = arith.maximumf %176, %180 : vector<4x64xf32>
      %183 = arith.maximumf %181, %182 : vector<4x64xf32>
      %cst_114 = arith.constant 0.000000e+00 : f32
      %184 = vector.broadcast %cst_114 : f32 to vector<4x64xf32>
      %185 = arith.maximumf %183, %184 : vector<4x64xf32>
      %cst_115 = arith.constant 0.000000e+00 : f32
      %186 = vector.broadcast %cst_115 : f32 to vector<1x64xf32>
      %cst_116 = arith.constant 0.000000e+00 : f32
      %187 = vector.broadcast %cst_116 : f32 to vector<1x64xf32>
      %188 = tpu.concatenate %186, %185, %187 in 0 : vector<1x64xf32>, vector<4x64xf32>, vector<1x64xf32> -> vector<6x64xf32>
      %c12_i32 = arith.constant 12 : i32
      %189 = arith.addi %138, %c12_i32 : i32
      %190 = arith.index_cast %189 : i32 to index
      %c0_117 = arith.constant 0 : index
      %191 = vector.load %arg9[%190, %c0_117] : memref<72x64xf32, #tpu.memory_space<vmem>>, vector<6x64xf32>
      tpu.vector_store %arg9[%190, %c0_117], %188 {strides = array<i32>} : memref<72x64xf32, #tpu.memory_space<vmem>>, vector<6x64xf32>,
      %c40_i32 = arith.constant 40 : i32
      %192 = arith.addi %137, %c40_i32 : i32
      %193 = arith.index_cast %192 : i32 to index
      %c0_118 = arith.constant 0 : index
      %194 = tpu.strided_load %arg8[%193, %c0_118] {strides = array<i32: 2, 1>} : memref<178x64xf32, #tpu.memory_space<vmem>>, vector<4x64xf32>
      %c1_i32_119 = arith.constant 1 : i32
      %195 = arith.addi %192, %c1_i32_119 : i32
      %196 = arith.index_cast %195 : i32 to index
      %c0_120 = arith.constant 0 : index
      %197 = tpu.strided_load %arg8[%196, %c0_120] {strides = array<i32: 2, 1>} : memref<178x64xf32, #tpu.memory_space<vmem>>, vector<4x64xf32>
      %c10_i32_121 = arith.constant 10 : i32
      %198 = arith.addi %192, %c10_i32_121 : i32
      %199 = arith.index_cast %198 : i32 to index
      %c0_122 = arith.constant 0 : index
      %200 = tpu.strided_load %arg8[%199, %c0_122] {strides = array<i32: 2, 1>} : memref<178x64xf32, #tpu.memory_space<vmem>>, vector<4x64xf32>
      %c10_i32_123 = arith.constant 10 : i32
      %201 = arith.addi %192, %c10_i32_123 : i32
      %c1_i32_124 = arith.constant 1 : i32
      %202 = arith.addi %201, %c1_i32_124 : i32
      %203 = arith.index_cast %202 : i32 to index
      %c0_125 = arith.constant 0 : index
      %204 = tpu.strided_load %arg8[%203, %c0_125] {strides = array<i32: 2, 1>} : memref<178x64xf32, #tpu.memory_space<vmem>>, vector<4x64xf32>
      %205 = arith.maximumf %194, %197 : vector<4x64xf32>
      %206 = arith.maximumf %200, %204 : vector<4x64xf32>
      %207 = arith.maximumf %205, %206 : vector<4x64xf32>
      %cst_126 = arith.constant 0.000000e+00 : f32
      %208 = vector.broadcast %cst_126 : f32 to vector<4x64xf32>
      %209 = arith.maximumf %207, %208 : vector<4x64xf32>
      %cst_127 = arith.constant 0.000000e+00 : f32
      %210 = vector.broadcast %cst_127 : f32 to vector<1x64xf32>
      %cst_128 = arith.constant 0.000000e+00 : f32
      %211 = vector.broadcast %cst_128 : f32 to vector<1x64xf32>
      %212 = tpu.concatenate %210, %209, %211 in 0 : vector<1x64xf32>, vector<4x64xf32>, vector<1x64xf32> -> vector<6x64xf32>
      %c18_i32 = arith.constant 18 : i32
      %213 = arith.addi %138, %c18_i32 : i32
      %214 = arith.index_cast %213 : i32 to index
      %c0_129 = arith.constant 0 : index
      %215 = vector.load %arg9[%214, %c0_129] : memref<72x64xf32, #tpu.memory_space<vmem>>, vector<6x64xf32>
      tpu.vector_store %arg9[%214, %c0_129], %212 {strides = array<i32>} : memref<72x64xf32, #tpu.memory_space<vmem>>, vector<6x64xf32>,
      %c60_i32 = arith.constant 60 : i32
      %216 = arith.addi %137, %c60_i32 : i32
      %217 = arith.index_cast %216 : i32 to index
      %c0_130 = arith.constant 0 : index
      %218 = tpu.strided_load %arg8[%217, %c0_130] {strides = array<i32: 2, 1>} : memref<178x64xf32, #tpu.memory_space<vmem>>, vector<4x64xf32>
      %c1_i32_131 = arith.constant 1 : i32
      %219 = arith.addi %216, %c1_i32_131 : i32
      %220 = arith.index_cast %219 : i32 to index
      %c0_132 = arith.constant 0 : index
      %221 = tpu.strided_load %arg8[%220, %c0_132] {strides = array<i32: 2, 1>} : memref<178x64xf32, #tpu.memory_space<vmem>>, vector<4x64xf32>
      %c10_i32_133 = arith.constant 10 : i32
      %222 = arith.addi %216, %c10_i32_133 : i32
      %223 = arith.index_cast %222 : i32 to index
      %c0_134 = arith.constant 0 : index
      %224 = tpu.strided_load %arg8[%223, %c0_134] {strides = array<i32: 2, 1>} : memref<178x64xf32, #tpu.memory_space<vmem>>, vector<4x64xf32>
      %c10_i32_135 = arith.constant 10 : i32
      %225 = arith.addi %216, %c10_i32_135 : i32
      %c1_i32_136 = arith.constant 1 : i32
      %226 = arith.addi %225, %c1_i32_136 : i32
      %227 = arith.index_cast %226 : i32 to index
      %c0_137 = arith.constant 0 : index
      %228 = tpu.strided_load %arg8[%227, %c0_137] {strides = array<i32: 2, 1>} : memref<178x64xf32, #tpu.memory_space<vmem>>, vector<4x64xf32>
      %229 = arith.maximumf %218, %221 : vector<4x64xf32>
      %230 = arith.maximumf %224, %228 : vector<4x64xf32>
      %231 = arith.maximumf %229, %230 : vector<4x64xf32>
      %cst_138 = arith.constant 0.000000e+00 : f32
      %232 = vector.broadcast %cst_138 : f32 to vector<4x64xf32>
      %233 = arith.maximumf %231, %232 : vector<4x64xf32>
      %cst_139 = arith.constant 0.000000e+00 : f32
      %234 = vector.broadcast %cst_139 : f32 to vector<1x64xf32>
      %cst_140 = arith.constant 0.000000e+00 : f32
      %235 = vector.broadcast %cst_140 : f32 to vector<1x64xf32>
      %236 = tpu.concatenate %234, %233, %235 in 0 : vector<1x64xf32>, vector<4x64xf32>, vector<1x64xf32> -> vector<6x64xf32>
      %c24_i32 = arith.constant 24 : i32
      %237 = arith.addi %138, %c24_i32 : i32
      %238 = arith.index_cast %237 : i32 to index
      %c0_141 = arith.constant 0 : index
      %239 = vector.load %arg9[%238, %c0_141] : memref<72x64xf32, #tpu.memory_space<vmem>>, vector<6x64xf32>
      tpu.vector_store %arg9[%238, %c0_141], %236 {strides = array<i32>} : memref<72x64xf32, #tpu.memory_space<vmem>>, vector<6x64xf32>,
    }
    %c2_i32_47 = arith.constant 2 : i32
    %cst_48 = arith.constant 0.000000e+00 : f32
    %60 = vector.broadcast %cst_48 : f32 to vector<58x64xf32>
    %c0_49 = arith.constant 0 : index
    %c0_50 = arith.constant 0 : index
    %61 = vector.load %arg9[%c0_49, %c0_50] : memref<72x64xf32, #tpu.memory_space<vmem>>, vector<58x64xf32>
    %c0_51 = arith.constant 0 : index
    %c0_52 = arith.constant 0 : index
    %62 = vector.load %arg4[%c0_51, %c0_52] : memref<9x64xf32, #tpu.memory_space<vmem>>, vector<1x64xf32>
    %63 = vector.shape_cast %62 : vector<1x64xf32> to vector<64xf32>
    %64 = vector.shape_cast %63 : vector<64xf32> to vector<1x64xf32>
    %65 = vector.broadcast %64 : vector<1x64xf32> to vector<58x64xf32>
    %66 = arith.mulf %61, %65 : vector<58x64xf32>
    %67 = arith.addf %60, %66 : vector<58x64xf32>
    %c1_53 = arith.constant 1 : index
    %c0_54 = arith.constant 0 : index
    %68 = vector.load %arg9[%c1_53, %c0_54] : memref<72x64xf32, #tpu.memory_space<vmem>>, vector<58x64xf32>
    %c1_55 = arith.constant 1 : index
    %c0_56 = arith.constant 0 : index
    %69 = vector.load %arg4[%c1_55, %c0_56] : memref<9x64xf32, #tpu.memory_space<vmem>>, vector<1x64xf32>
    %70 = vector.shape_cast %69 : vector<1x64xf32> to vector<64xf32>
    %71 = vector.shape_cast %70 : vector<64xf32> to vector<1x64xf32>
    %72 = vector.broadcast %71 : vector<1x64xf32> to vector<58x64xf32>
    %73 = arith.mulf %68, %72 : vector<58x64xf32>
    %74 = arith.addf %67, %73 : vector<58x64xf32>
    %c2_57 = arith.constant 2 : index
    %c0_58 = arith.constant 0 : index
    %75 = vector.load %arg9[%c2_57, %c0_58] : memref<72x64xf32, #tpu.memory_space<vmem>>, vector<58x64xf32>
    %c2_59 = arith.constant 2 : index
    %c0_60 = arith.constant 0 : index
    %76 = vector.load %arg4[%c2_59, %c0_60] : memref<9x64xf32, #tpu.memory_space<vmem>>, vector<1x64xf32>
    %77 = vector.shape_cast %76 : vector<1x64xf32> to vector<64xf32>
    %78 = vector.shape_cast %77 : vector<64xf32> to vector<1x64xf32>
    %79 = vector.broadcast %78 : vector<1x64xf32> to vector<58x64xf32>
    %80 = arith.mulf %75, %79 : vector<58x64xf32>
    %81 = arith.addf %74, %80 : vector<58x64xf32>
    %c6_61 = arith.constant 6 : index
    %c0_62 = arith.constant 0 : index
    %82 = vector.load %arg9[%c6_61, %c0_62] : memref<72x64xf32, #tpu.memory_space<vmem>>, vector<58x64xf32>
    %c3_63 = arith.constant 3 : index
    %c0_64 = arith.constant 0 : index
    %83 = vector.load %arg4[%c3_63, %c0_64] : memref<9x64xf32, #tpu.memory_space<vmem>>, vector<1x64xf32>
    %84 = vector.shape_cast %83 : vector<1x64xf32> to vector<64xf32>
    %85 = vector.shape_cast %84 : vector<64xf32> to vector<1x64xf32>
    %86 = vector.broadcast %85 : vector<1x64xf32> to vector<58x64xf32>
    %87 = arith.mulf %82, %86 : vector<58x64xf32>
    %88 = arith.addf %81, %87 : vector<58x64xf32>
    %c7_65 = arith.constant 7 : index
    %c0_66 = arith.constant 0 : index
    %89 = vector.load %arg9[%c7_65, %c0_66] : memref<72x64xf32, #tpu.memory_space<vmem>>, vector<58x64xf32>
    %c4_67 = arith.constant 4 : index
    %c0_68 = arith.constant 0 : index
    %90 = vector.load %arg4[%c4_67, %c0_68] : memref<9x64xf32, #tpu.memory_space<vmem>>, vector<1x64xf32>
    %91 = vector.shape_cast %90 : vector<1x64xf32> to vector<64xf32>
    %92 = vector.shape_cast %91 : vector<64xf32> to vector<1x64xf32>
    %93 = vector.broadcast %92 : vector<1x64xf32> to vector<58x64xf32>
    %94 = arith.mulf %89, %93 : vector<58x64xf32>
    %95 = arith.addf %88, %94 : vector<58x64xf32>
    %c8_69 = arith.constant 8 : index
    %c0_70 = arith.constant 0 : index
    %96 = vector.load %arg9[%c8_69, %c0_70] : memref<72x64xf32, #tpu.memory_space<vmem>>, vector<58x64xf32>
    %c5_71 = arith.constant 5 : index
    %c0_72 = arith.constant 0 : index
    %97 = vector.load %arg4[%c5_71, %c0_72] : memref<9x64xf32, #tpu.memory_space<vmem>>, vector<1x64xf32>
    %98 = vector.shape_cast %97 : vector<1x64xf32> to vector<64xf32>
    %99 = vector.shape_cast %98 : vector<64xf32> to vector<1x64xf32>
    %100 = vector.broadcast %99 : vector<1x64xf32> to vector<58x64xf32>
    %101 = arith.mulf %96, %100 : vector<58x64xf32>
    %102 = arith.addf %95, %101 : vector<58x64xf32>
    %c12_73 = arith.constant 12 : index
    %c0_74 = arith.constant 0 : index
    %103 = vector.load %arg9[%c12_73, %c0_74] : memref<72x64xf32, #tpu.memory_space<vmem>>, vector<58x64xf32>
    %c6_75 = arith.constant 6 : index
    %c0_76 = arith.constant 0 : index
    %104 = vector.load %arg4[%c6_75, %c0_76] : memref<9x64xf32, #tpu.memory_space<vmem>>, vector<1x64xf32>
    %105 = vector.shape_cast %104 : vector<1x64xf32> to vector<64xf32>
    %106 = vector.shape_cast %105 : vector<64xf32> to vector<1x64xf32>
    %107 = vector.broadcast %106 : vector<1x64xf32> to vector<58x64xf32>
    %108 = arith.mulf %103, %107 : vector<58x64xf32>
    %109 = arith.addf %102, %108 : vector<58x64xf32>
    %c13 = arith.constant 13 : index
    %c0_77 = arith.constant 0 : index
    %110 = vector.load %arg9[%c13, %c0_77] : memref<72x64xf32, #tpu.memory_space<vmem>>, vector<58x64xf32>
    %c7_78 = arith.constant 7 : index
    %c0_79 = arith.constant 0 : index
    %111 = vector.load %arg4[%c7_78, %c0_79] : memref<9x64xf32, #tpu.memory_space<vmem>>, vector<1x64xf32>
    %112 = vector.shape_cast %111 : vector<1x64xf32> to vector<64xf32>
    %113 = vector.shape_cast %112 : vector<64xf32> to vector<1x64xf32>
    %114 = vector.broadcast %113 : vector<1x64xf32> to vector<58x64xf32>
    %115 = arith.mulf %110, %114 : vector<58x64xf32>
    %116 = arith.addf %109, %115 : vector<58x64xf32>
    %c14 = arith.constant 14 : index
    %c0_80 = arith.constant 0 : index
    %117 = vector.load %arg9[%c14, %c0_80] : memref<72x64xf32, #tpu.memory_space<vmem>>, vector<58x64xf32>
    %c8_81 = arith.constant 8 : index
    %c0_82 = arith.constant 0 : index
    %118 = vector.load %arg4[%c8_81, %c0_82] : memref<9x64xf32, #tpu.memory_space<vmem>>, vector<1x64xf32>
    %119 = vector.shape_cast %118 : vector<1x64xf32> to vector<64xf32>
    %120 = vector.shape_cast %119 : vector<64xf32> to vector<1x64xf32>
    %121 = vector.broadcast %120 : vector<1x64xf32> to vector<58x64xf32>
    %122 = arith.mulf %117, %121 : vector<58x64xf32>
    %123 = arith.addf %116, %122 : vector<58x64xf32>
    %cst_83 = arith.constant dense<0.000000e+00> : vector<58xf32>
    %124 = vector.multi_reduction <add>, %123, %cst_83 [1] : vector<58x64xf32> to vector<58xf32>
    %cst_84 = arith.constant -1.000000e+00 : f32
    %cst_85 = arith.constant 1.000000e+00 : f32
    %125 = vector.broadcast %cst_84 : f32 to vector<58xf32>
    %126 = arith.maximumf %125, %124 : vector<58xf32>
    %127 = vector.broadcast %cst_85 : f32 to vector<58xf32>
    %128 = arith.minimumf %127, %126 : vector<58xf32>
    %129 = vector.extract_strided_slice %128 {offsets = [0], sizes = [22], strides = [1]} : vector<58xf32> to vector<22xf32>
    %c0_86 = arith.constant 0 : index
    %c0_87 = arith.constant 0 : index
    %c0_88 = arith.constant 0 : index
    %130 = vector.load %arg5[%c0_86, %c0_87, %c0_88] : memref<2x1x22xf32, #tpu.memory_space<vmem>>, vector<1x1x22xf32>
    %131 = vector.shape_cast %130 : vector<1x1x22xf32> to vector<22xf32>
    %132 = vector.shape_cast %129 : vector<22xf32> to vector<1x1x22xf32>
    tpu.vector_store %arg5[%c0_86, %c0_87, %c0_88], %132 {strides = array<i32>} : memref<2x1x22xf32, #tpu.memory_space<vmem>>, vector<1x1x22xf32>,
    %133 = vector.extract_strided_slice %128 {offsets = [36], sizes = [22], strides = [1]} : vector<58xf32> to vector<22xf32>
    %c1_89 = arith.constant 1 : index
    %c0_90 = arith.constant 0 : index
    %c0_91 = arith.constant 0 : index
    %134 = vector.load %arg5[%c1_89, %c0_90, %c0_91] : memref<2x1x22xf32, #tpu.memory_space<vmem>>, vector<1x1x22xf32>
    %135 = vector.shape_cast %134 : vector<1x1x22xf32> to vector<22xf32>
    %136 = vector.shape_cast %133 : vector<22xf32> to vector<1x1x22xf32>
    tpu.vector_store %arg5[%c1_89, %c0_90, %c0_91], %136 {strides = array<i32>} : memref<2x1x22xf32, #tpu.memory_space<vmem>>, vector<1x1x22xf32>,
    return
  }
  func.func @transform_0(%arg0: i32) -> (i32, i32, i32) {
    %c0_i32 = arith.constant 0 : i32
    %c0_i32_0 = arith.constant 0 : i32
    %c0_i32_1 = arith.constant 0 : i32
    return %arg0, %c0_i32, %c0_i32_0 : i32, i32, i32
  }
  func.func @transform_1(%arg0: i32) -> (i32, i32) {
    %c0_i32 = arith.constant 0 : i32
    %c0_i32_0 = arith.constant 0 : i32
    %c0_i32_1 = arith.constant 0 : i32
    return %c0_i32, %c0_i32_0 : i32, i32
  }
  func.func @transform_2(%arg0: i32) -> (i32, i32, i32) {
    %c0_i32 = arith.constant 0 : i32
    %c0_i32_0 = arith.constant 0 : i32
    %c0_i32_1 = arith.constant 0 : i32
    %c0_i32_2 = arith.constant 0 : i32
    return %c0_i32, %c0_i32_0, %c0_i32_1 : i32, i32, i32
  }
  func.func @transform_3(%arg0: i32) -> (i32, i32) {
    %c0_i32 = arith.constant 0 : i32
    %c0_i32_0 = arith.constant 0 : i32
    %c0_i32_1 = arith.constant 0 : i32
    return %c0_i32, %c0_i32_0 : i32, i32
  }
  func.func @transform_4(%arg0: i32) -> (i32, i32, i32) {
    %c0_i32 = arith.constant 0 : i32
    %c0_i32_0 = arith.constant 0 : i32
    %c0_i32_1 = arith.constant 0 : i32
    return %arg0, %c0_i32, %c0_i32_0 : i32, i32, i32
  }
}

</mosaic_0001>

<bundles_post_ra>
// kernel: tpu_custom_call.1
= control target key start
LH: loop header
LB: loop body
LE: loop exit
PB: predicated region body
PF: predicated region fallthrough
CT: control target
= control target key end

     0   :  { %9 = vsyncpa [#allocation7], 0  ;;  %s9155_s0 = inlined_call_operand.vmem [shape: f32[4,18,18], index: 0, kind: input, shape index: {}]   ;;  %s9156_s1 = inlined_call_operand.vmem [shape: f32[9,32], index: 1, kind: input, shape index: {}]   ;;  %s9157_s2 = inlined_call_operand.vmem [shape: bf16[9,32,64], index: 2, kind: input, shape index: {}]   ;;  %s9158_s3 = inlined_call_operand.vmem [shape: f32[9,64], index: 3, kind: input, shape index: {}]   ;;  %s9159_s4 = inlined_call_operand.hbm [shape: f32[4,1,22], index: 4, kind: output, shape index: {}]  }
   0x1   :  { %11 = vsyncpa [#allocation7 + $0x1], 0  ;;  %s6700_s15 = smov 0   ;;  %s6702_s16 = smov 0  }
   0x2   :  { %s6704_s17 = smov 0   ;;  %s6706_s18 = smov 0  }
   0x3 LB: > { %s6721_s19 = sadd.s32 4294967295, %s6642_s18   ;;  %s5536_s20 = sadd.s32 4294967294, %s6642_s18   ;;  %s6642_s18 = sphi %s6706_s18, %s9202_s18   ;;  %s6638_s17 = sphi %s6704_s17, %s9201_s17   ;;  %s6634_s16 = sphi %s6702_s16, %s9200_s16   ;;  %s6630_s15 = sphi %s6700_s15, %s9199_s15  }
   0x4   : > { %s6725_s21 = sadd.s32 1, %s6642_s18   ;;  %s113_s22 = sadd.s32 1, %s6638_s17 }
   0x5   : > { %s110_s23 = ssub.s32 %s6642_s18, %s6725_s21  ;;  %p123_p0 = scmp.ne.s32.totalorder %s6638_s17, %s6634_s16 }
   0x6   : > { %p111_p1 = scmp.eq.s32.totalorder %s110_s23, 0  ;;  %p124_p2 = scmp.eq.s32.totalorder %s6721_s19, 1 }
   0x7   : > { %p129_p3 = scmp.ne.s32.totalorder %s6634_s16, %s6630_s15  ;;  %p130_p4 = scmp.eq.s32.totalorder %s5536_s20, 1 }
   0x8   : > { %s6736_s24 = scalar_select %p111_p1, %s6638_s17, %s113_s22  }
   0x9   : > { %p6738_p5 = por %p124_p2, %p123_p0  ;;  %p6742_p6 = por %p130_p4, %p129_p3 }
   0xa   : > { %p5539_p7 = scmp.ge.s32.totalorder %s6642_s18, 1  ;;  %p167_p8 = scmp.lt.s32.totalorder %s6642_s18, 3 }
   0xc   : > { %p168_p9 = pnand %p5539_p7, %p167_p8 }
   0xd   : > { %s191_s27 = sand.u32 (!%p168_p9), 1, %s6634_s16   ;;  %s5541_s28 = sshll.u32 (!%p168_p9), %s6721_s19, 1 }
   0xe   : > { %171 = sbr.rel (%p168_p9) target bundleno = 1155 (0x483), region = 36  ;;  %s5540_s29 = sshll.u32 (!%p168_p9), %s191_s27, 1 }
   0xf   : > { %p195_p10 = scmp.lt.s32.totalorder (!%p168_p9), %s5541_s28, 3  ;;  %s6757_s8 = scalar_lea.vmem (!%p168_p9), [#allocation6], %s5540_s29 }
  0x10   : > { %s6759_s9 = smov (!%p168_p9), 0  }
  0x15   : > { %s9204_s28 = smov (!%p195_p10, %s5541_s28), 3 }
  0x16   : > { %s6407_s30 = smul.u32 24, %s9204_s28 }
  0x18   : > { %s6755_s7 = scalar_lea.vmem %s9155_s0, %s6407_s30 }
  0x19 LB: >> { %v6652_v0 = vmov 1   ;;  %v6653_v1 = vmov 0   ;;  %s219_s10 = smul.u32 24, %s6646_s9  ;;  %v6654_v5 = vmov 2   ;;  %v6655_v6 = vmov 3   ;;  %s6646_s9 = sphi %s6759_s9, %s208_s9  }
  0x1a   : >> { %6486 = vset.pattern.permute.xlu1 %v6652_v0  ;;  %6485 = vset.pattern.permute.xlu0 %v6653_v1  ;;  %v6656_v7 = vmov 4   ;;  %v6657_v9 = vmov 5   ;;  %s209_s12 = smul.u32 100, %s6646_s9  ;;  %vm211_vm0 = vcmask 261120   ;;  %vm213_vm1 = vcmask 254976   ;;  %s208_s9 = sadd.s32 1, %s6646_s9  }
  0x1b   : >> { %s6766_s11 = scalar_lea.vmem %s6755_s7, %s219_s10  ;;  %v6658_v10 = vmov 6   ;;  %v6659_v11 = vmov 0.0   ;;  %v6660_v12 = vmov 7   ;;  %v6661_v13 = vmov 8   ;;  %v6850_v24 = vld [vmem:[%s9156_s1 + $0x4] ss:$0 sm:$0xff] }
  0x1c   : >> { %v6769_v2 = vld [vmem:[%s6766_s11] sm:$0xff]  ;;  %v6774_v3 = vld [vmem:[%s6766_s11 + $0x8] sm:$0xff]  ;;  %v223_v4 = vld [vmem:[%s6766_s11 + $0x10] sm:$0x3]  ;;  %s6794_s13 = scalar_lea.vmem [#allocation3], %s209_s12  ;;  %v6662_v14 = vmov 9  }
  0x1d   : >> { %244 = vperm.xlu1 %6486, %v6769_v2   ;;  %227 = vperm.xlu0 %6485, %v6769_v2   ;;  %v548_v8 = vld [vmem:[%s6766_s11 + $0x10] sm:$0x3]  ;;  %212 = vst.msk [vmem:[%s6794_s13] sm:$0xff] %vm211_vm0, %v6659_v11  ;;  %5543 = vst.msk [vmem:[%s6794_s13 + $0x5a] sm:$0xff] %vm211_vm0, %v6659_v11  ;;  %v6663_v16 = vmov 10   ;;  %v6664_v17 = vmov 11  }
  0x1e   : >> { %214 = vst.msk [vmem:[%s6794_s13 + $0x8] sm:$0x3] %vm213_vm1, %v6659_v11  ;;  %5544 = vst.msk [vmem:[%s6794_s13 + $0x62] sm:$0x3] %vm213_vm1, %v6659_v11  ;;  %v869_v15 = vld [vmem:[%s6766_s11 + $0x10] sm:$0x3] }
  0x1f   : >> { %v6665_v18 = vmov 12   ;;  %v2151_v19 = vld [vmem:[%s6766_s11] sm:$0xff]  ;;  %v6666_v20 = vmov 13   ;;  %v6836_v21 = vld [vmem:[%s6766_s11 + $0x10] sm:$0x3]  ;;  %v6667_v23 = vmov 14  }
  0x20   : >> { %v6839_v22 = vld [vmem:[%s6766_s11 + $0x10] sm:$0x3]  ;;  %v6855_v25 = vld [vmem:[%s9156_s1 + $0x5] ss:$0 sm:$0xff]  ;;  %v6862_v27 = vld [vmem:[%s9156_s1] ss:$0 sm:$0xff] }
  0x21   : >> { %248 = vperm.xlu1 %6486, %v6774_v3   ;;  %232 = vperm.xlu0 %6485, %v6774_v3   ;;  %v6867_v28 = vld [vmem:[%s9156_s1 + $0x1] ss:$0 sm:$0xff]  ;;  %v6874_v32 = vld [vmem:[%s9156_s1 + $0x2] ss:$0 sm:$0xff]  ;;  %v6879_v33 = vld [vmem:[%s9156_s1 + $0x3] ss:$0 sm:$0xff] }
  0x22   : >> { %vm271_vm2 = vcmask 1046528   ;;  %vm311_vm3 = vcmask 1045504   ;;  %v6668_v53 = vmov 15   ;;  %v2474_v0 = vld [vmem:[%s6766_s11 + $0x10] sm:$0x3]  ;;  %vm539_vm4 = vcmask 1040384  }
  0x23   : >> { %p205_p11 = scmp.ge.s32.totalorder %s208_s9, 2  }
  0x24   : > { %vm4898_vm5 = vcmask (%p205_p11), 523264   ;;  %vm4921_vm6 = vcmask (%p205_p11), 517120  }
  0x25   : >> { %282 = vperm.xlu1 %6486, %v223_v4   ;;  %258 = vperm.xlu0 %6485, %v223_v4  }
  0x29   : >> { %6488 = vset.pattern.permute.xlu1 %v6654_v5  ;;  %6487 = vset.pattern.permute.xlu0 %v6654_v5 }
  0x2a   : >> { %350 = vperm.xlu1 %6488, %v6774_v3   ;;  %346 = vperm.xlu0 %6487, %v6769_v2  }
  0x2e   : >> { %378 = vperm.xlu1 %6488, %v223_v4   ;;  %552 = vperm.xlu0 %6487, %v6769_v2  }
  0x32   : >> { %6489 = vset.pattern.permute.xlu1 %v6655_v6  ;;  %6490 = vset.pattern.permute.xlu0 %v6655_v6 }
  0x33   : >> { %445 = vperm.xlu1 %6489, %v6774_v3   ;;  %441 = vperm.xlu0 %6490, %v6769_v2  }
  0x37   : >> { %473 = vperm.xlu1 %6489, %v223_v4   ;;  %573 = vperm.xlu0 %6490, %v6774_v3  }
  0x3b   : >> { %6491 = vset.pattern.permute.xlu1 %v6654_v5  ;;  %6495 = vset.pattern.permute.xlu0 %v6656_v7 }
  0x3c   : >> { %557 = vperm.xlu1 %6491, %v6774_v3   ;;  %669 = vperm.xlu0 %6495, %v6769_v2  }
  0x40   : >> { %6492 = vset.pattern.permute.xlu1 %v6655_v6  ;;  %873 = vperm.xlu0 %6495, %v6769_v2  }
  0x41   : >> { %569 = vperm.xlu1 %6492, %v6769_v2  }
  0x44   : >> { %6498 = vset.pattern.permute.xlu0 %v6657_v9 }
  0x45   : >> { %6493 = vset.pattern.permute.xlu1 %v6654_v5  ;;  %764 = vperm.xlu0 %6498, %v6769_v2  }
  0x46   : >> { %583 = vperm.xlu1 %6493, %v548_v8  }
  0x49   : >> { %894 = vperm.xlu0 %6498, %v6774_v3  }
  0x4a   : >> { %6494 = vset.pattern.permute.xlu1 %v6655_v6 }
  0x4b   : >> { %606 = vperm.xlu1 %6494, %v548_v8  }
  0x4d   : >> { %6503 = vset.pattern.permute.xlu0 %v6658_v10 }
  0x4e   : >> { %990 = vperm.xlu0 %6503, %v6769_v2  }
  0x4f   : >> { %6496 = vset.pattern.permute.xlu1 %v6656_v7 }
  0x50   : >> { %673 = vperm.xlu1 %6496, %v6774_v3  }
  0x52   : >> { %1194 = vperm.xlu0 %6503, %v6769_v2  }
  0x54   : >> { %701 = vperm.xlu1 %6496, %v548_v8  }
  0x56   : >> { %6506 = vset.pattern.permute.xlu0 %v6660_v12 }
  0x57   : >> { %1085 = vperm.xlu0 %6506, %v6769_v2  }
  0x58   : >> { %6497 = vset.pattern.permute.xlu1 %v6657_v9 }
  0x59   : >> { %768 = vperm.xlu1 %6497, %v6774_v3  }
  0x5b   : >> { %1215 = vperm.xlu0 %6506, %v6774_v3  }
  0x5d   : >> { %796 = vperm.xlu1 %6497, %v548_v8  }
  0x5f   : >> { %6511 = vset.pattern.permute.xlu0 %v6661_v13 }
  0x60   : >> { %1311 = vperm.xlu0 %6511, %v6769_v2  }
  0x61   : >> { %6499 = vset.pattern.permute.xlu1 %v6656_v7 }
  0x62   : >> { %878 = vperm.xlu1 %6499, %v6774_v3  }
  0x64   : >> { %1515 = vperm.xlu0 %6511, %v6769_v2  }
  0x66   : >> { %6500 = vset.pattern.permute.xlu1 %v6657_v9 }
  0x67   : >> { %890 = vperm.xlu1 %6500, %v6769_v2  }
  0x68   : >> { %6514 = vset.pattern.permute.xlu0 %v6662_v14 }
  0x69   : >> { %1406 = vperm.xlu0 %6514, %v6769_v2  }
  0x6b   : >> { %6501 = vset.pattern.permute.xlu1 %v6656_v7 }
  0x6c   : >> { %904 = vperm.xlu1 %6501, %v869_v15  }
  0x6d   : >> { %1536 = vperm.xlu0 %6514, %v6774_v3  }
  0x70   : >> { %6502 = vset.pattern.permute.xlu1 %v6657_v9 }
  0x71   : >> { %927 = vperm.xlu1 %6502, %v869_v15   ;;  %6519 = vset.pattern.permute.xlu0 %v6663_v16 }
  0x72   : >> { %1632 = vperm.xlu0 %6519, %v6769_v2  }
  0x75   : >> { %6504 = vset.pattern.permute.xlu1 %v6658_v10 }
  0x76   : >> { %994 = vperm.xlu1 %6504, %v6774_v3   ;;  %1836 = vperm.xlu0 %6519, %v6769_v2  }
  0x7a   : >> { %1022 = vperm.xlu1 %6504, %v869_v15   ;;  %6522 = vset.pattern.permute.xlu0 %v6664_v17 }
  0x7b   : >> { %1727 = vperm.xlu0 %6522, %v6769_v2  }
  0x7e   : >> { %6505 = vset.pattern.permute.xlu1 %v6660_v12 }
  0x7f   : >> { %1089 = vperm.xlu1 %6505, %v6774_v3   ;;  %1857 = vperm.xlu0 %6522, %v6774_v3  }
  0x83   : >> { %1117 = vperm.xlu1 %6505, %v869_v15   ;;  %6527 = vset.pattern.permute.xlu0 %v6665_v18 }
  0x84   : >> { %1953 = vperm.xlu0 %6527, %v6769_v2  }
  0x87   : >> { %6507 = vset.pattern.permute.xlu1 %v6658_v10 }
  0x88   : >> { %1199 = vperm.xlu1 %6507, %v6774_v3   ;;  %2157 = vperm.xlu0 %6527, %v2151_v19  }
  0x8c   : >> { %6508 = vset.pattern.permute.xlu1 %v6660_v12  ;;  %6529 = vset.pattern.permute.xlu0 %v6666_v20 }
  0x8d   : >> { %1211 = vperm.xlu1 %6508, %v6769_v2   ;;  %2174 = vperm.xlu0 %6529, %v2151_v19  }
  0x91   : >> { %6509 = vset.pattern.permute.xlu1 %v6658_v10  ;;  %2211 = vperm.xlu0 %6529, %v6836_v21  }
  0x92   : >> { %1225 = vperm.xlu1 %6509, %v6839_v22  }
  0x95   : >> { %2052 = vperm.xlu0 %6529, %v6774_v3  }
  0x96   : >> { %6510 = vset.pattern.permute.xlu1 %v6660_v12 }
  0x97   : >> { %1248 = vperm.xlu1 %6510, %v6839_v22  }
  0x99   : >> { %6533 = vset.pattern.permute.xlu0 %v6667_v23 }
  0x9a   : >> { %2274 = vperm.xlu0 %6533, %v2151_v19  }
  0x9b   : >> { %6512 = vset.pattern.permute.xlu1 %v6661_v13 }
  0x9c   : >> { %1315 = vperm.xlu1 %6512, %v6774_v3   ;;  %v245_v26 = vpop.permute.xlu1 %244  ;;  %v228_v29 = vpop.permute.xlu0 %227 }
  0x9d   : >> { %v362_v30 = vmul.f32 %v6850_v24, %v245_v26  ;;  %v401_v31 = vmul.f32 %v6855_v25, %v245_v26  ;;  %v265_v34 = vmul.f32 %v6867_v28, %v228_v29  ;;  %v305_v35 = vmul.f32 %v6874_v32, %v228_v29 }
  0x9e   : >> { %2478 = vperm.xlu0 %6533, %v2151_v19   ;;  %v6884_v36 = vmul.f32 %v6862_v27, %v245_v26  ;;  %v239_v37 = vmul.f32 %v6862_v27, %v228_v29  ;;  %v285_v38 = vmul.f32 %v6867_v28, %v245_v26  ;;  %v341_v42 = vmul.f32 %v6879_v33, %v245_v26 }
  0x9f   : >> { %v368_v39 = vrot.slane %v362_v30, 1  ;;  %v407_v40 = vrot.slane %v401_v31, 2  ;;  %v6891_v44 = vmul.f32 %v6874_v32, %v245_v26  ;;  %v272_v45 = vrot.slane %v265_v34, 1 }
  0xa0   : >> { %1343 = vperm.xlu1 %6512, %v6839_v22   ;;  %v249_v41 = vpop.permute.xlu1 %248  ;;  %v233_v43 = vpop.permute.xlu0 %232  ;;  %v312_v49 = vrot.slane %v305_v35, 2  ;;  %v291_v57 = vrot.slane %v285_v38, 1 }
  0xa1   : >> { %v286_v46 = vmul.f32 %v6867_v28, %v249_v41  ;;  %v6895_v47 = vmul.f32 %v6874_v32, %v249_v41  ;;  %v363_v48 = vmul.f32 %v6850_v24, %v249_v41  ;;  %v402_v50 = vmul.f32 %v6855_v25, %v249_v41 }
  0xa2   : >> { %v266_v51 = vmul.f32 %v6867_v28, %v233_v43  ;;  %v306_v52 = vmul.f32 %v6874_v32, %v233_v43  ;;  %6535 = vset.pattern.permute.xlu0 %v6668_v53  ;;  %v252_v54 = vmul.f32 %v6862_v27, %v249_v41  ;;  %v240_v56 = vmul.f32 %v6862_v27, %v233_v43 }
  0xa3   : >> { %v292_v55 = vrot.slane %v286_v46, 1  ;;  %2495 = vperm.xlu0 %6535, %v2151_v19   ;;  %v328_v58 = vrot.slane %v6895_v47, 2  ;;  %v369_v59 = vrot.slane %v363_v48, 1  ;;  %v408_v1 = vrot.slane %v402_v50, 2  ;;  %v6930_v50 = vld [vmem:[%s6766_s11 + $0x8] sm:$0xff] }
  0xa4   : >> { %v273_v60 = vrot.slane %v266_v51, 1  ;;  %v313_v61 = vrot.slane %v306_v52, 2  ;;  %6513 = vset.pattern.permute.xlu1 %v6662_v14  ;;  %v283_v62 = vpop.permute.xlu1 %282  ;;  %v259_v63 = vpop.permute.xlu0 %258  ;;  %v342_v10 = vmul.f32 %v6879_v33, %v249_v41  ;;  %v327_v31 = vrot.slane %v6891_v44, 2  ;;  %v6943_v52 = vld [vmem:[%s9156_s1 + $0x7] ss:$0 sm:$0xff] }
  0xa5   : >> { %v287_v4 = vmul.f32 %v6867_v28, %v283_v62  ;;  %v323_v5 = vmul.f32 %v6874_v32, %v283_v62  ;;  %v364_v6 = vmul.f32 %v6850_v24, %v283_v62  ;;  %1410 = vperm.xlu1 %6513, %v6774_v3   ;;  %v403_v9 = vmul.f32 %v6855_v25, %v283_v62 }
  0xa6   : >> { %v274_v7 = vsel %vm271_vm2, %v272_v45, %v273_v60  ;;  %v314_v8 = vsel %vm311_vm3, %v312_v49, %v313_v61  ;;  %v267_v29 = vmul.f32 %v6867_v28, %v259_v63  ;;  %v307_v30 = vmul.f32 %v6874_v32, %v259_v63 }
  0xa7   : >> { %v279_v11 = vadd.f32 %v274_v7, %v239_v37  ;;  %v294_v12 = vrot.slane %v287_v4, 1  ;;  %v330_v15 = vrot.slane %v323_v5, 2  ;;  %v371_v19 = vrot.slane %v364_v6, 1  ;;  %2532 = vperm.xlu0 %6535, %v2474_v0  }
  0xa8   : >> { %v410_v26 = vrot.slane %v403_v9, 2  ;;  %v370_v34 = vsel %vm271_vm2, %v368_v39, %v369_v59  ;;  %v409_v35 = vsel %vm311_vm3, %v407_v40, %v408_v1  ;;  %v275_v45 = vrot.slane %v267_v29, 1 }
  0xa9   : >> { %v319_v38 = vadd.f32 %v314_v8, %v279_v11  ;;  %v295_v41 = vsel %vm271_vm2, %v292_v55, %v294_v12  ;;  %1438 = vperm.xlu1 %6513, %v6839_v22   ;;  %v6922_v37 = vpop.permute.xlu1 %350  ;;  %v315_v46 = vrot.slane %v307_v30, 2  ;;  %v6924_v48 = vpop.permute.xlu0 %346  ;;  %v6927_v49 = vsel %vm271_vm2, %v291_v57, %v292_v55 }
  0xaa   : >> { %v299_v43 = vadd.f32 %v295_v41, %v252_v54  ;;  %v331_v40 = vsel %vm311_vm3, %v328_v58, %v330_v15  ;;  %v372_v51 = vsel %vm271_vm2, %v369_v59, %v371_v19  ;;  %v6938_v22 = vmul.f32 %v6850_v24, %v6922_v37  ;;  %v6948_v54 = vld [vmem:[%s9156_s1 + $0x8] ss:$0 sm:$0xff] }
  0xab   : >> { %v343_v39 = vadd.f32 %v341_v42, %v319_v38  ;;  %2373 = vperm.xlu0 %6535, %v6930_v50   ;;  %v411_v42 = vsel %vm311_vm3, %v408_v1, %v410_v26  ;;  %v276_v55 = vsel %vm271_vm2, %v273_v60, %v275_v45  ;;  %v316_v57 = vsel %vm311_vm3, %v313_v61, %v315_v46 }
  0xac   : >> { %v354_v59 = vmul.f32 %v6879_v33, %v6922_v37  ;;  %v280_v63 = vadd.f32 %v276_v55, %v240_v56  ;;  %v6958_v0 = vmul.f32 %v6855_v25, %v6922_v37  ;;  %v6962_v4 = vmul.f32 %v6850_v24, %v6924_v48  ;;  %v7005_v55 = vld [vmem:[%s9156_s1 + $0x6] ss:$0 sm:$0xff] }
  0xad   : >> { %v375_v62 = vadd.f32 %v370_v34, %v343_v39  ;;  %6515 = vset.pattern.permute.xlu1 %v6661_v13  ;;  %v379_v1 = vpop.permute.xlu1 %378  ;;  %v335_v5 = vadd.f32 %v331_v40, %v299_v43  ;;  %v6967_v60 = vmul.f32 %v6855_v25, %v6924_v48  ;;  %v6971_v61 = vmul.f32 %v6943_v52, %v6924_v48  ;;  %v553_v38 = vpop.permute.xlu0 %552 }
  0xae   : >> { %v6975_v56 = vmul.f32 %v6948_v54, %v6924_v48  ;;  %1520 = vperm.xlu1 %6515, %v6774_v3   ;;  %v320_v6 = vadd.f32 %v316_v57, %v280_v63  ;;  %v388_v7 = vrot.slane %v6938_v22, 1  ;;  %v353_v8 = vmul.f32 %v6879_v33, %v6924_v48 }
  0xaf   : >> { %v458_v9 = vmul.f32 %v6943_v52, %v6922_v37  ;;  %v414_v11 = vadd.f32 %v409_v35, %v375_v62  ;;  %v387_v12 = vrot.slane %v6962_v4, 1  ;;  %v422_v15 = vrot.slane %v6967_v60, 2 }
  0xb0   : >> { %v6987_v19 = vmul.f32 %v6948_v54, %v6922_v37  ;;  %v344_v26 = vadd.f32 %v342_v10, %v320_v6  ;;  %v463_v29 = vrot.slane %v6971_v61, 1  ;;  %v383_v30 = vmul.f32 %v6850_v24, %v379_v1  ;;  %v7015_v6 = vld [vmem:[%s6766_s11 + $0x10] sm:$0x3] }
  0xb1   : >> { %v418_v34 = vmul.f32 %v6855_v25, %v379_v1  ;;  %v502_v41 = vrot.slane %v6975_v56, 2  ;;  %v459_v35 = vmul.f32 %v6943_v52, %v379_v1  ;;  %v498_v43 = vmul.f32 %v6948_v54, %v379_v1 }
  0xb2   : >> { %v6996_v45 = vmul.f32 %v6867_v28, %v553_v38  ;;  %6516 = vset.pattern.permute.xlu1 %v6662_v14  ;;  %v446_v10 = vpop.permute.xlu1 %445  ;;  %v376_v46 = vadd.f32 %v372_v51, %v344_v26  ;;  %v390_v39 = vrot.slane %v383_v30, 1  ;;  %v7000_v22 = vmul.f32 %v6874_v32, %v553_v38 }
  0xb3   : >> { %v425_v40 = vrot.slane %v418_v34, 2  ;;  %1532 = vperm.xlu1 %6516, %v6769_v2   ;;  %v464_v57 = vrot.slane %v458_v9, 1  ;;  %v503_v62 = vrot.slane %v6987_v19, 2  ;;  %v7010_v63 = vmul.f32 %v6862_v27, %v553_v38 }
  0xb4   : >> { %v356_v4 = vadd.f32 %v354_v59, %v335_v5  ;;  %v415_v51 = vadd.f32 %v411_v42, %v376_v46  ;;  %v466_v1 = vrot.slane %v459_v35, 1  ;;  %v391_v61 = vsel %vm271_vm2, %v388_v7, %v390_v39 }
  0xb5   : >> { %v423_v56 = vrot.slane %v6958_v0, 2  ;;  %v505_v26 = vrot.slane %v498_v43, 2  ;;  %v596_v30 = vrot.slane %v6996_v45, 1  ;;  %v437_v9 = vmul.f32 %v7005_v55, %v6922_v37  ;;  %v442_v37 = vpop.permute.xlu0 %441 }
  0xb6   : >> { %v395_v34 = vadd.f32 %v391_v61, %v356_v4  ;;  %v474_v19 = vpop.permute.xlu1 %473  ;;  %v635_v38 = vrot.slane %v7000_v22, 2  ;;  %v436_v42 = vmul.f32 %v7005_v55, %v6924_v48  ;;  %v477_v5 = vmul.f32 %v6943_v52, %v446_v10 }
  0xb7   : >> { %v426_v59 = vsel %vm311_vm3, %v423_v56, %v425_v40  ;;  %6517 = vset.pattern.permute.xlu1 %v6661_v13  ;;  %v439_v35 = vadd.f32 %v437_v9, %v415_v51  ;;  %v512_v43 = vmul.f32 %v6948_v54, %v446_v10  ;;  %v298_v46 = vadd.f32 %v6927_v49, %v6884_v36 }
  0xb8   : >> { %v430_v0 = vadd.f32 %v426_v59, %v395_v34  ;;  %1546 = vperm.xlu1 %6517, %v7015_v6   ;;  %v467_v39 = vsel %vm271_vm2, %v464_v57, %v466_v1  ;;  %v438_v40 = vadd.f32 %v436_v42, %v414_v11  ;;  %v449_v4 = vmul.f32 %v7005_v55, %v446_v10 }
  0xb9   : >> { %v329_v13 = vsel %vm311_vm3, %v327_v31, %v328_v58  ;;  %v506_v48 = vsel %vm311_vm3, %v503_v62, %v505_v26  ;;  %v483_v51 = vrot.slane %v477_v5, 1  ;;  %v389_v36 = vsel %vm271_vm2, %v387_v12, %v388_v7 }
  0xba   : >> { %v334_v61 = vadd.f32 %v329_v13, %v298_v46  ;;  %v451_v49 = vadd.f32 %v449_v4, %v430_v0  ;;  %v518_v34 = vrot.slane %v512_v43, 2  ;;  %v465_v9 = vsel %vm271_vm2, %v463_v29, %v464_v57  ;;  %v574_v43 = vpop.permute.xlu0 %573 }
  0xbb   : >> { %v476_v11 = vmul.f32 %v6943_v52, %v442_v37  ;;  %v558_v1 = vpop.permute.xlu1 %557  ;;  %v470_v59 = vadd.f32 %v465_v9, %v438_v40  ;;  %v511_v47 = vmul.f32 %v6948_v54, %v442_v37  ;;  %v471_v44 = vadd.f32 %v467_v39, %v439_v35 }
  0xbc   : >> { %v355_v10 = vadd.f32 %v353_v8, %v334_v61  ;;  %6518 = vset.pattern.permute.xlu1 %v6662_v14  ;;  %v424_v58 = vsel %vm311_vm3, %v422_v15, %v423_v56  ;;  %v478_v7 = vmul.f32 %v6943_v52, %v474_v19  ;;  %v513_v12 = vmul.f32 %v6948_v54, %v474_v19 }
  0xbd   : >> { %v482_v31 = vrot.slane %v476_v11, 1  ;;  %1569 = vperm.xlu1 %6518, %v7015_v6   ;;  %v504_v8 = vsel %vm311_vm3, %v502_v41, %v503_v62  ;;  %v448_v57 = vmul.f32 %v7005_v55, %v442_v37  ;;  %v517_v26 = vrot.slane %v511_v47, 2 }
  0xbe   : >> { %v394_v29 = vadd.f32 %v389_v36, %v355_v10  ;;  %v485_v42 = vrot.slane %v478_v7, 1  ;;  %v520_v5 = vrot.slane %v513_v12, 2  ;;  %v7052_v14 = vmul.f32 %v6862_v27, %v558_v1 }
  0xbf   : >> { %v591_v60 = vmul.f32 %v6867_v28, %v558_v1  ;;  %v509_v56 = vadd.f32 %v504_v8, %v470_v59  ;;  %v510_v0 = vadd.f32 %v506_v48, %v471_v44  ;;  %v630_v19 = vmul.f32 %v6874_v32, %v558_v1 }
  0xc0   : >> { %v429_v15 = vadd.f32 %v424_v58, %v394_v29  ;;  %v7056_v35 = vpop.permute.xlu1 %569  ;;  %v484_v41 = vsel %vm271_vm2, %v482_v31, %v483_v51  ;;  %v519_v62 = vsel %vm311_vm3, %v517_v26, %v518_v34  ;;  %v486_v46 = vsel %vm271_vm2, %v483_v51, %v485_v42 }
  0xc1   : >> { %v597_v37 = vrot.slane %v591_v60, 1  ;;  %6520 = vset.pattern.permute.xlu1 %v6663_v16  ;;  %v490_v40 = vadd.f32 %v486_v46, %v451_v49  ;;  %v636_v4 = vrot.slane %v630_v19, 2  ;;  %v7064_v13 = vmul.f32 %v6867_v28, %v7056_v35 }
  0xc2   : >> { %v450_v39 = vadd.f32 %v448_v57, %v429_v15  ;;  %1636 = vperm.xlu1 %6520, %v6774_v3   ;;  %v521_v48 = vsel %vm311_vm3, %v518_v34, %v520_v5  ;;  %v7073_v51 = vmul.f32 %v6874_v32, %v7056_v35  ;;  %v7076_v36 = vmul.f32 %v6867_v28, %v574_v43  ;;  %v7108_v15 = vpop.permute.xlu0 %669 }
  0xc3   : >> { %v598_v61 = vsel %vm271_vm2, %v596_v30, %v597_v37  ;;  %v525_v9 = vadd.f32 %v521_v48, %v490_v40  ;;  %v577_v1 = vmul.f32 %v6862_v27, %v574_v43  ;;  %v637_v34 = vsel %vm311_vm3, %v635_v38, %v636_v4 }
  0xc4   : >> { %v489_v49 = vadd.f32 %v484_v41, %v450_v39  ;;  %v603_v11 = vadd.f32 %v598_v61, %v7010_v63  ;;  %v7085_v45 = vmul.f32 %v6862_v27, %v7056_v35  ;;  %v664_v30 = vmul.f32 %v6879_v33, %v7056_v35 }
  0xc5   : >> { %v7090_v10 = vmul.f32 %v6874_v32, %v574_v43  ;;  %v584_v59 = vpop.permute.xlu1 %583  ;;  %v527_v44 = vmax.f32 %v510_v0, %v525_v9  ;;  %v615_v58 = vrot.slane %v7064_v13, 1  ;;  %v650_v22 = vrot.slane %v7073_v51, 2 }
  0xc6   : >> { %v524_v47 = vadd.f32 %v519_v62, %v489_v49  ;;  %v642_v63 = vadd.f32 %v637_v34, %v603_v11  ;;  %1664 = vperm.xlu1 %6520, %v7015_v6   ;;  %v616_v38 = vrot.slane %v7076_v36, 1  ;;  %v7097_v31 = vmul.f32 %v6850_v24, %v574_v43  ;;  %v874_v34 = vpop.permute.xlu0 %873 }
  0xc7   : >> { %v592_v7 = vmul.f32 %v6867_v28, %v584_v59  ;;  %v529_v29 = vmax.f32 %v527_v44, 0.0  ;;  %v7101_v8 = vmul.f32 %v6855_v25, %v574_v43  ;;  %v631_v57 = vmul.f32 %v6874_v32, %v584_v59 }
  0xc8   : >> { %v526_v12 = vmax.f32 %v509_v56, %v524_v47  ;;  %v7104_v26 = vadd.f32 %v664_v30, %v642_v63  ;;  %v651_v42 = vrot.slane %v7090_v10, 2  ;;  %v665_v5 = vmul.f32 %v6879_v33, %v574_v43 }
  0xc9   : >> { %v599_v60 = vrot.slane %v592_v7, 1  ;;  %531 = vst.msk [vmem:[#allocation2 + $0x8] sm:$0xff] %vm211_vm0, %v529_v29  ;;  %v638_v19 = vrot.slane %v631_v57, 2  ;;  %v7113_v56 = vmul.f32 %v6850_v24, %v7108_v15  ;;  %v7117_v41 = vmul.f32 %v6855_v25, %v7108_v15 }
  0xca   : >> { %v528_v0 = vmax.f32 %v526_v12, 0.0  ;;  %6521 = vset.pattern.permute.xlu1 %v6664_v17  ;;  %v607_v62 = vpop.permute.xlu1 %606  ;;  %v692_v13 = vrot.slane %v7097_v31, 1  ;;  %v731_v48 = vrot.slane %v7101_v8, 2  ;;  %v676_v10 = vmul.f32 %v6879_v33, %v7108_v15 }
  0xcb   : >> { %v600_v43 = vsel %vm271_vm2, %v597_v37, %v599_v60  ;;  %v611_v46 = vmul.f32 %v6867_v28, %v607_v62  ;;  %v646_v39 = vmul.f32 %v6874_v32, %v607_v62  ;;  %v687_v40 = vmul.f32 %v6850_v24, %v607_v62  ;;  %1731 = vperm.xlu1 %6521, %v6774_v3  }
  0xcc   : >> { %530 = vst.msk [vmem:[#allocation2] sm:$0xff] %vm211_vm0, %v528_v0  ;;  %v604_v61 = vadd.f32 %v600_v43, %v7052_v14  ;;  %v639_v36 = vsel %vm311_vm3, %v636_v4, %v638_v19  ;;  %v726_v11 = vmul.f32 %v6855_v25, %v607_v62  ;;  %v7134_v59 = vmul.f32 %v6867_v28, %v874_v34 }
  0xcd   : >> { %v618_v37 = vrot.slane %v611_v46, 1  ;;  %v653_v49 = vrot.slane %v646_v39, 2  ;;  %v694_v9 = vrot.slane %v687_v40, 1  ;;  %v7137_v47 = vmul.f32 %v6874_v32, %v874_v34 }
  0xce   : >> { %v643_v30 = vadd.f32 %v639_v36, %v604_v61  ;;  %v710_v14 = vrot.slane %v7113_v56, 1  ;;  %v745_v4 = vrot.slane %v7117_v41, 2  ;;  %v733_v63 = vrot.slane %v726_v11, 2 }
  0xcf   : >> { %v619_v44 = vsel %vm271_vm2, %v616_v38, %v618_v37  ;;  %1759 = vperm.xlu1 %6521, %v7015_v6   ;;  %v7143_v31 = vpop.permute.xlu1 %673  ;;  %v7146_v12 = vsel %vm311_vm3, %v651_v42, %v653_v49  ;;  %v695_v29 = vsel %vm271_vm2, %v692_v13, %v694_v9  ;;  %v7150_v57 = vmul.f32 %v6862_v27, %v874_v34 }
  0xd0   : >> { %v667_v7 = vadd.f32 %v665_v5, %v643_v30  ;;  %v7152_v60 = vadd.f32 %v619_v44, %v577_v1  ;;  %v917_v0 = vrot.slane %v7134_v59, 1  ;;  %v956_v19 = vrot.slane %v7137_v47, 2 }
  0xd1   : >> { %v617_v56 = vsel %vm271_vm2, %v615_v58, %v616_v38  ;;  %v7159_v6 = vmul.f32 %v6943_v52, %v7143_v31  ;;  %v7163_v5 = vmul.f32 %v6948_v54, %v7143_v31  ;;  %v685_v1 = vmul.f32 %v6850_v24, %v7056_v35 }
  0xd2   : >> { %v622_v62 = vadd.f32 %v617_v56, %v7085_v45  ;;  %v699_v39 = vadd.f32 %v695_v29, %v667_v7  ;;  %v734_v58 = vsel %vm311_vm3, %v731_v48, %v733_v63  ;;  %v652_v40 = vsel %vm311_vm3, %v650_v22, %v651_v42 }
  0xd3   : >> { %v532_v43 = vld [vmem:[#allocation2] ss:$2 sm:$0xff]  ;;  %v534_v46 = vld [vmem:[#allocation2 + $0x1] ss:$2 sm:$0xff]  ;;  %6523 = vset.pattern.permute.xlu1 %v6663_v16  ;;  %v702_v38 = vpop.permute.xlu1 %701  ;;  %v705_v45 = vmul.f32 %v6850_v24, %v7143_v31  ;;  %v724_v49 = vmul.f32 %v6855_v25, %v7056_v35  ;;  %v691_v42 = vrot.slane %v685_v1, 1  ;;  %v787_v34 = vrot.slane %v7159_v6, 1 }
  0xd4   : >> { %v535_v61 = vmax.f32 %v532_v43, %v534_v46  ;;  %v706_v36 = vmul.f32 %v6850_v24, %v702_v38  ;;  %v7179_v37 = vmul.f32 %v6855_v25, %v702_v38  ;;  %1841 = vperm.xlu1 %6523, %v6774_v3   ;;  %v782_v9 = vmul.f32 %v6943_v52, %v702_v38 }
  0xd5   : >> { %v7186_v51 = vmul.f32 %v6948_v54, %v702_v38  ;;  %v657_v22 = vadd.f32 %v652_v40, %v622_v62  ;;  %v826_v30 = vrot.slane %v7163_v5, 2  ;;  %v711_v44 = vrot.slane %v705_v45, 1 }
  0xd6   : >> { %v537_v11 = vrot.slane %v535_v61, 7  ;;  %v738_v63 = vadd.f32 %v734_v58, %v699_v39  ;;  %v789_v7 = vrot.slane %v782_v9, 1  ;;  %v693_v35 = vsel %vm271_vm2, %v691_v42, %v692_v13  ;;  %v765_v58 = vpop.permute.xlu0 %764 }
  0xd7   : >> { %v678_v29 = vadd.f32 %v676_v10, %v657_v22  ;;  %v698_v62 = vadd.f32 %v693_v35, %v7104_v26  ;;  %v712_v1 = vsel %vm271_vm2, %v710_v14, %v711_v44  ;;  %v713_v6 = vrot.slane %v706_v36, 1 }
  0xd8   : >> { %v540_v56 = vsel %vm539_vm4, 0.0, %v537_v11  ;;  %v541_v43 = vsel %vm539_vm4, %v537_v11, 0.0  ;;  %6524 = vset.pattern.permute.xlu1 %v6664_v17  ;;  %v769_v46 = vpop.permute.xlu1 %768  ;;  %v748_v10 = vrot.slane %v7179_v37, 2  ;;  %v828_v13 = vrot.slane %v7186_v51, 2  ;;  %v7216_v37 = vld [vmem:[%s6766_s11 + $0x10] sm:$0x3] }
  0xd9   : >> { %5554 = vst.msk [vmem:[%s6794_s13 + $0xa] sm:$0xff] %vm211_vm0, %v540_v56  ;;  %v730_v39 = vrot.slane %v724_v49, 2  ;;  %1853 = vperm.xlu1 %6524, %v6769_v2   ;;  %v790_v26 = vsel %vm271_vm2, %v787_v34, %v789_v7  ;;  %v717_v14 = vadd.f32 %v712_v1, %v678_v29  ;;  %v740_v38 = vmul.f32 %v6855_v25, %v7143_v31 }
  0xda   : >> { %5555 = vst.msk [vmem:[%s6794_s13 + $0x12] sm:$0x3] %vm213_vm1, %v541_v43  ;;  %v759_v40 = vmul.f32 %v7005_v55, %v7108_v15  ;;  %v760_v61 = vmul.f32 %v7005_v55, %v7143_v31  ;;  %v799_v36 = vmul.f32 %v6943_v52, %v765_v58  ;;  %v834_v2 = vmul.f32 %v6948_v54, %v765_v58 }
  0xdb   : >> { %v732_v45 = vsel %vm311_vm3, %v730_v39, %v731_v48  ;;  %v746_v9 = vrot.slane %v740_v38, 2  ;;  %v771_v51 = vmul.f32 %v7005_v55, %v765_v58  ;;  %v677_v22 = vmul.f32 %v6879_v33, %v7143_v31 }
  0xdc   : >> { %v737_v49 = vadd.f32 %v732_v45, %v698_v62  ;;  %v797_v42 = vpop.permute.xlu1 %796  ;;  %v762_v8 = vadd.f32 %v760_v61, %v738_v63  ;;  %v805_v11 = vrot.slane %v799_v36, 1  ;;  %v714_v48 = vsel %vm271_vm2, %v711_v44, %v713_v6 }
  0xdd   : >> { %v658_v7 = vadd.f32 %v7146_v12, %v7152_v60  ;;  %6525 = vset.pattern.permute.xlu1 %v6663_v16  ;;  %v747_v29 = vsel %vm311_vm3, %v745_v4, %v746_v9  ;;  %v840_v35 = vrot.slane %v834_v2, 2  ;;  %v772_v56 = vmul.f32 %v7005_v55, %v769_v46 }
  0xde   : >> { %v780_v31 = vmul.f32 %v6943_v52, %v7108_v15  ;;  %1867 = vperm.xlu1 %6525, %v7216_v37   ;;  %v752_v63 = vadd.f32 %v747_v29, %v717_v14  ;;  %v800_v44 = vmul.f32 %v6943_v52, %v769_v46  ;;  %v819_v12 = vmul.f32 %v6948_v54, %v7108_v15 }
  0xdf   : >> { %v679_v43 = vadd.f32 %v677_v22, %v658_v7  ;;  %v761_v16 = vadd.f32 %v759_v40, %v737_v49  ;;  %v835_v41 = vmul.f32 %v6948_v54, %v769_v46  ;;  %v801_v4 = vmul.f32 %v6943_v52, %v797_v42 }
  0xe0   : >> { %v786_v60 = vrot.slane %v780_v31, 1  ;;  %v749_v62 = vsel %vm311_vm3, %v746_v9, %v748_v10  ;;  %v806_v6 = vrot.slane %v800_v44, 1  ;;  %v825_v39 = vrot.slane %v819_v12, 2 }
  0xe1   : >> { %v718_v1 = vadd.f32 %v714_v48, %v679_v43  ;;  %v879_v58 = vpop.permute.xlu1 %878  ;;  %v773_v38 = vadd.f32 %v771_v51, %v752_v63  ;;  %v841_v45 = vrot.slane %v835_v41, 2  ;;  %v808_v61 = vrot.slane %v801_v4, 1 }
  0xe2   : >> { %v788_v14 = vsel %vm271_vm2, %v786_v60, %v787_v34  ;;  %6526 = vset.pattern.permute.xlu1 %v6664_v17  ;;  %v807_v36 = vsel %vm271_vm2, %v805_v11, %v806_v6  ;;  %v794_v46 = vadd.f32 %v790_v26, %v762_v8  ;;  %v829_v10 = vsel %vm311_vm3, %v826_v30, %v828_v13 }
  0xe3   : >> { %v753_v15 = vadd.f32 %v749_v62, %v718_v1  ;;  %v793_v40 = vadd.f32 %v788_v14, %v761_v16  ;;  %1890 = vperm.xlu1 %6526, %v7216_v37   ;;  %v812_v2 = vadd.f32 %v807_v36, %v773_v38  ;;  %v809_v49 = vsel %vm271_vm2, %v806_v6, %v808_v61 }
  0xe4   : >> { %v836_v34 = vmul.f32 %v6948_v54, %v797_v42  ;;  %v827_v17 = vsel %vm311_vm3, %v825_v39, %v826_v30  ;;  %v842_v51 = vsel %vm311_vm3, %v840_v35, %v841_v45  ;;  %v7252_v26 = vmul.f32 %v6867_v28, %v879_v58 }
  0xe5   : >> { %v774_v9 = vadd.f32 %v772_v56, %v753_v15  ;;  %v832_v22 = vadd.f32 %v827_v17, %v793_v40  ;;  %v847_v8 = vadd.f32 %v842_v51, %v812_v2  ;;  %v7255_v13 = vmul.f32 %v6874_v32, %v879_v58  ;;  %v895_v56 = vpop.permute.xlu0 %894 }
  0xe6   : >> { %v843_v11 = vrot.slane %v836_v34, 2  ;;  %v891_v48 = vpop.permute.xlu1 %890  ;;  %v833_v29 = vadd.f32 %v829_v10, %v794_v46  ;;  %v886_v42 = vmul.f32 %v6862_v27, %v879_v58  ;;  %v918_v5 = vrot.slane %v7252_v26, 1 }
  0xe7   : >> { %v813_v7 = vadd.f32 %v809_v49, %v774_v9  ;;  %6528 = vset.pattern.permute.xlu1 %v6665_v18  ;;  %v849_v30 = vmax.f32 %v832_v22, %v847_v8  ;;  %v957_v31 = vrot.slane %v7255_v13, 2  ;;  %v7263_v63 = vmul.f32 %v6862_v27, %v895_v56 }
  0xe8   : >> { %v844_v35 = vsel %vm311_vm3, %v841_v45, %v843_v11  ;;  %1957 = vperm.xlu1 %6528, %v6774_v3   ;;  %v919_v44 = vsel %vm271_vm2, %v917_v0, %v918_v5  ;;  %v7270_v12 = vmul.f32 %v6867_v28, %v891_v48  ;;  %v7273_v16 = vmul.f32 %v6874_v32, %v891_v48 }
  0xe9   : >> { %v848_v43 = vadd.f32 %v844_v35, %v813_v7  ;;  %v851_v60 = vmax.f32 %v849_v30, 0.0  ;;  %v924_v41 = vadd.f32 %v919_v44, %v7150_v57  ;;  %v958_v4 = vsel %vm311_vm3, %v956_v19, %v957_v31  ;;  %v7303_v46 = vpop.permute.xlu0 %990 }
  0xea   : >> { %v7280_v3 = vmul.f32 %v6862_v27, %v891_v48  ;;  %v1006_v59 = vmul.f32 %v6850_v24, %v891_v48  ;;  %v7284_v0 = vmul.f32 %v6855_v25, %v891_v48  ;;  %v7287_v1 = vmul.f32 %v6867_v28, %v895_v56 }
  0xeb   : >> { %v850_v62 = vmax.f32 %v833_v29, %v848_v43  ;;  %v905_v6 = vpop.permute.xlu1 %904  ;;  %853 = vst.msk [vmem:[#allocation2] sm:$0xff] %vm211_vm0, %v851_v60  ;;  %v963_v57 = vadd.f32 %v958_v4, %v924_v41  ;;  %v7291_v47 = vmul.f32 %v6874_v32, %v895_v56  ;;  %v1007_v19 = vmul.f32 %v6850_v24, %v895_v56 }
  0xec   : >> { %v7295_v39 = vmul.f32 %v6855_v25, %v895_v56  ;;  %1985 = vperm.xlu1 %6528, %v7216_v37   ;;  %v936_v38 = vrot.slane %v7270_v12, 1  ;;  %v971_v14 = vrot.slane %v7273_v16, 2  ;;  %v985_v45 = vmul.f32 %v6879_v33, %v891_v48 }
  0xed   : >> { %v852_v58 = vmax.f32 %v850_v62, 0.0  ;;  %v1012_v61 = vrot.slane %v1006_v59, 1  ;;  %v1051_v15 = vrot.slane %v7284_v0, 2  ;;  %v937_v40 = vrot.slane %v7287_v1, 1  ;;  %v1195_v35 = vpop.permute.xlu0 %1194 }
  0xee   : >> { %v1013_v36 = vrot.slane %v1007_v19, 1  ;;  %v7306_v10 = vadd.f32 %v985_v45, %v963_v57  ;;  %v972_v2 = vrot.slane %v7291_v47, 2  ;;  %v913_v49 = vmul.f32 %v6867_v28, %v905_v6 }
  0xef   : >> { %854 = vst.msk [vmem:[#allocation2 + $0x8] sm:$0xff] %vm211_vm0, %v852_v58  ;;  %v952_v34 = vmul.f32 %v6874_v32, %v905_v6  ;;  %v1052_v9 = vrot.slane %v7295_v39, 2  ;;  %v986_v17 = vmul.f32 %v6879_v33, %v895_v56  ;;  %v7315_v51 = vmul.f32 %v6850_v24, %v7303_v46 }
  0xf0   : >> { %v7319_v26 = vmul.f32 %v6855_v25, %v7303_v46  ;;  %2162 = vperm.xlu1 %6528, %v6930_v50   ;;  %v928_v22 = vpop.permute.xlu1 %927  ;;  %v920_v8 = vrot.slane %v913_v49, 1  ;;  %v7325_v7 = vsel %vm271_vm2, %v1012_v61, %v1013_v36  ;;  %v7329_v29 = vmul.f32 %v6879_v33, %v7303_v46 }
  0xf1   : >> { %v959_v11 = vrot.slane %v952_v34, 2  ;;  %v932_v13 = vmul.f32 %v6867_v28, %v928_v22  ;;  %v967_v48 = vmul.f32 %v6874_v32, %v928_v22  ;;  %v1008_v56 = vmul.f32 %v6850_v24, %v928_v22  ;;  %v1086_v47 = vpop.permute.xlu0 %1085 }
  0xf2   : >> { %v1047_v30 = vmul.f32 %v6855_v25, %v928_v22  ;;  %v921_v43 = vsel %vm271_vm2, %v918_v5, %v920_v8  ;;  %v7335_v60 = vmul.f32 %v6862_v27, %v1195_v35  ;;  %v1031_v4 = vrot.slane %v7315_v51, 1 }
  0xf3   : >> { %v939_v44 = vrot.slane %v932_v13, 1  ;;  %v974_v12 = vrot.slane %v967_v48, 2  ;;  %v925_v41 = vadd.f32 %v921_v43, %v886_v42  ;;  %v1015_v62 = vrot.slane %v1008_v56, 1 }
  0xf4   : >> { %v1054_v59 = vrot.slane %v1047_v30, 2  ;;  %6530 = vset.pattern.permute.xlu1 %v6666_v20  ;;  %v960_v1 = vsel %vm311_vm3, %v957_v31, %v959_v11  ;;  %v1066_v6 = vrot.slane %v7319_v26, 2  ;;  %v7344_v19 = vmul.f32 %v6867_v28, %v1195_v35 }
  0xf5   : >> { %v940_v57 = vsel %vm271_vm2, %v937_v40, %v939_v44  ;;  %2178 = vperm.xlu1 %6530, %v6930_v50   ;;  %v995_v5 = vpop.permute.xlu1 %994  ;;  %v964_v58 = vadd.f32 %v960_v1, %v925_v41  ;;  %v975_v61 = vsel %vm311_vm3, %v972_v2, %v974_v12  ;;  %v7351_v31 = vmul.f32 %v6874_v32, %v1195_v35 }
  0xf6   : >> { %v855_v27 = vld [vmem:[#allocation2] ss:$2 sm:$0xff]  ;;  %v856_v42 = vld [vmem:[#allocation2 + $0x1] ss:$2 sm:$0xff]  ;;  %v944_v45 = vadd.f32 %v940_v57, %v7263_v63  ;;  %v1016_v34 = vsel %vm271_vm2, %v1013_v36, %v1015_v62  ;;  %v1026_v51 = vmul.f32 %v6850_v24, %v995_v5  ;;  %v938_v28 = vsel %vm271_vm2, %v936_v38, %v937_v40 }
  0xf7   : >> { %v857_v49 = vmax.f32 %v855_v27, %v856_v42  ;;  %v988_v26 = vadd.f32 %v986_v17, %v964_v58  ;;  %v1055_v22 = vsel %vm311_vm3, %v1052_v9, %v1054_v59  ;;  %v998_v63 = vmul.f32 %v6879_v33, %v995_v5 }
  0xf8   : >> { %v1061_v8 = vmul.f32 %v6855_v25, %v995_v5  ;;  %v979_v32 = vadd.f32 %v975_v61, %v944_v45  ;;  %v1238_v13 = vrot.slane %v7344_v19, 1  ;;  %v7364_v36 = vmul.f32 %v6943_v52, %v995_v5 }
  0xf9   : >> { %v859_v11 = vrot.slane %v857_v49, 7  ;;  %6531 = vset.pattern.permute.xlu1 %v6665_v18  ;;  %v1023_v38 = vpop.permute.xlu1 %1022  ;;  %v1020_v40 = vadd.f32 %v1016_v34, %v988_v26  ;;  %v7367_v17 = vmul.f32 %v6948_v54, %v995_v5  ;;  %v1032_v35 = vrot.slane %v1026_v51, 1 }
  0xfa   : >> { %v1027_v33 = vmul.f32 %v6850_v24, %v1023_v38  ;;  %v1062_v48 = vmul.f32 %v6855_v25, %v1023_v38  ;;  %2188 = vperm.xlu1 %6531, %v6836_v21   ;;  %v1103_v18 = vmul.f32 %v6943_v52, %v1023_v38  ;;  %v1067_v44 = vrot.slane %v1061_v8, 2 }
  0xfb   : >> { %v861_v56 = vsel %vm539_vm4, 0.0, %v859_v11  ;;  %v862_v30 = vsel %vm539_vm4, %v859_v11, 0.0  ;;  %v1059_v43 = vadd.f32 %v1055_v22, %v1020_v40  ;;  %v1277_v12 = vrot.slane %v7351_v31, 2 }
  0xfc   : >> { %5565 = vst.msk [vmem:[%s6794_s13 + $0x14] sm:$0xff] %vm211_vm0, %v861_v56  ;;  %v1108_v24 = vrot.slane %v7364_v36, 1  ;;  %v1147_v21 = vrot.slane %v7367_v17, 2  ;;  %v1110_v25 = vrot.slane %v1103_v18, 1  ;;  %v7383_v41 = vmul.f32 %v6948_v54, %v1023_v38  ;;  %v6547_v17 = vld [vmem:[%s9156_s1] ss:$0 sm:$0xff] }
  0xfd   : >> { %5566 = vst.msk [vmem:[%s6794_s13 + $0x1c] sm:$0x3] %vm213_vm1, %v862_v30  ;;  %v943_v62 = vadd.f32 %v938_v28, %v7280_v3  ;;  %v1034_v59 = vrot.slane %v1027_v33, 1  ;;  %v1069_v1 = vrot.slane %v1062_v48, 2  ;;  %v973_v57 = vsel %vm311_vm3, %v971_v14, %v972_v2  ;;  %v6543_v14 = vld [vmem:[%s6766_s11] sm:$0xff] }
  0xfe   : >> { %v1019_v27 = vadd.f32 %v7325_v7, %v7306_v10  ;;  %6532 = vset.pattern.permute.xlu1 %v6666_v20  ;;  %v1090_v42 = vpop.permute.xlu1 %1089  ;;  %v1033_v45 = vsel %vm271_vm2, %v1031_v4, %v1032_v35  ;;  %v1053_v3 = vsel %vm311_vm3, %v1051_v15, %v1052_v9  ;;  %v1080_v16 = vmul.f32 %v7005_v55, %v7303_v46 }
  0xff   : >> { %v978_v58 = vadd.f32 %v973_v57, %v943_v62  ;;  %2048 = vperm.xlu1 %6532, %v6543_v14   ;;  %v1068_v10 = vsel %vm311_vm3, %v1066_v6, %v1067_v44  ;;  %v1081_v20 = vmul.f32 %v7005_v55, %v995_v5  ;;  %v1120_v7 = vmul.f32 %v6943_v52, %v1086_v47 }
 0x100   : >> { %v1058_v2 = vadd.f32 %v1053_v3, %v1019_v27  ;;  %v1111_v4 = vsel %vm271_vm2, %v1108_v24, %v1110_v25  ;;  %v1149_v39 = vrot.slane %v7383_v41, 2  ;;  %v1155_v15 = vmul.f32 %v6948_v54, %v1086_v47 }
 0x101   : >> { %v999_v0 = vadd.f32 %v7329_v29, %v978_v58  ;;  %v1083_v61 = vadd.f32 %v1081_v20, %v1059_v43  ;;  %v1092_v49 = vmul.f32 %v7005_v55, %v1086_v47  ;;  %v1035_v34 = vsel %vm271_vm2, %v1032_v35, %v1034_v59 }
 0x102   : >> { %v1082_v9 = vadd.f32 %v1080_v16, %v1058_v2  ;;  %v1118_v51 = vpop.permute.xlu1 %1117  ;;  %v1126_v28 = vrot.slane %v1120_v7, 1  ;;  %v1070_v5 = vsel %vm311_vm3, %v1067_v44, %v1069_v1  ;;  %v1000_v26 = vadd.f32 %v998_v63, %v979_v32  ;;  %v7454_v7 = vld [vmem:[%s6766_s11 + $0x10] sm:$0x3] }
 0x103   : >> { %v1038_v6 = vadd.f32 %v1033_v45, %v999_v0  ;;  %2080 = vperm.xlu1 %6532, %v7216_v37   ;;  %v1101_v22 = vmul.f32 %v6943_v52, %v7303_v46  ;;  %v1121_v29 = vmul.f32 %v6943_v52, %v1090_v42  ;;  %v1140_v8 = vmul.f32 %v6948_v54, %v7303_v46  ;;  %v1216_v45 = vpop.permute.xlu0 %1215 }
 0x104   : >> { %v1156_v11 = vmul.f32 %v6948_v54, %v1090_v42  ;;  %v1161_v38 = vrot.slane %v1155_v15, 2  ;;  %v1039_v40 = vadd.f32 %v1035_v34, %v1000_v26  ;;  %v1122_v33 = vmul.f32 %v6943_v52, %v1118_v51  ;;  %v7468_v15 = vld [vmem:[%s9156_s1 + $0x4] ss:$0 sm:$0xff] }
 0x105   : >> { %v1073_v36 = vadd.f32 %v1068_v10, %v1038_v6  ;;  %v1107_v48 = vrot.slane %v1101_v22, 1  ;;  %v1127_v56 = vrot.slane %v1121_v29, 1  ;;  %v1146_v63 = vrot.slane %v1140_v8, 2 }
 0x106   : >> { %v1162_v32 = vrot.slane %v1156_v11, 2  ;;  %v1074_v30 = vadd.f32 %v1070_v5, %v1039_v40  ;;  %v1093_v35 = vmul.f32 %v7005_v55, %v1090_v42  ;;  %v1129_v18 = vrot.slane %v1122_v33, 1  ;;  %v7443_v42 = vld [vmem:[%s9156_s1 + $0x2] ss:$0 sm:$0xff] }
 0x107   : >> { %v1094_v37 = vadd.f32 %v1092_v49, %v1073_v36  ;;  %6534 = vset.pattern.permute.xlu1 %v6667_v23  ;;  %v1200_v43 = vpop.permute.xlu1 %1199  ;;  %v1109_v46 = vsel %vm271_vm2, %v1107_v48, %v1108_v24  ;;  %v1128_v44 = vsel %vm271_vm2, %v1126_v28, %v1127_v56  ;;  %v1148_v52 = vsel %vm311_vm3, %v1146_v63, %v1147_v21  ;;  %v7435_v24 = vld [vmem:[%s9156_s1 + $0x1] ss:$0 sm:$0xff] }
 0x108   : >> { %v1115_v25 = vadd.f32 %v1111_v4, %v1083_v61  ;;  %2278 = vperm.xlu1 %6534, %v6930_v50   ;;  %v1095_v41 = vadd.f32 %v1093_v35, %v1074_v30  ;;  %v1114_v62 = vadd.f32 %v1109_v46, %v1082_v9  ;;  %v1130_v55 = vsel %vm271_vm2, %v1127_v56, %v1129_v18  ;;  %v7473_v9 = vld [vmem:[%s9156_s1 + $0x5] ss:$0 sm:$0xff]  ;;  %v7519_v30 = vpop.permute.xlu0 %1311 }
 0x109   : >> { %v1133_v59 = vadd.f32 %v1128_v44, %v1094_v37  ;;  %v1163_v1 = vsel %vm311_vm3, %v1161_v38, %v1162_v32  ;;  %v1157_v57 = vmul.f32 %v6948_v54, %v1118_v51  ;;  %v7438_v27 = vmul.f32 %v7435_v24, %v1200_v43 }
 0x10a   : >> { %v7446_v58 = vmul.f32 %v7443_v42, %v1200_v43  ;;  %v1150_v54 = vsel %vm311_vm3, %v1147_v21, %v1149_v39  ;;  %v1153_v3 = vadd.f32 %v1148_v52, %v1114_v62  ;;  %v1134_v47 = vadd.f32 %v1130_v55, %v1095_v41  ;;  %v7463_v39 = vld [vmem:[%s9156_s1 + $0x3] ss:$0 sm:$0xff]  ;;  %v7534_v62 = vld [vmem:[%s6766_s11 + $0x8] sm:$0xff] }
 0x10b   : >> { %v1168_v16 = vadd.f32 %v1163_v1, %v1133_v59  ;;  %v1154_v14 = vadd.f32 %v1150_v54, %v1115_v25  ;;  %v1164_v2 = vrot.slane %v1157_v57, 2  ;;  %v1239_v10 = vrot.slane %v7438_v27, 1  ;;  %v7545_v27 = vld [vmem:[%s9156_s1 + $0x1] ss:$0 sm:$0xff] }
 0x10c   : >> { %v1278_v20 = vrot.slane %v7446_v58, 2  ;;  %2306 = vperm.xlu1 %6534, %v7454_v7   ;;  %v1212_v4 = vpop.permute.xlu1 %1211  ;;  %v1207_v21 = vmul.f32 %v6547_v17, %v1200_v43  ;;  %v7475_v61 = vmul.f32 %v6547_v17, %v1216_v45  ;;  %v7478_v49 = vmul.f32 %v7435_v24, %v1216_v45  ;;  %v7576_v58 = vld [vmem:[%s9156_s1] ss:$0 sm:$0xff] }
 0x10d   : >> { %v1170_v0 = vmax.f32 %v1153_v3, %v1168_v16  ;;  %v1165_v34 = vsel %vm311_vm3, %v1162_v32, %v1164_v2  ;;  %v1240_v51 = vsel %vm271_vm2, %v1238_v13, %v1239_v10  ;;  %v7484_v6 = vmul.f32 %v6547_v17, %v1212_v4  ;;  %v7569_v17 = vld [vmem:[%s6766_s11] sm:$0xff] }
 0x10e   : >> { %v7487_v28 = vmul.f32 %v7435_v24, %v1212_v4  ;;  %v1169_v26 = vadd.f32 %v1165_v34, %v1134_v47  ;;  %v1245_v22 = vadd.f32 %v1240_v51, %v7335_v60  ;;  %v7491_v29 = vmul.f32 %v7443_v42, %v1212_v4 }
 0x10f   : >> { %v1172_v5 = vmax.f32 %v1170_v0, 0.0  ;;  %v1279_v19 = vsel %vm311_vm3, %v1277_v12, %v1278_v20  ;;  %v1306_v13 = vmul.f32 %v7463_v39, %v1212_v4  ;;  %v1327_v8 = vmul.f32 %v7468_v15, %v1212_v4 }
 0x110   : >> { %v7501_v11 = vmul.f32 %v7473_v9, %v1212_v4  ;;  %2483 = vperm.xlu1 %6534, %v6930_v50   ;;  %v1171_v60 = vmax.f32 %v1154_v14, %v1169_v26  ;;  %v1284_v36 = vadd.f32 %v1279_v19, %v1245_v22  ;;  %v7506_v38 = vmul.f32 %v7443_v42, %v1216_v45  ;;  %v7585_v26 = vld [vmem:[%s6766_s11 + $0x10] sm:$0x3] }
 0x111   : >> { %1174 = vst.msk [vmem:[#allocation2] sm:$0xff] %vm211_vm0, %v1172_v5  ;;  %v7509_v31 = vmul.f32 %v7468_v15, %v1216_v45  ;;  %v1226_v12 = vpop.permute.xlu1 %1225  ;;  %v1257_v40 = vrot.slane %v7487_v28, 1  ;;  %v1333_v33 = vrot.slane %v1327_v8, 1  ;;  %v7513_v48 = vmul.f32 %v7473_v9, %v1216_v45 }
 0x112   : >> { %v1234_v56 = vmul.f32 %v7435_v24, %v1226_v12  ;;  %v1173_v50 = vmax.f32 %v1171_v60, 0.0  ;;  %v1292_v63 = vrot.slane %v7491_v29, 2  ;;  %v1258_v32 = vrot.slane %v7478_v49, 1 }
 0x113   : >> { %v1334_v37 = vrot.slane %v7509_v31, 1  ;;  %v7521_v35 = vadd.f32 %v1306_v13, %v1284_v36  ;;  %v1372_v18 = vrot.slane %v7501_v11, 2  ;;  %v1273_v46 = vmul.f32 %v7443_v42, %v1226_v12  ;;  %v7597_v36 = vld [vmem:[%s9156_s1 + $0x7] ss:$0 sm:$0xff] }
 0x114   : >> { %v1241_v43 = vrot.slane %v1234_v56, 1  ;;  %6536 = vset.pattern.permute.xlu1 %v6668_v53  ;;  %1175 = vst.msk [vmem:[#allocation2 + $0x8] sm:$0xff] %vm211_vm0, %v1173_v50  ;;  %v1293_v44 = vrot.slane %v7506_v38, 2  ;;  %v1373_v25 = vrot.slane %v7513_v48, 2  ;;  %v1307_v41 = vmul.f32 %v7463_v39, %v1216_v45  ;;  %v7550_v45 = vld [vmem:[%s9156_s1 + $0x2] ss:$0 sm:$0xff] }
 0x115   : >> { %v7529_v52 = vsel %vm271_vm2, %v1333_v33, %v1334_v37  ;;  %2499 = vperm.xlu1 %6536, %v7534_v62   ;;  %v1280_v55 = vrot.slane %v1273_v46, 2  ;;  %v7540_v1 = vmul.f32 %v7463_v39, %v7519_v30  ;;  %v7554_v3 = vmul.f32 %v7468_v15, %v7519_v30 }
 0x116   : >> { %v1242_v59 = vsel %vm271_vm2, %v1239_v10, %v1241_v43  ;;  %v1249_v57 = vpop.permute.xlu1 %1248  ;;  %v7558_v16 = vmul.f32 %v7473_v9, %v7519_v30  ;;  %v6669_v14 = vmov 16   ;;  %v1259_v43 = vsel %vm271_vm2, %v1257_v40, %v1258_v32 }
 0x117   : >> { %v1246_v54 = vadd.f32 %v1242_v59, %v1207_v21  ;;  %v1253_v47 = vmul.f32 %v7435_v24, %v1249_v57  ;;  %6539 = vset.pattern.permute.xlu0 %v6669_v14  ;;  %v1281_v2 = vsel %vm311_vm3, %v1278_v20, %v1280_v55  ;;  %v1288_v10 = vmul.f32 %v7443_v42, %v1249_v57  ;;  %v1516_v21 = vpop.permute.xlu0 %1515 }
 0x118   : >> { %v1329_v4 = vmul.f32 %v7468_v15, %v1249_v57  ;;  %v1368_v0 = vmul.f32 %v7473_v9, %v1249_v57  ;;  %2595 = vperm.xlu0 %6539, %v7569_v17   ;;  %v7579_v42 = vmul.f32 %v7545_v27, %v1516_v21  ;;  %v7582_v20 = vmul.f32 %v7550_v45, %v1516_v21  ;;  %v7610_v57 = vld [vmem:[%s9156_s1 + $0x8] ss:$0 sm:$0xff] }
 0x119   : >> { %v1285_v24 = vadd.f32 %v1281_v2, %v1246_v54  ;;  %v1260_v49 = vrot.slane %v1253_v47, 1  ;;  %6537 = vset.pattern.permute.xlu1 %v6667_v23  ;;  %v1295_v34 = vrot.slane %v1288_v10, 2  ;;  %v7589_v23 = vmul.f32 %v7576_v58, %v1516_v21 }
 0x11a   : >> { %v1336_v51 = vrot.slane %v1329_v4, 1  ;;  %v1375_v5 = vrot.slane %v1368_v0, 2  ;;  %2509 = vperm.xlu1 %6537, %v7585_v26   ;;  %v1352_v19 = vrot.slane %v7554_v3, 1  ;;  %v1387_v13 = vrot.slane %v7558_v16, 2 }
 0x11b   : >> { %v1309_v22 = vadd.f32 %v1307_v41, %v1285_v24  ;;  %v1261_v8 = vsel %vm271_vm2, %v1258_v32, %v1260_v49  ;;  %v1316_v60 = vpop.permute.xlu1 %1315  ;;  %v1176_v31 = vld [vmem:[#allocation2] ss:$2 sm:$0xff]  ;;  %v1177_v12 = vld [vmem:[#allocation2 + $0x1] ss:$2 sm:$0xff]  ;;  %v1559_v50 = vrot.slane %v7579_v42, 1  ;;  %v1598_v55 = vrot.slane %v7582_v20, 2 }
 0x11c   : >> { %v1265_v33 = vadd.f32 %v1261_v8, %v7475_v61  ;;  %v1337_v56 = vsel %vm271_vm2, %v1334_v37, %v1336_v51  ;;  %v1178_v46 = vmax.f32 %v1176_v31, %v1177_v12  ;;  %v1347_v59 = vmul.f32 %v7468_v15, %v1316_v60 }
 0x11d   : >> { %v1341_v41 = vadd.f32 %v1337_v56, %v1309_v22  ;;  %v1296_v61 = vsel %vm311_vm3, %v1293_v44, %v1295_v34  ;;  %v1376_v28 = vsel %vm311_vm3, %v1373_v25, %v1375_v5  ;;  %v1319_v40 = vmul.f32 %v7463_v39, %v1316_v60  ;;  %v7637_v34 = vld [vmem:[%s9156_s1 + $0x6] ss:$0 sm:$0xff] }
 0x11e   : >> { %v1382_v32 = vmul.f32 %v7473_v9, %v1316_v60  ;;  %6538 = vset.pattern.permute.xlu1 %v6668_v53  ;;  %v1180_v37 = vrot.slane %v1178_v46, 7  ;;  %v1300_v54 = vadd.f32 %v1296_v61, %v1265_v33  ;;  %v7623_v3 = vmul.f32 %v7597_v36, %v1316_v60 }
 0x11f   : >> { %2369 = vperm.xlu1 %6538, %v7569_v17   ;;  %v1344_v16 = vpop.permute.xlu1 %1343  ;;  %v1264_v47 = vadd.f32 %v1259_v43, %v7484_v6  ;;  %v1380_v2 = vadd.f32 %v1376_v28, %v1341_v41  ;;  %v1353_v10 = vrot.slane %v1347_v59, 1  ;;  %v7627_v4 = vmul.f32 %v7610_v57, %v1316_v60 }
 0x120   : >> { %v1348_v0 = vmul.f32 %v7468_v15, %v1344_v16  ;;  %v1182_v53 = vsel %vm539_vm4, 0.0, %v1180_v37  ;;  %v1183_v21 = vsel %vm539_vm4, %v1180_v37, 0.0  ;;  %v1383_v24 = vmul.f32 %v7473_v9, %v1344_v16 }
 0x121   : >> { %v1424_v49 = vmul.f32 %v7597_v36, %v1344_v16  ;;  %5576 = vst.msk [vmem:[%s6794_s13 + $0x1e] sm:$0xff] %vm211_vm0, %v1182_v53  ;;  %v1388_v6 = vrot.slane %v1382_v32, 2  ;;  %v7644_v51 = vmul.f32 %v7610_v57, %v1344_v16  ;;  %v1294_v5 = vsel %vm311_vm3, %v1292_v63, %v1293_v44  ;;  %v1407_v63 = vpop.permute.xlu0 %1406 }
 0x122   : >> { %5577 = vst.msk [vmem:[%s6794_s13 + $0x26] sm:$0x3] %vm213_vm1, %v1183_v21  ;;  %v1340_v22 = vadd.f32 %v7529_v52, %v7521_v35  ;;  %v1429_v8 = vrot.slane %v7623_v3, 1  ;;  %v1355_v31 = vrot.slane %v1348_v0, 1  ;;  %v1299_v33 = vadd.f32 %v1294_v5, %v1264_v47 }
 0x123   : >> { %v1431_v12 = vrot.slane %v1424_v49, 1  ;;  %2401 = vperm.xlu1 %6538, %v7454_v7   ;;  %v1468_v56 = vrot.slane %v7627_v4, 2  ;;  %v1354_v43 = vsel %vm271_vm2, %v1352_v19, %v1353_v10  ;;  %v1374_v29 = vsel %vm311_vm3, %v1372_v18, %v1373_v25 }
 0x124   : >> { %v1401_v38 = vmul.f32 %v7637_v34, %v7519_v30  ;;  %v1411_v35 = vpop.permute.xlu1 %1410  ;;  %v1390_v44 = vrot.slane %v1383_v24, 2  ;;  %v1470_v52 = vrot.slane %v7644_v51, 2  ;;  %v1320_v7 = vadd.f32 %v7540_v1, %v1299_v33 }
 0x125   : >> { %v1379_v46 = vadd.f32 %v1374_v29, %v1340_v22  ;;  %v1389_v41 = vsel %vm311_vm3, %v1387_v13, %v1388_v6  ;;  %v1402_v19 = vmul.f32 %v7637_v34, %v1316_v60  ;;  %v1441_v48 = vmul.f32 %v7597_v36, %v1407_v63 }
 0x126   : >> { %v1476_v11 = vmul.f32 %v7610_v57, %v1407_v63  ;;  %v1432_v18 = vsel %vm271_vm2, %v1429_v8, %v1431_v12  ;;  %v1359_v25 = vadd.f32 %v1354_v43, %v1320_v7  ;;  %v1413_v59 = vmul.f32 %v7637_v34, %v1407_v63 }
 0x127   : >> { %v1356_v61 = vsel %vm271_vm2, %v1353_v10, %v1355_v31  ;;  %6540 = vset.pattern.permute.xlu1 %v6669_v14  ;;  %v1403_v28 = vadd.f32 %v1401_v38, %v1379_v46  ;;  %v1404_v1 = vadd.f32 %v1402_v19, %v1380_v2  ;;  %v1447_v32 = vrot.slane %v1441_v48, 1 }
 0x128   : >> { %v1321_v37 = vadd.f32 %v1319_v40, %v1300_v54  ;;  %2599 = vperm.xlu1 %6540, %v7534_v62   ;;  %v1439_v13 = vpop.permute.xlu1 %1438  ;;  %v1394_v60 = vadd.f32 %v1389_v41, %v1359_v25  ;;  %v1482_v3 = vrot.slane %v1476_v11, 2  ;;  %v1422_v16 = vmul.f32 %v7597_v36, %v7519_v30  ;;  %v1537_v25 = vpop.permute.xlu0 %1536 }
 0x129   : >> { %v1442_v47 = vmul.f32 %v7597_v36, %v1411_v35  ;;  %v1391_v4 = vsel %vm311_vm3, %v1388_v6, %v1390_v44  ;;  %v1461_v14 = vmul.f32 %v7610_v57, %v7519_v30  ;;  %v1477_v2 = vmul.f32 %v7610_v57, %v1411_v35 }
 0x12a   : >> { %v1360_v0 = vadd.f32 %v1356_v61, %v1321_v37  ;;  %v1414_v40 = vmul.f32 %v7637_v34, %v1411_v35  ;;  %v1428_v54 = vrot.slane %v1422_v16, 1  ;;  %v1443_v53 = vmul.f32 %v7597_v36, %v1439_v13 }
 0x12b   : >> { %v1448_v10 = vrot.slane %v1442_v47, 1  ;;  %v1415_v21 = vadd.f32 %v1413_v59, %v1394_v60  ;;  %v1467_v49 = vrot.slane %v1461_v14, 2  ;;  %v1483_v51 = vrot.slane %v1477_v2, 2 }
 0x12c   : >> { %v1395_v24 = vadd.f32 %v1391_v4, %v1360_v0  ;;  %2627 = vperm.xlu1 %6540, %v7585_v26   ;;  %v1430_v6 = vsel %vm271_vm2, %v1428_v54, %v1429_v8  ;;  %v1450_v22 = vrot.slane %v1443_v53, 1  ;;  %v1478_v30 = vmul.f32 %v7610_v57, %v1439_v13 }
 0x12d   : >> { %v1449_v5 = vsel %vm271_vm2, %v1447_v32, %v1448_v10  ;;  %v1521_v31 = vpop.permute.xlu1 %1520  ;;  %v1435_v33 = vadd.f32 %v1430_v6, %v1403_v28  ;;  %v1436_v29 = vadd.f32 %v1432_v18, %v1404_v1  ;;  %v1469_v38 = vsel %vm311_vm3, %v1467_v49, %v1468_v56 }
 0x12e   : >> { %v1416_v12 = vadd.f32 %v1414_v40, %v1395_v24  ;;  %v1454_v43 = vadd.f32 %v1449_v5, %v1415_v21  ;;  %v1484_v63 = vsel %vm311_vm3, %v1482_v3, %v1483_v51  ;;  %v1451_v35 = vsel %vm271_vm2, %v1448_v10, %v1450_v22  ;;  %v7731_v24 = vpop.permute.xlu0 %1632 }
 0x12f   : >> { %v1485_v44 = vrot.slane %v1478_v30, 2  ;;  %v1474_v7 = vadd.f32 %v1469_v38, %v1435_v33  ;;  %v1554_v41 = vmul.f32 %v7545_v27, %v1521_v31  ;;  %v1471_v19 = vsel %vm311_vm3, %v1468_v56, %v1470_v52 }
 0x130   : >> { %v1489_v46 = vadd.f32 %v1484_v63, %v1454_v43  ;;  %v1455_v8 = vadd.f32 %v1451_v35, %v1416_v12  ;;  %v1593_v11 = vmul.f32 %v7550_v45, %v1521_v31  ;;  %v1475_v59 = vadd.f32 %v1471_v19, %v1436_v29 }
 0x131   : >> { %v1486_v48 = vsel %vm311_vm3, %v1483_v51, %v1485_v44  ;;  %v1560_v28 = vrot.slane %v1554_v41, 1  ;;  %v6670_v1 = vmov 17   ;;  %v1528_v37 = vmul.f32 %v7576_v58, %v1521_v31 }
 0x132   : >> { %v1491_v18 = vmax.f32 %v1474_v7, %v1489_v46  ;;  %v1490_v61 = vadd.f32 %v1486_v48, %v1455_v8  ;;  %6541 = vset.pattern.permute.xlu0 %v6670_v1  ;;  %6542 = vset.pattern.permute.xlu1 %v6670_v1  ;;  %v1533_v32 = vpop.permute.xlu1 %1532  ;;  %v1599_v13 = vrot.slane %v1593_v11, 2  ;;  %v7699_v56 = vmul.f32 %v7576_v58, %v1537_v25  ;;  %v1837_v46 = vpop.permute.xlu0 %1836 }
 0x133   : >> { %2690 = vperm.xlu0 %6541, %v7569_v17   ;;  %2694 = vperm.xlu1 %6542, %v7534_v62   ;;  %v1561_v3 = vsel %vm271_vm2, %v1559_v50, %v1560_v28  ;;  %v1573_v16 = vmul.f32 %v7545_v27, %v1537_v25  ;;  %v7707_v4 = vmul.f32 %v7576_v58, %v1533_v32 }
 0x134   : >> { %v1493_v52 = vmax.f32 %v1491_v18, 0.0  ;;  %v1492_v60 = vmax.f32 %v1475_v59, %v1490_v61  ;;  %v1566_v47 = vadd.f32 %v1561_v3, %v7589_v23  ;;  %v1572_v17 = vmul.f32 %v7545_v27, %v1533_v32 }
 0x135   : >> { %v7711_v62 = vmul.f32 %v7550_v45, %v1533_v32  ;;  %v1600_v42 = vsel %vm311_vm3, %v1598_v55, %v1599_v13  ;;  %v1648_v50 = vmul.f32 %v7468_v15, %v1533_v32  ;;  %v7719_v14 = vmul.f32 %v7473_v9, %v1533_v32 }
 0x136   : >> { %1495 = vst.msk [vmem:[#allocation2] sm:$0xff] %vm211_vm0, %v1493_v52  ;;  %v1494_v0 = vmax.f32 %v1492_v60, 0.0  ;;  %v1605_v23 = vadd.f32 %v1600_v42, %v1566_v47  ;;  %v1608_v2 = vmul.f32 %v7550_v45, %v1537_v25  ;;  %v1649_v40 = vmul.f32 %v7468_v15, %v1537_v25 }
 0x137   : >> { %v7724_v54 = vmul.f32 %v7473_v9, %v1537_v25  ;;  %2722 = vperm.xlu1 %6542, %v7585_v26   ;;  %v1547_v10 = vpop.permute.xlu1 %1546  ;;  %v1627_v20 = vmul.f32 %v7463_v39, %v1533_v32  ;;  %v1654_v55 = vrot.slane %v1648_v50, 1  ;;  %v1578_v49 = vrot.slane %v1572_v17, 1 }
 0x138   : >> { %1496 = vst.msk [vmem:[#allocation2 + $0x8] sm:$0xff] %vm211_vm0, %v1494_v0  ;;  %v1555_v53 = vmul.f32 %v7545_v27, %v1547_v10  ;;  %v1594_v21 = vmul.f32 %v7550_v45, %v1547_v10  ;;  %v1613_v51 = vrot.slane %v7711_v62, 2  ;;  %v1579_v6 = vrot.slane %v1573_v16, 1 }
 0x139   : >> { %v1655_v5 = vrot.slane %v1649_v40, 1  ;;  %v7734_v22 = vadd.f32 %v1627_v20, %v1605_v23  ;;  %v1693_v26 = vrot.slane %v7719_v14, 2  ;;  %v1614_v12 = vrot.slane %v1608_v2, 2 }
 0x13a   : >> { %v1562_v30 = vrot.slane %v1555_v53, 1  ;;  %v1601_v31 = vrot.slane %v1594_v21, 2  ;;  %v1694_v33 = vrot.slane %v7724_v54, 2  ;;  %v1628_v43 = vmul.f32 %v7463_v39, %v1537_v25 }
 0x13b   : >> { %v1639_v29 = vmul.f32 %v7463_v39, %v7731_v24  ;;  %v1656_v38 = vsel %vm271_vm2, %v1654_v55, %v1655_v5  ;;  %v1667_v35 = vmul.f32 %v7468_v15, %v7731_v24  ;;  %v7747_v44 = vmul.f32 %v7473_v9, %v7731_v24 }
 0x13c   : >> { %v1563_v63 = vsel %vm271_vm2, %v1560_v28, %v1562_v30  ;;  %v1570_v7 = vpop.permute.xlu1 %1569  ;;  %v1602_v41 = vsel %vm311_vm3, %v1599_v13, %v1601_v31  ;;  %v7752_v48 = vmul.f32 %v7576_v58, %v1837_v46  ;;  %v7758_v59 = vmul.f32 %v7545_v27, %v1837_v46 }
 0x13d   : >> { %v1567_v8 = vadd.f32 %v1563_v63, %v1528_v37  ;;  %v1574_v19 = vmul.f32 %v7545_v27, %v1570_v7  ;;  %v1609_v11 = vmul.f32 %v7550_v45, %v1570_v7  ;;  %v1650_v25 = vmul.f32 %v7468_v15, %v1570_v7 }
 0x13e   : >> { %v1689_v18 = vmul.f32 %v7473_v9, %v1570_v7  ;;  %v7761_v37 = vmul.f32 %v7550_v45, %v1837_v46  ;;  %v1580_v13 = vsel %vm271_vm2, %v1578_v49, %v1579_v6  ;;  %v1673_v60 = vrot.slane %v1667_v35, 1 }
 0x13f   : >> { %v1497_v61 = vld [vmem:[#allocation2] ss:$2 sm:$0xff]  ;;  %v1498_v28 = vld [vmem:[#allocation2 + $0x1] ss:$2 sm:$0xff]  ;;  %v1606_v1 = vadd.f32 %v1602_v41, %v1567_v8  ;;  %v1581_v32 = vrot.slane %v1574_v19, 1  ;;  %v1616_v3 = vrot.slane %v1609_v11, 2  ;;  %v1585_v40 = vadd.f32 %v1580_v13, %v7707_v4 }
 0x140   : >> { %v1499_v52 = vmax.f32 %v1497_v61, %v1498_v28  ;;  %v1657_v16 = vrot.slane %v1650_v25, 1  ;;  %v1708_v17 = vrot.slane %v7747_v44, 2  ;;  %v1696_v0 = vrot.slane %v1689_v18, 2 }
 0x141   : >> { %v1630_v47 = vadd.f32 %v1628_v43, %v1606_v1  ;;  %v1582_v62 = vsel %vm271_vm2, %v1579_v6, %v1581_v32  ;;  %v1637_v42 = vpop.permute.xlu1 %1636  ;;  %v1880_v2 = vrot.slane %v7758_v59, 1  ;;  %v1617_v20 = vsel %vm311_vm3, %v1614_v12, %v1616_v3 }
 0x142   : >> { %v1501_v50 = vrot.slane %v1499_v52, 7  ;;  %v1658_v23 = vsel %vm271_vm2, %v1655_v5, %v1657_v16  ;;  %v1586_v10 = vadd.f32 %v1582_v62, %v7699_v56  ;;  %v1668_v55 = vmul.f32 %v7468_v15, %v1637_v42  ;;  %v1728_v16 = vpop.permute.xlu0 %1727 }
 0x143   : >> { %v1615_v53 = vsel %vm311_vm3, %v1613_v51, %v1614_v12  ;;  %v1662_v6 = vadd.f32 %v1658_v23, %v1630_v47  ;;  %v1703_v30 = vmul.f32 %v7473_v9, %v1637_v42  ;;  %v1697_v56 = vsel %vm311_vm3, %v1694_v33, %v1696_v0 }
 0x144   : >> { %v1503_v21 = vsel %vm539_vm4, 0.0, %v1501_v50  ;;  %v1504_v49 = vsel %vm539_vm4, %v1501_v50, 0.0  ;;  %v1640_v4 = vmul.f32 %v7463_v39, %v1637_v42  ;;  %v1674_v5 = vrot.slane %v1668_v55, 1 }
 0x145   : >> { %5587 = vst.msk [vmem:[%s6794_s13 + $0x28] sm:$0xff] %vm211_vm0, %v1503_v21  ;;  %v1744_v51 = vmul.f32 %v7597_v36, %v1637_v42  ;;  %v1665_v31 = vpop.permute.xlu1 %1664  ;;  %v7786_v12 = vmul.f32 %v7610_v57, %v1637_v42  ;;  %v1621_v44 = vadd.f32 %v1617_v20, %v1586_v10  ;;  %v1709_v7 = vrot.slane %v1703_v30, 2 }
 0x146   : >> { %5588 = vst.msk [vmem:[%s6794_s13 + $0x30] sm:$0x3] %vm213_vm1, %v1504_v49  ;;  %v1669_v43 = vmul.f32 %v7468_v15, %v1665_v31  ;;  %v1704_v63 = vmul.f32 %v7473_v9, %v1665_v31  ;;  %v1745_v35 = vmul.f32 %v7597_v36, %v1665_v31  ;;  %v1784_v46 = vmul.f32 %v7610_v57, %v1665_v31 }
 0x147   : >> { %v1620_v8 = vadd.f32 %v1615_v53, %v1585_v40  ;;  %v1701_v41 = vadd.f32 %v1697_v56, %v1662_v6  ;;  %v1661_v25 = vadd.f32 %v1656_v38, %v7734_v22  ;;  %v1750_v18 = vrot.slane %v1744_v51, 1 }
 0x148   : >> { %v1676_v19 = vrot.slane %v1669_v43, 1  ;;  %v1752_v11 = vrot.slane %v1745_v35, 1  ;;  %v1675_v28 = vsel %vm271_vm2, %v1673_v60, %v1674_v5  ;;  %v1695_v1 = vsel %vm311_vm3, %v1693_v26, %v1694_v33 }
 0x149   : >> { %v1641_v61 = vadd.f32 %v1639_v29, %v1620_v8  ;;  %v1789_v32 = vrot.slane %v7786_v12, 2  ;;  %v1711_v13 = vrot.slane %v1704_v63, 2  ;;  %v1700_v52 = vadd.f32 %v1695_v1, %v1661_v25 }
 0x14a   : >> { %v1722_v3 = vmul.f32 %v7637_v34, %v7731_v24  ;;  %v1732_v47 = vpop.permute.xlu1 %1731  ;;  %v1753_v22 = vsel %vm271_vm2, %v1750_v18, %v1752_v11  ;;  %v1791_v29 = vrot.slane %v1784_v46, 2  ;;  %v1710_v60 = vsel %vm311_vm3, %v1708_v17, %v1709_v7 }
 0x14b   : >> { %v1680_v38 = vadd.f32 %v1675_v28, %v1641_v61  ;;  %v1723_v54 = vmul.f32 %v7637_v34, %v1637_v42  ;;  %v1762_v14 = vmul.f32 %v7597_v36, %v1728_v16  ;;  %v1797_v26 = vmul.f32 %v7610_v57, %v1728_v16 }
 0x14c   : >> { %v1677_v33 = vsel %vm271_vm2, %v1674_v5, %v1676_v19  ;;  %v1724_v0 = vadd.f32 %v1722_v3, %v1700_v52  ;;  %v1734_v50 = vmul.f32 %v7637_v34, %v1728_v16  ;;  %v1642_v23 = vadd.f32 %v1640_v4, %v1621_v44  ;;  %v1858_v52 = vpop.permute.xlu0 %1857 }
 0x14d   : >> { %v1715_v62 = vadd.f32 %v1710_v60, %v1680_v38  ;;  %v1725_v40 = vadd.f32 %v1723_v54, %v1701_v41  ;;  %v1768_v10 = vrot.slane %v1762_v14, 1  ;;  %v1712_v20 = vsel %vm311_vm3, %v1709_v7, %v1711_v13 }
 0x14e   : >> { %v1743_v17 = vmul.f32 %v7597_v36, %v7731_v24  ;;  %v1760_v55 = vpop.permute.xlu1 %1759  ;;  %v1803_v42 = vrot.slane %v1797_v26, 2  ;;  %v1681_v53 = vadd.f32 %v1677_v33, %v1642_v23  ;;  %v1763_v21 = vmul.f32 %v7597_v36, %v1732_v47 }
 0x14f   : >> { %v1782_v49 = vmul.f32 %v7610_v57, %v7731_v24  ;;  %v1735_v6 = vmul.f32 %v7637_v34, %v1732_v47  ;;  %v1798_v56 = vmul.f32 %v7610_v57, %v1732_v47  ;;  %v1764_v4 = vmul.f32 %v7597_v36, %v1760_v55 }
 0x150   : >> { %v1749_v30 = vrot.slane %v1743_v17, 1  ;;  %v1716_v5 = vadd.f32 %v1712_v20, %v1681_v53  ;;  %v1769_v51 = vrot.slane %v1763_v21, 1  ;;  %v1799_v12 = vmul.f32 %v7610_v57, %v1760_v55 }
 0x151   : >> { %v1788_v31 = vrot.slane %v1782_v49, 2  ;;  %v1736_v43 = vadd.f32 %v1734_v50, %v1715_v62  ;;  %v1804_v35 = vrot.slane %v1798_v56, 2  ;;  %v1771_v44 = vrot.slane %v1764_v4, 1 }
 0x152   : >> { %v1751_v63 = vsel %vm271_vm2, %v1749_v30, %v1750_v18  ;;  %v1737_v7 = vadd.f32 %v1735_v6, %v1716_v5  ;;  %v1770_v24 = vsel %vm271_vm2, %v1768_v10, %v1769_v51  ;;  %v1757_v8 = vadd.f32 %v1753_v22, %v1725_v40  ;;  %v7845_v40 = vpop.permute.xlu0 %1953 }
 0x153   : >> { %v1756_v46 = vadd.f32 %v1751_v63, %v1724_v0  ;;  %v1842_v41 = vpop.permute.xlu1 %1841  ;;  %v1792_v19 = vsel %vm311_vm3, %v1789_v32, %v1791_v29  ;;  %v1775_v11 = vadd.f32 %v1770_v24, %v1736_v43  ;;  %v1772_v25 = vsel %vm271_vm2, %v1769_v51, %v1771_v44 }
 0x154   : >> { %v1806_v61 = vrot.slane %v1799_v12, 2  ;;  %v1790_v28 = vsel %vm311_vm3, %v1788_v31, %v1789_v32  ;;  %v1805_v1 = vsel %vm311_vm3, %v1803_v42, %v1804_v35  ;;  %v1776_v13 = vadd.f32 %v1772_v25, %v1737_v7 }
 0x155   : >> { %v1875_v18 = vmul.f32 %v7545_v27, %v1842_v41  ;;  %v1795_v3 = vadd.f32 %v1790_v28, %v1756_v46  ;;  %v1810_v16 = vadd.f32 %v1805_v1, %v1775_v11  ;;  %v7828_v22 = vmul.f32 %v7550_v45, %v1842_v41 }
 0x156   : >> { %v1807_v47 = vsel %vm311_vm3, %v1804_v35, %v1806_v61  ;;  %v1919_v29 = vrot.slane %v7761_v37, 2  ;;  %v1796_v38 = vadd.f32 %v1792_v19, %v1757_v8  ;;  %v1849_v32 = vmul.f32 %v7576_v58, %v1842_v41  ;;  %v2158_v31 = vpop.permute.xlu0 %2157 }
 0x157   : >> { %v1811_v60 = vadd.f32 %v1807_v47, %v1776_v13  ;;  %v1881_v54 = vrot.slane %v1875_v18, 1  ;;  %v1812_v14 = vmax.f32 %v1795_v3, %v1810_v16  ;;  %v1920_v26 = vrot.slane %v7828_v22, 2 }
 0x158   : >> { %v1854_v33 = vpop.permute.xlu1 %1853  ;;  %v7834_v62 = vmul.f32 %v7545_v27, %v1858_v52  ;;  %v7843_v37 = vmul.f32 %v7468_v15, %v1858_v52  ;;  %v7852_v55 = vmul.f32 %v7550_v45, %v1858_v52  ;;  %v7857_v53 = vmul.f32 %v7473_v9, %v1858_v52 }
 0x159   : >> { %v1813_v0 = vmax.f32 %v1796_v38, %v1811_v60  ;;  %v1882_v50 = vsel %vm271_vm2, %v1880_v2, %v1881_v54  ;;  %v7840_v23 = vmul.f32 %v7545_v27, %v1854_v33  ;;  %v1814_v10 = vmax.f32 %v1812_v14, 0.0 }
 0x15a   : >> { %v1887_v20 = vadd.f32 %v1882_v50, %v7752_v48  ;;  %v7849_v17 = vmul.f32 %v7550_v45, %v1854_v33  ;;  %v1921_v2 = vsel %vm311_vm3, %v1919_v29, %v1920_v26  ;;  %v1969_v42 = vmul.f32 %v7468_v15, %v1854_v33  ;;  %v2175_v60 = vpop.permute.xlu0 %2174 }
 0x15b   : >> { %v1815_v59 = vmax.f32 %v1813_v0, 0.0  ;;  %1816 = vst.msk [vmem:[#allocation2] sm:$0xff] %vm211_vm0, %v1814_v10  ;;  %v7861_v49 = vmul.f32 %v7576_v58, %v1854_v33  ;;  %v7864_v48 = vmul.f32 %v7473_v9, %v1854_v33  ;;  %v1861_v6 = vmul.f32 %v7576_v58, %v1858_v52 }
 0x15c   : >> { %v1926_v21 = vadd.f32 %v1921_v2, %v1887_v20  ;;  %v1948_v56 = vmul.f32 %v7463_v39, %v1854_v33  ;;  %v1975_v4 = vrot.slane %v1969_v42, 1  ;;  %v1976_v5 = vrot.slane %v7843_v37, 1 }
 0x15d   : >> { %1817 = vst.msk [vmem:[#allocation2 + $0x8] sm:$0xff] %vm211_vm0, %v1815_v59  ;;  %v1868_v51 = vpop.permute.xlu1 %1867  ;;  %v9161_v43 = vrot.slane %v7834_v62, 1  ;;  %v9160_v7 = vrot.slane %v7852_v55, 2  ;;  %v2015_v46 = vrot.slane %v7857_v53, 2  ;;  %v7881_v24 = vmul.f32 %v7468_v15, %v7845_v40 }
 0x15e   : >> { %v1876_v63 = vmul.f32 %v7545_v27, %v1868_v51  ;;  %v1915_v35 = vmul.f32 %v7550_v45, %v1868_v51  ;;  %v7875_v44 = vadd.f32 %v1948_v56, %v1926_v21  ;;  %v2014_v8 = vrot.slane %v7864_v48, 2 }
 0x15f   : >> { %v7885_v41 = vsel %vm271_vm2, %v1975_v4, %v1976_v5  ;;  %v1949_v25 = vmul.f32 %v7463_v39, %v1858_v52  ;;  %v7890_v61 = vmul.f32 %v7463_v39, %v7845_v40  ;;  %v7894_v28 = vmul.f32 %v7473_v9, %v7845_v40 }
 0x160   : >> { %v1883_v19 = vrot.slane %v1876_v63, 1  ;;  %v1922_v11 = vrot.slane %v1915_v35, 2  ;;  %v7897_v1 = vmul.f32 %v7576_v58, %v2158_v31  ;;  %v7902_v16 = vmul.f32 %v7545_v27, %v2158_v31 }
 0x161   : >> { %v7905_v52 = vmul.f32 %v7550_v45, %v2158_v31  ;;  %v7913_v50 = vmul.f32 %v7576_v58, %v2175_v60  ;;  %v7916_v37 = vmul.f32 %v7545_v27, %v2175_v60 }
 0x162   : >> { %v1884_v13 = vsel %vm271_vm2, %v1881_v54, %v1883_v19  ;;  %v1891_v3 = vpop.permute.xlu1 %1890  ;;  %v1923_v54 = vsel %vm311_vm3, %v1920_v26, %v1922_v11  ;;  %v2201_v21 = vrot.slane %v7902_v16, 1  ;;  %v7921_v26 = vmul.f32 %v7550_v45, %v2175_v60 }
 0x163   : >> { %v1888_v47 = vadd.f32 %v1884_v13, %v1849_v32  ;;  %v1895_v22 = vmul.f32 %v7545_v27, %v1891_v3  ;;  %v1930_v29 = vmul.f32 %v7550_v45, %v1891_v3  ;;  %v1971_v38 = vmul.f32 %v7468_v15, %v1891_v3 }
 0x164   : >> { %v1818_v14 = vld [vmem:[#allocation2] ss:$2 sm:$0xff]  ;;  %v1819_v33 = vld [vmem:[#allocation2 + $0x1] ss:$2 sm:$0xff]  ;;  %v2010_v0 = vmul.f32 %v7473_v9, %v1891_v3  ;;  %v9169_v16 = vrot.slane %v7905_v52, 2 }
 0x165   : >> { %v1820_v32 = vmax.f32 %v1818_v14, %v1819_v33  ;;  %v1927_v10 = vadd.f32 %v1923_v54, %v1888_v47  ;;  %v1902_v59 = vrot.slane %v1895_v22, 1  ;;  %v1937_v2 = vrot.slane %v1930_v29, 2 }
 0x166   : >> { %v1978_v42 = vrot.slane %v1971_v38, 1  ;;  %v2017_v31 = vrot.slane %v2010_v0, 2  ;;  %v7950_v38 = vmul.f32 %v7468_v15, %v2175_v60  ;;  %v7958_v0 = vmul.f32 %v7473_v9, %v2175_v60 }
 0x167   : >> { %v1822_v56 = vrot.slane %v1820_v32, 7  ;;  %v1951_v4 = vadd.f32 %v1949_v25, %v1927_v10  ;;  %v1903_v51 = vsel %vm271_vm2, %v9161_v43, %v1902_v59  ;;  %v7926_v63 = vpop.permute.xlu1 %1957  ;;  %v7961_v10 = vmul.f32 %v7463_v39, %v2175_v60 }
 0x168   : >> { %v1907_v35 = vadd.f32 %v1903_v51, %v1861_v6  ;;  %v1979_v19 = vsel %vm271_vm2, %v1976_v5, %v1978_v42  ;;  %v7935_v25 = vmul.f32 %v7468_v15, %v7926_v63  ;;  %v1938_v6 = vsel %vm311_vm3, %v9160_v7, %v1937_v2 }
 0x169   : >> { %v1824_v3 = vsel %vm539_vm4, 0.0, %v1822_v56  ;;  %v1825_v47 = vsel %vm539_vm4, %v1822_v56, 0.0  ;;  %v1983_v22 = vadd.f32 %v1979_v19, %v1951_v4  ;;  %v7946_v5 = vmul.f32 %v7473_v9, %v7926_v63 }
 0x16a   : >> { %5598 = vst.msk [vmem:[%s6794_s13 + $0x32] sm:$0xff] %vm211_vm0, %v1824_v3  ;;  %v1942_v14 = vadd.f32 %v1938_v6, %v1907_v35  ;;  %v2018_v33 = vsel %vm311_vm3, %v2015_v46, %v2017_v31  ;;  %v1961_v54 = vmul.f32 %v7463_v39, %v7926_v63  ;;  %v7965_v59 = vmul.f32 %v7597_v36, %v7926_v63  ;;  %v2212_v35 = vpop.permute.xlu0 %2211 }
 0x16b   : >> { %5599 = vst.msk [vmem:[%s6794_s13 + $0x3a] sm:$0x3] %vm213_vm1, %v1825_v47  ;;  %v1986_v32 = vpop.permute.xlu1 %1985  ;;  %v7969_v2 = vmul.f32 %v7610_v57, %v7926_v63  ;;  %v2022_v56 = vadd.f32 %v2018_v33, %v1983_v22  ;;  %v1995_v4 = vrot.slane %v7935_v25, 1  ;;  %v2030_v39 = vrot.slane %v7946_v5, 2 }
 0x16c   : >> { %v1990_v42 = vmul.f32 %v7468_v15, %v1986_v32  ;;  %v2025_v51 = vmul.f32 %v7473_v9, %v1986_v32  ;;  %v2066_v31 = vmul.f32 %v7597_v36, %v1986_v32  ;;  %v2105_v19 = vmul.f32 %v7610_v57, %v1986_v32 }
 0x16d   : >> { %v2216_v3 = vmul.f32 %v7545_v27, %v2212_v35  ;;  %v7981_v22 = vmul.f32 %v7550_v45, %v2212_v35  ;;  %v9162_v13 = vrot.slane %v7965_v59, 1  ;;  %v2110_v20 = vrot.slane %v7969_v2, 2 }
 0x16e   : >> { %v1997_v6 = vrot.slane %v1990_v42, 1  ;;  %v2073_v29 = vrot.slane %v2066_v31, 1  ;;  %v2032_v18 = vrot.slane %v2025_v51, 2  ;;  %v7986_v12 = vmul.f32 %v7468_v15, %v2212_v35  ;;  %v2053_v11 = vpop.permute.xlu0 %2052 }
 0x16f   : >> { %v2163_v33 = vpop.permute.xlu1 %2162  ;;  %v2112_v7 = vrot.slane %v2105_v19, 2  ;;  %v2223_v32 = vrot.slane %v2216_v3, 1  ;;  %v7989_v30 = vmul.f32 %v7473_v9, %v2212_v35  ;;  %v1963_v51 = vadd.f32 %v1961_v54, %v1942_v14 }
 0x170   : >> { %v2196_v42 = vmul.f32 %v7545_v27, %v2163_v33  ;;  %v7995_v31 = vsel %vm271_vm2, %v9162_v13, %v2073_v29  ;;  %v2170_v47 = vmul.f32 %v7576_v58, %v2163_v33  ;;  %v7999_v43 = vmul.f32 %v7550_v45, %v2163_v33 }
 0x171   : >> { %v2258_v60 = vrot.slane %v7981_v22, 2  ;;  %v1982_v35 = vadd.f32 %v7885_v41, %v7875_v44  ;;  %v1998_v3 = vsel %vm271_vm2, %v1995_v4, %v1997_v6  ;;  %v2016_v14 = vsel %vm311_vm3, %v2014_v8, %v2015_v46 }
 0x172   : >> { %v2202_v19 = vrot.slane %v2196_v42, 1  ;;  %v2241_v29 = vrot.slane %v7999_v43, 2  ;;  %v2002_v13 = vadd.f32 %v1998_v3, %v1963_v51  ;;  %v2043_v54 = vmul.f32 %v7637_v34, %v7845_v40 }
 0x173   : >> { %v2299_v44 = vrot.slane %v7986_v12, 1  ;;  %v2021_v6 = vadd.f32 %v2016_v14, %v1982_v35  ;;  %v2033_v43 = vsel %vm311_vm3, %v2030_v39, %v2032_v18  ;;  %v8025_v53 = vsel %vm311_vm3, %v2110_v20, %v2112_v7 }
 0x174   : >> { %v2179_v33 = vpop.permute.xlu1 %2178  ;;  %v2203_v41 = vsel %vm271_vm2, %v2201_v21, %v2202_v19  ;;  %v2037_v46 = vadd.f32 %v2033_v43, %v2002_v13  ;;  %v2056_v8 = vmul.f32 %v7637_v34, %v2053_v11  ;;  %v2338_v12 = vrot.slane %v7989_v30, 2 }
 0x175   : >> { %v2208_v48 = vadd.f32 %v2203_v41, %v7897_v1  ;;  %v2242_v21 = vsel %vm311_vm3, %v9169_v16, %v2241_v29  ;;  %v2044_v42 = vmul.f32 %v7637_v34, %v7926_v63  ;;  %v8036_v18 = vmul.f32 %v7597_v36, %v2053_v11  ;;  %v8074_v16 = vld [vmem:[%s9156_s1 + $0x3] ss:$0 sm:$0xff] }
 0x176   : >> { %v8038_v7 = vadd.f32 %v2043_v54, %v2021_v6  ;;  %v8041_v1 = vmul.f32 %v7610_v57, %v2053_v11  ;;  %v8044_v13 = vmul.f32 %v7545_v27, %v2179_v33  ;;  %v8047_v52 = vmul.f32 %v7550_v45, %v2179_v33  ;;  %v8058_v6 = vpop.permute.xlu0 %2274 }
 0x177   : >> { %v2247_v51 = vadd.f32 %v2242_v21, %v2208_v48  ;;  %v2046_v30 = vadd.f32 %v2044_v42, %v2022_v56  ;;  %v2291_v35 = vmul.f32 %v7468_v15, %v2179_v33  ;;  %v8051_v63 = vmul.f32 %v7473_v9, %v2179_v33 }
 0x178   : >> { %v8053_v14 = vadd.f32 %v2056_v8, %v2037_v46  ;;  %v2182_v54 = vmul.f32 %v7576_v58, %v2179_v33  ;;  %v9163_v11 = vrot.slane %v8044_v13, 1  ;;  %v2090_v56 = vrot.slane %v8036_v18, 1 }
 0x179   : >> { %v2189_v3 = vpop.permute.xlu1 %2188  ;;  %v2297_v43 = vrot.slane %v2291_v35, 1  ;;  %v2336_v48 = vrot.slane %v8051_v63, 2  ;;  %v8064_v9 = vadd.f32 %v7961_v10, %v2247_v51  ;;  %v2125_v46 = vrot.slane %v8041_v1, 2  ;;  %v8092_v35 = vld [vmem:[%s9156_s1 + $0x4] ss:$0 sm:$0xff] }
 0x17a   : >> { %v2197_v41 = vmul.f32 %v7545_v27, %v2189_v3  ;;  %v2236_v15 = vmul.f32 %v7550_v45, %v2189_v3  ;;  %v2224_v58 = vsel %vm271_vm2, %v9163_v11, %v2223_v32  ;;  %v2256_v27 = vrot.slane %v8047_v52, 2 }
 0x17b   : >> { %v2270_v21 = vmul.f32 %v8074_v16, %v2179_v33  ;;  %v8079_v10 = vmul.f32 %v8074_v16, %v8058_v6  ;;  %v8081_v42 = vadd.f32 %v2224_v58, %v2182_v54  ;;  %v9170_v18 = vrot.slane %v7950_v38, 1 }
 0x17c   : >> { %v2204_v8 = vrot.slane %v2197_v41, 1  ;;  %v2243_v45 = vrot.slane %v2236_v15, 2  ;;  %v8096_v33 = vmul.f32 %v8092_v35, %v8058_v6  ;;  %v2300_v54 = vsel %vm271_vm2, %v2297_v43, %v2299_v44 }
 0x17d   : >> { %v8086_v32 = vsel %vm271_vm2, %v9170_v18, %v2297_v43  ;;  %v2339_v38 = vsel %vm311_vm3, %v2336_v48, %v2338_v12  ;;  %v9171_v15 = vrot.slane %v7834_v62, 1  ;;  %v8111_v18 = vld [vmem:[%s9156_s1 + $0x5] ss:$0 sm:$0xff]  ;;  %v9173_v12 = vrot.slane %v7852_v55, 2 }
 0x17e   : >> { %v2205_v51 = vsel %vm271_vm2, %v2202_v19, %v2204_v8  ;;  %v2049_v3 = vpop.permute.xlu1 %2048  ;;  %v9172_v19 = vrot.slane %v7840_v23, 1  ;;  %v2244_v8 = vsel %vm311_vm3, %v2241_v29, %v2243_v45  ;;  %v9174_v62 = vrot.slane %v7849_v17, 2 }
 0x17f   : >> { %v2209_v41 = vadd.f32 %v2205_v51, %v2170_v47  ;;  %v8115_v47 = vmul.f32 %v8111_v18, %v8058_v6  ;;  %v9175_v29 = vrot.slane %v7881_v24, 1  ;;  %v2064_v51 = vmul.f32 %v7597_v36, %v7845_v40 }
 0x180   : >> { %v1901_v58 = vsel %vm271_vm2, %v9172_v19, %v9171_v15  ;;  %v1936_v23 = vsel %vm311_vm3, %v9174_v62, %v9173_v12  ;;  %v2083_v15 = vmul.f32 %v7597_v36, %v2049_v3  ;;  %v2103_v55 = vmul.f32 %v7610_v57, %v7845_v40 }
 0x181   : >> { %v1906_v44 = vadd.f32 %v1901_v58, %v7861_v49  ;;  %v2248_v43 = vadd.f32 %v2244_v8, %v2209_v41  ;;  %v1996_v45 = vsel %vm271_vm2, %v9175_v29, %v1995_v4  ;;  %v2118_v17 = vmul.f32 %v7610_v57, %v2049_v3 }
 0x182   : >> { %v2081_v49 = vpop.permute.xlu1 %2080  ;;  %v2078_v41 = vadd.f32 %v7995_v31, %v2046_v30  ;;  %v2070_v25 = vrot.slane %v2064_v51, 1  ;;  %v2089_v8 = vrot.slane %v2083_v15, 1  ;;  %v9176_v40 = vrot.slane %v7894_v28, 2  ;;  %v8157_v28 = vld [vmem:[%s9156_s1 + $0x2] ss:$0 sm:$0xff] }
 0x183   : >> { %v1941_v19 = vadd.f32 %v1936_v23, %v1906_v44  ;;  %v2272_v58 = vadd.f32 %v2270_v21, %v2248_v43  ;;  %v2085_v24 = vmul.f32 %v7597_v36, %v2081_v49  ;;  %v2109_v44 = vrot.slane %v2103_v55, 2  ;;  %v2479_v23 = vpop.permute.xlu0 %2478  ;;  %v8150_v43 = vld [vmem:[%s9156_s1 + $0x1] ss:$0 sm:$0xff] }
 0x184   : >> { %v2031_v29 = vsel %vm311_vm3, %v9176_v40, %v2030_v39  ;;  %v9177_v31 = vrot.slane %v7965_v59, 1  ;;  %v2124_v21 = vrot.slane %v2118_v17, 2  ;;  %v2055_v15 = vmul.f32 %v7637_v34, %v2049_v3 }
 0x185   : >> { %v1962_v62 = vadd.f32 %v7890_v61, %v1941_v19  ;;  %v2092_v36 = vrot.slane %v2085_v24, 1  ;;  %v2304_v61 = vadd.f32 %v2300_v54, %v2272_v58  ;;  %v2117_v5 = vadd.f32 %v8025_v53, %v2078_v41  ;;  %v8199_v58 = vld [vmem:[%s9156_s1 + $0x4] ss:$0 sm:$0xff] }
 0x186   : >> { %v2072_v30 = vsel %vm271_vm2, %v2070_v25, %v9177_v31  ;;  %v2091_v39 = vsel %vm271_vm2, %v2089_v8, %v2090_v56  ;;  %v2120_v55 = vmul.f32 %v7610_v57, %v2081_v49  ;;  %v2111_v34 = vsel %vm311_vm3, %v2109_v44, %v2110_v20  ;;  %v8178_v57 = vld [vmem:[%s9156_s1] ss:$0 sm:$0xff] }
 0x187   : >> { %v2001_v51 = vadd.f32 %v1996_v45, %v1962_v62  ;;  %v2077_v59 = vadd.f32 %v2072_v30, %v8038_v7  ;;  %v2093_v19 = vsel %vm271_vm2, %v2090_v56, %v2092_v36  ;;  %v8163_v17 = vpop.permute.xlu1 %2278  ;;  %v8170_v3 = vmul.f32 %v8150_v43, %v2479_v23  ;;  %v2496_v25 = vpop.permute.xlu0 %2495  ;;  %v8211_v62 = vld [vmem:[%s9156_s1 + $0x5] ss:$0 sm:$0xff] }
 0x188   : >> { %v2097_v53 = vadd.f32 %v2093_v19, %v8053_v14  ;;  %v2126_v7 = vsel %vm311_vm3, %v2124_v21, %v2125_v46  ;;  %v2127_v45 = vrot.slane %v2120_v55, 2  ;;  %v8181_v56 = vmul.f32 %v8157_v28, %v2479_v23  ;;  %v8245_v19 = vld [vmem:[%s9156_s1 + $0x3] ss:$0 sm:$0xff] }
 0x189   : >> { %v2036_v54 = vadd.f32 %v2031_v29, %v2001_v51  ;;  %v8185_v20 = vmul.f32 %v8092_v35, %v8163_v17  ;;  %v8187_v2 = vadd.f32 %v2339_v38, %v2304_v61  ;;  %v8190_v49 = vmul.f32 %v8178_v57, %v2479_v23 }
 0x18a   : >> { %v8194_v41 = vmul.f32 %v8111_v18, %v8163_v17  ;;  %v2116_v8 = vadd.f32 %v2111_v34, %v2077_v59  ;;  %v2128_v38 = vsel %vm311_vm3, %v2125_v46, %v2127_v45  ;;  %v8206_v24 = vmul.f32 %v8074_v16, %v8163_v17  ;;  %v8223_v46 = vld [vmem:[%s9156_s1 + $0x7] ss:$0 sm:$0xff]  ;;  %v8228_v16 = vld [vmem:[%s9156_s1 + $0x8] ss:$0 sm:$0xff] }
 0x18b   : >> { %v2057_v14 = vadd.f32 %v2055_v15, %v2036_v54  ;;  %v8214_v44 = vmul.f32 %v8150_v43, %v2496_v25  ;;  %v2307_v23 = vpop.permute.xlu1 %2306  ;;  %v2132_v29 = vadd.f32 %v2128_v38, %v2097_v53  ;;  %v2522_v31 = vrot.slane %v8170_v3, 1  ;;  %v2533_v12 = vpop.permute.xlu0 %2532 }
 0x18c   : >> { %v8218_v1 = vmul.f32 %v8178_v57, %v2496_v25  ;;  %v9166_v21 = vrot.slane %v8185_v20, 1  ;;  %v8233_v36 = vmul.f32 %v8157_v28, %v2496_v25  ;;  %v8236_v61 = vmul.f32 %v8199_v58, %v2496_v25 }
 0x18d   : >> { %v2096_v40 = vadd.f32 %v2091_v39, %v2057_v14  ;;  %v2134_v15 = vmax.f32 %v2117_v5, %v2132_v29  ;;  %v8240_v39 = vmul.f32 %v8211_v62, %v2496_v25  ;;  %v8250_v54 = vmul.f32 %v8223_v46, %v8163_v17 }
 0x18e   : >> { %v8254_v34 = vmul.f32 %v8228_v16, %v8163_v17  ;;  %v2311_v5 = vmul.f32 %v8092_v35, %v2307_v23  ;;  %v8258_v45 = vmul.f32 %v8245_v19, %v2496_v25  ;;  %v2346_v14 = vmul.f32 %v8111_v18, %v2307_v23 }
 0x18f   : >> { %v2131_v51 = vadd.f32 %v2126_v7, %v2096_v40  ;;  %v2484_v53 = vpop.permute.xlu1 %2483  ;;  %v2136_v7 = vmax.f32 %v2134_v15, 0.0  ;;  %v2387_v29 = vmul.f32 %v8223_v46, %v2307_v23  ;;  %v2426_v55 = vmul.f32 %v8228_v16, %v2307_v23 }
 0x190   : >> { %v8271_v25 = vmul.f32 %v8157_v28, %v2533_v12  ;;  %v9165_v18 = vrot.slane %v8250_v54, 1  ;;  %v2318_v15 = vrot.slane %v2311_v5, 1  ;;  %v2353_v23 = vrot.slane %v2346_v14, 2 }
 0x191   : >> { %v2133_v3 = vmax.f32 %v2116_v8, %v2131_v51  ;;  %2138 = vst.msk [vmem:[#allocation2 + $0x8] sm:$0xff] %vm211_vm0, %v2136_v7  ;;  %v8268_v8 = vmul.f32 %v8150_v43, %v2533_v12  ;;  %v9164_v51 = vrot.slane %v8254_v34, 2  ;;  %v2394_v40 = vrot.slane %v2387_v29, 1 }
 0x192   : >> { %v8277_v7 = vmul.f32 %v8199_v58, %v2533_v12  ;;  %v8280_v35 = vmul.f32 %v8150_v43, %v2484_v53  ;;  %v8285_v30 = vmul.f32 %v8211_v62, %v2533_v12  ;;  %v8288_v5 = vmul.f32 %v8178_v57, %v2484_v53 }
 0x193   : >> { %v2135_v4 = vmax.f32 %v2133_v3, 0.0  ;;  %v2433_v3 = vrot.slane %v2426_v55, 2  ;;  %v2544_v11 = vrot.slane %v8268_v8, 1  ;;  %v8297_v14 = vmul.f32 %v8157_v28, %v2484_v53 }
 0x194   : >> { %v2500_v38 = vpop.permute.xlu1 %2499  ;;  %v2523_v55 = vrot.slane %v8280_v35, 1  ;;  %v2259_v12 = vsel %vm311_vm3, %v2256_v27, %v2258_v60  ;;  %v2303_v29 = vadd.f32 %v8086_v32, %v8064_v9  ;;  %v8309_v8 = vsel %vm271_vm2, %v9165_v18, %v2394_v40 }
 0x195   : >> { %2137 = vst.msk [vmem:[#allocation2] sm:$0xff] %vm211_vm0, %v2135_v4  ;;  %v8293_v4 = vld [vmem:[%s9156_s1 + $0x6] ss:$0 sm:$0xff]  ;;  %v2263_v59 = vadd.f32 %v2259_v12, %v8081_v42  ;;  %v2319_v53 = vsel %vm271_vm2, %v9166_v21, %v2318_v15  ;;  %v9178_v22 = vrot.slane %v7958_v0, 2  ;;  %v2562_v9 = vrot.slane %v8297_v14, 2 }
 0x196   : >> { %v2524_v35 = vsel %vm271_vm2, %v2522_v31, %v2523_v55  ;;  %v2364_v40 = vmul.f32 %v8293_v4, %v8058_v6  ;;  %v8327_v42 = vsel %vm311_vm3, %v9164_v51, %v2433_v3  ;;  %v2365_v0 = vmul.f32 %v8293_v4, %v8163_v17 }
 0x197   : >> { %v2337_v60 = vsel %vm311_vm3, %v9178_v22, %v2336_v48  ;;  %v2529_v15 = vadd.f32 %v2524_v35, %v8190_v49  ;;  %v2284_v63 = vadd.f32 %v8206_v24, %v2263_v59  ;;  %v2374_v48 = vpop.permute.xlu0 %2373  ;;  %v9180_v3 = vrot.slane %v8194_v41, 2 }
 0x198   : >> { %v2342_v32 = vadd.f32 %v2337_v60, %v2303_v29  ;;  %v9179_v29 = vrot.slane %v8181_v56, 2  ;;  %v8342_v17 = vmul.f32 %v8223_v46, %v2374_v48  ;;  %v8345_v51 = vmul.f32 %v8228_v16, %v2374_v48 }
 0x199   : >> { %v2510_v31 = vpop.permute.xlu1 %2509  ;;  %v2354_v60 = vsel %vm311_vm3, %v9180_v3, %v2353_v23  ;;  %v2323_v59 = vadd.f32 %v2319_v53, %v2284_v63  ;;  %v2377_v56 = vmul.f32 %v8293_v4, %v2374_v48  ;;  %v2367_v23 = vadd.f32 %v2365_v0, %v8187_v2 }
 0x19a   : >> { %v2563_v22 = vsel %vm311_vm3, %v9179_v29, %v2562_v9  ;;  %v2366_v12 = vadd.f32 %v2364_v40, %v2342_v32  ;;  %v8349_v29 = vmul.f32 %v8150_v43, %v2500_v38  ;;  %v8354_v53 = vmul.f32 %v8157_v28, %v2500_v38 }
 0x19b   : >> { %v2568_v24 = vadd.f32 %v2563_v22, %v2529_v15  ;;  %v2358_v14 = vadd.f32 %v2354_v60, %v2323_v59  ;;  %v2503_v15 = vmul.f32 %v8178_v57, %v2500_v38  ;;  %v8358_v32 = vmul.f32 %v8199_v58, %v2500_v38  ;;  %v8385_v21 = vpop.permute.xlu0 %2595 }
 0x19c   : >> { %v2139_v49 = vld [vmem:[#allocation2] ss:$2 sm:$0xff]  ;;  %v2140_v35 = vld [vmem:[#allocation2 + $0x1] ss:$2 sm:$0xff]  ;;  %v2542_v22 = vrot.slane %v8349_v29, 1  ;;  %v8361_v40 = vmul.f32 %v8211_v62, %v2500_v38  ;;  %v2411_v2 = vrot.slane %v8342_v17, 1  ;;  %v2518_v0 = vmul.f32 %v8150_v43, %v2510_v31 }
 0x19d   : >> { %v2141_v18 = vmax.f32 %v2139_v49, %v2140_v35  ;;  %v8364_v3 = vadd.f32 %v8258_v45, %v2568_v24  ;;  %v2591_v35 = vmul.f32 %v8245_v19, %v2500_v38  ;;  %v2379_v45 = vadd.f32 %v2377_v56, %v2358_v14 }
 0x19e   : >> { %v2370_v48 = vpop.permute.xlu1 %2369  ;;  %v2545_v49 = vsel %vm271_vm2, %v2542_v22, %v2544_v11  ;;  %v2577_v24 = vrot.slane %v8354_v53, 2  ;;  %v2525_v59 = vrot.slane %v2518_v0, 1  ;;  %v2557_v43 = vmul.f32 %v8157_v28, %v2510_v31 }
 0x19f   : >> { %v2143_v63 = vrot.slane %v2141_v18, 7  ;;  %v8381_v17 = vadd.f32 %v2545_v49, %v2503_v15  ;;  %v2657_v57 = vrot.slane %v8361_v40, 2  ;;  %v9181_v11 = vrot.slane %v8044_v13, 1 }
 0x1a0   : >> { %v9182_v38 = vrot.slane %v7916_v37, 1  ;;  %v2526_v56 = vsel %vm271_vm2, %v2523_v55, %v2525_v59  ;;  %v2564_v0 = vrot.slane %v2557_v43, 2  ;;  %v8395_v28 = vmul.f32 %v8199_v58, %v8385_v21 }
 0x1a1   : >> { %v2145_v18 = vsel %vm539_vm4, 0.0, %v2143_v63  ;;  %v2146_v60 = vsel %vm539_vm4, %v2143_v63, 0.0  ;;  %v2618_v63 = vrot.slane %v8358_v32, 1  ;;  %v2530_v15 = vadd.f32 %v2526_v56, %v8288_v5 }
 0x1a2   : >> { %5609 = vst.msk [vmem:[%s6794_s13 + $0x3c] sm:$0xff] %vm211_vm0, %v2145_v18  ;;  %v2222_v18 = vsel %vm271_vm2, %v9182_v38, %v9181_v11  ;;  %v2402_v14 = vpop.permute.xlu1 %2401  ;;  %v9183_v13 = vrot.slane %v7921_v26, 2  ;;  %v9185_v49 = vrot.slane %v8096_v33, 1  ;;  %v2385_v59 = vmul.f32 %v8223_v46, %v8058_v6 }
 0x1a3   : >> { %5610 = vst.msk [vmem:[%s6794_s13 + $0x44] sm:$0x3] %vm213_vm1, %v2146_v60  ;;  %v2227_v31 = vadd.f32 %v2222_v18, %v7913_v50  ;;  %v9184_v60 = vrot.slane %v8185_v20, 1  ;;  %v2565_v43 = vsel %vm311_vm3, %v2562_v9, %v2564_v0  ;;  %v2404_v5 = vmul.f32 %v8223_v46, %v2370_v48 }
 0x1a4   : >> { %v2257_v37 = vsel %vm311_vm3, %v9183_v13, %v2256_v27  ;;  %v2424_v52 = vmul.f32 %v8228_v16, %v8058_v6  ;;  %v2569_v26 = vadd.f32 %v2565_v43, %v2530_v15  ;;  %v2391_v11 = vrot.slane %v2385_v59, 1 }
 0x1a5   : >> { %v2317_v55 = vsel %vm271_vm2, %v9185_v49, %v9184_v60  ;;  %v2262_v50 = vadd.f32 %v2257_v37, %v2227_v31  ;;  %v2439_v27 = vmul.f32 %v8228_v16, %v2370_v48  ;;  %v2399_v20 = vadd.f32 %v8309_v8, %v2367_v23 }
 0x1a6   : >> { %v2410_v38 = vrot.slane %v2404_v5, 1  ;;  %v2430_v18 = vrot.slane %v2424_v52, 2  ;;  %v2406_v56 = vmul.f32 %v8223_v46, %v2402_v14  ;;  %v9186_v9 = vrot.slane %v8277_v7, 1 }
 0x1a7   : >> { %v2283_v33 = vadd.f32 %v8079_v10, %v2262_v50  ;;  %v8419_v13 = vpop.permute.xlu1 %2599  ;;  %v2636_v0 = vrot.slane %v8395_v28, 1  ;;  %v9187_v31 = vrot.slane %v8194_v41, 2  ;;  %v9188_v8 = vrot.slane %v8115_v47, 2 }
 0x1a8   : >> { %v2621_v6 = vsel %vm271_vm2, %v2618_v63, %v9186_v9  ;;  %v9189_v23 = vrot.slane %v8250_v54, 1  ;;  %v2593_v37 = vadd.f32 %v2591_v35, %v2569_v26  ;;  %v2376_v7 = vmul.f32 %v8293_v4, %v2370_v48 }
 0x1a9   : >> { %v2352_v10 = vsel %vm311_vm3, %v9188_v8, %v9187_v31  ;;  %v2322_v60 = vadd.f32 %v2317_v55, %v2283_v33  ;;  %v2445_v49 = vrot.slane %v2439_v27, 2  ;;  %v2413_v43 = vrot.slane %v2406_v56, 1 }
 0x1aa   : >> { %v2393_v15 = vsel %vm271_vm2, %v2391_v11, %v9189_v23  ;;  %v2438_v50 = vadd.f32 %v8327_v42, %v2399_v20  ;;  %v2441_v28 = vmul.f32 %v8228_v16, %v2402_v14  ;;  %v2412_v47 = vsel %vm271_vm2, %v2410_v38, %v2411_v2 }
 0x1ab   : >> { %v2398_v59 = vadd.f32 %v2393_v15, %v2366_v12  ;;  %v2357_v41 = vadd.f32 %v2352_v10, %v2322_v60  ;;  %v9190_v5 = vrot.slane %v8254_v34, 2  ;;  %v8444_v35 = vmul.f32 %v8199_v58, %v8419_v13  ;;  %v2628_v55 = vpop.permute.xlu1 %2627 }
 0x1ac   : >> { %v2414_v48 = vsel %vm271_vm2, %v2411_v2, %v2413_v43  ;;  %v2448_v12 = vrot.slane %v2441_v28, 2  ;;  %v8449_v42 = vmul.f32 %v8223_v46, %v8419_v13  ;;  %v8453_v14 = vmul.f32 %v8228_v16, %v8419_v13 }
 0x1ad   : >> { %v2432_v54 = vsel %vm311_vm3, %v2430_v18, %v9190_v5  ;;  %v2625_v52 = vadd.f32 %v2621_v6, %v2593_v37  ;;  %v2378_v34 = vadd.f32 %v2376_v7, %v2357_v41  ;;  %v2418_v26 = vadd.f32 %v2414_v48, %v2379_v45 }
 0x1ae   : >> { %v2632_v11 = vmul.f32 %v8199_v58, %v2628_v55  ;;  %v2437_v27 = vadd.f32 %v2432_v54, %v2398_v59  ;;  %v9191_v20 = vrot.slane %v8345_v51, 2  ;;  %v2603_v18 = vmul.f32 %v8245_v19, %v8419_v13 }
 0x1af   : >> { %v2417_v56 = vadd.f32 %v2412_v47, %v2378_v34  ;;  %v2637_v6 = vrot.slane %v8444_v35, 1  ;;  %v2708_v45 = vmul.f32 %v8223_v46, %v2628_v55  ;;  %v2713_v58 = vrot.slane %v8449_v42, 1 }
 0x1b0   : >> { %v2447_v33 = vsel %vm311_vm3, %v2445_v49, %v9191_v20  ;;  %v9192_v2 = vmov %v9191_v20  ;;  %v2752_v31 = vrot.slane %v8453_v14, 2  ;;  %v8469_v8 = vmul.f32 %v8211_v62, %v2628_v55 }
 0x1b1   : >> { %v2449_v38 = vsel %vm311_vm3, %v9192_v2, %v2448_v12  ;;  %v9193_v51 = vrot.slane %v8214_v44, 1  ;;  %v2452_v23 = vadd.f32 %v2447_v33, %v2417_v56  ;;  %v2639_v37 = vrot.slane %v2632_v11, 1 }
 0x1b2   : >> { %v2453_v9 = vadd.f32 %v2449_v38, %v2418_v26  ;;  %v8478_v7 = vmul.f32 %v8228_v16, %v2628_v55  ;;  %v9194_v49 = vrot.slane %v8233_v36, 2  ;;  %v2602_v29 = vmul.f32 %v8245_v19, %v8385_v21  ;;  %v2695_v41 = vpop.permute.xlu1 %2694 }
 0x1b3   : >> { %v2543_v10 = vsel %vm271_vm2, %v9193_v51, %v2542_v22  ;;  %v9195_v44 = vrot.slane %v8236_v61, 1  ;;  %v2454_v43 = vmax.f32 %v2437_v27, %v2452_v23  ;;  %v2638_v36 = vsel %vm271_vm2, %v2636_v0, %v2637_v6  ;;  %v2691_v0 = vpop.permute.xlu0 %2690 }
 0x1b4   : >> { %v2455_v15 = vmax.f32 %v2438_v50, %v2453_v9  ;;  %v2548_v60 = vadd.f32 %v2543_v10, %v8218_v1  ;;  %v2578_v59 = vsel %vm311_vm3, %v9194_v49, %v2577_v24  ;;  %v2715_v50 = vrot.slane %v2708_v45, 1 }
 0x1b5   : >> { %v2619_v22 = vsel %vm271_vm2, %v9195_v44, %v2618_v63  ;;  %v9196_v5 = vrot.slane %v8240_v39, 2  ;;  %v9197_v32 = vrot.slane %v8285_v30, 2  ;;  %v2456_v63 = vmax.f32 %v2454_v43, 0.0 }
 0x1b6   : >> { %v2457_v1 = vmax.f32 %v2455_v15, 0.0  ;;  %v2583_v28 = vadd.f32 %v2578_v59, %v2548_v60  ;;  %v2624_v47 = vadd.f32 %v2619_v22, %v8364_v3  ;;  %v2665_v3 = vmul.f32 %v8211_v62, %v8385_v21  ;;  %v2723_v38 = vpop.permute.xlu1 %2722 }
 0x1b7   : >> { %v2658_v19 = vsel %vm311_vm3, %v9196_v5, %v2657_v57  ;;  %v2660_v61 = vsel %vm311_vm3, %v2657_v57, %v9197_v32  ;;  %v2666_v39 = vmul.f32 %v8211_v62, %v8419_v13  ;;  %v2685_v30 = vmul.f32 %v8293_v4, %v8385_v21  ;;  %2458 = vst.msk [vmem:[#allocation2] sm:$0xff] %vm211_vm0, %v2456_v63 }
 0x1b8   : >> { %2459 = vst.msk [vmem:[#allocation2 + $0x8] sm:$0xff] %vm211_vm0, %v2457_v1  ;;  %v2604_v54 = vadd.f32 %v2602_v29, %v2583_v28  ;;  %v2664_v35 = vadd.f32 %v2660_v61, %v2625_v52  ;;  %v2663_v55 = vadd.f32 %v2658_v19, %v2624_v47  ;;  %v2686_v40 = vmul.f32 %v8293_v4, %v8419_v13 }
 0x1b9   : >> { %v2674_v57 = vrot.slane %v8469_v8, 2  ;;  %v2671_v12 = vrot.slane %v2665_v3, 2  ;;  %v2725_v52 = vmul.f32 %v8223_v46, %v2691_v0  ;;  %v2716_v34 = vsel %vm271_vm2, %v2713_v58, %v2715_v50 }
 0x1ba   : >> { %v2643_v48 = vadd.f32 %v2638_v36, %v2604_v54  ;;  %v2754_v62 = vrot.slane %v8478_v7, 2  ;;  %v2672_v26 = vrot.slane %v2666_v39, 2  ;;  %v2697_v11 = vmul.f32 %v8293_v4, %v2691_v0 }
 0x1bb   : >> { %v2687_v27 = vadd.f32 %v2685_v30, %v2663_v55  ;;  %v2688_v20 = vadd.f32 %v2686_v40, %v2664_v35  ;;  %v2760_v13 = vmul.f32 %v8228_v16, %v2691_v0  ;;  %v9198_v33 = vrot.slane %v8271_v25, 2 }
 0x1bc   : >> { %v2673_v56 = vsel %vm311_vm3, %v2671_v12, %v2672_v26  ;;  %v2731_v9 = vrot.slane %v2725_v52, 1  ;;  %v2640_v45 = vsel %vm271_vm2, %v2637_v6, %v2639_v37  ;;  %v2706_v10 = vmul.f32 %v8223_v46, %v8385_v21 }
 0x1bd   : >> { %v2580_v2 = vsel %vm311_vm3, %v2577_v24, %v9198_v33  ;;  %v2678_v51 = vadd.f32 %v2673_v56, %v2643_v48  ;;  %v2726_v23 = vmul.f32 %v8223_v46, %v2695_v41  ;;  %v2745_v25 = vmul.f32 %v8228_v16, %v8385_v21 }
 0x1be   : >> { %v2584_v8 = vadd.f32 %v2580_v2, %v8381_v17  ;;  %v2698_v24 = vmul.f32 %v8293_v4, %v2695_v41  ;;  %v2761_v15 = vmul.f32 %v8228_v16, %v2695_v41  ;;  %v2727_v60 = vmul.f32 %v8223_v46, %v2723_v38 }
 0x1bf   : >> { %v2766_v7 = vrot.slane %v2760_v13, 2  ;;  %v2712_v6 = vrot.slane %v2706_v10, 1  ;;  %v2732_v37 = vrot.slane %v2726_v23, 1  ;;  %v2751_v17 = vrot.slane %v2745_v25, 2  ;;  %v2460_v49 = vld [vmem:[#allocation2] ss:$2 sm:$0xff] }
 0x1c0   : >> { %v2605_v53 = vadd.f32 %v2603_v18, %v2584_v8  ;;  %v2461_v59 = vld [vmem:[#allocation2 + $0x1] ss:$2 sm:$0xff]  ;;  %v2699_v29 = vadd.f32 %v2697_v11, %v2678_v51  ;;  %v2767_v22 = vrot.slane %v2761_v15, 2  ;;  %v2734_v43 = vrot.slane %v2727_v60, 1  ;;  %v8576_v11 = vld [vmem:[%s9157_s2 + $0x40] sm:$0xff] (%p205_p11)  }
 0x1c1   : >> { %v2462_v1 = vmax.f32 %v2460_v49, %v2461_v59  ;;  %v2675_v21 = vsel %vm311_vm3, %v2672_v26, %v2674_v57  ;;  %v2714_v4 = vsel %vm271_vm2, %v2712_v6, %v2713_v58  ;;  %v2733_v18 = vsel %vm271_vm2, %v2731_v9, %v2732_v37  ;;  %6072 = vmatprep.subr.bf16.mxu0 (%p205_p11), %v8576_v11  ;;  %v6558_v10 = vld [vmem:[%s9157_s2] sm:$0xff] (%p205_p11)  }
 0x1c2   : >> { %v2644_v44 = vadd.f32 %v2640_v45, %v2605_v53  ;;  %v2719_v50 = vadd.f32 %v2714_v4, %v2687_v27  ;;  %v2738_v28 = vadd.f32 %v2733_v18, %v2699_v29  ;;  %v2753_v41 = vsel %vm311_vm3, %v2751_v17, %v2752_v31  ;;  %v6556_v27 = vld [vmem:[%s9157_s2 + $0x18] sm:$0xff] (%p205_p11)   ;;  %6073 = vmatpush3.bf16.msra.mxu0 (%p205_p11), %v8576_v11 }
 0x1c3   : >> { %v2464_v47 = vrot.slane %v2462_v1, 7  ;;  %v2768_v36 = vsel %vm311_vm3, %v2766_v7, %v2767_v22  ;;  %v2735_v5 = vsel %vm271_vm2, %v2732_v37, %v2734_v43  ;;  %v2762_v42 = vmul.f32 %v8228_v16, %v2723_v38 }
 0x1c4   : >> { %v2679_v46 = vadd.f32 %v2675_v21, %v2644_v44  ;;  %v2758_v58 = vadd.f32 %v2753_v41, %v2719_v50  ;;  %v2773_v32 = vadd.f32 %v2768_v36, %v2738_v28  ;;  %v2720_v61 = vadd.f32 %v2716_v34, %v2688_v20  ;;  %v8585_v20 = vld [vmem:[%s9157_s2 + $0x48] sm:$0xff] (%p205_p11)  }
 0x1c5   : >> { %v2466_v63 = vsel %vm539_vm4, 0.0, %v2464_v47  ;;  %v2467_v54 = vsel %vm539_vm4, %v2464_v47, 0.0  ;;  %v2769_v35 = vrot.slane %v2762_v42, 2  ;;  %v2755_v16 = vsel %vm311_vm3, %v2752_v31, %v2754_v62  ;;  %v6554_v62 = vld [vmem:[%s9157_s2 + $0x10] sm:$0xff] (%p205_p11)   ;;  %6074 = vmatprep.subr.bf16.mxu0 (%p205_p11), %v8585_v20  ;;  %v6561_v41 = vld [vmem:[%s9157_s2 + $0x8] sm:$0xff] (%p205_p11)   ;;  %v6562_v42 = vld [vmem:[%s9157_s2 + $0x60] sm:$0xff] (%p205_p11)  }
 0x1c6   : >> { %v2700_v19 = vadd.f32 %v2698_v24, %v2679_v46  ;;  %5620 = vst.msk [vmem:[%s6794_s13 + $0x46] sm:$0xff] %vm211_vm0, %v2466_v63  ;;  %v2775_v3 = vmax.f32 %v2758_v58, %v2773_v32  ;;  %v2759_v30 = vadd.f32 %v2755_v16, %v2720_v61  ;;  %5960 = vmatprep.subr.bf16.mxu1 (%p205_p11), %v6554_v62  ;;  %v6559_v24 = vld [vmem:[%s9157_s2 + $0x50] sm:$0xff] (%p205_p11)  }
 0x1c7   : >> { %5621 = vst.msk [vmem:[%s6794_s13 + $0x4e] sm:$0x3] %vm213_vm1, %v2467_v54  ;;  %v2770_v55 = vsel %vm311_vm3, %v2767_v22, %v2769_v35  ;;  %5961 = vmatpush3.bf16.msra.mxu1 (%p205_p11), %v6554_v62  ;;  %6075 = vmatpush3.bf16.msra.mxu0 (%p205_p11), %v8585_v20  ;;  %v6560_v22 = vld [vmem:[%s9157_s2 + $0x58] sm:$0xff] (%p205_p11)  }
 0x1c8   : >> { %v2739_v0 = vadd.f32 %v2735_v5, %v2700_v19  ;;  %v2777_v39 = vmax.f32 %v2775_v3, 0.0  ;;  %5962 = vmatprep.subr.bf16.mxu1 (%p205_p11), %v6556_v27  ;;  %6100 = vmatprep.subr.bf16.mxu0 (%p205_p11), %v6559_v24 }
 0x1ca   : >> { %v2774_v40 = vadd.f32 %v2770_v55, %v2739_v0  ;;  %2779 = vst.msk [vmem:[#allocation2] sm:$0xff] %vm211_vm0, %v2777_v39 }
 0x1cb   : > { %5963 = vmatpush3.bf16.msra.mxu1 (%p205_p11), %v6556_v27  ;;  %v6564_v27 = vld [vmem:[%s9157_s2 + $0x68] sm:$0xff] (%p205_p11)  }
 0x1cc   : >> { %v2776_v57 = vmax.f32 %v2759_v30, %v2774_v40  ;;  %5988 = vmatprep.subr.bf16.mxu1 (%p205_p11), %v6558_v10 }
 0x1ce   : >> { %v2778_v48 = vmax.f32 %v2776_v57, 0.0  ;;  %v8628_v57 = vld [vmem:[%s9157_s2 + $0x20] sm:$0xff] (%p205_p11)  }
 0x1d0   : >> { %2780 = vst.msk [vmem:[#allocation2 + $0x8] sm:$0xff] %vm211_vm0, %v2778_v48 }
 0x1d7   : >> { %v2781_v12 = vld [vmem:[#allocation2] ss:$2 sm:$0xff]  ;;  %v2782_v52 = vld [vmem:[#allocation2 + $0x1] ss:$2 sm:$0xff] }
 0x1d8   : >> { %v2783_v34 = vmax.f32 %v2781_v12, %v2782_v52  ;;  %207 = sbr.rel (!%p205_p11) target bundleno = 25 (0x19), region = 128 }
 0x1da   : >> { %v2785_v26 = vrot.slane %v2783_v34, 7 }
 0x1dc   : >> { %v2787_v14 = vsel %vm539_vm4, 0.0, %v2785_v26  ;;  %v2788_v31 = vsel %vm539_vm4, %v2785_v26, 0.0 }
 0x1dd   : >> { %5631 = vst.msk [vmem:[%s6794_s13 + $0x50] sm:$0xff] %vm211_vm0, %v2787_v14 }
 0x1de   : >> { %5632 = vst.msk [vmem:[%s6794_s13 + $0x58] sm:$0x3] %vm213_vm1, %v2788_v31  ;;  %s8951_s13 = smov (%p205_p11), 0  }
 0x1e5   : > { %v2832_v13 = vld [vmem:[#allocation3 + $0x1] sm:$0xff]  ;;  %v2833_v33 = vld [vmem:[#allocation3 + $0x9] sm:$0xff]  ;;  %v3704_v56 = vld [vmem:[#allocation3 + $0x13] sm:$0xff] }
 0x1e6   : > { %v3703_v2 = vld [vmem:[#allocation3 + $0xb] sm:$0xff]  ;;  %v2855_v38 = vpack.c.bf16 %v2833_v33, %v2832_v13  ;;  %v2835_v45 = vld [vmem:[#allocation3 + $0x19] sm:$0xff]  ;;  %v3706_v25 = vld [vmem:[#allocation3 + $0x23] sm:$0xff] }
 0x1e7   : > { %v2834_v9 = vld [vmem:[#allocation3 + $0x11] sm:$0xff]  ;;  %v3726_v8 = vpack.c.bf16 %v3704_v56, %v3703_v2  ;;  %v3705_v23 = vld [vmem:[#allocation3 + $0x1b] sm:$0xff]  ;;  %v2837_v60 = vld [vmem:[#allocation3 + $0x29] sm:$0xff] }
 0x1e8   : > { %v2856_v51 = vpack.c.bf16 %v2835_v45, %v2834_v9  ;;  %5964 = vmatprep.mubr.msk.bf16.mxu1 %vm211_vm0, %v2855_v38  ;;  %v3727_v53 = vpack.c.bf16 %v3706_v25, %v3705_v23  ;;  %v2836_v15 = vld [vmem:[#allocation3 + $0x21] sm:$0xff]  ;;  %v3707_v7 = vld [vmem:[#allocation3 + $0x2b] sm:$0xff]  ;;  %v3708_v6 = vld [vmem:[#allocation3 + $0x33] sm:$0xff] }
 0x1e9   : > { %6076 = vmatprep.mubr.msk.bf16.mxu0 %vm211_vm0, %v3726_v8  ;;  %v2857_v37 = vpack.c.bf16 %v2837_v60, %v2836_v15  ;;  %v3728_v17 = vpack.c.bf16 %v3708_v6, %v3707_v7  ;;  %v2838_v49 = vld [vmem:[#allocation3 + $0x31] sm:$0xff]  ;;  %v2839_v59 = vld [vmem:[#allocation3 + $0x39] sm:$0xff]  ;;  %v3710_v44 = vld [vmem:[#allocation3 + $0x43] sm:$0xff] }
 0x1ea   : > { %5965 = vmatmul.mubr.msk.bf16.vlgmr.msra.gmra.mrb[0].mxu1 %vm211_vm0, %v2856_v51  ;;  %v3709_v29 = vld [vmem:[#allocation3 + $0x3b] sm:$0xff]  ;;  %6077 = vmatmul.mubr.msk.bf16.vlgmr.msra.gmra.mrb[0].mxu0 %vm211_vm0, %v3727_v53  ;;  %v2841_v1 = vld [vmem:[#allocation3 + $0x49] sm:$0xff]  ;;  %v3712_v4 = vld [vmem:[#allocation3 + $0x53] sm:$0xff]  ;;  %v2858_v18 = vpack.c.bf16 %v2839_v59, %v2838_v49 }
 0x1eb   : > { %5989 = vmatpush3.bf16.msra.mxu1 %v6558_v10  ;;  %6101 = vmatpush3.bf16.msra.mxu0 %v6559_v24  ;;  %v2840_v43 = vld [vmem:[#allocation3 + $0x41] sm:$0xff]  ;;  %v3711_v21 = vld [vmem:[#allocation3 + $0x4b] sm:$0xff]  ;;  %v3729_v46 = vpack.c.bf16 %v3710_v44, %v3709_v29  ;;  %v2843_v36 = vld [vmem:[#allocation3 + $0x59] sm:$0xff] }
 0x1ec   : > { %5968 = vmatprep.mubr.msk.bf16.mxu1 %vm211_vm0, %v2857_v37  ;;  %6080 = vmatprep.mubr.msk.bf16.mxu0 %vm211_vm0, %v3728_v17  ;;  %v2859_v50 = vpack.c.bf16 %v2841_v1, %v2840_v43  ;;  %v3730_v28 = vpack.c.bf16 %v3712_v4, %v3711_v21  ;;  %v2842_v47 = vld [vmem:[#allocation3 + $0x51] sm:$0xff]  ;;  %v3713_v5 = vld [vmem:[#allocation3 + $0x5b] sm:$0xff]  ;;  %v3714_v19 = vld [vmem:[#allocation3 + $0x63] sm:$0xff] }
 0x1ed   : > { %6102 = vmatprep.subr.bf16.mxu0 %v6560_v22  ;;  %v2844_v58 = vld [vmem:[#allocation3 + $0x61] sm:$0xff]  ;;  %v2845_v32 = vld [vmem:[#allocation3 + $0x69] sm:$0xff]  ;;  %5990 = vmatprep.subr.bf16.mxu1 %v6561_v41  ;;  %v8615_v63 = vld [vmem:[#allocation3 + $0x14] sm:$0xff]  ;;  %v2860_v54 = vpack.c.bf16 %v2843_v36, %v2842_v47  ;;  %v3731_v35 = vpack.c.bf16 %v3714_v19, %v3713_v5 }
 0x1ee   : > { %v3942_v61 = vld [vmem:[#allocation3 + $0xc] sm:$0xff]  ;;  %v2861_v3 = vpack.c.bf16 %v2845_v32, %v2844_v58  ;;  %v2847_v55 = vld [vmem:[#allocation3 + $0x79] sm:$0xff]  ;;  %v8621_v30 = vld [vmem:[#allocation3 + $0x24] sm:$0xff] }
 0x1ef   : > { %6103 = vmatpush3.bf16.msra.mxu0 %v6560_v22  ;;  %5991 = vmatpush3.bf16.msra.mxu1 %v6561_v41  ;;  %v3965_v0 = vpack.c.bf16 %v8615_v63, %v3942_v61  ;;  %v2846_v16 = vld [vmem:[#allocation3 + $0x71] sm:$0xff]  ;;  %v8619_v39 = vld [vmem:[#allocation3 + $0x1c] sm:$0xff]  ;;  %v2849_v48 = vld [vmem:[#allocation3 + $0x89] sm:$0xff] }
 0x1f0   : > { %6128 = vmatprep.subr.bf16.mxu0 %v6562_v42  ;;  %v2848_v40 = vld [vmem:[#allocation3 + $0x81] sm:$0xff]  ;;  %v8631_v12 = vld [vmem:[#allocation3 + $0x2c] sm:$0xff]  ;;  %v8633_v52 = vld [vmem:[#allocation3 + $0x34] sm:$0xff]  ;;  %6016 = vmatprep.subr.bf16.mxu1 %v8628_v57  ;;  %v2862_v34 = vpack.c.bf16 %v2847_v55, %v2846_v16  ;;  %v3966_v26 = vpack.c.bf16 %v8621_v30, %v8619_v39 }
 0x1f1   : > { %v2863_v14 = vpack.c.bf16 %v2849_v48, %v2848_v40  ;;  %v3967_v31 = vpack.c.bf16 %v8633_v52, %v8631_v12  ;;  %v2850_v62 = vld [vmem:[#allocation3 + $0x91] sm:$0xff]  ;;  %v2851_v13 = vld [vmem:[#allocation3 + $0x99] sm:$0xff]  ;;  %v8646_v2 = vld [vmem:[#allocation3 + $0x44] sm:$0xff] }
 0x1f2   : > { %5969 = vmatmul.mubr.msk.bf16.gmra.mrb[4].mxu1 %vm211_vm0, %v2858_v18  ;;  %6081 = vmatmul.mubr.msk.bf16.gmra.mrb[4].mxu0 %vm211_vm0, %v3729_v46  ;;  %v8644_v33 = vld [vmem:[#allocation3 + $0x3c] sm:$0xff]  ;;  %v2853_v56 = vld [vmem:[#allocation3 + $0xa9] sm:$0xff]  ;;  %v8653_v45 = vld [vmem:[#allocation3 + $0x54] sm:$0xff]  ;;  %v2864_v51 = vpack.c.bf16 %v2851_v13, %v2850_v62  ;;  %v4204_v13 = vpack.c.bf16 %v8619_v39, %v8615_v63 }
 0x1f3   : > { %5972 = vmatprep.mubr.msk.bf16.mxu1 %vm211_vm0, %v2859_v50  ;;  %6084 = vmatprep.mubr.msk.bf16.mxu0 %vm211_vm0, %v3730_v28  ;;  %v2852_v38 = vld [vmem:[#allocation3 + $0xa1] sm:$0xff]  ;;  %v8651_v9 = vld [vmem:[#allocation3 + $0x4c] sm:$0xff]  ;;  %v3968_v10 = vpack.c.bf16 %v8646_v2, %v8644_v33  ;;  %v8675_v37 = vld [vmem:[#allocation3 + $0x74] sm:$0xff]  ;;  %v4206_v63 = vpack.c.bf16 %v8644_v33, %v8633_v52 }
 0x1f4   : > { %v8658_v8 = vld [vmem:[%s9157_s2 + $0x70] sm:$0xff]   ;;  %v2865_v23 = vpack.c.bf16 %v2853_v56, %v2852_v38  ;;  %v3969_v25 = vpack.c.bf16 %v8653_v45, %v8651_v9  ;;  %v8668_v24 = vld [vmem:[#allocation3 + $0x5c] sm:$0xff]  ;;  %v8671_v15 = vld [vmem:[#allocation3 + $0x64] sm:$0xff] }
 0x1f5   : > { %v2854_v53 = vld [vmem:[#allocation3 + $0xb1] sm:$0x3]  ;;  %v2793_v60 = vld [vmem:[#allocation3] sm:$0xff]  ;;  %v2794_v7 = vld [vmem:[#allocation3 + $0x8] sm:$0xff]  ;;  %v3970_v49 = vpack.c.bf16 %v8671_v15, %v8668_v24 }
 0x1f6   : > { %v8673_v6 = vld [vmem:[#allocation3 + $0x6c] sm:$0xff]  ;;  %v2866_v17 = vpack.c.bf16 %v2854_v53, %v2854_v53  ;;  %v2816_v59 = vpack.c.bf16 %v2794_v7, %v2793_v60  ;;  %v2796_v22 = vld [vmem:[#allocation3 + $0x18] sm:$0xff]  ;;  %v8687_v1 = vld [vmem:[#allocation3 + $0x84] sm:$0xff] }
 0x1f7   : > { %v3971_v29 = vpack.c.bf16 %v8675_v37, %v8673_v6  ;;  %v2795_v44 = vld [vmem:[#allocation3 + $0x10] sm:$0xff]  ;;  %v8685_v43 = vld [vmem:[#allocation3 + $0x7c] sm:$0xff]  ;;  %v2798_v4 = vld [vmem:[#allocation3 + $0x28] sm:$0xff] }
 0x1f8   : > { %v2797_v21 = vld [vmem:[#allocation3 + $0x20] sm:$0xff]  ;;  %v8689_v18 = vld [vmem:[#allocation3 + $0x8c] sm:$0xff]  ;;  %v8691_v46 = vld [vmem:[#allocation3 + $0x94] sm:$0xff]  ;;  %v2817_v50 = vpack.c.bf16 %v2796_v22, %v2795_v44  ;;  %v3972_v28 = vpack.c.bf16 %v8687_v1, %v8685_v43 }
 0x1f9   : > { %v2818_v41 = vpack.c.bf16 %v2798_v4, %v2797_v21  ;;  %v3973_v47 = vpack.c.bf16 %v8691_v46, %v8689_v18  ;;  %v6565_v36 = vld [vmem:[%s9157_s2 + $0x28] sm:$0xff]   ;;  %v2799_v5 = vld [vmem:[#allocation3 + $0x30] sm:$0xff]  ;;  %v8703_v19 = vld [vmem:[#allocation3 + $0x9c] sm:$0xff] }
 0x1fa   : > { %5973 = vmatmul.mubr.msk.bf16.gmra.mrb[8].mxu1 %vm211_vm0, %v2860_v54  ;;  %6085 = vmatmul.mubr.msk.bf16.gmra.mrb[8].mxu0 %vm211_vm0, %v3731_v35  ;;  %v8705_v58 = vld [vmem:[#allocation3 + $0xa4] sm:$0xff]  ;;  %v8712_v54 = vld [vmem:[%s9157_s2 + $0x30] sm:$0xff]   ;;  %v2804_v48 = vld [vmem:[#allocation3 + $0x58] sm:$0xff] }
 0x1fb   : > { %5976 = vmatprep.mubr.msk.bf16.mxu1 %vm211_vm0, %v2861_v3  ;;  %6104 = vmatprep.mubr.msk.bf16.mxu0 %vm211_vm0, %v3965_v0  ;;  %v2801_v32 = vld [vmem:[#allocation3 + $0x40] sm:$0xff]  ;;  %v2802_v61 = vld [vmem:[#allocation3 + $0x48] sm:$0xff]  ;;  %v8716_v3 = vld [vmem:[#allocation3 + $0xb4] sm:$0xff]  ;;  %v3974_v16 = vpack.c.bf16 %v8705_v58, %v8703_v19 }
 0x1fc   : > { %v8714_v35 = vld [vmem:[#allocation3 + $0xac] sm:$0xff]  ;;  %v2820_v55 = vpack.c.bf16 %v2802_v61, %v2801_v32  ;;  %v2808_v56 = vld [vmem:[#allocation3 + $0x78] sm:$0xff]  ;;  %v8748_v52 = vld [vmem:[%s9157_s2 + $0x80] sm:$0xff]  }
 0x1fd   : > { %v3975_v40 = vpack.c.bf16 %v8716_v3, %v8714_v35  ;;  %v2807_v38 = vld [vmem:[#allocation3 + $0x70] sm:$0xff]  ;;  %v6568_v39 = vld [vmem:[%s9157_s2 + $0x78] sm:$0xff]   ;;  %v8774_v4 = vld [vmem:[#allocation3 + $0x22] sm:$0xff] }
 0x1fe   : > { %v2811_v60 = vld [vmem:[#allocation3 + $0x90] sm:$0xff]  ;;  %v2812_v7 = vld [vmem:[#allocation3 + $0x98] sm:$0xff] }
 0x1ff   : > { %v2825_v33 = vpack.c.bf16 %v2812_v7, %v2811_v60  ;;  %v8759_v44 = vld [vmem:[#allocation3 + $0xa] sm:$0xff]  ;;  %v8769_v22 = vld [vmem:[#allocation3 + $0x12] sm:$0xff]  ;;  %v8771_v21 = vld [vmem:[#allocation3 + $0x1a] sm:$0xff] }
 0x200   : > { %v8813_v32 = vld [vmem:[#allocation3 + $0x52] sm:$0xff]  ;;  %v8815_v61 = vld [vmem:[#allocation3 + $0x5a] sm:$0xff]  ;;  %v8854_v60 = vld [vmem:[#allocation3 + $0xa2] sm:$0xff] }
 0x201   : > { %v8856_v7 = vld [vmem:[#allocation3 + $0xaa] sm:$0xff] }
 0x202   : > { %5977 = vmatmul.mubr.msk.bf16.gmra.mrb[12].mxu1 %vm211_vm0, %v2862_v34  ;;  %6105 = vmatmul.mubr.msk.bf16.vlgmr.msra.gmra.mrb[0].mxu0 %vm211_vm0, %v3966_v26  ;;  %v3964_v34 = vld [vmem:[#allocation3 + $0xbc] sm:$0x3]  ;;  %v2805_v26 = vld [vmem:[#allocation3 + $0x60] sm:$0xff] }
 0x203   : > { %5980 = vmatprep.mubr.msk.bf16.mxu1 %vm211_vm0, %v2863_v14  ;;  %6129 = vmatpush3.bf16.msra.mxu0 %v6562_v42  ;;  %v2800_v42 = vld [vmem:[#allocation3 + $0x38] sm:$0xff]  ;;  %v2806_v14 = vld [vmem:[#allocation3 + $0x68] sm:$0xff]  ;;  %v3976_v62 = vpack.c.bf16 %v3964_v34, %v3964_v34 }
 0x204   : > { %6108 = vmatprep.mubr.msk.bf16.mxu0 %vm211_vm0, %v3967_v31  ;;  %6130 = vmatprep.subr.bf16.mxu0 %v6564_v27  ;;  %v2819_v0 = vpack.c.bf16 %v2800_v42, %v2799_v5  ;;  %v4213_v5 = vpack.c.bf16 %v8714_v35, %v8705_v58  ;;  %v4203_v58 = vld [vmem:[#allocation3 + $0xc4] sm:$0x3]  ;;  %v8820_v35 = vld [vmem:[#allocation3 + $0x6a] sm:$0xff]  ;;  %v8831_v34 = vld [vmem:[#allocation3 + $0x7a] sm:$0xff] }
 0x207   : > { %6131 = vmatpush3.bf16.msra.mxu0 %v6564_v27  ;;  %v2822_v27 = vpack.c.bf16 %v2806_v14, %v2805_v26  ;;  %v4422_v26 = vld [vmem:[#allocation3 + $0x25] sm:$0xff]  ;;  %v4423_v14 = vld [vmem:[#allocation3 + $0x2d] sm:$0xff] }
 0x208   : > { %6156 = vmatprep.subr.bf16.mxu0 %v8658_v8 }
 0x20a   : > { %5981 = vmatmul.mubr.msk.bf16.gmra.mrb[16].mxu1 %vm211_vm0, %v2864_v51  ;;  %6109 = vmatmul.mubr.msk.bf16.gmra.mrb[4].mxu0 %vm211_vm0, %v3968_v10  ;;  %v2809_v51 = vld [vmem:[#allocation3 + $0x80] sm:$0xff]  ;;  %v2810_v10 = vld [vmem:[#allocation3 + $0x88] sm:$0xff] }
 0x20b   : > { %5984 = vmatprep.mubr.msk.bf16.mxu1 %vm211_vm0, %v2865_v23  ;;  %6112 = vmatprep.mubr.msk.bf16.mxu0 %vm211_vm0, %v3969_v25  ;;  %v2823_v23 = vpack.c.bf16 %v2808_v56, %v2807_v38  ;;  %v4205_v25 = vpack.c.bf16 %v8631_v12, %v8621_v30  ;;  %v2824_v53 = vpack.c.bf16 %v2810_v10, %v2809_v51  ;;  %v2813_v30 = vld [vmem:[#allocation3 + $0xa0] sm:$0xff]  ;;  %v2814_v12 = vld [vmem:[#allocation3 + $0xa8] sm:$0xff] }
 0x20c   : > { %v4444_v56 = vpack.c.bf16 %v4423_v14, %v4422_v26  ;;  %v4665_v26 = vld [vmem:[#allocation3 + $0x46] sm:$0xff]  ;;  %v4666_v14 = vld [vmem:[#allocation3 + $0x4e] sm:$0xff] }
 0x212   : > { %5985 = vmatmul.mubr.msk.bf16.gmra.mrb[20].mxu1 %vm211_vm0, %v2866_v17  ;;  %6113 = vmatmul.mubr.msk.bf16.gmra.mrb[8].mxu0 %vm211_vm0, %v3970_v49  ;;  %v4207_v17 = vpack.c.bf16 %v8651_v9, %v8646_v2  ;;  %v2826_v49 = vpack.c.bf16 %v2814_v12, %v2813_v30  ;;  %v4209_v9 = vpack.c.bf16 %v8673_v6, %v8671_v15  ;;  %v8776_v15 = vld [vmem:[#allocation3 + $0x2a] sm:$0xff]  ;;  %v4428_v30 = vld [vmem:[#allocation3 + $0x55] sm:$0xff]  ;;  %v4429_v12 = vld [vmem:[#allocation3 + $0x5d] sm:$0xff] }
 0x213   : > { %5992 = vmatprep.mubr.msk.bf16.mxu1 %vm211_vm0, %v2816_v59  ;;  %6116 = vmatprep.mubr.msk.bf16.mxu0 %vm211_vm0, %v3971_v29  ;;  %v4208_v59 = vpack.c.bf16 %v8668_v24, %v8653_v45  ;;  %v3225_v29 = vld [vmem:[#allocation3 + $0x2] sm:$0xff]  ;;  %v4210_v24 = vpack.c.bf16 %v8685_v43, %v8675_v37  ;;  %v3249_v6 = vpack.c.bf16 %v8771_v21, %v8769_v22 }
 0x214   : > { %v3248_v45 = vpack.c.bf16 %v8759_v44, %v3225_v29  ;;  %v4211_v37 = vpack.c.bf16 %v8689_v18, %v8687_v1  ;;  %v3250_v43 = vpack.c.bf16 %v8776_v15, %v8774_v4  ;;  %v8798_v1 = vld [vmem:[#allocation3 + $0x42] sm:$0xff]  ;;  %v8800_v18 = vld [vmem:[#allocation3 + $0x4a] sm:$0xff] }
 0x215   : > { %v3252_v42 = vpack.c.bf16 %v8800_v18, %v8798_v1  ;;  %v4431_v29 = vld [vmem:[#allocation3 + $0x6d] sm:$0xff] }
 0x21a   : > { %5993 = vmatmul.mubr.msk.bf16.vlgmr.msra.gmra.mrb[0].mxu1 %vm211_vm0, %v2817_v50  ;;  %6117 = vmatmul.mubr.msk.bf16.gmra.mrb[12].mxu0 %vm211_vm0, %v3972_v28  ;;  %v4212_v50 = vpack.c.bf16 %v8703_v19, %v8691_v46  ;;  %v6569_v28 = vld [vmem:[%s9157_s2 + $0x38] sm:$0xff]  }
 0x21b   : > { %6017 = vmatpush3.bf16.msra.mxu1 %v8628_v57  ;;  %5996 = vmatprep.mubr.msk.bf16.mxu1 %vm211_vm0, %v2818_v41  ;;  %v2803_v57 = vld [vmem:[#allocation3 + $0x50] sm:$0xff]  ;;  %v4202_v46 = vld [vmem:[#allocation3 + $0xbc] sm:$0xff] }
 0x21c   : > { %6120 = vmatprep.mubr.msk.bf16.mxu0 %vm211_vm0, %v3973_v47  ;;  %6018 = vmatprep.subr.bf16.mxu1 %v6565_v36  ;;  %v2821_v31 = vpack.c.bf16 %v2804_v48, %v2803_v57  ;;  %v8792_v41 = vld [vmem:[#allocation3 + $0x32] sm:$0xff]  ;;  %v8794_v47 = vld [vmem:[#allocation3 + $0x3a] sm:$0xff]  ;;  %v4214_v19 = vpack.c.bf16 %v4202_v46, %v8716_v3 }
 0x21d   : > { %v4420_v3 = vld [vmem:[#allocation3 + $0x15] sm:$0xff]  ;;  %v4437_v46 = vld [vmem:[#allocation3 + $0x9d] sm:$0xff] }
 0x21e   : > { %v8829_v48 = vld [vmem:[#allocation3 + $0x72] sm:$0xff] }
 0x21f   : > { %6019 = vmatpush3.bf16.msra.mxu1 %v6565_v36  ;;  %v3251_v36 = vpack.c.bf16 %v8794_v47, %v8792_v41  ;;  %v3255_v38 = vpack.c.bf16 %v8831_v34, %v8829_v48 }
 0x220   : > { %6044 = vmatprep.subr.bf16.mxu1 %v8712_v54 }
 0x222   : > { %5997 = vmatmul.mubr.msk.bf16.gmra.mrb[4].mxu1 %vm211_vm0, %v2819_v0  ;;  %6121 = vmatmul.mubr.msk.bf16.gmra.mrb[16].mxu0 %vm211_vm0, %v3974_v16  ;;  %v4421_v0 = vld [vmem:[#allocation3 + $0x1d] sm:$0xff]  ;;  %v3253_v16 = vpack.c.bf16 %v8815_v61, %v8813_v32 }
 0x223   : > { %6000 = vmatprep.mubr.msk.bf16.mxu1 %vm211_vm0, %v2820_v55  ;;  %6124 = vmatprep.mubr.msk.bf16.mxu0 %vm211_vm0, %v3975_v40  ;;  %v4215_v55 = vpack.c.bf16 %v4203_v58, %v4203_v58  ;;  %v4443_v57 = vpack.c.bf16 %v4421_v0, %v4420_v3  ;;  %v4440_v58 = vld [vmem:[#allocation3 + $0xb5] sm:$0xff]  ;;  %v4441_v3 = vld [vmem:[#allocation3 + $0xbd] sm:$0xff] }
 0x224   : > { %v4659_v0 = vld [vmem:[#allocation3 + $0x16] sm:$0xff] }
 0x22a   : > { %6001 = vmatmul.mubr.msk.bf16.gmra.mrb[8].mxu1 %vm211_vm0, %v2821_v31  ;;  %6125 = vmatmul.mubr.msk.bf16.gmra.mrb[20].mxu0 %vm211_vm0, %v3976_v62  ;;  %v8834_v31 = vld [vmem:[#allocation3 + $0x82] sm:$0xff]  ;;  %v8836_v62 = vld [vmem:[#allocation3 + $0x8a] sm:$0xff] }
 0x22b   : > { %6004 = vmatprep.mubr.msk.bf16.mxu1 %vm211_vm0, %v2822_v27  ;;  %6132 = vmatprep.mubr.msk.bf16.mxu0 %vm211_vm0, %v4204_v13  ;;  %v4424_v27 = vld [vmem:[#allocation3 + $0x35] sm:$0xff]  ;;  %v4425_v13 = vld [vmem:[#allocation3 + $0x3d] sm:$0xff]  ;;  %v3256_v51 = vpack.c.bf16 %v8836_v62, %v8834_v31 }
 0x22c   : > { %v4445_v10 = vpack.c.bf16 %v4425_v13, %v4424_v27  ;;  %v3485_v27 = vld [vmem:[#allocation3 + $0xb2] sm:$0xff] }
 0x22d   : > { %v4667_v13 = vld [vmem:[#allocation3 + $0x56] sm:$0xff] }
 0x232   : > { %6005 = vmatmul.mubr.msk.bf16.gmra.mrb[12].mxu1 %vm211_vm0, %v2823_v23  ;;  %6133 = vmatmul.mubr.msk.bf16.vlgmr.msra.gmra.mrb[0].mxu0 %vm211_vm0, %v4205_v25  ;;  %v6571_v23 = vld [vmem:[%s9157_s2 + $0x88] sm:$0xff]   ;;  %v8848_v25 = vld [vmem:[#allocation3 + $0x92] sm:$0xff] }
 0x233   : > { %6008 = vmatprep.mubr.msk.bf16.mxu1 %vm211_vm0, %v2824_v53  ;;  %6157 = vmatpush3.bf16.msra.mxu0 %v8658_v8  ;;  %v2815_v8 = vld [vmem:[#allocation3 + $0xb0] sm:$0x3]  ;;  %v8850_v53 = vld [vmem:[#allocation3 + $0x9a] sm:$0xff] }
 0x234   : > { %6136 = vmatprep.mubr.msk.bf16.mxu0 %vm211_vm0, %v4206_v63  ;;  %6158 = vmatprep.subr.bf16.mxu0 %v6568_v39  ;;  %v2827_v2 = vpack.c.bf16 %v2815_v8, %v2815_v8  ;;  %v4426_v63 = vld [vmem:[#allocation3 + $0x45] sm:$0xff] }
 0x235   : > { %v4430_v8 = vld [vmem:[#allocation3 + $0x65] sm:$0xff] }
 0x237   : > { %6159 = vmatpush3.bf16.msra.mxu0 %v6568_v39  ;;  %v4427_v39 = vld [vmem:[#allocation3 + $0x4d] sm:$0xff] }
 0x238   : > { %6184 = vmatprep.subr.bf16.mxu0 %v8748_v52 }
 0x23a   : > { %6009 = vmatmul.mubr.msk.bf16.gmra.mrb[16].mxu1 %vm211_vm0, %v2825_v33  ;;  %6137 = vmatmul.mubr.msk.bf16.gmra.mrb[4].mxu0 %vm211_vm0, %v4207_v17  ;;  %v3257_v33 = vpack.c.bf16 %v8850_v53, %v8848_v25  ;;  %v4446_v17 = vpack.c.bf16 %v4427_v39, %v4426_v63  ;;  %v3716_v63 = vld [vmem:[#allocation3 + $0x73] sm:$0xff] }
 0x23b   : > { %6012 = vmatprep.mubr.msk.bf16.mxu1 %vm211_vm0, %v2826_v49  ;;  %6140 = vmatprep.mubr.msk.bf16.mxu0 %vm211_vm0, %v4208_v59  ;;  %v3258_v49 = vpack.c.bf16 %v8856_v7, %v8854_v60  ;;  %v4447_v59 = vpack.c.bf16 %v4429_v12, %v4428_v30  ;;  %v4671_v39 = vld [vmem:[#allocation3 + $0x76] sm:$0xff]  ;;  %v4672_v30 = vld [vmem:[#allocation3 + $0x7e] sm:$0xff] }
 0x242   : > { %6013 = vmatmul.mubr.msk.bf16.gmra.mrb[20].mxu1 %vm211_vm0, %v2827_v2  ;;  %6141 = vmatmul.mubr.msk.bf16.gmra.mrb[8].mxu0 %vm211_vm0, %v4209_v9  ;;  %v4432_v2 = vld [vmem:[#allocation3 + $0x75] sm:$0xff]  ;;  %v4433_v9 = vld [vmem:[#allocation3 + $0x7d] sm:$0xff] }
 0x243   : > { %6020 = vmatprep.mubr.msk.bf16.mxu1 %vm211_vm0, %v3248_v45  ;;  %6144 = vmatprep.mubr.msk.bf16.mxu0 %vm211_vm0, %v4210_v24  ;;  %v4448_v24 = vpack.c.bf16 %v4431_v29, %v4430_v8  ;;  %v3720_v8 = vld [vmem:[#allocation3 + $0x93] sm:$0xff] }
 0x244   : > { %v4675_v29 = vld [vmem:[#allocation3 + $0x96] sm:$0xff] }
 0x24a   : > { %6021 = vmatmul.mubr.msk.bf16.vlgmr.msra.gmra.mrb[0].mxu1 %vm211_vm0, %v3249_v6  ;;  %6145 = vmatmul.mubr.msk.bf16.gmra.mrb[12].mxu0 %vm211_vm0, %v4211_v37  ;;  %v3487_v6 = vpack.c.bf16 %v8769_v22, %v8759_v44  ;;  %v4449_v37 = vpack.c.bf16 %v4433_v9, %v4432_v2  ;;  %v3489_v44 = vpack.c.bf16 %v8792_v41, %v8776_v15  ;;  %v4442_v41 = vld [vmem:[#allocation3 + $0xc5] sm:$0x3] }
 0x24b   : > { %6045 = vmatpush3.bf16.msra.mxu1 %v8712_v54  ;;  %6024 = vmatprep.mubr.msk.bf16.mxu1 %vm211_vm0, %v3250_v43  ;;  %v8818_v54 = vld [vmem:[#allocation3 + $0x62] sm:$0xff]  ;;  %v3491_v15 = vpack.c.bf16 %v8813_v32, %v8800_v18  ;;  %v3493_v18 = vpack.c.bf16 %v8829_v48, %v8820_v35 }
 0x24c   : > { %6148 = vmatprep.mubr.msk.bf16.mxu0 %vm211_vm0, %v4212_v50  ;;  %6046 = vmatprep.subr.bf16.mxu1 %v6569_v28  ;;  %v3254_v40 = vpack.c.bf16 %v8820_v35, %v8818_v54  ;;  %v4434_v43 = vld [vmem:[#allocation3 + $0x85] sm:$0xff]  ;;  %v4435_v50 = vld [vmem:[#allocation3 + $0x8d] sm:$0xff]  ;;  %v3495_v35 = vpack.c.bf16 %v8848_v25, %v8836_v62  ;;  %v3497_v62 = vpack.c.bf16 %v3485_v27, %v8856_v7 }
 0x24d   : > { %v4661_v32 = vld [vmem:[#allocation3 + $0x26] sm:$0xff]  ;;  %v4688_v7 = vpack.c.bf16 %v4672_v30, %v4671_v39  ;;  %v4676_v2 = vld [vmem:[#allocation3 + $0x9e] sm:$0xff] }
 0x24e   : > { %v3715_v25 = vld [vmem:[#allocation3 + $0x6b] sm:$0xff] }
 0x24f   : > { %6047 = vmatpush3.bf16.msra.mxu1 %v6569_v28  ;;  %v4436_v28 = vld [vmem:[#allocation3 + $0x95] sm:$0xff]  ;;  %v3732_v12 = vpack.c.bf16 %v3716_v63, %v3715_v25 }
 0x250   : > { %6212 = vmatprep.subr.bf16.mxu1 %v8576_v11  ;;  %v4451_v22 = vpack.c.bf16 %v4437_v46, %v4436_v28  ;;  %v4678_v28 = vld [vmem:[#allocation3 + $0xae] sm:$0xff] }
 0x251   : > { %v3723_v46 = vld [vmem:[#allocation3 + $0xab] sm:$0xff] }
 0x252   : > { %6025 = vmatmul.mubr.msk.bf16.gmra.mrb[4].mxu1 %vm211_vm0, %v3251_v36  ;;  %6149 = vmatmul.mubr.msk.bf16.gmra.mrb[16].mxu0 %vm211_vm0, %v4213_v5  ;;  %v3488_v36 = vpack.c.bf16 %v8774_v4, %v8771_v21  ;;  %v4450_v5 = vpack.c.bf16 %v4435_v50, %v4434_v43  ;;  %v3490_v21 = vpack.c.bf16 %v8798_v1, %v8794_v47  ;;  %v3722_v43 = vld [vmem:[#allocation3 + $0xa3] sm:$0xff] }
 0x253   : > { %6028 = vmatprep.mubr.msk.bf16.mxu1 %vm211_vm0, %v3252_v42  ;;  %6152 = vmatprep.mubr.msk.bf16.mxu0 %vm211_vm0, %v4214_v19  ;;  %v4438_v42 = vld [vmem:[#allocation3 + $0xa5] sm:$0xff]  ;;  %v4439_v19 = vld [vmem:[#allocation3 + $0xad] sm:$0xff]  ;;  %v3492_v47 = vpack.c.bf16 %v8818_v54, %v8815_v61  ;;  %v4454_v1 = vpack.c.bf16 %v4442_v41, %v4442_v41  ;;  %v3494_v61 = vpack.c.bf16 %v8834_v31, %v8831_v34 }
 0x254   : > { %v4452_v4 = vpack.c.bf16 %v4439_v19, %v4438_v42  ;;  %v3496_v34 = vpack.c.bf16 %v8854_v60, %v8850_v53  ;;  %v4685_v31 = vpack.c.bf16 %v4666_v14, %v4665_v26  ;;  %v4677_v50 = vld [vmem:[#allocation3 + $0xa6] sm:$0xff] }
 0x255   : > { %v4691_v42 = vpack.c.bf16 %v4678_v28, %v4677_v50 }
 0x25a   : > { %6029 = vmatmul.mubr.msk.bf16.gmra.mrb[8].mxu1 %vm211_vm0, %v3253_v16  ;;  %6153 = vmatmul.mubr.msk.bf16.gmra.mrb[20].mxu0 %vm211_vm0, %v4215_v55  ;;  %v4660_v16 = vld [vmem:[#allocation3 + $0x1e] sm:$0xff]  ;;  %v4662_v55 = vld [vmem:[#allocation3 + $0x2e] sm:$0xff] }
 0x25b   : > { %6032 = vmatprep.mubr.msk.bf16.mxu1 %vm211_vm0, %v3254_v40  ;;  %6160 = vmatprep.mubr.msk.bf16.mxu0 %vm211_vm0, %v4443_v57  ;;  %v4663_v40 = vld [vmem:[#allocation3 + $0x36] sm:$0xff]  ;;  %v4664_v57 = vld [vmem:[#allocation3 + $0x3e] sm:$0xff]  ;;  %v4683_v54 = vpack.c.bf16 %v4662_v55, %v4661_v32 }
 0x25c   : > { %v4684_v48 = vpack.c.bf16 %v4664_v57, %v4663_v40 }
 0x262   : > { %6033 = vmatmul.mubr.msk.bf16.gmra.mrb[12].mxu1 %vm211_vm0, %v3255_v38  ;;  %6161 = vmatmul.mubr.msk.bf16.vlgmr.msra.gmra.mrb[0].mxu0 %vm211_vm0, %v4444_v56  ;;  %v4668_v38 = vld [vmem:[#allocation3 + $0x5e] sm:$0xff] }
 0x263   : > { %6036 = vmatprep.mubr.msk.bf16.mxu1 %vm211_vm0, %v3256_v51  ;;  %6185 = vmatpush3.bf16.msra.mxu0 %v8748_v52  ;;  %v3247_v52 = vld [vmem:[#allocation3 + $0xb2] sm:$0x3]  ;;  %v4686_v56 = vpack.c.bf16 %v4668_v38, %v4667_v13  ;;  %v3486_v51 = vld [vmem:[#allocation3 + $0xba] sm:$0x3] }
 0x264   : > { %6164 = vmatprep.mubr.msk.bf16.mxu0 %vm211_vm0, %v4445_v10  ;;  %6186 = vmatprep.subr.bf16.mxu0 %v6571_v23  ;;  %v3259_v45 = vpack.c.bf16 %v3247_v52, %v3247_v52  ;;  %v4669_v10 = vld [vmem:[#allocation3 + $0x66] sm:$0xff]  ;;  %v3498_v53 = vpack.c.bf16 %v3486_v51, %v3486_v51 }
 0x265   : > { %v3719_v52 = vld [vmem:[#allocation3 + $0x8b] sm:$0xff] }
 0x267   : > { %6187 = vmatpush3.bf16.msra.mxu0 %v6571_v23  ;;  %v4670_v23 = vld [vmem:[#allocation3 + $0x6e] sm:$0xff] }
 0x268   : > { %v4687_v60 = vpack.c.bf16 %v4670_v23, %v4669_v10 }
 0x26a   : > { %6037 = vmatmul.mubr.msk.bf16.gmra.mrb[16].mxu1 %vm211_vm0, %v3257_v33  ;;  %6165 = vmatmul.mubr.msk.bf16.gmra.mrb[4].mxu0 %vm211_vm0, %v4446_v17  ;;  %v3717_v33 = vld [vmem:[#allocation3 + $0x7b] sm:$0xff]  ;;  %v3718_v17 = vld [vmem:[#allocation3 + $0x83] sm:$0xff] }
 0x26b   : > { %6040 = vmatprep.mubr.msk.bf16.mxu1 %vm211_vm0, %v3258_v49  ;;  %6168 = vmatprep.mubr.msk.bf16.mxu0 %vm211_vm0, %v4447_v59  ;;  %v4673_v49 = vld [vmem:[#allocation3 + $0x86] sm:$0xff]  ;;  %v4674_v59 = vld [vmem:[#allocation3 + $0x8e] sm:$0xff]  ;;  %v3733_v9 = vpack.c.bf16 %v3718_v17, %v3717_v33 }
 0x272   : > { %6041 = vmatmul.mubr.msk.bf16.gmra.mrb[20].mxu1 %vm211_vm0, %v3259_v45  ;;  %6169 = vmatmul.mubr.msk.bf16.gmra.mrb[8].mxu0 %vm211_vm0, %v4448_v24  ;;  %v4689_v45 = vpack.c.bf16 %v4674_v59, %v4673_v49  ;;  %v3734_v24 = vpack.c.bf16 %v3720_v8, %v3719_v52 }
 0x273   : > { %6048 = vmatprep.mubr.msk.bf16.mxu1 %vm211_vm0, %v3487_v6  ;;  %6172 = vmatprep.mubr.msk.bf16.mxu0 %vm211_vm0, %v4449_v37  ;;  %v4690_v6 = vpack.c.bf16 %v4676_v2, %v4675_v29  ;;  %v3721_v37 = vld [vmem:[#allocation3 + $0x9b] sm:$0xff] }
 0x27a   : > { %6049 = vmatmul.mubr.msk.bf16.vlgmr.msra.gmra.mrb[0].mxu1 %vm211_vm0, %v3488_v36  ;;  %6173 = vmatmul.mubr.msk.bf16.gmra.mrb[12].mxu0 %vm211_vm0, %v4450_v5  ;;  %v3724_v36 = vld [vmem:[#allocation3 + $0xb3] sm:$0xff] }
 0x27b   : > { %6214 = vmatpush3.bf16.msra.mxu1 %v8576_v11  ;;  %6052 = vmatprep.mubr.msk.bf16.mxu1 %vm211_vm0, %v3489_v44  ;;  %v4453_v11 = vpack.c.bf16 %v4441_v3, %v4440_v58  ;;  %v4679_v5 = vld [vmem:[#allocation3 + $0xb6] sm:$0xff]  ;;  %v4680_v44 = vld [vmem:[#allocation3 + $0xbe] sm:$0xff]  ;;  %v3736_v19 = vpack.c.bf16 %v3724_v36, %v3723_v46 }
 0x27c   : > { %6176 = vmatprep.mubr.msk.bf16.mxu0 %vm211_vm0, %v4451_v22  ;;  %6213 = vmatprep.subr.bf16.mxu1 %v8585_v20  ;;  %v3735_v22 = vpack.c.bf16 %v3722_v43, %v3721_v37  ;;  %v4692_v58 = vpack.c.bf16 %v4680_v44, %v4679_v5  ;;  %v3725_v3 = vld [vmem:[#allocation3 + $0xbb] sm:$0x3] }
 0x27f   : > { %6215 = vmatpush3.bf16.msra.mxu1 %v8585_v20  ;;  %v4682_v20 = vpack.c.bf16 %v4660_v16, %v4659_v0 }
 0x282   : > { %6053 = vmatmul.mubr.msk.bf16.gmra.mrb[4].mxu1 %vm211_vm0, %v3490_v21  ;;  %6177 = vmatmul.mubr.msk.bf16.gmra.mrb[16].mxu0 %vm211_vm0, %v4452_v4  ;;  %v4681_v21 = vld [vmem:[#allocation3 + $0xc6] sm:$0x3]  ;;  %v3737_v4 = vpack.c.bf16 %v3725_v3, %v3725_v3 }
 0x283   : > { %6056 = vmatprep.mubr.msk.bf16.mxu1 %vm211_vm0, %v3491_v15  ;;  %6180 = vmatprep.mubr.msk.bf16.mxu0 %vm211_vm0, %v4453_v11  ;;  %v4693_v15 = vpack.c.bf16 %v4681_v21, %v4681_v21 }
 0x28a   : > { %6057 = vmatmul.mubr.msk.bf16.gmra.mrb[8].mxu1 %vm211_vm0, %v3492_v47  ;;  %6181 = vmatmul.mubr.msk.bf16.gmra.mrb[20].mxu0 %vm211_vm0, %v4454_v1 }
 0x28b   : > { %6060 = vmatprep.mubr.msk.bf16.mxu1 %vm211_vm0, %v3493_v18  ;;  %6188 = vmatprep.mubr.msk.bf16.mxu0 %vm211_vm0, %v4682_v20 }
 0x292   : > { %6061 = vmatmul.mubr.msk.bf16.gmra.mrb[12].mxu1 %vm211_vm0, %v3494_v61  ;;  %6189 = vmatmul.mubr.msk.bf16.vlgmr.msra.gmra.mrb[0].mxu0 %vm211_vm0, %v4683_v54 }
 0x293   : > { %6064 = vmatprep.mubr.msk.bf16.mxu1 %vm211_vm0, %v3495_v35  ;;  %6192 = vmatprep.mubr.msk.bf16.mxu0 %vm211_vm0, %v4684_v48 }
 0x29a   : > { %6065 = vmatmul.mubr.msk.bf16.gmra.mrb[16].mxu1 %vm211_vm0, %v3496_v34  ;;  %6193 = vmatmul.mubr.msk.bf16.gmra.mrb[4].mxu0 %vm211_vm0, %v4685_v31 }
 0x29b   : > { %6068 = vmatprep.mubr.msk.bf16.mxu1 %vm211_vm0, %v3497_v62  ;;  %6196 = vmatprep.mubr.msk.bf16.mxu0 %vm211_vm0, %v4686_v56 }
 0x2a2   : > { %6069 = vmatmul.mubr.msk.bf16.gmra.mrb[20].mxu1 %vm211_vm0, %v3498_v53  ;;  %6197 = vmatmul.mubr.msk.bf16.gmra.mrb[8].mxu0 %vm211_vm0, %v4687_v60 }
 0x2a3   : > { %6088 = vmatprep.mubr.msk.bf16.mxu1 %vm211_vm0, %v3732_v12  ;;  %6200 = vmatprep.mubr.msk.bf16.mxu0 %vm211_vm0, %v4688_v7 }
 0x2aa   : > { %6089 = vmatmul.mubr.msk.bf16.vlgmr.msra.gmra.mrb[12].mxu1 %vm211_vm0, %v3733_v9  ;;  %6201 = vmatmul.mubr.msk.bf16.gmra.mrb[12].mxu0 %vm211_vm0, %v4689_v45 }
 0x2ab   : > { %6092 = vmatprep.mubr.msk.bf16.mxu1 %vm211_vm0, %v3734_v24  ;;  %6204 = vmatprep.mubr.msk.bf16.mxu0 %vm211_vm0, %v4690_v6 }
 0x2b2   : > { %6093 = vmatmul.mubr.msk.bf16.gmra.mrb[16].mxu1 %vm211_vm0, %v3735_v22  ;;  %6205 = vmatmul.mubr.msk.bf16.gmra.mrb[16].mxu0 %vm211_vm0, %v4691_v42 }
 0x2b3   : > { %6096 = vmatprep.mubr.msk.bf16.mxu1 %vm211_vm0, %v3736_v19  ;;  %6208 = vmatprep.mubr.msk.bf16.mxu0 %vm211_vm0, %v4692_v58 }
 0x2ba   : > { %6097 = vmatmul.mubr.msk.bf16.gmra.mrb[20].mxu1 %vm211_vm0, %v3737_v4  ;;  %6209 = vmatmul.mubr.msk.bf16.gmra.mrb[20].mxu0 %vm211_vm0, %v4693_v15 }
 0x34d   : > { %v6050_v11 = vpop.f32.mrb[0].mxu1 }
 0x34e   : > { %v3586_v41 = vpop.f32.mrb[1].mxu1 }
 0x34f   : > { %v6051_v0 = vpop.f32.mrb[2].mxu1 }
 0x350   : > { %v3589_v16 = vpop.f32.mrb[3].mxu1 }
 0x355   : > { %v6054_v47 = vpop.f32.mrb[4].mxu1 }
 0x356   : > { %v3602_v1 = vpop.f32.mrb[5].mxu1 }
 0x357   : > { %v6055_v18 = vpop.f32.mrb[6].mxu1 }
 0x358   : > { %v3605_v20 = vpop.f32.mrb[7].mxu1 }
 0x35d   : > { %v6058_v32 = vpop.f32.mrb[8].mxu1 }
 0x35e   : > { %v3618_v55 = vpop.f32.mrb[9].mxu1 }
 0x35f   : > { %v6059_v40 = vpop.f32.mrb[10].mxu1 }
 0x360   : > { %v3621_v57 = vpop.f32.mrb[11].mxu1 }
 0x365   : > { %v6190_v61 = vpop.f32.mrb[0].mxu0 }
 0x366   : > { %v6216_v54 = vadd.f32 %v6190_v61, %v6050_v11  ;;  %v4781_v35 = vpop.f32.mrb[1].mxu0 }
 0x367   : > { %v6217_v48 = vadd.f32 %v4781_v35, %v3586_v41  ;;  %v6191_v26 = vpop.f32.mrb[2].mxu0 }
 0x368   : > { %4901 = vst.msk [vmem:[#allocation4 + $0x10] sm:$0xff] %vm4898_vm5, %v6216_v54  ;;  %v6218_v14 = vadd.f32 %v6191_v26, %v6051_v0  ;;  %v4784_v27 = vpop.f32.mrb[3].mxu0 }
 0x369   : > { %4899 = vst.msk [vmem:[#allocation4] sm:$0xff] %vm4898_vm5, %v6217_v48  ;;  %v6219_v13 = vadd.f32 %v4784_v27, %v3589_v16 }
 0x36a   : > { %4902 = vst.msk [vmem:[#allocation4 + $0x18] sm:$0xff] %vm4898_vm5, %v6218_v14 }
 0x36b   : > { %4900 = vst.msk [vmem:[#allocation4 + $0x8] sm:$0xff] %vm4898_vm5, %v6219_v13 }
 0x36d   : > { %v6194_v38 = vpop.f32.mrb[4].mxu0 }
 0x36e   : > { %v6220_v34 = vadd.f32 %v6194_v38, %v6054_v47  ;;  %v4797_v31 = vpop.f32.mrb[5].mxu0 }
 0x36f   : > { %v6221_v62 = vadd.f32 %v4797_v31, %v3602_v1  ;;  %v6195_v56 = vpop.f32.mrb[6].mxu0 }
 0x370   : > { %4905 = vst.msk [vmem:[#allocation4 + $0x30] sm:$0xff] %vm4898_vm5, %v6220_v34  ;;  %v6222_v51 = vadd.f32 %v6195_v56, %v6055_v18  ;;  %v4800_v10 = vpop.f32.mrb[7].mxu0 }
 0x371   : > { %4903 = vst.msk [vmem:[#allocation4 + $0x20] sm:$0xff] %vm4898_vm5, %v6221_v62  ;;  %v6223_v23 = vadd.f32 %v4800_v10, %v3605_v20 }
 0x372   : > { %4906 = vst.msk [vmem:[#allocation4 + $0x38] sm:$0xff] %vm4898_vm5, %v6222_v51 }
 0x373   : > { %4904 = vst.msk [vmem:[#allocation4 + $0x28] sm:$0xff] %vm4898_vm5, %v6223_v23 }
 0x375   : > { %v6198_v25 = vpop.f32.mrb[8].mxu0 }
 0x376   : > { %v6224_v63 = vadd.f32 %v6198_v25, %v6058_v32  ;;  %v4813_v39 = vpop.f32.mrb[9].mxu0 }
 0x377   : > { %v6225_v30 = vadd.f32 %v4813_v39, %v3618_v55  ;;  %v6199_v53 = vpop.f32.mrb[10].mxu0 }
 0x378   : > { %4909 = vst.msk [vmem:[#allocation4 + $0x50] sm:$0xff] %vm4898_vm5, %v6224_v63  ;;  %v6226_v60 = vadd.f32 %v6199_v53, %v6059_v40  ;;  %v4816_v12 = vpop.f32.mrb[11].mxu0 }
 0x379   : > { %4907 = vst.msk [vmem:[#allocation4 + $0x40] sm:$0xff] %vm4898_vm5, %v6225_v30  ;;  %v6227_v7 = vadd.f32 %v4816_v12, %v3621_v57 }
 0x37a   : > { %4910 = vst.msk [vmem:[#allocation4 + $0x58] sm:$0xff] %vm4898_vm5, %v6226_v60 }
 0x37b   : > { %4908 = vst.msk [vmem:[#allocation4 + $0x48] sm:$0xff] %vm4898_vm5, %v6227_v7 }
 0x37d   : > { %v6090_v33 = vpop.f32.mrb[12].mxu1  ;;  %v6202_v17 = vpop.f32.mrb[12].mxu0 }
 0x37e   : > { %v3873_v49 = vpop.f32.mrb[13].mxu1  ;;  %v6228_v59 = vadd.f32 %v6202_v17, %v6090_v33  ;;  %v4829_v52 = vpop.f32.mrb[13].mxu0 }
 0x37f   : > { %v6091_v8 = vpop.f32.mrb[14].mxu1  ;;  %v6229_v29 = vadd.f32 %v4829_v52, %v3873_v49  ;;  %v6203_v2 = vpop.f32.mrb[14].mxu0 }
 0x380   : > { %v3876_v9 = vpop.f32.mrb[15].mxu1  ;;  %4913 = vst.msk [vmem:[#allocation4 + $0x70] sm:$0xff] %vm4898_vm5, %v6228_v59  ;;  %v6230_v45 = vadd.f32 %v6203_v2, %v6091_v8  ;;  %v4832_v24 = vpop.f32.mrb[15].mxu0 }
 0x381   : > { %4911 = vst.msk [vmem:[#allocation4 + $0x60] sm:$0xff] %vm4898_vm5, %v6229_v29  ;;  %v6231_v6 = vadd.f32 %v4832_v24, %v3876_v9 }
 0x382   : > { %4914 = vst.msk [vmem:[#allocation4 + $0x78] sm:$0xff] %vm4898_vm5, %v6230_v45 }
 0x383   : > { %4912 = vst.msk [vmem:[#allocation4 + $0x68] sm:$0xff] %vm4898_vm5, %v6231_v6 }
 0x385   : > { %v6094_v37 = vpop.f32.mrb[16].mxu1  ;;  %v6206_v43 = vpop.f32.mrb[16].mxu0 }
 0x386   : > { %v3889_v50 = vpop.f32.mrb[17].mxu1  ;;  %v6232_v28 = vadd.f32 %v6206_v43, %v6094_v37  ;;  %v4845_v46 = vpop.f32.mrb[17].mxu0 }
 0x387   : > { %v6095_v36 = vpop.f32.mrb[18].mxu1  ;;  %v6233_v5 = vadd.f32 %v4845_v46, %v3889_v50  ;;  %v6207_v44 = vpop.f32.mrb[18].mxu0 }
 0x388   : > { %v3892_v22 = vpop.f32.mrb[19].mxu1  ;;  %4917 = vst.msk [vmem:[#allocation4 + $0x90] sm:$0xff] %vm4898_vm5, %v6232_v28  ;;  %v6234_v42 = vadd.f32 %v6207_v44, %v6095_v36  ;;  %v4848_v19 = vpop.f32.mrb[19].mxu0 }
 0x389   : > { %4915 = vst.msk [vmem:[#allocation4 + $0x80] sm:$0xff] %vm4898_vm5, %v6233_v5  ;;  %v6235_v58 = vadd.f32 %v4848_v19, %v3892_v22 }
 0x38a   : > { %4918 = vst.msk [vmem:[#allocation4 + $0x98] sm:$0xff] %vm4898_vm5, %v6234_v42 }
 0x38b   : > { %4916 = vst.msk [vmem:[#allocation4 + $0x88] sm:$0xff] %vm4898_vm5, %v6235_v58 }
 0x38d   : > { %v6098_v3 = vpop.f32.mrb[20].mxu1  ;;  %v6210_v21 = vpop.f32.mrb[20].mxu0 }
 0x38e   : > { %v3905_v4 = vpop.f32.mrb[21].mxu1  ;;  %v6236_v15 = vadd.f32 %v6210_v21, %v6098_v3  ;;  %v4861_v11 = vpop.f32.mrb[21].mxu0 }
 0x38f   : > { %v6099_v41 = vpop.f32.mrb[22].mxu1  ;;  %v6237_v0 = vadd.f32 %v4861_v11, %v3905_v4  ;;  %v6211_v16 = vpop.f32.mrb[22].mxu0 }
 0x390   : > { %v3908_v47 = vpop.f32.mrb[23].mxu1  ;;  %4922 = vst.msk [vmem:[#allocation4 + $0xb0] sm:$0x3] %vm4921_vm6, %v6236_v15  ;;  %v4864_v1 = vpop.f32.mrb[23].mxu0 }
 0x391   : > { %4919 = vst.msk [vmem:[#allocation4 + $0xa0] sm:$0xff] %vm4898_vm5, %v6237_v0  ;;  %v6238_v18 = vadd.f32 %v4864_v1, %v3908_v47 }
 0x393   : > { %4920 = vst.msk [vmem:[#allocation4 + $0xa8] sm:$0xff] %vm4898_vm5, %v6238_v18 }
 0x394 LB: >> { %s4929_s9 = smul.u32 100, %s6650_s13  ;;  %vm4932_vm7 = vcmask 521216   ;;  %v6671_v32 = vmov 0.0   ;;  %vm4957_vm8 = vcmask 1044480   ;;  %s6650_s13 = sphi %s8951_s13, %s4928_s13  }
 0x395   : >> { %s4930_s7 = smul.u32 36, %s6650_s13  ;;  %s4928_s13 = sadd.s32 1, %s6650_s13  }
 0x396   : >> { %s4937_s23 = scalar_lea.vmem [#allocation4], %s4929_s9  ;;  %p4925_p12 = scmp.ge.s32.totalorder %s4928_s13, 2  }
 0x397   : >> { %s8958_s28 = scalar_lea.vmem [#allocation5], %s4930_s7  ;;  %v8986_v5 = vld [vmem:[%s9158_s3] ss:$0 sm:$0xff] (%p4925_p12)  ;;  %v8993_v58 = vld [vmem:[%s9158_s3 + $0x1] ss:$0 sm:$0xff] (%p4925_p12)  ;;  %vm5309_vm9 = vcmask (%p4925_p12), 130112  }
 0x398   : >> { %4933 = vst.msk [vmem:[%s8958_s28] sm:$0x3f] %vm4932_vm7, %v6671_v32  ;;  %5791 = vst.msk [vmem:[%s8958_s28 + $0x1e] sm:$0x3f] %vm4932_vm7, %v6671_v32  ;;  %v9000_v11 = vld [vmem:[%s9158_s3 + $0x2] ss:$0 sm:$0xff] (%p4925_p12) }
 0x399   : > { %v9007_v1 = vld [vmem:[%s9158_s3 + $0x3] ss:$0 sm:$0xff] (%p4925_p12)  ;;  %vm5316_vm10 = vcmask (%p4925_p12), 195712   ;;  %vm5319_vm11 = vcmask (%p4925_p12), 172032   ;;  %vm5335_vm12 = vcmask (%p4925_p12), 97312   ;;  %s5833_s5 = sshll.u32 (%p4925_p12), %s6721_s19, 5 }
 0x39a   : >> { %v4938_v20 = vld [vmem:[%s4937_s23] ss:$2 sm:$0xf]  ;;  %v5792_v55 = vld [vmem:[%s4937_s23 + $0x1] ss:$2 sm:$0xf]  ;;  %s9107_s14 = scalar_lea.hbm (%p4925_p12), %s9159_s4, %s5833_s5 }
 0x39b   : >> { %v5793_v40 = vld [vmem:[%s4937_s23 + $0xa] ss:$2 sm:$0xf]  ;;  %v5794_v57 = vld [vmem:[%s4937_s23 + $0xb] ss:$2 sm:$0xf]  ;;  %v4948_v61 = vmax.f32 %v4938_v20, %v5792_v55 }
 0x39c   : >> { %v5796_v54 = vld [vmem:[%s4937_s23 + $0x14] ss:$2 sm:$0xf]  ;;  %v4949_v35 = vmax.f32 %v5793_v40, %v5794_v57  ;;  %v5797_v48 = vld [vmem:[%s4937_s23 + $0x15] ss:$2 sm:$0xf] }
 0x39d   : >> { %v5798_v26 = vld [vmem:[%s4937_s23 + $0x1e] ss:$2 sm:$0xf]  ;;  %v5799_v14 = vld [vmem:[%s4937_s23 + $0x1f] ss:$2 sm:$0xf]  ;;  %v4974_v27 = vmax.f32 %v5796_v54, %v5797_v48 }
 0x39e   : >> { %v5801_v13 = vld [vmem:[%s4937_s23 + $0x28] ss:$2 sm:$0xf]  ;;  %v4950_v38 = vmax.f32 %v4948_v61, %v4949_v35  ;;  %v4975_v34 = vmax.f32 %v5798_v26, %v5799_v14  ;;  %v5802_v31 = vld [vmem:[%s4937_s23 + $0x29] ss:$2 sm:$0xf] }
 0x39f   : >> { %v5803_v62 = vld [vmem:[%s4937_s23 + $0x32] ss:$2 sm:$0xf]  ;;  %v5804_v56 = vld [vmem:[%s4937_s23 + $0x33] ss:$2 sm:$0xf]  ;;  %v4998_v51 = vmax.f32 %v5801_v13, %v5802_v31 }
 0x3a0   : >> { %v5806_v10 = vld [vmem:[%s4937_s23 + $0x3c] ss:$2 sm:$0xf]  ;;  %v4951_v23 = vmax.f32 %v4950_v38, 0.0  ;;  %v4976_v25 = vmax.f32 %v4974_v27, %v4975_v34  ;;  %v4999_v63 = vmax.f32 %v5803_v62, %v5804_v56  ;;  %v9014_v61 = vld [vmem:[%s9158_s3 + $0x4] ss:$0 sm:$0xff] (%p4925_p12) }
 0x3a1   : >> { %v5807_v39 = vld [vmem:[%s4937_s23 + $0x3d] ss:$2 sm:$0xf]  ;;  %v5808_v30 = vld [vmem:[%s4937_s23 + $0x46] ss:$2 sm:$0xf] }
 0x3a2   : >> { %v5809_v53 = vld [vmem:[%s4937_s23 + $0x47] ss:$2 sm:$0xf]  ;;  %v5022_v60 = vmax.f32 %v5806_v10, %v5807_v39  ;;  %v4953_v12 = vrot.slane %v4951_v23, 7  ;;  %v4977_v7 = vmax.f32 %v4976_v25, 0.0  ;;  %v5000_v33 = vmax.f32 %v4998_v51, %v4999_v63  ;;  %s5369_s6 = sshll.u32 (%p4925_p12), %s6757_s8, 4  ;;  %s9109_s6 = int_to_ptr.vmem [resolvable:$true] %s5369_s6 }
 0x3a3   : >> { %v5023_v17 = vmax.f32 %v5808_v30, %v5809_v53  ;;  %v9019_v54 = vld [vmem:[%s9158_s3 + $0x5] ss:$0 sm:$0xff] (%p4925_p12)  ;;  %v9024_v48 = vld [vmem:[%s9158_s3 + $0x6] ss:$0 sm:$0xff] (%p4925_p12)  ;;  %v9031_v34 = vld [vmem:[%s9158_s3 + $0x7] ss:$0 sm:$0xff] (%p4925_p12) }
 0x3a4   : >> { %v4956_v49 = vsel %vm539_vm4, 0.0, %v4953_v12  ;;  %v4979_v59 = vrot.slane %v4977_v7, 7  ;;  %v5001_v52 = vmax.f32 %v5000_v33, 0.0  ;;  %v9036_v31 = vld [vmem:[%s9158_s3 + $0x8] ss:$0 sm:$0xff] (%p4925_p12)  ;;  %vm5342_vm13 = vcmask (%p4925_p12), 162912  }
 0x3a5   : >> { %v5024_v8 = vmax.f32 %v5022_v60, %v5023_v17  ;;  %v4958_v29 = vsel %vm4957_vm8, %v4956_v49, 0.0  ;;  %vm5349_vm14 = vcmask (%p4925_p12), 228512   ;;  %vm5353_vm15 = vcmask (%p4925_p12), 176132   ;;  %s9114_s19 = scalar_lea.sflag (%p4925_p12), [#allocation7], %s191_s27  ;;  %s6572_s20 = scalar_lea.vmem (%p4925_p12), %s9109_s6, 32 }
 0x3a6   : >> { %5795 = vst.msk [vmem:[%s8958_s28 + $0x6] sm:$0x3f] %vm4932_vm7, %v4958_v29  ;;  %v4981_v2 = vsel %vm539_vm4, 0.0, %v4979_v59  ;;  %v5003_v9 = vrot.slane %v5001_v52, 7  ;;  %p6573_p13 = scmp.ne.s32.totalorder (%p4925_p12), %s9109_s6, %s6572_s20  ;;  %s6672_s22 = smov (%p4925_p12), [#allocation6]  }
 0x3a7   : >> { %v5025_v45 = vmax.f32 %v5024_v8, 0.0  ;;  %v4982_v24 = vsel %vm4957_vm8, %v4981_v2, 0.0  ;;  %4927 = sbr.rel (!%p4925_p12) target bundleno = 916 (0x394), region = 139  ;;  %s6576_s13 = sshll.u32 (%p4925_p12), %s6672_s22, 4  ;;  %s6577_s13 = int_to_ptr.vmem [resolvable:$false] %s6576_s13 }
 0x3a8   : >> { %5800 = vst.msk [vmem:[%s8958_s28 + $0xc] sm:$0x3f] %vm4932_vm7, %v4982_v24  ;;  %v5005_v6 = vsel %vm539_vm4, 0.0, %v5003_v9  ;;  %p6574_p0 = pnand (%p4925_p12), %p6573_p13, %p6738_p5  ;;  %s6578_s9 = scalar_lea.vmem (%p4925_p12), %s6577_s13, 64 }
 0x3a9   : >> { %v5027_v37 = vrot.slane %v5025_v45, 7  ;;  %v5006_v43 = vsel %vm4957_vm8, %v5005_v6, 0.0  ;;  %p6579_p2 = scmp.lt.s32.totalorder (%p4925_p12), %s9109_s6, %s6577_s13  ;;  %p6580_p3 = scmp.lt.s32.totalorder (%p4925_p12), %s6578_s9, %s6572_s20 }
 0x3aa   : >> { %5805 = vst.msk [vmem:[%s8958_s28 + $0x12] sm:$0x3f] %vm4932_vm7, %v5006_v43  ;;  %p6575_p1 = pneg (%p4925_p12), %p6574_p0 }
 0x3ab   : >> { %v5029_v50 = vsel %vm539_vm4, 0.0, %v5027_v37  ;;  %p6581_p4 = por (%p4925_p12), %p6580_p3, %p6579_p2 }
 0x3ac   : >> { %v5030_v28 = vsel %vm4957_vm8, %v5029_v50, 0.0 }
 0x3ad   : >> { %5810 = vst.msk [vmem:[%s8958_s28 + $0x18] sm:$0x3f] %vm4932_vm7, %v5030_v28  ;;  %p6582_p7 = pnand (%p4925_p12), %p6581_p4, %p6575_p1 }
 0x3b4   : > { %v5037_v46 = vld [vmem:[#allocation5 + $0x20] sm:$0xff]  ;;  %v5038_v36 = vld [vmem:[#allocation5 + $0x28] sm:$0xff] }
 0x3b5   : > { %v5049_v44 = vmul.f32 %v8986_v5, %v5037_v46  ;;  %v5050_v22 = vmul.f32 %v8986_v5, %v5038_v36  ;;  %v5063_v42 = vld [vmem:[#allocation5 + $0x21] sm:$0xff]  ;;  %v5064_v19 = vld [vmem:[#allocation5 + $0x29] sm:$0xff]  ;;  %v5175_v62 = vmul.f32 %v9019_v54, %v5038_v36 }
 0x3b6   : > { %v5075_v3 = vmul.f32 %v8993_v58, %v5063_v42  ;;  %v5076_v21 = vmul.f32 %v8993_v58, %v5064_v19  ;;  %v5089_v4 = vld [vmem:[#allocation5 + $0x22] sm:$0xff]  ;;  %v5090_v15 = vld [vmem:[#allocation5 + $0x2a] sm:$0xff]  ;;  %v5091_v19 = vld [vmem:[#allocation5 + $0x32] sm:$0xff] }
 0x3b7   : > { %v5101_v41 = vmul.f32 %v9000_v11, %v5089_v4  ;;  %v5102_v0 = vmul.f32 %v9000_v11, %v5090_v15  ;;  %v5115_v16 = vld [vmem:[#allocation5 + $0x26] sm:$0xff]  ;;  %v5116_v47 = vld [vmem:[#allocation5 + $0x2e] sm:$0xff] }
 0x3b8   : > { %v5082_v18 = vadd.f32 %v5075_v3, %v5049_v44  ;;  %v5083_v20 = vadd.f32 %v5076_v21, %v5050_v22  ;;  %v5127_v32 = vmul.f32 %v9007_v1, %v5115_v16  ;;  %v5128_v55 = vmul.f32 %v9007_v1, %v5116_v47  ;;  %v5141_v40 = vld [vmem:[#allocation5 + $0x27] sm:$0xff]  ;;  %v5142_v57 = vld [vmem:[#allocation5 + $0x2f] sm:$0xff] }
 0x3b9   : > { %v5189_v35 = vld [vmem:[#allocation5 + $0x2c] sm:$0xff]  ;;  %v5153_v27 = vmul.f32 %v9014_v61, %v5141_v40  ;;  %v5154_v13 = vmul.f32 %v9014_v61, %v5142_v57  ;;  %v9042_v10 = vmul.f32 %v9036_v31, %v5116_v47  ;;  %v5034_v23 = vld [vmem:[#allocation5] sm:$0xff]  ;;  %v5103_v57 = vmul.f32 %v9000_v11, %v5091_v19 }
 0x3ba   : > { %v5108_v26 = vadd.f32 %v5101_v41, %v5082_v18  ;;  %v5109_v14 = vadd.f32 %v5102_v0, %v5083_v20  ;;  %v5215_v38 = vld [vmem:[#allocation5 + $0x2d] sm:$0xff]  ;;  %v5201_v56 = vmul.f32 %v9024_v48, %v5189_v35  ;;  %v5060_v63 = vld [vmem:[#allocation5 + $0x1] sm:$0xff]  ;;  %v5046_v53 = vmul.f32 %v8986_v5, %v5034_v23  ;;  %v5117_v41 = vld [vmem:[#allocation5 + $0x36] sm:$0xff] }
 0x3bb   : > { %v5227_v51 = vmul.f32 %v9031_v34, %v5215_v38  ;;  %v5035_v25 = vld [vmem:[#allocation5 + $0x8] sm:$0xff]  ;;  %v5072_v17 = vmul.f32 %v8993_v58, %v5060_v63  ;;  %v5039_v22 = vld [vmem:[#allocation5 + $0x30] sm:$0xff]  ;;  %v5129_v35 = vmul.f32 %v9007_v1, %v5117_v41 }
 0x3bc   : > { %v5134_v39 = vadd.f32 %v5127_v32, %v5108_v26  ;;  %v5135_v30 = vadd.f32 %v5128_v55, %v5109_v14  ;;  %v5047_v60 = vmul.f32 %v8986_v5, %v5035_v25  ;;  %v5061_v12 = vld [vmem:[#allocation5 + $0x9] sm:$0xff]  ;;  %v5065_v42 = vld [vmem:[#allocation5 + $0x31] sm:$0xff]  ;;  %v5172_v21 = vmul.f32 %v9019_v54, %v5035_v25 }
 0x3bd   : > { %v5086_v7 = vld [vmem:[#allocation5 + $0x2] sm:$0xff]  ;;  %v5087_v33 = vld [vmem:[#allocation5 + $0xa] sm:$0xff]  ;;  %v5073_v49 = vmul.f32 %v8993_v58, %v5061_v12  ;;  %v5079_v28 = vadd.f32 %v5072_v17, %v5046_v53  ;;  %v5190_v0 = vld [vmem:[#allocation5 + $0x34] sm:$0xff]  ;;  %v5051_v20 = vmul.f32 %v8986_v5, %v5039_v22  ;;  %v5077_v40 = vmul.f32 %v8993_v58, %v5065_v42 }
 0x3be   : > { %v5098_v59 = vmul.f32 %v9000_v11, %v5086_v7  ;;  %v5099_v52 = vmul.f32 %v9000_v11, %v5087_v33  ;;  %v5112_v8 = vld [vmem:[#allocation5 + $0x6] sm:$0xff]  ;;  %v5113_v29 = vld [vmem:[#allocation5 + $0xe] sm:$0xff]  ;;  %v5160_v9 = vadd.f32 %v5153_v27, %v5134_v39  ;;  %v5161_v45 = vadd.f32 %v5154_v13, %v5135_v30  ;;  %v5114_v30 = vld [vmem:[#allocation5 + $0x16] sm:$0xff] }
 0x3bf   : > { %v5138_v2 = vld [vmem:[#allocation5 + $0x7] sm:$0xff]  ;;  %v5124_v24 = vmul.f32 %v9007_v1, %v5112_v8  ;;  %v5125_v6 = vmul.f32 %v9007_v1, %v5113_v29  ;;  %v5139_v37 = vld [vmem:[#allocation5 + $0xf] sm:$0xff]  ;;  %v5080_v46 = vadd.f32 %v5073_v49, %v5047_v60  ;;  %v5246_v18 = vmul.f32 %v9036_v31, %v5113_v29 }
 0x3c0   : > { %v5186_v43 = vld [vmem:[#allocation5 + $0xc] sm:$0xff]  ;;  %v5150_v36 = vmul.f32 %v9014_v61, %v5138_v2  ;;  %v5151_v44 = vmul.f32 %v9014_v61, %v5139_v37  ;;  %v5182_v3 = vadd.f32 %v5175_v62, %v5160_v9  ;;  %v5105_v16 = vadd.f32 %v5098_v59, %v5079_v28  ;;  %v5216_v32 = vld [vmem:[#allocation5 + $0x35] sm:$0xff] }
 0x3c1   : > { %v5212_v50 = vld [vmem:[#allocation5 + $0xd] sm:$0xff]  ;;  %v5198_v4 = vmul.f32 %v9024_v48, %v5186_v43  ;;  %v5106_v47 = vadd.f32 %v5099_v52, %v5080_v46  ;;  %v5176_v13 = vmul.f32 %v9019_v54, %v5039_v22  ;;  %v5202_v38 = vmul.f32 %v9024_v48, %v5190_v0 }
 0x3c2   : > { %v5224_v15 = vmul.f32 %v9031_v34, %v5212_v50  ;;  %v5208_v55 = vadd.f32 %v5201_v56, %v5182_v3  ;;  %v5036_v26 = vld [vmem:[#allocation5 + $0x10] sm:$0xff]  ;;  %v5131_v14 = vadd.f32 %v5124_v24, %v5105_v16  ;;  %v5084_v63 = vadd.f32 %v5077_v40, %v5051_v20  ;;  %v5239_v20 = vld [vmem:[#allocation5 + $0x3e] sm:$0xff] }
 0x3c3   : > { %v5132_v27 = vadd.f32 %v5125_v6, %v5106_v47  ;;  %v5062_v62 = vld [vmem:[#allocation5 + $0x11] sm:$0xff]  ;;  %v5228_v39 = vmul.f32 %v9031_v34, %v5216_v32  ;;  %v5250_v56 = vmul.f32 %v9036_v31, %v5117_v41  ;;  %v5183_v12 = vadd.f32 %v5176_v13, %v5161_v45  ;;  %v5217_v47 = vld [vmem:[#allocation5 + $0x3d] sm:$0xff] }
 0x3c4   : > { %v5088_v23 = vld [vmem:[#allocation5 + $0x12] sm:$0xff]  ;;  %v5234_v25 = vadd.f32 %v5227_v51, %v5208_v55  ;;  %v5157_v53 = vadd.f32 %v5150_v36, %v5131_v14  ;;  %v5048_v7 = vmul.f32 %v8986_v5, %v5036_v26  ;;  %v5110_v49 = vadd.f32 %v5103_v57, %v5084_v63  ;;  %v5188_v57 = vld [vmem:[#allocation5 + $0x1c] sm:$0xff] }
 0x3c5   : > { %v5158_v60 = vadd.f32 %v5151_v44, %v5132_v27  ;;  %v5187_v33 = vld [vmem:[#allocation5 + $0x14] sm:$0xff]  ;;  %v5074_v59 = vmul.f32 %v8993_v58, %v5062_v62  ;;  %v5100_v52 = vmul.f32 %v9000_v11, %v5088_v23  ;;  %v5209_v29 = vadd.f32 %v5202_v38, %v5183_v12  ;;  %v5191_v44 = vld [vmem:[#allocation5 + $0x3c] sm:$0xff] }
 0x3c6   : > { %v5256_v17 = vadd.f32 %v9042_v10, %v5234_v25  ;;  %v5213_v51 = vld [vmem:[#allocation5 + $0x15] sm:$0xff]  ;;  %v5179_v8 = vadd.f32 %v5172_v21, %v5157_v53  ;;  %v5126_v2 = vmul.f32 %v9007_v1, %v5114_v30  ;;  %v5173_v9 = vmul.f32 %v9019_v54, %v5036_v26 }
 0x3c7   : > { %v5143_v24 = vld [vmem:[#allocation5 + $0x37] sm:$0xff]  ;;  %v5136_v37 = vadd.f32 %v5129_v35, %v5110_v49  ;;  %v5081_v43 = vadd.f32 %v5074_v59, %v5048_v7  ;;  %v5199_v10 = vmul.f32 %v9024_v48, %v5187_v33  ;;  %v5235_v28 = vadd.f32 %v5228_v39, %v5209_v29 }
 0x3c8   : > { %v5165_v6 = vld [vmem:[#allocation5 + $0x38] sm:$0xff]  ;;  %v5269_v45 = vsel %vm4898_vm5, %v5256_v17, 0.0  ;;  %v5205_v50 = vadd.f32 %v5198_v4, %v5179_v8  ;;  %v5180_v46 = vadd.f32 %v5173_v9, %v5158_v60  ;;  %v5225_v36 = vmul.f32 %v9031_v34, %v5213_v51 }
 0x3c9   : > { %5270 = vadd.xlane.f32.xlu0 %v5269_v45  ;;  %v5107_v22 = vadd.f32 %v5100_v52, %v5081_v43  ;;  %v5155_v42 = vmul.f32 %v9014_v61, %v5143_v24  ;;  %v5177_v19 = vmul.f32 %v9019_v54, %v5165_v6  ;;  %v5140_v3 = vld [vmem:[#allocation5 + $0x17] sm:$0xff]  ;;  %v5257_v41 = vadd.f32 %v5250_v56, %v5235_v28  ;;  %v5144_v8 = vld [vmem:[#allocation5 + $0x3f] sm:$0x3]  ;;  %v5192_v43 = vld [vmem:[#allocation5 + $0x44] sm:$0x3] }
 0x3ca   : > { %v5231_v21 = vadd.f32 %v5224_v15, %v5205_v50  ;;  %v5206_v0 = vadd.f32 %v5199_v10, %v5180_v46  ;;  %v5247_v16 = vmul.f32 %v9036_v31, %v5114_v30  ;;  %v5164_v32 = vld [vmem:[#allocation5 + $0x18] sm:$0xff]  ;;  %v5203_v40 = vmul.f32 %v9024_v48, %v5191_v44  ;;  %v5166_v45 = vld [vmem:[#allocation5 + $0x40] sm:$0x3] }
 0x3cb   : > { %v5133_v4 = vadd.f32 %v5126_v2, %v5107_v22  ;;  %v5162_v55 = vadd.f32 %v5155_v42, %v5136_v37  ;;  %v5040_v35 = vld [vmem:[#allocation5 + $0x38] sm:$0x3]  ;;  %v5272_v14 = vsel %vm4898_vm5, %v5257_v41, 0.0  ;;  %v5152_v13 = vmul.f32 %v9014_v61, %v5140_v3  ;;  %v5092_v38 = vld [vmem:[#allocation5 + $0x3a] sm:$0x3]  ;;  %v5214_v39 = vld [vmem:[#allocation5 + $0x1d] sm:$0xff] }
 0x3cc   : > { %v5253_v26 = vadd.f32 %v5246_v18, %v5231_v21  ;;  %v5232_v27 = vadd.f32 %v5225_v36, %v5206_v0  ;;  %v5066_v15 = vld [vmem:[#allocation5 + $0x39] sm:$0x3]  ;;  %v5229_v23 = vmul.f32 %v9031_v34, %v5217_v47  ;;  %v5251_v25 = vmul.f32 %v9036_v31, %v5239_v20  ;;  %v5118_v60 = vld [vmem:[#allocation5 + $0x3e] sm:$0x3]  ;;  %v5218_v36 = vld [vmem:[#allocation5 + $0x45] sm:$0x3] }
 0x3cd   : > { %5273 = vadd.xlane.f32.xlu0 %v5272_v14  ;;  %v5184_v62 = vadd.f32 %v5177_v19, %v5162_v55  ;;  %v5174_v63 = vmul.f32 %v9019_v54, %v5164_v32  ;;  %v5159_v18 = vadd.f32 %v5152_v13, %v5133_v4  ;;  %v5200_v53 = vmul.f32 %v9024_v48, %v5188_v57  ;;  %v5238_v7 = vld [vmem:[#allocation5 + $0x1e] sm:$0xff]  ;;  %v5240_v42 = vld [vmem:[#allocation5 + $0x46] sm:$0x3] }
 0x3ce   : > { %v5260_v56 = vsel %vm4898_vm5, %v5253_v26, 0.0  ;;  %v5254_v30 = vadd.f32 %v5247_v16, %v5232_v27  ;;  %v5052_v33 = vmul.f32 %v8986_v5, %v5040_v35  ;;  %v5078_v17 = vmul.f32 %v8993_v58, %v5066_v15 }
 0x3cf   : > { %5261 = vadd.xlane.f32.xlu1 %v5260_v56  ;;  %v5210_v12 = vadd.f32 %v5203_v40, %v5184_v62  ;;  %v5104_v49 = vmul.f32 %v9000_v11, %v5092_v38  ;;  %v5181_v52 = vadd.f32 %v5174_v63, %v5159_v18  ;;  %v5226_v51 = vmul.f32 %v9031_v34, %v5214_v39 }
 0x3d0   : > { %v5263_v59 = vsel %vm4898_vm5, %v5254_v30, 0.0  ;;  %v5085_v2 = vadd.f32 %v5078_v17, %v5052_v33  ;;  %v5130_v9 = vmul.f32 %v9007_v1, %v5118_v60  ;;  %v5248_v6 = vmul.f32 %v9036_v31, %v5238_v7 }
 0x3d1   : > { %v5236_v29 = vadd.f32 %v5229_v23, %v5210_v12  ;;  %v5207_v24 = vadd.f32 %v5200_v53, %v5181_v52  ;;  %v5156_v58 = vmul.f32 %v9014_v61, %v5144_v8  ;;  %v5178_v28 = vmul.f32 %v9019_v54, %v5166_v45 }
 0x3d2   : > { %v5111_v37 = vadd.f32 %v5104_v49, %v5085_v2  ;;  %v5204_v44 = vmul.f32 %v9024_v48, %v5192_v43  ;;  %v5230_v61 = vmul.f32 %v9031_v34, %v5218_v36  ;;  %v5252_v21 = vmul.f32 %v9036_v31, %v5240_v42 }
 0x3d3   : > { %5264 = vadd.xlane.f32.xlu1 %v5263_v59  ;;  %v5258_v5 = vadd.f32 %v5251_v25, %v5236_v29  ;;  %v5233_v11 = vadd.f32 %v5226_v51, %v5207_v24  ;;  %v5298_v16 = vlaneseq }
 0x3d4   : > { %v5137_v50 = vadd.f32 %v5130_v9, %v5111_v37 }
 0x3d5   : > { %v5275_v10 = vsel %vm4898_vm5, %v5258_v5, 0.0  ;;  %v5255_v46 = vadd.f32 %v5248_v6, %v5233_v11  ;;  %v5299_v47 = vand.u32 127, %v5298_v16  ;;  %v5301_v4 = vshrl.u32 %v5298_v16, 7 }
 0x3d6   : > { %5276 = vadd.xlane.f32.xlu0 %v5275_v10  ;;  %v5163_v1 = vadd.f32 %v5156_v58, %v5137_v50 }
 0x3d7   : > { %v5266_v22 = vsel %vm4898_vm5, %v5255_v46, 0.0  ;;  %v5304_v48 = vadd.s32 4294967288, %v5299_v47  ;;  %v5311_v40 = vadd.s32 4294967280, %v5299_v47  ;;  %v5302_v57 = vsub.s32 %v5299_v47, %v5301_v4 }
 0x3d8   : > { %5267 = vadd.xlane.f32.xlu1 %v5266_v22  ;;  %v5185_v19 = vadd.f32 %v5178_v28, %v5163_v1  ;;  %v5330_v13 = vadd.s32 4294967292, %v5299_v47  ;;  %v5337_v62 = vadd.s32 4294967284, %v5299_v47  ;;  %v5325_v25 = vadd.s32 4, %v5299_v47 }
 0x3d9   : > { %v5307_v34 = vsub.s32 %v5304_v48, %v5301_v4  ;;  %v5314_v27 = vsub.s32 %v5311_v40, %v5301_v4  ;;  %v5344_v53 = vadd.s32 4294967276, %v5299_v47 }
 0x3da   : > { %v5211_v3 = vadd.f32 %v5204_v44, %v5185_v19  ;;  %v5333_v56 = vsub.s32 %v5330_v13, %v5301_v4  ;;  %v5340_v60 = vsub.s32 %v5337_v62, %v5301_v4  ;;  %v5328_v33 = vsub.s32 %v5325_v25, %v5301_v4 }
 0x3db   : > { %v5347_v59 = vsub.s32 %v5344_v53, %v5301_v4 }
 0x3dc   : > { %v5237_v41 = vadd.f32 %v5230_v61, %v5211_v3 }
 0x3de   : > { %v5259_v0 = vadd.f32 %v5252_v21, %v5237_v41 }
 0x3e0   : > { %v5278_v54 = vsel %vm4921_vm6, %v5259_v0, 0.0 }
 0x3e1   : > { %5279 = vadd.xlane.f32.xlu0 %v5278_v54 }
 0x456   : > { %v5271_v20 = vpop.xlane.xlu0 %5270 }
 0x457   : > { %v5823_v17 = vclamps-f32 %v5271_v20, 1.0 }
 0x459   : > { %v5329_v8 = vrot.slane %v5823_v17, %v5328_v33 }
 0x45a   : > { %v5274_v26 = vpop.xlane.xlu0 %5273 }
 0x45b   : > { %v5824_v30 = vclamps-f32 %v5274_v26, 1.0 }
 0x45c   : > { %v5262_v32 = vpop.xlane.xlu1 %5261 }
 0x45d   : > { %v5820_v35 = vclamps-f32 %v5262_v32, 1.0  ;;  %v5334_v49 = vrot.slane %v5824_v30, %v5333_v56 }
 0x45f   : > { %v5303_v31 = vrot.slane %v5820_v35, %v5302_v57  ;;  %v5336_v2 = vsel %vm5335_vm12, %v5334_v49, %v5329_v8 }
 0x460   : > { %v5265_v55 = vpop.xlane.xlu1 %5264 }
 0x461   : > { %v5821_v14 = vclamps-f32 %v5265_v55, 1.0 }
 0x463   : > { %v5308_v15 = vrot.slane %v5821_v14, %v5307_v34  ;;  %v5277_v63 = vpop.xlane.xlu0 %5276 }
 0x464   : > { %v5825_v12 = vclamps-f32 %v5277_v63, 1.0 }
 0x465   : > { %v5268_v38 = vpop.xlane.xlu1 %5267  ;;  %v5310_v18 = vsel %vm5309_vm9, %v5308_v15, %v5303_v31 }
 0x466   : > { %v5822_v23 = vclamps-f32 %v5268_v38, 1.0  ;;  %v5341_v52 = vrot.slane %v5825_v12, %v5340_v60 }
 0x468   : > { %v5315_v39 = vrot.slane %v5822_v23, %v5314_v27  ;;  %v5343_v24 = vsel %vm5342_vm13, %v5341_v52, %v5336_v2 }
 0x46a   : > { %v5317_v7 = vsel %vm5316_vm10, %v5315_v39, %v5310_v18 }
 0x46b   : > { %5320 = vst.msk [vmem:[%s6757_s8] sm:$0x1] %vm5319_vm11, %v5317_v7 }
 0x46e   : > { %v5280_v51 = vpop.xlane.xlu0 %5279 }
 0x46f   : > { %v5826_v29 = vclamps-f32 %v5280_v51, 1.0 }
 0x471   : > { %v5348_v9 = vrot.slane %v5826_v29, %v5347_v59 }
 0x473   : > { %v5350_v6 = vsel %vm5349_vm14, %v5348_v9, %v5343_v24 }
 0x474   : > { %5827 = vst.msk [vmem:[%s6757_s8 - $0x3] sm:$0x10] %vm5353_vm15, %v5350_v6 }
 0x475   : > { %6585 = shalt.err (!%p6582_p7)
}
 0x476   : > { %s6586_s27 = scalar_lea.hbm %s9107_s14, 32  ;;  %s6590_s23 = scalar_lea.hbm %s9159_s4, 64 }
 0x477   : > { %p6587_p8 = scmp.ne.s32.totalorder %s9107_s14, %s6586_s27  ;;  %p6591_p11 = scmp.lt.u32.totalorder %s9107_s14, %s9159_s4 }
 0x478   : > { %p6592_p12 = scmp.lt.u32.totalorder %s6590_s23, %s6586_s27  ;;  %p6594_p0 = scmp.lt.u32.totalorder %s6586_s27, %s9107_s14 }
 0x479   : > { %p6588_p9 = pnand %p6587_p8, %p6738_p5 }
 0x47a   : > { %p6593_p13 = por %p6592_p12, %p6591_p11 }
 0x47b   : > { %p6589_p10 = pneg %p6588_p9 }
 0x47c   : > { %p6595_p1 = por %p6594_p0, %p6593_p13 }
 0x47e   : > { %p6596_p2 = pnand %p6595_p1, %p6589_p10 }
 0x480   : > { %6599 = shalt.err (!%p6596_p2)
}
 0x481   : > { %s6673_s29 = smov 16   ;;  %s6674_s30 = smov 1  }
 0x482   : > { %6408 = dma.vmem_to_hbm [thread:$0]  (%p6738_p5), %s9109_s6, 32, %s9107_s14, %s9114_s19, %s6673_s29, %s6673_s29, %s6674_s30  }
 0x483 PF: > { %p6414_p3 = scmp.ge.s32.totalorder %s6642_s18, 2  ;;  %s5384_s5 = sand.u32 1, %s6630_s15  }
 0x484   : > { %s5385_s10 = scalar_lea.sflag [#allocation7], %s5384_s5 }
 0x485   : > { %p6411_p4 = pnand %p6414_p3, %p6742_p6 }
 0x487   : > { %6625 = dma.done.wait (!%p6411_p4), %s5385_s10, 32  }
 0x488   : > { %6627 = vsyncadd (!%p6411_p4), %s5385_s10, 4294967264  ;;  %p14_p7 = scmp.ge.s32.totalorder %s6725_s21, 4   ;;  %s9199_s15 = smov %s6634_s16 }
 0x489   : > { %s9200_s16 = smov %s6638_s17  ;;  %s9201_s17 = smov %s6736_s24 }
 0x48a   : > { %s9202_s18 = smov %s6725_s21  ;;  %16 = sbr.rel (!%p14_p7) target bundleno = 3 (0x3), region = 150 }
 0x491   :  { %5390 = vsyncpa [#allocation7], 1 }
 0x492   :  { %5392 = vsyncpa [#allocation7 + $0x1], 1 }

</bundles_post_ra>
